<compile_context>
chip_gen: v6e
topology: v6e:2x2x1
jax: 0.10.0
libtpu: 0.0.40
codegen_flags: <defaults>
</compile_context>

<pallas_src>
import jax
import jax.numpy as jnp
from jax import lax
from jax.experimental import pallas as pl
from jax.experimental.pallas import tpu as pltpu


K_SIZES = (64, 32, 16, 8)        # conv kernel sizes (fc1..fc4)
CHANNELS = (1, 8, 16, 32, 64)    # channel chain
POOL = 3                         # MaxPool1d(kernel_size=3, stride=3)
HIDDEN = 128                     # LSTM hidden size
WDT = jnp.bfloat16               # storage dtype for the large MXU weights


def layer_dims(L):
    """Static (Lout, Lpool) for each conv layer given input length L."""
    dims = []
    for k in K_SIZES:
        lout = L - k + 1
        lp = lout // POOL
        dims.append((lout, lp))
        L = lp
    return dims


def build_forward(B, L, n_classes):
    dims = layer_dims(L)
    T = dims[-1][1]
    assert T >= 1, "input length too short for the conv/pool stack"
    assert K_SIZES[0] % 8 == 0
    H = HIDDEN
    H4 = 4 * H

    def kernel(x_ref,
               w1_ref, sc1_ref, sh1_ref,
               w2_ref, sc2_ref, sh2_ref,
               w3_ref, sc3_ref, sh3_ref,
               w4_ref, sc4_ref, sh4_ref,
               wih1_ref, whh1cat_ref, b1_ref,
               whh2_ref, b2_ref,
               h0_ref, c0_ref,
               wl_ref, bl_ref,
               out_ref, hn_ref, cn_ref,
               q_ref, p1_ref, p2_ref, p3_ref, p4_ref):
        conv_w = (w1_ref, w2_ref, w3_ref, w4_ref)
        conv_sc = (sc1_ref, sc2_ref, sc3_ref, sc4_ref)
        conv_sh = (sh1_ref, sh2_ref, sh3_ref, sh4_ref)
        patches = (p1_ref, p2_ref, p3_ref, p4_ref)

        def conv_bn_relu_pool(li):
            """One conv layer on the already-filled batched patch -> (Cout, B*lp)."""
            lout, lp = dims[li]
            # single MXU dot for the whole layer & batch
            y = jnp.dot(conv_w[li][...], patches[li][...],
                        preferred_element_type=jnp.float32)           # (Cout, B*Lout)
            # folded eval-mode BatchNorm (conv bias folded into shift) + ReLU
            y = jnp.maximum(y * conv_sc[li][...] + conv_sh[li][...], 0.0)
            # MaxPool1d(3,3): VPU pre-max of 3 shifted views + ONE 0/1 selection matmul
            wcols = POOL * lp - 2
            rows = lax.broadcasted_iota(jnp.int32, (wcols, lp), 0)
            cols = lax.broadcasted_iota(jnp.int32, (wcols, lp), 1)
            sel = (rows == POOL * cols).astype(jnp.float32)            # generated in VMEM
            outs = []
            for b in range(B):
                yb = y[:, b * lout:(b + 1) * lout]
                m = jnp.maximum(jnp.maximum(yb[:, 0:wcols], yb[:, 1:1 + wcols]),
                                yb[:, 2:2 + wcols])
                outs.append(jnp.dot(m, sel, preferred_element_type=jnp.float32))
            return jnp.concatenate(outs, axis=1)                       # (Cout, B*lp)

        # ----------------------- conv stack (batched over B) ------------------------
        # layer 1 (cin=1): two-stage packed im2col
        k0 = K_SIZES[0]
        lout0, _ = dims[0]
        qw = lout0 + k0 - 8
        for b in range(B):
            a = x_ref[b]                                               # (1, L)
            for r in range(8):                                         # shift slab Q[r,:]=x[r:]
                q_ref[r:r + 1, :] = a[:, r:r + qw]
            for j in range(k0 // 8):                                   # 8 full-slab stores
                p1_ref[8 * j:8 * j + 8, b * lout0:(b + 1) * lout0] = \
                    q_ref[:, 8 * j:8 * j + lout0]
        act = conv_bn_relu_pool(0)

        # layers 2-4: generic batched im2col
        for li in range(1, len(K_SIZES)):
            cin = CHANNELS[li]
            k_sz = K_SIZES[li]
            lin = dims[li - 1][1]
            lout, _ = dims[li]
            pref = patches[li]
            for ktap in range(k_sz):
                for b in range(B):
                    pref[ktap * cin:(ktap + 1) * cin, b * lout:(b + 1) * lout] = \
                        act[:, b * lin + ktap: b * lin + ktap + lout]
            act = conv_bn_relu_pool(li)

        pmat = act                                                     # (64, B*T), col = b*T+t

        # -------- LSTM1: hoisted input projection (absorbs the NCW->NWC permute) -----
        xp1_bt = lax.dot_general(pmat.astype(WDT), wih1_ref[...],
                                 (((0,), (0,)), ((), ())),
                                 preferred_element_type=jnp.float32) + b1_ref[...]  # (B*T,4H)
        # one-time row permute to time-major so the recurrence slices contiguous rows
        xp1 = jnp.concatenate(
            [xp1_bt[b * T + t: b * T + t + 1, :] for t in range(T) for b in range(B)],
            axis=0)                                                    # (T*B, 4H), row t*B+b

        def gates_to_state(g, c):
            i_g = jax.nn.sigmoid(g[:, 0:H])
            f_g = jax.nn.sigmoid(g[:, H:2 * H])
            g_g = jnp.tanh(g[:, 2 * H:3 * H])
            o_g = jax.nn.sigmoid(g[:, 3 * H:4 * H])
            c = f_g * c + i_g * g_g
            h = o_g * jnp.tanh(c)
            return h, c

        # LSTM1 recurrence, fused with LSTM2's input projection (Wih2 concat into RHS)
        h = h0_ref[0]                                                  # (B, H)
        c = c0_ref[0]
        xp2 = []
        for t in range(T):
            hw = jnp.dot(h.astype(WDT), whh1cat_ref[...],
                         preferred_element_type=jnp.float32)           # (B, 8H)
            if t > 0:
                xp2.append(hw[:, H4:] + b2_ref[...])                   # y1[t-1] @ Wih2^T + b2
            h, c = gates_to_state(xp1[t * B:(t + 1) * B, :] + hw[:, :H4], c)
        hw = jnp.dot(h.astype(WDT), whh1cat_ref[...],
                     preferred_element_type=jnp.float32)
        xp2.append(hw[:, H4:] + b2_ref[...])                           # y1[T-1] @ Wih2^T + b2

        # -------- LSTM2 (seeded with LSTM1's final state, as in the torch code) ------
        acc = jnp.zeros((B, H), jnp.float32)
        for t in range(T):
            hw2 = jnp.dot(h.astype(WDT), whh2_ref[...],
                          preferred_element_type=jnp.float32)
            h, c = gates_to_state(xp2[t] + hw2, c)
            acc = acc + h                                              # accumulate for GAP

        # ---- GAP over time + Dropout(identity, eval) + Linear + folded bn_final -----
        pooled = acc * (1.0 / T)                                       # (B, H)
        out_ref[...] = (jnp.dot(pooled, wl_ref[...],
                                preferred_element_type=jnp.float32) + bl_ref[...])
        hn_ref[0] = h
        cn_ref[0] = c

    scratch = [pltpu.VMEM((8, dims[0][0] + K_SIZES[0] - 8), jnp.float32)]           # Q slab
    scratch += [pltpu.VMEM((K_SIZES[li] * CHANNELS[li], B * dims[li][0]), jnp.float32)
                for li in range(len(K_SIZES))]                                       # patches

    return pl.pallas_call(
        kernel,
        out_shape=(jax.ShapeDtypeStruct((B, n_classes), jnp.float32),
                   jax.ShapeDtypeStruct((1, B, H), jnp.float32),
                   jax.ShapeDtypeStruct((1, B, H), jnp.float32)),
        scratch_shapes=scratch,
        compiler_params=pltpu.CompilerParams(vmem_limit_bytes=16 * 1024 * 1024),
    )


def forward(x, hidden, params, fwd_call):
    h0, c0 = hidden
    args = [x]
    for (w, sc, sh) in params["convs"]:
        args += [w, sc, sh]
    args += list(params["lstm1"])     # (wih1^T, [whh1^T | wih2^T], b1)
    args += list(params["lstm2"])     # (whh2^T, b2)
    args += [h0, c0]
    args += list(params["head"])      # (wl_folded, bl_folded)
    logits, hn, cn = fwd_call(*args)
    return logits, (hn, cn)


# ----------------------------------------------------------------------------- params
def init_params(key, n_classes, L, eps=1e-5):
    keys = iter(jax.random.split(key, 64))

    def nrm(shape, s=0.05):
        return s * jax.random.normal(next(keys), shape, jnp.float32)

    def bn_fold(c):
        gamma = 1.0 + nrm((c,))
        beta = nrm((c,))
        rmean = nrm((c,))
        rvar = 1.0 + 0.1 * jnp.abs(jax.random.normal(next(keys), (c,), jnp.float32))
        scale = gamma * lax.rsqrt(rvar + eps)
        shift = beta - rmean * scale
        return scale, shift

    convs = []
    for li in range(len(K_SIZES)):
        cin, cout, k = CHANNELS[li], CHANNELS[li + 1], K_SIZES[li]
        w = nrm((cout, cin, k))                                  # PyTorch Conv1d layout
        w2 = jnp.transpose(w, (0, 2, 1)).reshape(cout, k * cin)  # matches im2col row order
        bias = nrm((cout,))
        scale, shift = bn_fold(cout)
        shift = shift + bias * scale                             # fold conv bias into BN shift
        convs.append((w2, scale.reshape(cout, 1), shift.reshape(cout, 1)))

    def lstm_raw(din, h):
        return (nrm((4 * h, din)), nrm((4 * h, h)), nrm((4 * h,)), nrm((4 * h,)))

    wih1, whh1, bih1, bhh1 = lstm_raw(64, HIDDEN)
    wih2, whh2, bih2, bhh2 = lstm_raw(HIDDEN, HIDDEN)
    # LSTM1 recurrence RHS fused with LSTM2's input projection: [Whh1^T | Wih2^T]
    whh1cat = jnp.concatenate([whh1.T, wih2.T], axis=1)          # (H, 8H)
    lstm1 = (wih1.T.astype(WDT), whh1cat.astype(WDT),
             (bih1 + bhh1).reshape(1, 4 * HIDDEN))
    lstm2 = (whh2.T.astype(WDT), (bih2 + bhh2).reshape(1, 4 * HIDDEN))

    wl = nrm((n_classes, HIDDEN))
    bl = nrm((n_classes,))
    scale, shift = bn_fold(n_classes)
    wl_f = wl.T * scale[None, :]                                 # fold bn_final scale into weight
    bl_f = (bl * scale + shift).reshape(1, n_classes)            # fold linear bias + bn_final shift
    head = (wl_f, bl_f)

    return dict(convs=convs, lstm1=lstm1, lstm2=lstm2, head=head)


# ----------------------------------------------------------------------------- main
if __name__ == "__main__":
    class Config:
        n_classes = 5

    cfg = Config()
    key = jax.random.PRNGKey(0)
    pkey, xkey = jax.random.split(key)

    B, L = 2, 800                                    # seq length chosen so T=3 after conv/pool stack
    params = init_params(pkey, cfg.n_classes, L)

    x = jax.random.normal(xkey, (B, 1, L), jnp.float32)
    hidden = (jnp.zeros((1, B, HIDDEN), jnp.float32),   # init_hidden()
              jnp.zeros((1, B, HIDDEN), jnp.float32))

    fwd_call = build_forward(B, L, cfg.n_classes)
    logits, hidden_out = forward(x, hidden, params, fwd_call)
    jax.block_until_ready(logits)
    jax.block_until_ready(hidden_out)
    assert logits.shape == (B, cfg.n_classes)
    assert hidden_out[0].shape == (1, B, HIDDEN) and hidden_out[1].shape == (1, B, HIDDEN)
    print("KERNEL_OK")
</pallas_src>

<mosaic_0001>
module attributes {stable_mosaic.version = 11 : i64} {
  func.func @kernel(%arg0: memref<2x1x800xf32, #tpu.memory_space<vmem>>, %arg1: memref<8x64xf32, #tpu.memory_space<vmem>>, %arg2: memref<8x1xf32, #tpu.memory_space<vmem>>, %arg3: memref<8x1xf32, #tpu.memory_space<vmem>>, %arg4: memref<16x256xf32, #tpu.memory_space<vmem>>, %arg5: memref<16x1xf32, #tpu.memory_space<vmem>>, %arg6: memref<16x1xf32, #tpu.memory_space<vmem>>, %arg7: memref<32x256xf32, #tpu.memory_space<vmem>>, %arg8: memref<32x1xf32, #tpu.memory_space<vmem>>, %arg9: memref<32x1xf32, #tpu.memory_space<vmem>>, %arg10: memref<64x256xf32, #tpu.memory_space<vmem>>, %arg11: memref<64x1xf32, #tpu.memory_space<vmem>>, %arg12: memref<64x1xf32, #tpu.memory_space<vmem>>, %arg13: memref<64x512xbf16, #tpu.memory_space<vmem>>, %arg14: memref<128x1024xbf16, #tpu.memory_space<vmem>>, %arg15: memref<1x512xf32, #tpu.memory_space<vmem>>, %arg16: memref<128x512xbf16, #tpu.memory_space<vmem>>, %arg17: memref<1x512xf32, #tpu.memory_space<vmem>>, %arg18: memref<1x2x128xf32, #tpu.memory_space<vmem>>, %arg19: memref<1x2x128xf32, #tpu.memory_space<vmem>>, %arg20: memref<128x5xf32, #tpu.memory_space<vmem>>, %arg21: memref<1x5xf32, #tpu.memory_space<vmem>>, %arg22: memref<2x5xf32, #tpu.memory_space<vmem>>, %arg23: memref<1x2x128xf32, #tpu.memory_space<vmem>>, %arg24: memref<1x2x128xf32, #tpu.memory_space<vmem>>, %arg25: memref<8x793xf32, #tpu.memory_space<vmem>>, %arg26: memref<64x1474xf32, #tpu.memory_space<vmem>>, %arg27: memref<256x428xf32, #tpu.memory_space<vmem>>, %arg28: memref<256x112xf32, #tpu.memory_space<vmem>>, %arg29: memref<256x22xf32, #tpu.memory_space<vmem>>) attributes {dimension_semantics = [], scalar_prefetch = 0 : i64, scratch_operands = 5 : i64, tpu.core_type = #tpu.core_type<tc>} {
    %c0 = arith.constant 0 : index
    %c0_0 = arith.constant 0 : index
    %c0_1 = arith.constant 0 : index
    %0 = vector.load %arg0[%c0, %c0_0, %c0_1] : memref<2x1x800xf32, #tpu.memory_space<vmem>>, vector<1x1x800xf32>
    %1 = vector.shape_cast %0 : vector<1x1x800xf32> to vector<1x800xf32>
    %2 = vector.extract_strided_slice %1 {offsets = [0, 0], sizes = [1, 793], strides = [1, 1]} : vector<1x800xf32> to vector<1x793xf32>
    %c0_2 = arith.constant 0 : index
    %c0_3 = arith.constant 0 : index
    %3 = vector.load %arg25[%c0_2, %c0_3] : memref<8x793xf32, #tpu.memory_space<vmem>>, vector<1x793xf32>
    tpu.vector_store %arg25[%c0_2, %c0_3], %2 {strides = array<i32>} : memref<8x793xf32, #tpu.memory_space<vmem>>, vector<1x793xf32>,
    %4 = vector.extract_strided_slice %1 {offsets = [0, 1], sizes = [1, 793], strides = [1, 1]} : vector<1x800xf32> to vector<1x793xf32>
    %c1 = arith.constant 1 : index
    %c0_4 = arith.constant 0 : index
    %5 = vector.load %arg25[%c1, %c0_4] : memref<8x793xf32, #tpu.memory_space<vmem>>, vector<1x793xf32>
    tpu.vector_store %arg25[%c1, %c0_4], %4 {strides = array<i32>} : memref<8x793xf32, #tpu.memory_space<vmem>>, vector<1x793xf32>,
    %6 = vector.extract_strided_slice %1 {offsets = [0, 2], sizes = [1, 793], strides = [1, 1]} : vector<1x800xf32> to vector<1x793xf32>
    %c2 = arith.constant 2 : index
    %c0_5 = arith.constant 0 : index
    %7 = vector.load %arg25[%c2, %c0_5] : memref<8x793xf32, #tpu.memory_space<vmem>>, vector<1x793xf32>
    tpu.vector_store %arg25[%c2, %c0_5], %6 {strides = array<i32>} : memref<8x793xf32, #tpu.memory_space<vmem>>, vector<1x793xf32>,
    %8 = vector.extract_strided_slice %1 {offsets = [0, 3], sizes = [1, 793], strides = [1, 1]} : vector<1x800xf32> to vector<1x793xf32>
    %c3 = arith.constant 3 : index
    %c0_6 = arith.constant 0 : index
    %9 = vector.load %arg25[%c3, %c0_6] : memref<8x793xf32, #tpu.memory_space<vmem>>, vector<1x793xf32>
    tpu.vector_store %arg25[%c3, %c0_6], %8 {strides = array<i32>} : memref<8x793xf32, #tpu.memory_space<vmem>>, vector<1x793xf32>,
    %10 = vector.extract_strided_slice %1 {offsets = [0, 4], sizes = [1, 793], strides = [1, 1]} : vector<1x800xf32> to vector<1x793xf32>
    %c4 = arith.constant 4 : index
    %c0_7 = arith.constant 0 : index
    %11 = vector.load %arg25[%c4, %c0_7] : memref<8x793xf32, #tpu.memory_space<vmem>>, vector<1x793xf32>
    tpu.vector_store %arg25[%c4, %c0_7], %10 {strides = array<i32>} : memref<8x793xf32, #tpu.memory_space<vmem>>, vector<1x793xf32>,
    %12 = vector.extract_strided_slice %1 {offsets = [0, 5], sizes = [1, 793], strides = [1, 1]} : vector<1x800xf32> to vector<1x793xf32>
    %c5 = arith.constant 5 : index
    %c0_8 = arith.constant 0 : index
    %13 = vector.load %arg25[%c5, %c0_8] : memref<8x793xf32, #tpu.memory_space<vmem>>, vector<1x793xf32>
    tpu.vector_store %arg25[%c5, %c0_8], %12 {strides = array<i32>} : memref<8x793xf32, #tpu.memory_space<vmem>>, vector<1x793xf32>,
    %14 = vector.extract_strided_slice %1 {offsets = [0, 6], sizes = [1, 793], strides = [1, 1]} : vector<1x800xf32> to vector<1x793xf32>
    %c6 = arith.constant 6 : index
    %c0_9 = arith.constant 0 : index
    %15 = vector.load %arg25[%c6, %c0_9] : memref<8x793xf32, #tpu.memory_space<vmem>>, vector<1x793xf32>
    tpu.vector_store %arg25[%c6, %c0_9], %14 {strides = array<i32>} : memref<8x793xf32, #tpu.memory_space<vmem>>, vector<1x793xf32>,
    %16 = vector.extract_strided_slice %1 {offsets = [0, 7], sizes = [1, 793], strides = [1, 1]} : vector<1x800xf32> to vector<1x793xf32>
    %c7 = arith.constant 7 : index
    %c0_10 = arith.constant 0 : index
    %17 = vector.load %arg25[%c7, %c0_10] : memref<8x793xf32, #tpu.memory_space<vmem>>, vector<1x793xf32>
    tpu.vector_store %arg25[%c7, %c0_10], %16 {strides = array<i32>} : memref<8x793xf32, #tpu.memory_space<vmem>>, vector<1x793xf32>,
    %c0_11 = arith.constant 0 : index
    %c0_12 = arith.constant 0 : index
    %18 = vector.load %arg25[%c0_11, %c0_12] : memref<8x793xf32, #tpu.memory_space<vmem>>, vector<8x737xf32>
    %c0_13 = arith.constant 0 : index
    %c0_14 = arith.constant 0 : index
    %19 = vector.load %arg26[%c0_13, %c0_14] : memref<64x1474xf32, #tpu.memory_space<vmem>>, vector<8x737xf32>
    tpu.vector_store %arg26[%c0_13, %c0_14], %18 {strides = array<i32>} : memref<64x1474xf32, #tpu.memory_space<vmem>>, vector<8x737xf32>,
    %c0_15 = arith.constant 0 : index
    %c8 = arith.constant 8 : index
    %20 = vector.load %arg25[%c0_15, %c8] : memref<8x793xf32, #tpu.memory_space<vmem>>, vector<8x737xf32>
    %c8_16 = arith.constant 8 : index
    %c0_17 = arith.constant 0 : index
    %21 = vector.load %arg26[%c8_16, %c0_17] : memref<64x1474xf32, #tpu.memory_space<vmem>>, vector<8x737xf32>
    tpu.vector_store %arg26[%c8_16, %c0_17], %20 {strides = array<i32>} : memref<64x1474xf32, #tpu.memory_space<vmem>>, vector<8x737xf32>,
    %c0_18 = arith.constant 0 : index
    %c16 = arith.constant 16 : index
    %22 = vector.load %arg25[%c0_18, %c16] : memref<8x793xf32, #tpu.memory_space<vmem>>, vector<8x737xf32>
    %c16_19 = arith.constant 16 : index
    %c0_20 = arith.constant 0 : index
    %23 = vector.load %arg26[%c16_19, %c0_20] : memref<64x1474xf32, #tpu.memory_space<vmem>>, vector<8x737xf32>
    tpu.vector_store %arg26[%c16_19, %c0_20], %22 {strides = array<i32>} : memref<64x1474xf32, #tpu.memory_space<vmem>>, vector<8x737xf32>,
    %c0_21 = arith.constant 0 : index
    %c24 = arith.constant 24 : index
    %24 = vector.load %arg25[%c0_21, %c24] : memref<8x793xf32, #tpu.memory_space<vmem>>, vector<8x737xf32>
    %c24_22 = arith.constant 24 : index
    %c0_23 = arith.constant 0 : index
    %25 = vector.load %arg26[%c24_22, %c0_23] : memref<64x1474xf32, #tpu.memory_space<vmem>>, vector<8x737xf32>
    tpu.vector_store %arg26[%c24_22, %c0_23], %24 {strides = array<i32>} : memref<64x1474xf32, #tpu.memory_space<vmem>>, vector<8x737xf32>,
    %c0_24 = arith.constant 0 : index
    %c32 = arith.constant 32 : index
    %26 = vector.load %arg25[%c0_24, %c32] : memref<8x793xf32, #tpu.memory_space<vmem>>, vector<8x737xf32>
    %c32_25 = arith.constant 32 : index
    %c0_26 = arith.constant 0 : index
    %27 = vector.load %arg26[%c32_25, %c0_26] : memref<64x1474xf32, #tpu.memory_space<vmem>>, vector<8x737xf32>
    tpu.vector_store %arg26[%c32_25, %c0_26], %26 {strides = array<i32>} : memref<64x1474xf32, #tpu.memory_space<vmem>>, vector<8x737xf32>,
    %c0_27 = arith.constant 0 : index
    %c40 = arith.constant 40 : index
    %28 = vector.load %arg25[%c0_27, %c40] : memref<8x793xf32, #tpu.memory_space<vmem>>, vector<8x737xf32>
    %c40_28 = arith.constant 40 : index
    %c0_29 = arith.constant 0 : index
    %29 = vector.load %arg26[%c40_28, %c0_29] : memref<64x1474xf32, #tpu.memory_space<vmem>>, vector<8x737xf32>
    tpu.vector_store %arg26[%c40_28, %c0_29], %28 {strides = array<i32>} : memref<64x1474xf32, #tpu.memory_space<vmem>>, vector<8x737xf32>,
    %c0_30 = arith.constant 0 : index
    %c48 = arith.constant 48 : index
    %30 = vector.load %arg25[%c0_30, %c48] : memref<8x793xf32, #tpu.memory_space<vmem>>, vector<8x737xf32>
    %c48_31 = arith.constant 48 : index
    %c0_32 = arith.constant 0 : index
    %31 = vector.load %arg26[%c48_31, %c0_32] : memref<64x1474xf32, #tpu.memory_space<vmem>>, vector<8x737xf32>
    tpu.vector_store %arg26[%c48_31, %c0_32], %30 {strides = array<i32>} : memref<64x1474xf32, #tpu.memory_space<vmem>>, vector<8x737xf32>,
    %c0_33 = arith.constant 0 : index
    %c56 = arith.constant 56 : index
    %32 = vector.load %arg25[%c0_33, %c56] : memref<8x793xf32, #tpu.memory_space<vmem>>, vector<8x737xf32>
    %c56_34 = arith.constant 56 : index
    %c0_35 = arith.constant 0 : index
    %33 = vector.load %arg26[%c56_34, %c0_35] : memref<64x1474xf32, #tpu.memory_space<vmem>>, vector<8x737xf32>
    tpu.vector_store %arg26[%c56_34, %c0_35], %32 {strides = array<i32>} : memref<64x1474xf32, #tpu.memory_space<vmem>>, vector<8x737xf32>,
    %c1_36 = arith.constant 1 : index
    %c0_37 = arith.constant 0 : index
    %c0_38 = arith.constant 0 : index
    %34 = vector.load %arg0[%c1_36, %c0_37, %c0_38] : memref<2x1x800xf32, #tpu.memory_space<vmem>>, vector<1x1x800xf32>
    %35 = vector.shape_cast %34 : vector<1x1x800xf32> to vector<1x800xf32>
    %36 = vector.extract_strided_slice %35 {offsets = [0, 0], sizes = [1, 793], strides = [1, 1]} : vector<1x800xf32> to vector<1x793xf32>
    %c0_39 = arith.constant 0 : index
    %c0_40 = arith.constant 0 : index
    %37 = vector.load %arg25[%c0_39, %c0_40] : memref<8x793xf32, #tpu.memory_space<vmem>>, vector<1x793xf32>
    tpu.vector_store %arg25[%c0_39, %c0_40], %36 {strides = array<i32>} : memref<8x793xf32, #tpu.memory_space<vmem>>, vector<1x793xf32>,
    %38 = vector.extract_strided_slice %35 {offsets = [0, 1], sizes = [1, 793], strides = [1, 1]} : vector<1x800xf32> to vector<1x793xf32>
    %c1_41 = arith.constant 1 : index
    %c0_42 = arith.constant 0 : index
    %39 = vector.load %arg25[%c1_41, %c0_42] : memref<8x793xf32, #tpu.memory_space<vmem>>, vector<1x793xf32>
    tpu.vector_store %arg25[%c1_41, %c0_42], %38 {strides = array<i32>} : memref<8x793xf32, #tpu.memory_space<vmem>>, vector<1x793xf32>,
    %40 = vector.extract_strided_slice %35 {offsets = [0, 2], sizes = [1, 793], strides = [1, 1]} : vector<1x800xf32> to vector<1x793xf32>
    %c2_43 = arith.constant 2 : index
    %c0_44 = arith.constant 0 : index
    %41 = vector.load %arg25[%c2_43, %c0_44] : memref<8x793xf32, #tpu.memory_space<vmem>>, vector<1x793xf32>
    tpu.vector_store %arg25[%c2_43, %c0_44], %40 {strides = array<i32>} : memref<8x793xf32, #tpu.memory_space<vmem>>, vector<1x793xf32>,
    %42 = vector.extract_strided_slice %35 {offsets = [0, 3], sizes = [1, 793], strides = [1, 1]} : vector<1x800xf32> to vector<1x793xf32>
    %c3_45 = arith.constant 3 : index
    %c0_46 = arith.constant 0 : index
    %43 = vector.load %arg25[%c3_45, %c0_46] : memref<8x793xf32, #tpu.memory_space<vmem>>, vector<1x793xf32>
    tpu.vector_store %arg25[%c3_45, %c0_46], %42 {strides = array<i32>} : memref<8x793xf32, #tpu.memory_space<vmem>>, vector<1x793xf32>,
    %44 = vector.extract_strided_slice %35 {offsets = [0, 4], sizes = [1, 793], strides = [1, 1]} : vector<1x800xf32> to vector<1x793xf32>
    %c4_47 = arith.constant 4 : index
    %c0_48 = arith.constant 0 : index
    %45 = vector.load %arg25[%c4_47, %c0_48] : memref<8x793xf32, #tpu.memory_space<vmem>>, vector<1x793xf32>
    tpu.vector_store %arg25[%c4_47, %c0_48], %44 {strides = array<i32>} : memref<8x793xf32, #tpu.memory_space<vmem>>, vector<1x793xf32>,
    %46 = vector.extract_strided_slice %35 {offsets = [0, 5], sizes = [1, 793], strides = [1, 1]} : vector<1x800xf32> to vector<1x793xf32>
    %c5_49 = arith.constant 5 : index
    %c0_50 = arith.constant 0 : index
    %47 = vector.load %arg25[%c5_49, %c0_50] : memref<8x793xf32, #tpu.memory_space<vmem>>, vector<1x793xf32>
    tpu.vector_store %arg25[%c5_49, %c0_50], %46 {strides = array<i32>} : memref<8x793xf32, #tpu.memory_space<vmem>>, vector<1x793xf32>,
    %48 = vector.extract_strided_slice %35 {offsets = [0, 6], sizes = [1, 793], strides = [1, 1]} : vector<1x800xf32> to vector<1x793xf32>
    %c6_51 = arith.constant 6 : index
    %c0_52 = arith.constant 0 : index
    %49 = vector.load %arg25[%c6_51, %c0_52] : memref<8x793xf32, #tpu.memory_space<vmem>>, vector<1x793xf32>
    tpu.vector_store %arg25[%c6_51, %c0_52], %48 {strides = array<i32>} : memref<8x793xf32, #tpu.memory_space<vmem>>, vector<1x793xf32>,
    %50 = vector.extract_strided_slice %35 {offsets = [0, 7], sizes = [1, 793], strides = [1, 1]} : vector<1x800xf32> to vector<1x793xf32>
    %c7_53 = arith.constant 7 : index
    %c0_54 = arith.constant 0 : index
    %51 = vector.load %arg25[%c7_53, %c0_54] : memref<8x793xf32, #tpu.memory_space<vmem>>, vector<1x793xf32>
    tpu.vector_store %arg25[%c7_53, %c0_54], %50 {strides = array<i32>} : memref<8x793xf32, #tpu.memory_space<vmem>>, vector<1x793xf32>,
    %c0_55 = arith.constant 0 : index
    %c0_56 = arith.constant 0 : index
    %52 = vector.load %arg25[%c0_55, %c0_56] : memref<8x793xf32, #tpu.memory_space<vmem>>, vector<8x737xf32>
    %c0_57 = arith.constant 0 : index
    %c737 = arith.constant 737 : index
    %53 = vector.load %arg26[%c0_57, %c737] : memref<64x1474xf32, #tpu.memory_space<vmem>>, vector<8x737xf32>
    tpu.vector_store %arg26[%c0_57, %c737], %52 {strides = array<i32>} : memref<64x1474xf32, #tpu.memory_space<vmem>>, vector<8x737xf32>,
    %c0_58 = arith.constant 0 : index
    %c8_59 = arith.constant 8 : index
    %54 = vector.load %arg25[%c0_58, %c8_59] : memref<8x793xf32, #tpu.memory_space<vmem>>, vector<8x737xf32>
    %c8_60 = arith.constant 8 : index
    %c737_61 = arith.constant 737 : index
    %55 = vector.load %arg26[%c8_60, %c737_61] : memref<64x1474xf32, #tpu.memory_space<vmem>>, vector<8x737xf32>
    tpu.vector_store %arg26[%c8_60, %c737_61], %54 {strides = array<i32>} : memref<64x1474xf32, #tpu.memory_space<vmem>>, vector<8x737xf32>,
    %c0_62 = arith.constant 0 : index
    %c16_63 = arith.constant 16 : index
    %56 = vector.load %arg25[%c0_62, %c16_63] : memref<8x793xf32, #tpu.memory_space<vmem>>, vector<8x737xf32>
    %c16_64 = arith.constant 16 : index
    %c737_65 = arith.constant 737 : index
    %57 = vector.load %arg26[%c16_64, %c737_65] : memref<64x1474xf32, #tpu.memory_space<vmem>>, vector<8x737xf32>
    tpu.vector_store %arg26[%c16_64, %c737_65], %56 {strides = array<i32>} : memref<64x1474xf32, #tpu.memory_space<vmem>>, vector<8x737xf32>,
    %c0_66 = arith.constant 0 : index
    %c24_67 = arith.constant 24 : index
    %58 = vector.load %arg25[%c0_66, %c24_67] : memref<8x793xf32, #tpu.memory_space<vmem>>, vector<8x737xf32>
    %c24_68 = arith.constant 24 : index
    %c737_69 = arith.constant 737 : index
    %59 = vector.load %arg26[%c24_68, %c737_69] : memref<64x1474xf32, #tpu.memory_space<vmem>>, vector<8x737xf32>
    tpu.vector_store %arg26[%c24_68, %c737_69], %58 {strides = array<i32>} : memref<64x1474xf32, #tpu.memory_space<vmem>>, vector<8x737xf32>,
    %c0_70 = arith.constant 0 : index
    %c32_71 = arith.constant 32 : index
    %60 = vector.load %arg25[%c0_70, %c32_71] : memref<8x793xf32, #tpu.memory_space<vmem>>, vector<8x737xf32>
    %c32_72 = arith.constant 32 : index
    %c737_73 = arith.constant 737 : index
    %61 = vector.load %arg26[%c32_72, %c737_73] : memref<64x1474xf32, #tpu.memory_space<vmem>>, vector<8x737xf32>
    tpu.vector_store %arg26[%c32_72, %c737_73], %60 {strides = array<i32>} : memref<64x1474xf32, #tpu.memory_space<vmem>>, vector<8x737xf32>,
    %c0_74 = arith.constant 0 : index
    %c40_75 = arith.constant 40 : index
    %62 = vector.load %arg25[%c0_74, %c40_75] : memref<8x793xf32, #tpu.memory_space<vmem>>, vector<8x737xf32>
    %c40_76 = arith.constant 40 : index
    %c737_77 = arith.constant 737 : index
    %63 = vector.load %arg26[%c40_76, %c737_77] : memref<64x1474xf32, #tpu.memory_space<vmem>>, vector<8x737xf32>
    tpu.vector_store %arg26[%c40_76, %c737_77], %62 {strides = array<i32>} : memref<64x1474xf32, #tpu.memory_space<vmem>>, vector<8x737xf32>,
    %c0_78 = arith.constant 0 : index
    %c48_79 = arith.constant 48 : index
    %64 = vector.load %arg25[%c0_78, %c48_79] : memref<8x793xf32, #tpu.memory_space<vmem>>, vector<8x737xf32>
    %c48_80 = arith.constant 48 : index
    %c737_81 = arith.constant 737 : index
    %65 = vector.load %arg26[%c48_80, %c737_81] : memref<64x1474xf32, #tpu.memory_space<vmem>>, vector<8x737xf32>
    tpu.vector_store %arg26[%c48_80, %c737_81], %64 {strides = array<i32>} : memref<64x1474xf32, #tpu.memory_space<vmem>>, vector<8x737xf32>,
    %c0_82 = arith.constant 0 : index
    %c56_83 = arith.constant 56 : index
    %66 = vector.load %arg25[%c0_82, %c56_83] : memref<8x793xf32, #tpu.memory_space<vmem>>, vector<8x737xf32>
    %c56_84 = arith.constant 56 : index
    %c737_85 = arith.constant 737 : index
    %67 = vector.load %arg26[%c56_84, %c737_85] : memref<64x1474xf32, #tpu.memory_space<vmem>>, vector<8x737xf32>
    tpu.vector_store %arg26[%c56_84, %c737_85], %66 {strides = array<i32>} : memref<64x1474xf32, #tpu.memory_space<vmem>>, vector<8x737xf32>,
    %c0_86 = arith.constant 0 : index
    %c0_87 = arith.constant 0 : index
    %68 = vector.load %arg1[%c0_86, %c0_87] : memref<8x64xf32, #tpu.memory_space<vmem>>, vector<8x64xf32>
    %c0_88 = arith.constant 0 : index
    %c0_89 = arith.constant 0 : index
    %69 = vector.load %arg26[%c0_88, %c0_89] : memref<64x1474xf32, #tpu.memory_space<vmem>>, vector<64x1474xf32>
    %cst = arith.constant dense<0.000000e+00> : vector<8x1474xf32>
    %70 = tpu.matmul %68, %69, %cst {dimension_numbers = #tpu.dot_dimension_numbers<[1], [0], [0], [1], [0, 0, 1, 1], [], []>} : vector<8x64xf32>, vector<64x1474xf32>, vector<8x1474xf32> -> vector<8x1474xf32>
    %c0_90 = arith.constant 0 : index
    %c0_91 = arith.constant 0 : index
    %71 = vector.load %arg2[%c0_90, %c0_91] : memref<8x1xf32, #tpu.memory_space<vmem>>, vector<8x1xf32>
    %72 = vector.broadcast %71 : vector<8x1xf32> to vector<8x1474xf32>
    %73 = arith.mulf %70, %72 : vector<8x1474xf32>
    %c0_92 = arith.constant 0 : index
    %c0_93 = arith.constant 0 : index
    %74 = vector.load %arg3[%c0_92, %c0_93] : memref<8x1xf32, #tpu.memory_space<vmem>>, vector<8x1xf32>
    %75 = vector.broadcast %74 : vector<8x1xf32> to vector<8x1474xf32>
    %76 = arith.addf %73, %75 : vector<8x1474xf32>
    %cst_94 = arith.constant 0.000000e+00 : f32
    %77 = vector.broadcast %cst_94 : f32 to vector<8x1474xf32>
    %78 = arith.maximumf %76, %77 : vector<8x1474xf32>
    %79 = tpu.iota {dimensions = array<i32: 0>} : vector<733x245xi32>
    %80 = tpu.iota {dimensions = array<i32: 1>} : vector<733x245xi32>
    %c3_i32 = arith.constant 3 : i32
    %81 = vector.broadcast %c3_i32 : i32 to vector<733x245xi32>
    %82 = arith.muli %81, %80 : vector<733x245xi32>
    %83 = arith.cmpi eq, %79, %82 : vector<733x245xi32>
    %84 = arith.extui %83 : vector<733x245xi1> to vector<733x245xi32>
    %85 = arith.sitofp %84 : vector<733x245xi32> to vector<733x245xf32>
    %86 = vector.extract_strided_slice %78 {offsets = [0, 0], sizes = [8, 737], strides = [1, 1]} : vector<8x1474xf32> to vector<8x737xf32>
    %87 = vector.extract_strided_slice %86 {offsets = [0, 0], sizes = [8, 733], strides = [1, 1]} : vector<8x737xf32> to vector<8x733xf32>
    %88 = vector.extract_strided_slice %86 {offsets = [0, 1], sizes = [8, 733], strides = [1, 1]} : vector<8x737xf32> to vector<8x733xf32>
    %89 = arith.maximumf %87, %88 : vector<8x733xf32>
    %90 = vector.extract_strided_slice %86 {offsets = [0, 2], sizes = [8, 733], strides = [1, 1]} : vector<8x737xf32> to vector<8x733xf32>
    %91 = arith.maximumf %89, %90 : vector<8x733xf32>
    %cst_95 = arith.constant dense<0.000000e+00> : vector<8x245xf32>
    %92 = tpu.matmul %91, %85, %cst_95 {dimension_numbers = #tpu.dot_dimension_numbers<[1], [0], [0], [1], [0, 0, 1, 1], [], []>} : vector<8x733xf32>, vector<733x245xf32>, vector<8x245xf32> -> vector<8x245xf32>
    %93 = vector.extract_strided_slice %78 {offsets = [0, 737], sizes = [8, 737], strides = [1, 1]} : vector<8x1474xf32> to vector<8x737xf32>
    %94 = vector.extract_strided_slice %93 {offsets = [0, 0], sizes = [8, 733], strides = [1, 1]} : vector<8x737xf32> to vector<8x733xf32>
    %95 = vector.extract_strided_slice %93 {offsets = [0, 1], sizes = [8, 733], strides = [1, 1]} : vector<8x737xf32> to vector<8x733xf32>
    %96 = arith.maximumf %94, %95 : vector<8x733xf32>
    %97 = vector.extract_strided_slice %93 {offsets = [0, 2], sizes = [8, 733], strides = [1, 1]} : vector<8x737xf32> to vector<8x733xf32>
    %98 = arith.maximumf %96, %97 : vector<8x733xf32>
    %cst_96 = arith.constant dense<0.000000e+00> : vector<8x245xf32>
    %99 = tpu.matmul %98, %85, %cst_96 {dimension_numbers = #tpu.dot_dimension_numbers<[1], [0], [0], [1], [0, 0, 1, 1], [], []>} : vector<8x733xf32>, vector<733x245xf32>, vector<8x245xf32> -> vector<8x245xf32>
    %100 = tpu.concatenate %92, %99 in 1 : vector<8x245xf32>, vector<8x245xf32> -> vector<8x490xf32>
    %101 = vector.extract_strided_slice %100 {offsets = [0, 0], sizes = [8, 214], strides = [1, 1]} : vector<8x490xf32> to vector<8x214xf32>
    %c0_97 = arith.constant 0 : index
    %c0_98 = arith.constant 0 : index
    %102 = vector.load %arg27[%c0_97, %c0_98] : memref<256x428xf32, #tpu.memory_space<vmem>>, vector<8x214xf32>
    tpu.vector_store %arg27[%c0_97, %c0_98], %101 {strides = array<i32>} : memref<256x428xf32, #tpu.memory_space<vmem>>, vector<8x214xf32>,
    %103 = vector.extract_strided_slice %100 {offsets = [0, 245], sizes = [8, 214], strides = [1, 1]} : vector<8x490xf32> to vector<8x214xf32>
    %c0_99 = arith.constant 0 : index
    %c214 = arith.constant 214 : index
    %104 = vector.load %arg27[%c0_99, %c214] : memref<256x428xf32, #tpu.memory_space<vmem>>, vector<8x214xf32>
    tpu.vector_store %arg27[%c0_99, %c214], %103 {strides = array<i32>} : memref<256x428xf32, #tpu.memory_space<vmem>>, vector<8x214xf32>,
    %105 = vector.extract_strided_slice %100 {offsets = [0, 1], sizes = [8, 214], strides = [1, 1]} : vector<8x490xf32> to vector<8x214xf32>
    %c8_100 = arith.constant 8 : index
    %c0_101 = arith.constant 0 : index
    %106 = vector.load %arg27[%c8_100, %c0_101] : memref<256x428xf32, #tpu.memory_space<vmem>>, vector<8x214xf32>
    tpu.vector_store %arg27[%c8_100, %c0_101], %105 {strides = array<i32>} : memref<256x428xf32, #tpu.memory_space<vmem>>, vector<8x214xf32>,
    %107 = vector.extract_strided_slice %100 {offsets = [0, 246], sizes = [8, 214], strides = [1, 1]} : vector<8x490xf32> to vector<8x214xf32>
    %c8_102 = arith.constant 8 : index
    %c214_103 = arith.constant 214 : index
    %108 = vector.load %arg27[%c8_102, %c214_103] : memref<256x428xf32, #tpu.memory_space<vmem>>, vector<8x214xf32>
    tpu.vector_store %arg27[%c8_102, %c214_103], %107 {strides = array<i32>} : memref<256x428xf32, #tpu.memory_space<vmem>>, vector<8x214xf32>,
    %109 = vector.extract_strided_slice %100 {offsets = [0, 2], sizes = [8, 214], strides = [1, 1]} : vector<8x490xf32> to vector<8x214xf32>
    %c16_104 = arith.constant 16 : index
    %c0_105 = arith.constant 0 : index
    %110 = vector.load %arg27[%c16_104, %c0_105] : memref<256x428xf32, #tpu.memory_space<vmem>>, vector<8x214xf32>
    tpu.vector_store %arg27[%c16_104, %c0_105], %109 {strides = array<i32>} : memref<256x428xf32, #tpu.memory_space<vmem>>, vector<8x214xf32>,
    %111 = vector.extract_strided_slice %100 {offsets = [0, 247], sizes = [8, 214], strides = [1, 1]} : vector<8x490xf32> to vector<8x214xf32>
    %c16_106 = arith.constant 16 : index
    %c214_107 = arith.constant 214 : index
    %112 = vector.load %arg27[%c16_106, %c214_107] : memref<256x428xf32, #tpu.memory_space<vmem>>, vector<8x214xf32>
    tpu.vector_store %arg27[%c16_106, %c214_107], %111 {strides = array<i32>} : memref<256x428xf32, #tpu.memory_space<vmem>>, vector<8x214xf32>,
    %113 = vector.extract_strided_slice %100 {offsets = [0, 3], sizes = [8, 214], strides = [1, 1]} : vector<8x490xf32> to vector<8x214xf32>
    %c24_108 = arith.constant 24 : index
    %c0_109 = arith.constant 0 : index
    %114 = vector.load %arg27[%c24_108, %c0_109] : memref<256x428xf32, #tpu.memory_space<vmem>>, vector<8x214xf32>
    tpu.vector_store %arg27[%c24_108, %c0_109], %113 {strides = array<i32>} : memref<256x428xf32, #tpu.memory_space<vmem>>, vector<8x214xf32>,
    %115 = vector.extract_strided_slice %100 {offsets = [0, 248], sizes = [8, 214], strides = [1, 1]} : vector<8x490xf32> to vector<8x214xf32>
    %c24_110 = arith.constant 24 : index
    %c214_111 = arith.constant 214 : index
    %116 = vector.load %arg27[%c24_110, %c214_111] : memref<256x428xf32, #tpu.memory_space<vmem>>, vector<8x214xf32>
    tpu.vector_store %arg27[%c24_110, %c214_111], %115 {strides = array<i32>} : memref<256x428xf32, #tpu.memory_space<vmem>>, vector<8x214xf32>,
    %117 = vector.extract_strided_slice %100 {offsets = [0, 4], sizes = [8, 214], strides = [1, 1]} : vector<8x490xf32> to vector<8x214xf32>
    %c32_112 = arith.constant 32 : index
    %c0_113 = arith.constant 0 : index
    %118 = vector.load %arg27[%c32_112, %c0_113] : memref<256x428xf32, #tpu.memory_space<vmem>>, vector<8x214xf32>
    tpu.vector_store %arg27[%c32_112, %c0_113], %117 {strides = array<i32>} : memref<256x428xf32, #tpu.memory_space<vmem>>, vector<8x214xf32>,
    %119 = vector.extract_strided_slice %100 {offsets = [0, 249], sizes = [8, 214], strides = [1, 1]} : vector<8x490xf32> to vector<8x214xf32>
    %c32_114 = arith.constant 32 : index
    %c214_115 = arith.constant 214 : index
    %120 = vector.load %arg27[%c32_114, %c214_115] : memref<256x428xf32, #tpu.memory_space<vmem>>, vector<8x214xf32>
    tpu.vector_store %arg27[%c32_114, %c214_115], %119 {strides = array<i32>} : memref<256x428xf32, #tpu.memory_space<vmem>>, vector<8x214xf32>,
    %121 = vector.extract_strided_slice %100 {offsets = [0, 5], sizes = [8, 214], strides = [1, 1]} : vector<8x490xf32> to vector<8x214xf32>
    %c40_116 = arith.constant 40 : index
    %c0_117 = arith.constant 0 : index
    %122 = vector.load %arg27[%c40_116, %c0_117] : memref<256x428xf32, #tpu.memory_space<vmem>>, vector<8x214xf32>
    tpu.vector_store %arg27[%c40_116, %c0_117], %121 {strides = array<i32>} : memref<256x428xf32, #tpu.memory_space<vmem>>, vector<8x214xf32>,
    %123 = vector.extract_strided_slice %100 {offsets = [0, 250], sizes = [8, 214], strides = [1, 1]} : vector<8x490xf32> to vector<8x214xf32>
    %c40_118 = arith.constant 40 : index
    %c214_119 = arith.constant 214 : index
    %124 = vector.load %arg27[%c40_118, %c214_119] : memref<256x428xf32, #tpu.memory_space<vmem>>, vector<8x214xf32>
    tpu.vector_store %arg27[%c40_118, %c214_119], %123 {strides = array<i32>} : memref<256x428xf32, #tpu.memory_space<vmem>>, vector<8x214xf32>,
    %125 = vector.extract_strided_slice %100 {offsets = [0, 6], sizes = [8, 214], strides = [1, 1]} : vector<8x490xf32> to vector<8x214xf32>
    %c48_120 = arith.constant 48 : index
    %c0_121 = arith.constant 0 : index
    %126 = vector.load %arg27[%c48_120, %c0_121] : memref<256x428xf32, #tpu.memory_space<vmem>>, vector<8x214xf32>
    tpu.vector_store %arg27[%c48_120, %c0_121], %125 {strides = array<i32>} : memref<256x428xf32, #tpu.memory_space<vmem>>, vector<8x214xf32>,
    %127 = vector.extract_strided_slice %100 {offsets = [0, 251], sizes = [8, 214], strides = [1, 1]} : vector<8x490xf32> to vector<8x214xf32>
    %c48_122 = arith.constant 48 : index
    %c214_123 = arith.constant 214 : index
    %128 = vector.load %arg27[%c48_122, %c214_123] : memref<256x428xf32, #tpu.memory_space<vmem>>, vector<8x214xf32>
    tpu.vector_store %arg27[%c48_122, %c214_123], %127 {strides = array<i32>} : memref<256x428xf32, #tpu.memory_space<vmem>>, vector<8x214xf32>,
    %129 = vector.extract_strided_slice %100 {offsets = [0, 7], sizes = [8, 214], strides = [1, 1]} : vector<8x490xf32> to vector<8x214xf32>
    %c56_124 = arith.constant 56 : index
    %c0_125 = arith.constant 0 : index
    %130 = vector.load %arg27[%c56_124, %c0_125] : memref<256x428xf32, #tpu.memory_space<vmem>>, vector<8x214xf32>
    tpu.vector_store %arg27[%c56_124, %c0_125], %129 {strides = array<i32>} : memref<256x428xf32, #tpu.memory_space<vmem>>, vector<8x214xf32>,
    %131 = vector.extract_strided_slice %100 {offsets = [0, 252], sizes = [8, 214], strides = [1, 1]} : vector<8x490xf32> to vector<8x214xf32>
    %c56_126 = arith.constant 56 : index
    %c214_127 = arith.constant 214 : index
    %132 = vector.load %arg27[%c56_126, %c214_127] : memref<256x428xf32, #tpu.memory_space<vmem>>, vector<8x214xf32>
    tpu.vector_store %arg27[%c56_126, %c214_127], %131 {strides = array<i32>} : memref<256x428xf32, #tpu.memory_space<vmem>>, vector<8x214xf32>,
    %133 = vector.extract_strided_slice %100 {offsets = [0, 8], sizes = [8, 214], strides = [1, 1]} : vector<8x490xf32> to vector<8x214xf32>
    %c64 = arith.constant 64 : index
    %c0_128 = arith.constant 0 : index
    %134 = vector.load %arg27[%c64, %c0_128] : memref<256x428xf32, #tpu.memory_space<vmem>>, vector<8x214xf32>
    tpu.vector_store %arg27[%c64, %c0_128], %133 {strides = array<i32>} : memref<256x428xf32, #tpu.memory_space<vmem>>, vector<8x214xf32>,
    %135 = vector.extract_strided_slice %100 {offsets = [0, 253], sizes = [8, 214], strides = [1, 1]} : vector<8x490xf32> to vector<8x214xf32>
    %c64_129 = arith.constant 64 : index
    %c214_130 = arith.constant 214 : index
    %136 = vector.load %arg27[%c64_129, %c214_130] : memref<256x428xf32, #tpu.memory_space<vmem>>, vector<8x214xf32>
    tpu.vector_store %arg27[%c64_129, %c214_130], %135 {strides = array<i32>} : memref<256x428xf32, #tpu.memory_space<vmem>>, vector<8x214xf32>,
    %137 = vector.extract_strided_slice %100 {offsets = [0, 9], sizes = [8, 214], strides = [1, 1]} : vector<8x490xf32> to vector<8x214xf32>
    %c72 = arith.constant 72 : index
    %c0_131 = arith.constant 0 : index
    %138 = vector.load %arg27[%c72, %c0_131] : memref<256x428xf32, #tpu.memory_space<vmem>>, vector<8x214xf32>
    tpu.vector_store %arg27[%c72, %c0_131], %137 {strides = array<i32>} : memref<256x428xf32, #tpu.memory_space<vmem>>, vector<8x214xf32>,
    %139 = vector.extract_strided_slice %100 {offsets = [0, 254], sizes = [8, 214], strides = [1, 1]} : vector<8x490xf32> to vector<8x214xf32>
    %c72_132 = arith.constant 72 : index
    %c214_133 = arith.constant 214 : index
    %140 = vector.load %arg27[%c72_132, %c214_133] : memref<256x428xf32, #tpu.memory_space<vmem>>, vector<8x214xf32>
    tpu.vector_store %arg27[%c72_132, %c214_133], %139 {strides = array<i32>} : memref<256x428xf32, #tpu.memory_space<vmem>>, vector<8x214xf32>,
    %141 = vector.extract_strided_slice %100 {offsets = [0, 10], sizes = [8, 214], strides = [1, 1]} : vector<8x490xf32> to vector<8x214xf32>
    %c80 = arith.constant 80 : index
    %c0_134 = arith.constant 0 : index
    %142 = vector.load %arg27[%c80, %c0_134] : memref<256x428xf32, #tpu.memory_space<vmem>>, vector<8x214xf32>
    tpu.vector_store %arg27[%c80, %c0_134], %141 {strides = array<i32>} : memref<256x428xf32, #tpu.memory_space<vmem>>, vector<8x214xf32>,
    %143 = vector.extract_strided_slice %100 {offsets = [0, 255], sizes = [8, 214], strides = [1, 1]} : vector<8x490xf32> to vector<8x214xf32>
    %c80_135 = arith.constant 80 : index
    %c214_136 = arith.constant 214 : index
    %144 = vector.load %arg27[%c80_135, %c214_136] : memref<256x428xf32, #tpu.memory_space<vmem>>, vector<8x214xf32>
    tpu.vector_store %arg27[%c80_135, %c214_136], %143 {strides = array<i32>} : memref<256x428xf32, #tpu.memory_space<vmem>>, vector<8x214xf32>,
    %145 = vector.extract_strided_slice %100 {offsets = [0, 11], sizes = [8, 214], strides = [1, 1]} : vector<8x490xf32> to vector<8x214xf32>
    %c88 = arith.constant 88 : index
    %c0_137 = arith.constant 0 : index
    %146 = vector.load %arg27[%c88, %c0_137] : memref<256x428xf32, #tpu.memory_space<vmem>>, vector<8x214xf32>
    tpu.vector_store %arg27[%c88, %c0_137], %145 {strides = array<i32>} : memref<256x428xf32, #tpu.memory_space<vmem>>, vector<8x214xf32>,
    %147 = vector.extract_strided_slice %100 {offsets = [0, 256], sizes = [8, 214], strides = [1, 1]} : vector<8x490xf32> to vector<8x214xf32>
    %c88_138 = arith.constant 88 : index
    %c214_139 = arith.constant 214 : index
    %148 = vector.load %arg27[%c88_138, %c214_139] : memref<256x428xf32, #tpu.memory_space<vmem>>, vector<8x214xf32>
    tpu.vector_store %arg27[%c88_138, %c214_139], %147 {strides = array<i32>} : memref<256x428xf32, #tpu.memory_space<vmem>>, vector<8x214xf32>,
    %149 = vector.extract_strided_slice %100 {offsets = [0, 12], sizes = [8, 214], strides = [1, 1]} : vector<8x490xf32> to vector<8x214xf32>
    %c96 = arith.constant 96 : index
    %c0_140 = arith.constant 0 : index
    %150 = vector.load %arg27[%c96, %c0_140] : memref<256x428xf32, #tpu.memory_space<vmem>>, vector<8x214xf32>
    tpu.vector_store %arg27[%c96, %c0_140], %149 {strides = array<i32>} : memref<256x428xf32, #tpu.memory_space<vmem>>, vector<8x214xf32>,
    %151 = vector.extract_strided_slice %100 {offsets = [0, 257], sizes = [8, 214], strides = [1, 1]} : vector<8x490xf32> to vector<8x214xf32>
    %c96_141 = arith.constant 96 : index
    %c214_142 = arith.constant 214 : index
    %152 = vector.load %arg27[%c96_141, %c214_142] : memref<256x428xf32, #tpu.memory_space<vmem>>, vector<8x214xf32>
    tpu.vector_store %arg27[%c96_141, %c214_142], %151 {strides = array<i32>} : memref<256x428xf32, #tpu.memory_space<vmem>>, vector<8x214xf32>,
    %153 = vector.extract_strided_slice %100 {offsets = [0, 13], sizes = [8, 214], strides = [1, 1]} : vector<8x490xf32> to vector<8x214xf32>
    %c104 = arith.constant 104 : index
    %c0_143 = arith.constant 0 : index
    %154 = vector.load %arg27[%c104, %c0_143] : memref<256x428xf32, #tpu.memory_space<vmem>>, vector<8x214xf32>
    tpu.vector_store %arg27[%c104, %c0_143], %153 {strides = array<i32>} : memref<256x428xf32, #tpu.memory_space<vmem>>, vector<8x214xf32>,
    %155 = vector.extract_strided_slice %100 {offsets = [0, 258], sizes = [8, 214], strides = [1, 1]} : vector<8x490xf32> to vector<8x214xf32>
    %c104_144 = arith.constant 104 : index
    %c214_145 = arith.constant 214 : index
    %156 = vector.load %arg27[%c104_144, %c214_145] : memref<256x428xf32, #tpu.memory_space<vmem>>, vector<8x214xf32>
    tpu.vector_store %arg27[%c104_144, %c214_145], %155 {strides = array<i32>} : memref<256x428xf32, #tpu.memory_space<vmem>>, vector<8x214xf32>,
    %157 = vector.extract_strided_slice %100 {offsets = [0, 14], sizes = [8, 214], strides = [1, 1]} : vector<8x490xf32> to vector<8x214xf32>
    %c112 = arith.constant 112 : index
    %c0_146 = arith.constant 0 : index
    %158 = vector.load %arg27[%c112, %c0_146] : memref<256x428xf32, #tpu.memory_space<vmem>>, vector<8x214xf32>
    tpu.vector_store %arg27[%c112, %c0_146], %157 {strides = array<i32>} : memref<256x428xf32, #tpu.memory_space<vmem>>, vector<8x214xf32>,
    %159 = vector.extract_strided_slice %100 {offsets = [0, 259], sizes = [8, 214], strides = [1, 1]} : vector<8x490xf32> to vector<8x214xf32>
    %c112_147 = arith.constant 112 : index
    %c214_148 = arith.constant 214 : index
    %160 = vector.load %arg27[%c112_147, %c214_148] : memref<256x428xf32, #tpu.memory_space<vmem>>, vector<8x214xf32>
    tpu.vector_store %arg27[%c112_147, %c214_148], %159 {strides = array<i32>} : memref<256x428xf32, #tpu.memory_space<vmem>>, vector<8x214xf32>,
    %161 = vector.extract_strided_slice %100 {offsets = [0, 15], sizes = [8, 214], strides = [1, 1]} : vector<8x490xf32> to vector<8x214xf32>
    %c120 = arith.constant 120 : index
    %c0_149 = arith.constant 0 : index
    %162 = vector.load %arg27[%c120, %c0_149] : memref<256x428xf32, #tpu.memory_space<vmem>>, vector<8x214xf32>
    tpu.vector_store %arg27[%c120, %c0_149], %161 {strides = array<i32>} : memref<256x428xf32, #tpu.memory_space<vmem>>, vector<8x214xf32>,
    %163 = vector.extract_strided_slice %100 {offsets = [0, 260], sizes = [8, 214], strides = [1, 1]} : vector<8x490xf32> to vector<8x214xf32>
    %c120_150 = arith.constant 120 : index
    %c214_151 = arith.constant 214 : index
    %164 = vector.load %arg27[%c120_150, %c214_151] : memref<256x428xf32, #tpu.memory_space<vmem>>, vector<8x214xf32>
    tpu.vector_store %arg27[%c120_150, %c214_151], %163 {strides = array<i32>} : memref<256x428xf32, #tpu.memory_space<vmem>>, vector<8x214xf32>,
    %165 = vector.extract_strided_slice %100 {offsets = [0, 16], sizes = [8, 214], strides = [1, 1]} : vector<8x490xf32> to vector<8x214xf32>
    %c128 = arith.constant 128 : index
    %c0_152 = arith.constant 0 : index
    %166 = vector.load %arg27[%c128, %c0_152] : memref<256x428xf32, #tpu.memory_space<vmem>>, vector<8x214xf32>
    tpu.vector_store %arg27[%c128, %c0_152], %165 {strides = array<i32>} : memref<256x428xf32, #tpu.memory_space<vmem>>, vector<8x214xf32>,
    %167 = vector.extract_strided_slice %100 {offsets = [0, 261], sizes = [8, 214], strides = [1, 1]} : vector<8x490xf32> to vector<8x214xf32>
    %c128_153 = arith.constant 128 : index
    %c214_154 = arith.constant 214 : index
    %168 = vector.load %arg27[%c128_153, %c214_154] : memref<256x428xf32, #tpu.memory_space<vmem>>, vector<8x214xf32>
    tpu.vector_store %arg27[%c128_153, %c214_154], %167 {strides = array<i32>} : memref<256x428xf32, #tpu.memory_space<vmem>>, vector<8x214xf32>,
    %169 = vector.extract_strided_slice %100 {offsets = [0, 17], sizes = [8, 214], strides = [1, 1]} : vector<8x490xf32> to vector<8x214xf32>
    %c136 = arith.constant 136 : index
    %c0_155 = arith.constant 0 : index
    %170 = vector.load %arg27[%c136, %c0_155] : memref<256x428xf32, #tpu.memory_space<vmem>>, vector<8x214xf32>
    tpu.vector_store %arg27[%c136, %c0_155], %169 {strides = array<i32>} : memref<256x428xf32, #tpu.memory_space<vmem>>, vector<8x214xf32>,
    %171 = vector.extract_strided_slice %100 {offsets = [0, 262], sizes = [8, 214], strides = [1, 1]} : vector<8x490xf32> to vector<8x214xf32>
    %c136_156 = arith.constant 136 : index
    %c214_157 = arith.constant 214 : index
    %172 = vector.load %arg27[%c136_156, %c214_157] : memref<256x428xf32, #tpu.memory_space<vmem>>, vector<8x214xf32>
    tpu.vector_store %arg27[%c136_156, %c214_157], %171 {strides = array<i32>} : memref<256x428xf32, #tpu.memory_space<vmem>>, vector<8x214xf32>,
    %173 = vector.extract_strided_slice %100 {offsets = [0, 18], sizes = [8, 214], strides = [1, 1]} : vector<8x490xf32> to vector<8x214xf32>
    %c144 = arith.constant 144 : index
    %c0_158 = arith.constant 0 : index
    %174 = vector.load %arg27[%c144, %c0_158] : memref<256x428xf32, #tpu.memory_space<vmem>>, vector<8x214xf32>
    tpu.vector_store %arg27[%c144, %c0_158], %173 {strides = array<i32>} : memref<256x428xf32, #tpu.memory_space<vmem>>, vector<8x214xf32>,
    %175 = vector.extract_strided_slice %100 {offsets = [0, 263], sizes = [8, 214], strides = [1, 1]} : vector<8x490xf32> to vector<8x214xf32>
    %c144_159 = arith.constant 144 : index
    %c214_160 = arith.constant 214 : index
    %176 = vector.load %arg27[%c144_159, %c214_160] : memref<256x428xf32, #tpu.memory_space<vmem>>, vector<8x214xf32>
    tpu.vector_store %arg27[%c144_159, %c214_160], %175 {strides = array<i32>} : memref<256x428xf32, #tpu.memory_space<vmem>>, vector<8x214xf32>,
    %177 = vector.extract_strided_slice %100 {offsets = [0, 19], sizes = [8, 214], strides = [1, 1]} : vector<8x490xf32> to vector<8x214xf32>
    %c152 = arith.constant 152 : index
    %c0_161 = arith.constant 0 : index
    %178 = vector.load %arg27[%c152, %c0_161] : memref<256x428xf32, #tpu.memory_space<vmem>>, vector<8x214xf32>
    tpu.vector_store %arg27[%c152, %c0_161], %177 {strides = array<i32>} : memref<256x428xf32, #tpu.memory_space<vmem>>, vector<8x214xf32>,
    %179 = vector.extract_strided_slice %100 {offsets = [0, 264], sizes = [8, 214], strides = [1, 1]} : vector<8x490xf32> to vector<8x214xf32>
    %c152_162 = arith.constant 152 : index
    %c214_163 = arith.constant 214 : index
    %180 = vector.load %arg27[%c152_162, %c214_163] : memref<256x428xf32, #tpu.memory_space<vmem>>, vector<8x214xf32>
    tpu.vector_store %arg27[%c152_162, %c214_163], %179 {strides = array<i32>} : memref<256x428xf32, #tpu.memory_space<vmem>>, vector<8x214xf32>,
    %181 = vector.extract_strided_slice %100 {offsets = [0, 20], sizes = [8, 214], strides = [1, 1]} : vector<8x490xf32> to vector<8x214xf32>
    %c160 = arith.constant 160 : index
    %c0_164 = arith.constant 0 : index
    %182 = vector.load %arg27[%c160, %c0_164] : memref<256x428xf32, #tpu.memory_space<vmem>>, vector<8x214xf32>
    tpu.vector_store %arg27[%c160, %c0_164], %181 {strides = array<i32>} : memref<256x428xf32, #tpu.memory_space<vmem>>, vector<8x214xf32>,
    %183 = vector.extract_strided_slice %100 {offsets = [0, 265], sizes = [8, 214], strides = [1, 1]} : vector<8x490xf32> to vector<8x214xf32>
    %c160_165 = arith.constant 160 : index
    %c214_166 = arith.constant 214 : index
    %184 = vector.load %arg27[%c160_165, %c214_166] : memref<256x428xf32, #tpu.memory_space<vmem>>, vector<8x214xf32>
    tpu.vector_store %arg27[%c160_165, %c214_166], %183 {strides = array<i32>} : memref<256x428xf32, #tpu.memory_space<vmem>>, vector<8x214xf32>,
    %185 = vector.extract_strided_slice %100 {offsets = [0, 21], sizes = [8, 214], strides = [1, 1]} : vector<8x490xf32> to vector<8x214xf32>
    %c168 = arith.constant 168 : index
    %c0_167 = arith.constant 0 : index
    %186 = vector.load %arg27[%c168, %c0_167] : memref<256x428xf32, #tpu.memory_space<vmem>>, vector<8x214xf32>
    tpu.vector_store %arg27[%c168, %c0_167], %185 {strides = array<i32>} : memref<256x428xf32, #tpu.memory_space<vmem>>, vector<8x214xf32>,
    %187 = vector.extract_strided_slice %100 {offsets = [0, 266], sizes = [8, 214], strides = [1, 1]} : vector<8x490xf32> to vector<8x214xf32>
    %c168_168 = arith.constant 168 : index
    %c214_169 = arith.constant 214 : index
    %188 = vector.load %arg27[%c168_168, %c214_169] : memref<256x428xf32, #tpu.memory_space<vmem>>, vector<8x214xf32>
    tpu.vector_store %arg27[%c168_168, %c214_169], %187 {strides = array<i32>} : memref<256x428xf32, #tpu.memory_space<vmem>>, vector<8x214xf32>,
    %189 = vector.extract_strided_slice %100 {offsets = [0, 22], sizes = [8, 214], strides = [1, 1]} : vector<8x490xf32> to vector<8x214xf32>
    %c176 = arith.constant 176 : index
    %c0_170 = arith.constant 0 : index
    %190 = vector.load %arg27[%c176, %c0_170] : memref<256x428xf32, #tpu.memory_space<vmem>>, vector<8x214xf32>
    tpu.vector_store %arg27[%c176, %c0_170], %189 {strides = array<i32>} : memref<256x428xf32, #tpu.memory_space<vmem>>, vector<8x214xf32>,
    %191 = vector.extract_strided_slice %100 {offsets = [0, 267], sizes = [8, 214], strides = [1, 1]} : vector<8x490xf32> to vector<8x214xf32>
    %c176_171 = arith.constant 176 : index
    %c214_172 = arith.constant 214 : index
    %192 = vector.load %arg27[%c176_171, %c214_172] : memref<256x428xf32, #tpu.memory_space<vmem>>, vector<8x214xf32>
    tpu.vector_store %arg27[%c176_171, %c214_172], %191 {strides = array<i32>} : memref<256x428xf32, #tpu.memory_space<vmem>>, vector<8x214xf32>,
    %193 = vector.extract_strided_slice %100 {offsets = [0, 23], sizes = [8, 214], strides = [1, 1]} : vector<8x490xf32> to vector<8x214xf32>
    %c184 = arith.constant 184 : index
    %c0_173 = arith.constant 0 : index
    %194 = vector.load %arg27[%c184, %c0_173] : memref<256x428xf32, #tpu.memory_space<vmem>>, vector<8x214xf32>
    tpu.vector_store %arg27[%c184, %c0_173], %193 {strides = array<i32>} : memref<256x428xf32, #tpu.memory_space<vmem>>, vector<8x214xf32>,
    %195 = vector.extract_strided_slice %100 {offsets = [0, 268], sizes = [8, 214], strides = [1, 1]} : vector<8x490xf32> to vector<8x214xf32>
    %c184_174 = arith.constant 184 : index
    %c214_175 = arith.constant 214 : index
    %196 = vector.load %arg27[%c184_174, %c214_175] : memref<256x428xf32, #tpu.memory_space<vmem>>, vector<8x214xf32>
    tpu.vector_store %arg27[%c184_174, %c214_175], %195 {strides = array<i32>} : memref<256x428xf32, #tpu.memory_space<vmem>>, vector<8x214xf32>,
    %197 = vector.extract_strided_slice %100 {offsets = [0, 24], sizes = [8, 214], strides = [1, 1]} : vector<8x490xf32> to vector<8x214xf32>
    %c192 = arith.constant 192 : index
    %c0_176 = arith.constant 0 : index
    %198 = vector.load %arg27[%c192, %c0_176] : memref<256x428xf32, #tpu.memory_space<vmem>>, vector<8x214xf32>
    tpu.vector_store %arg27[%c192, %c0_176], %197 {strides = array<i32>} : memref<256x428xf32, #tpu.memory_space<vmem>>, vector<8x214xf32>,
    %199 = vector.extract_strided_slice %100 {offsets = [0, 269], sizes = [8, 214], strides = [1, 1]} : vector<8x490xf32> to vector<8x214xf32>
    %c192_177 = arith.constant 192 : index
    %c214_178 = arith.constant 214 : index
    %200 = vector.load %arg27[%c192_177, %c214_178] : memref<256x428xf32, #tpu.memory_space<vmem>>, vector<8x214xf32>
    tpu.vector_store %arg27[%c192_177, %c214_178], %199 {strides = array<i32>} : memref<256x428xf32, #tpu.memory_space<vmem>>, vector<8x214xf32>,
    %201 = vector.extract_strided_slice %100 {offsets = [0, 25], sizes = [8, 214], strides = [1, 1]} : vector<8x490xf32> to vector<8x214xf32>
    %c200 = arith.constant 200 : index
    %c0_179 = arith.constant 0 : index
    %202 = vector.load %arg27[%c200, %c0_179] : memref<256x428xf32, #tpu.memory_space<vmem>>, vector<8x214xf32>
    tpu.vector_store %arg27[%c200, %c0_179], %201 {strides = array<i32>} : memref<256x428xf32, #tpu.memory_space<vmem>>, vector<8x214xf32>,
    %203 = vector.extract_strided_slice %100 {offsets = [0, 270], sizes = [8, 214], strides = [1, 1]} : vector<8x490xf32> to vector<8x214xf32>
    %c200_180 = arith.constant 200 : index
    %c214_181 = arith.constant 214 : index
    %204 = vector.load %arg27[%c200_180, %c214_181] : memref<256x428xf32, #tpu.memory_space<vmem>>, vector<8x214xf32>
    tpu.vector_store %arg27[%c200_180, %c214_181], %203 {strides = array<i32>} : memref<256x428xf32, #tpu.memory_space<vmem>>, vector<8x214xf32>,
    %205 = vector.extract_strided_slice %100 {offsets = [0, 26], sizes = [8, 214], strides = [1, 1]} : vector<8x490xf32> to vector<8x214xf32>
    %c208 = arith.constant 208 : index
    %c0_182 = arith.constant 0 : index
    %206 = vector.load %arg27[%c208, %c0_182] : memref<256x428xf32, #tpu.memory_space<vmem>>, vector<8x214xf32>
    tpu.vector_store %arg27[%c208, %c0_182], %205 {strides = array<i32>} : memref<256x428xf32, #tpu.memory_space<vmem>>, vector<8x214xf32>,
    %207 = vector.extract_strided_slice %100 {offsets = [0, 271], sizes = [8, 214], strides = [1, 1]} : vector<8x490xf32> to vector<8x214xf32>
    %c208_183 = arith.constant 208 : index
    %c214_184 = arith.constant 214 : index
    %208 = vector.load %arg27[%c208_183, %c214_184] : memref<256x428xf32, #tpu.memory_space<vmem>>, vector<8x214xf32>
    tpu.vector_store %arg27[%c208_183, %c214_184], %207 {strides = array<i32>} : memref<256x428xf32, #tpu.memory_space<vmem>>, vector<8x214xf32>,
    %209 = vector.extract_strided_slice %100 {offsets = [0, 27], sizes = [8, 214], strides = [1, 1]} : vector<8x490xf32> to vector<8x214xf32>
    %c216 = arith.constant 216 : index
    %c0_185 = arith.constant 0 : index
    %210 = vector.load %arg27[%c216, %c0_185] : memref<256x428xf32, #tpu.memory_space<vmem>>, vector<8x214xf32>
    tpu.vector_store %arg27[%c216, %c0_185], %209 {strides = array<i32>} : memref<256x428xf32, #tpu.memory_space<vmem>>, vector<8x214xf32>,
    %211 = vector.extract_strided_slice %100 {offsets = [0, 272], sizes = [8, 214], strides = [1, 1]} : vector<8x490xf32> to vector<8x214xf32>
    %c216_186 = arith.constant 216 : index
    %c214_187 = arith.constant 214 : index
    %212 = vector.load %arg27[%c216_186, %c214_187] : memref<256x428xf32, #tpu.memory_space<vmem>>, vector<8x214xf32>
    tpu.vector_store %arg27[%c216_186, %c214_187], %211 {strides = array<i32>} : memref<256x428xf32, #tpu.memory_space<vmem>>, vector<8x214xf32>,
    %213 = vector.extract_strided_slice %100 {offsets = [0, 28], sizes = [8, 214], strides = [1, 1]} : vector<8x490xf32> to vector<8x214xf32>
    %c224 = arith.constant 224 : index
    %c0_188 = arith.constant 0 : index
    %214 = vector.load %arg27[%c224, %c0_188] : memref<256x428xf32, #tpu.memory_space<vmem>>, vector<8x214xf32>
    tpu.vector_store %arg27[%c224, %c0_188], %213 {strides = array<i32>} : memref<256x428xf32, #tpu.memory_space<vmem>>, vector<8x214xf32>,
    %215 = vector.extract_strided_slice %100 {offsets = [0, 273], sizes = [8, 214], strides = [1, 1]} : vector<8x490xf32> to vector<8x214xf32>
    %c224_189 = arith.constant 224 : index
    %c214_190 = arith.constant 214 : index
    %216 = vector.load %arg27[%c224_189, %c214_190] : memref<256x428xf32, #tpu.memory_space<vmem>>, vector<8x214xf32>
    tpu.vector_store %arg27[%c224_189, %c214_190], %215 {strides = array<i32>} : memref<256x428xf32, #tpu.memory_space<vmem>>, vector<8x214xf32>,
    %217 = vector.extract_strided_slice %100 {offsets = [0, 29], sizes = [8, 214], strides = [1, 1]} : vector<8x490xf32> to vector<8x214xf32>
    %c232 = arith.constant 232 : index
    %c0_191 = arith.constant 0 : index
    %218 = vector.load %arg27[%c232, %c0_191] : memref<256x428xf32, #tpu.memory_space<vmem>>, vector<8x214xf32>
    tpu.vector_store %arg27[%c232, %c0_191], %217 {strides = array<i32>} : memref<256x428xf32, #tpu.memory_space<vmem>>, vector<8x214xf32>,
    %219 = vector.extract_strided_slice %100 {offsets = [0, 274], sizes = [8, 214], strides = [1, 1]} : vector<8x490xf32> to vector<8x214xf32>
    %c232_192 = arith.constant 232 : index
    %c214_193 = arith.constant 214 : index
    %220 = vector.load %arg27[%c232_192, %c214_193] : memref<256x428xf32, #tpu.memory_space<vmem>>, vector<8x214xf32>
    tpu.vector_store %arg27[%c232_192, %c214_193], %219 {strides = array<i32>} : memref<256x428xf32, #tpu.memory_space<vmem>>, vector<8x214xf32>,
    %221 = vector.extract_strided_slice %100 {offsets = [0, 30], sizes = [8, 214], strides = [1, 1]} : vector<8x490xf32> to vector<8x214xf32>
    %c240 = arith.constant 240 : index
    %c0_194 = arith.constant 0 : index
    %222 = vector.load %arg27[%c240, %c0_194] : memref<256x428xf32, #tpu.memory_space<vmem>>, vector<8x214xf32>
    tpu.vector_store %arg27[%c240, %c0_194], %221 {strides = array<i32>} : memref<256x428xf32, #tpu.memory_space<vmem>>, vector<8x214xf32>,
    %223 = vector.extract_strided_slice %100 {offsets = [0, 275], sizes = [8, 214], strides = [1, 1]} : vector<8x490xf32> to vector<8x214xf32>
    %c240_195 = arith.constant 240 : index
    %c214_196 = arith.constant 214 : index
    %224 = vector.load %arg27[%c240_195, %c214_196] : memref<256x428xf32, #tpu.memory_space<vmem>>, vector<8x214xf32>
    tpu.vector_store %arg27[%c240_195, %c214_196], %223 {strides = array<i32>} : memref<256x428xf32, #tpu.memory_space<vmem>>, vector<8x214xf32>,
    %225 = vector.extract_strided_slice %100 {offsets = [0, 31], sizes = [8, 214], strides = [1, 1]} : vector<8x490xf32> to vector<8x214xf32>
    %c248 = arith.constant 248 : index
    %c0_197 = arith.constant 0 : index
    %226 = vector.load %arg27[%c248, %c0_197] : memref<256x428xf32, #tpu.memory_space<vmem>>, vector<8x214xf32>
    tpu.vector_store %arg27[%c248, %c0_197], %225 {strides = array<i32>} : memref<256x428xf32, #tpu.memory_space<vmem>>, vector<8x214xf32>,
    %227 = vector.extract_strided_slice %100 {offsets = [0, 276], sizes = [8, 214], strides = [1, 1]} : vector<8x490xf32> to vector<8x214xf32>
    %c248_198 = arith.constant 248 : index
    %c214_199 = arith.constant 214 : index
    %228 = vector.load %arg27[%c248_198, %c214_199] : memref<256x428xf32, #tpu.memory_space<vmem>>, vector<8x214xf32>
    tpu.vector_store %arg27[%c248_198, %c214_199], %227 {strides = array<i32>} : memref<256x428xf32, #tpu.memory_space<vmem>>, vector<8x214xf32>,
    %c0_200 = arith.constant 0 : index
    %c0_201 = arith.constant 0 : index
    %229 = vector.load %arg4[%c0_200, %c0_201] : memref<16x256xf32, #tpu.memory_space<vmem>>, vector<16x256xf32>
    %c0_202 = arith.constant 0 : index
    %c0_203 = arith.constant 0 : index
    %230 = vector.load %arg27[%c0_202, %c0_203] : memref<256x428xf32, #tpu.memory_space<vmem>>, vector<256x428xf32>
    %cst_204 = arith.constant dense<0.000000e+00> : vector<16x428xf32>
    %231 = tpu.matmul %229, %230, %cst_204 {dimension_numbers = #tpu.dot_dimension_numbers<[1], [0], [0], [1], [0, 0, 1, 1], [], []>} : vector<16x256xf32>, vector<256x428xf32>, vector<16x428xf32> -> vector<16x428xf32>
    %c0_205 = arith.constant 0 : index
    %c0_206 = arith.constant 0 : index
    %232 = vector.load %arg5[%c0_205, %c0_206] : memref<16x1xf32, #tpu.memory_space<vmem>>, vector<16x1xf32>
    %233 = vector.broadcast %232 : vector<16x1xf32> to vector<16x428xf32>
    %234 = arith.mulf %231, %233 : vector<16x428xf32>
    %c0_207 = arith.constant 0 : index
    %c0_208 = arith.constant 0 : index
    %235 = vector.load %arg6[%c0_207, %c0_208] : memref<16x1xf32, #tpu.memory_space<vmem>>, vector<16x1xf32>
    %236 = vector.broadcast %235 : vector<16x1xf32> to vector<16x428xf32>
    %237 = arith.addf %234, %236 : vector<16x428xf32>
    %cst_209 = arith.constant 0.000000e+00 : f32
    %238 = vector.broadcast %cst_209 : f32 to vector<16x428xf32>
    %239 = arith.maximumf %237, %238 : vector<16x428xf32>
    %240 = tpu.iota {dimensions = array<i32: 0>} : vector<211x71xi32>
    %241 = tpu.iota {dimensions = array<i32: 1>} : vector<211x71xi32>
    %c3_i32_210 = arith.constant 3 : i32
    %242 = vector.broadcast %c3_i32_210 : i32 to vector<211x71xi32>
    %243 = arith.muli %242, %241 : vector<211x71xi32>
    %244 = arith.cmpi eq, %240, %243 : vector<211x71xi32>
    %245 = arith.extui %244 : vector<211x71xi1> to vector<211x71xi32>
    %246 = arith.sitofp %245 : vector<211x71xi32> to vector<211x71xf32>
    %247 = vector.extract_strided_slice %239 {offsets = [0, 0], sizes = [16, 214], strides = [1, 1]} : vector<16x428xf32> to vector<16x214xf32>
    %248 = vector.extract_strided_slice %247 {offsets = [0, 0], sizes = [16, 211], strides = [1, 1]} : vector<16x214xf32> to vector<16x211xf32>
    %249 = vector.extract_strided_slice %247 {offsets = [0, 1], sizes = [16, 211], strides = [1, 1]} : vector<16x214xf32> to vector<16x211xf32>
    %250 = arith.maximumf %248, %249 : vector<16x211xf32>
    %251 = vector.extract_strided_slice %247 {offsets = [0, 2], sizes = [16, 211], strides = [1, 1]} : vector<16x214xf32> to vector<16x211xf32>
    %252 = arith.maximumf %250, %251 : vector<16x211xf32>
    %cst_211 = arith.constant dense<0.000000e+00> : vector<16x71xf32>
    %253 = tpu.matmul %252, %246, %cst_211 {dimension_numbers = #tpu.dot_dimension_numbers<[1], [0], [0], [1], [0, 0, 1, 1], [], []>} : vector<16x211xf32>, vector<211x71xf32>, vector<16x71xf32> -> vector<16x71xf32>
    %254 = vector.extract_strided_slice %239 {offsets = [0, 214], sizes = [16, 214], strides = [1, 1]} : vector<16x428xf32> to vector<16x214xf32>
    %255 = vector.extract_strided_slice %254 {offsets = [0, 0], sizes = [16, 211], strides = [1, 1]} : vector<16x214xf32> to vector<16x211xf32>
    %256 = vector.extract_strided_slice %254 {offsets = [0, 1], sizes = [16, 211], strides = [1, 1]} : vector<16x214xf32> to vector<16x211xf32>
    %257 = arith.maximumf %255, %256 : vector<16x211xf32>
    %258 = vector.extract_strided_slice %254 {offsets = [0, 2], sizes = [16, 211], strides = [1, 1]} : vector<16x214xf32> to vector<16x211xf32>
    %259 = arith.maximumf %257, %258 : vector<16x211xf32>
    %cst_212 = arith.constant dense<0.000000e+00> : vector<16x71xf32>
    %260 = tpu.matmul %259, %246, %cst_212 {dimension_numbers = #tpu.dot_dimension_numbers<[1], [0], [0], [1], [0, 0, 1, 1], [], []>} : vector<16x211xf32>, vector<211x71xf32>, vector<16x71xf32> -> vector<16x71xf32>
    %261 = tpu.concatenate %253, %260 in 1 : vector<16x71xf32>, vector<16x71xf32> -> vector<16x142xf32>
    %262 = vector.extract_strided_slice %261 {offsets = [0, 0], sizes = [16, 56], strides = [1, 1]} : vector<16x142xf32> to vector<16x56xf32>
    %c0_213 = arith.constant 0 : index
    %c0_214 = arith.constant 0 : index
    %263 = vector.load %arg28[%c0_213, %c0_214] : memref<256x112xf32, #tpu.memory_space<vmem>>, vector<16x56xf32>
    tpu.vector_store %arg28[%c0_213, %c0_214], %262 {strides = array<i32>} : memref<256x112xf32, #tpu.memory_space<vmem>>, vector<16x56xf32>,
    %264 = vector.extract_strided_slice %261 {offsets = [0, 71], sizes = [16, 56], strides = [1, 1]} : vector<16x142xf32> to vector<16x56xf32>
    %c0_215 = arith.constant 0 : index
    %c56_216 = arith.constant 56 : index
    %265 = vector.load %arg28[%c0_215, %c56_216] : memref<256x112xf32, #tpu.memory_space<vmem>>, vector<16x56xf32>
    tpu.vector_store %arg28[%c0_215, %c56_216], %264 {strides = array<i32>} : memref<256x112xf32, #tpu.memory_space<vmem>>, vector<16x56xf32>,
    %266 = vector.extract_strided_slice %261 {offsets = [0, 1], sizes = [16, 56], strides = [1, 1]} : vector<16x142xf32> to vector<16x56xf32>
    %c16_217 = arith.constant 16 : index
    %c0_218 = arith.constant 0 : index
    %267 = vector.load %arg28[%c16_217, %c0_218] : memref<256x112xf32, #tpu.memory_space<vmem>>, vector<16x56xf32>
    tpu.vector_store %arg28[%c16_217, %c0_218], %266 {strides = array<i32>} : memref<256x112xf32, #tpu.memory_space<vmem>>, vector<16x56xf32>,
    %268 = vector.extract_strided_slice %261 {offsets = [0, 72], sizes = [16, 56], strides = [1, 1]} : vector<16x142xf32> to vector<16x56xf32>
    %c16_219 = arith.constant 16 : index
    %c56_220 = arith.constant 56 : index
    %269 = vector.load %arg28[%c16_219, %c56_220] : memref<256x112xf32, #tpu.memory_space<vmem>>, vector<16x56xf32>
    tpu.vector_store %arg28[%c16_219, %c56_220], %268 {strides = array<i32>} : memref<256x112xf32, #tpu.memory_space<vmem>>, vector<16x56xf32>,
    %270 = vector.extract_strided_slice %261 {offsets = [0, 2], sizes = [16, 56], strides = [1, 1]} : vector<16x142xf32> to vector<16x56xf32>
    %c32_221 = arith.constant 32 : index
    %c0_222 = arith.constant 0 : index
    %271 = vector.load %arg28[%c32_221, %c0_222] : memref<256x112xf32, #tpu.memory_space<vmem>>, vector<16x56xf32>
    tpu.vector_store %arg28[%c32_221, %c0_222], %270 {strides = array<i32>} : memref<256x112xf32, #tpu.memory_space<vmem>>, vector<16x56xf32>,
    %272 = vector.extract_strided_slice %261 {offsets = [0, 73], sizes = [16, 56], strides = [1, 1]} : vector<16x142xf32> to vector<16x56xf32>
    %c32_223 = arith.constant 32 : index
    %c56_224 = arith.constant 56 : index
    %273 = vector.load %arg28[%c32_223, %c56_224] : memref<256x112xf32, #tpu.memory_space<vmem>>, vector<16x56xf32>
    tpu.vector_store %arg28[%c32_223, %c56_224], %272 {strides = array<i32>} : memref<256x112xf32, #tpu.memory_space<vmem>>, vector<16x56xf32>,
    %274 = vector.extract_strided_slice %261 {offsets = [0, 3], sizes = [16, 56], strides = [1, 1]} : vector<16x142xf32> to vector<16x56xf32>
    %c48_225 = arith.constant 48 : index
    %c0_226 = arith.constant 0 : index
    %275 = vector.load %arg28[%c48_225, %c0_226] : memref<256x112xf32, #tpu.memory_space<vmem>>, vector<16x56xf32>
    tpu.vector_store %arg28[%c48_225, %c0_226], %274 {strides = array<i32>} : memref<256x112xf32, #tpu.memory_space<vmem>>, vector<16x56xf32>,
    %276 = vector.extract_strided_slice %261 {offsets = [0, 74], sizes = [16, 56], strides = [1, 1]} : vector<16x142xf32> to vector<16x56xf32>
    %c48_227 = arith.constant 48 : index
    %c56_228 = arith.constant 56 : index
    %277 = vector.load %arg28[%c48_227, %c56_228] : memref<256x112xf32, #tpu.memory_space<vmem>>, vector<16x56xf32>
    tpu.vector_store %arg28[%c48_227, %c56_228], %276 {strides = array<i32>} : memref<256x112xf32, #tpu.memory_space<vmem>>, vector<16x56xf32>,
    %278 = vector.extract_strided_slice %261 {offsets = [0, 4], sizes = [16, 56], strides = [1, 1]} : vector<16x142xf32> to vector<16x56xf32>
    %c64_229 = arith.constant 64 : index
    %c0_230 = arith.constant 0 : index
    %279 = vector.load %arg28[%c64_229, %c0_230] : memref<256x112xf32, #tpu.memory_space<vmem>>, vector<16x56xf32>
    tpu.vector_store %arg28[%c64_229, %c0_230], %278 {strides = array<i32>} : memref<256x112xf32, #tpu.memory_space<vmem>>, vector<16x56xf32>,
    %280 = vector.extract_strided_slice %261 {offsets = [0, 75], sizes = [16, 56], strides = [1, 1]} : vector<16x142xf32> to vector<16x56xf32>
    %c64_231 = arith.constant 64 : index
    %c56_232 = arith.constant 56 : index
    %281 = vector.load %arg28[%c64_231, %c56_232] : memref<256x112xf32, #tpu.memory_space<vmem>>, vector<16x56xf32>
    tpu.vector_store %arg28[%c64_231, %c56_232], %280 {strides = array<i32>} : memref<256x112xf32, #tpu.memory_space<vmem>>, vector<16x56xf32>,
    %282 = vector.extract_strided_slice %261 {offsets = [0, 5], sizes = [16, 56], strides = [1, 1]} : vector<16x142xf32> to vector<16x56xf32>
    %c80_233 = arith.constant 80 : index
    %c0_234 = arith.constant 0 : index
    %283 = vector.load %arg28[%c80_233, %c0_234] : memref<256x112xf32, #tpu.memory_space<vmem>>, vector<16x56xf32>
    tpu.vector_store %arg28[%c80_233, %c0_234], %282 {strides = array<i32>} : memref<256x112xf32, #tpu.memory_space<vmem>>, vector<16x56xf32>,
    %284 = vector.extract_strided_slice %261 {offsets = [0, 76], sizes = [16, 56], strides = [1, 1]} : vector<16x142xf32> to vector<16x56xf32>
    %c80_235 = arith.constant 80 : index
    %c56_236 = arith.constant 56 : index
    %285 = vector.load %arg28[%c80_235, %c56_236] : memref<256x112xf32, #tpu.memory_space<vmem>>, vector<16x56xf32>
    tpu.vector_store %arg28[%c80_235, %c56_236], %284 {strides = array<i32>} : memref<256x112xf32, #tpu.memory_space<vmem>>, vector<16x56xf32>,
    %286 = vector.extract_strided_slice %261 {offsets = [0, 6], sizes = [16, 56], strides = [1, 1]} : vector<16x142xf32> to vector<16x56xf32>
    %c96_237 = arith.constant 96 : index
    %c0_238 = arith.constant 0 : index
    %287 = vector.load %arg28[%c96_237, %c0_238] : memref<256x112xf32, #tpu.memory_space<vmem>>, vector<16x56xf32>
    tpu.vector_store %arg28[%c96_237, %c0_238], %286 {strides = array<i32>} : memref<256x112xf32, #tpu.memory_space<vmem>>, vector<16x56xf32>,
    %288 = vector.extract_strided_slice %261 {offsets = [0, 77], sizes = [16, 56], strides = [1, 1]} : vector<16x142xf32> to vector<16x56xf32>
    %c96_239 = arith.constant 96 : index
    %c56_240 = arith.constant 56 : index
    %289 = vector.load %arg28[%c96_239, %c56_240] : memref<256x112xf32, #tpu.memory_space<vmem>>, vector<16x56xf32>
    tpu.vector_store %arg28[%c96_239, %c56_240], %288 {strides = array<i32>} : memref<256x112xf32, #tpu.memory_space<vmem>>, vector<16x56xf32>,
    %290 = vector.extract_strided_slice %261 {offsets = [0, 7], sizes = [16, 56], strides = [1, 1]} : vector<16x142xf32> to vector<16x56xf32>
    %c112_241 = arith.constant 112 : index
    %c0_242 = arith.constant 0 : index
    %291 = vector.load %arg28[%c112_241, %c0_242] : memref<256x112xf32, #tpu.memory_space<vmem>>, vector<16x56xf32>
    tpu.vector_store %arg28[%c112_241, %c0_242], %290 {strides = array<i32>} : memref<256x112xf32, #tpu.memory_space<vmem>>, vector<16x56xf32>,
    %292 = vector.extract_strided_slice %261 {offsets = [0, 78], sizes = [16, 56], strides = [1, 1]} : vector<16x142xf32> to vector<16x56xf32>
    %c112_243 = arith.constant 112 : index
    %c56_244 = arith.constant 56 : index
    %293 = vector.load %arg28[%c112_243, %c56_244] : memref<256x112xf32, #tpu.memory_space<vmem>>, vector<16x56xf32>
    tpu.vector_store %arg28[%c112_243, %c56_244], %292 {strides = array<i32>} : memref<256x112xf32, #tpu.memory_space<vmem>>, vector<16x56xf32>,
    %294 = vector.extract_strided_slice %261 {offsets = [0, 8], sizes = [16, 56], strides = [1, 1]} : vector<16x142xf32> to vector<16x56xf32>
    %c128_245 = arith.constant 128 : index
    %c0_246 = arith.constant 0 : index
    %295 = vector.load %arg28[%c128_245, %c0_246] : memref<256x112xf32, #tpu.memory_space<vmem>>, vector<16x56xf32>
    tpu.vector_store %arg28[%c128_245, %c0_246], %294 {strides = array<i32>} : memref<256x112xf32, #tpu.memory_space<vmem>>, vector<16x56xf32>,
    %296 = vector.extract_strided_slice %261 {offsets = [0, 79], sizes = [16, 56], strides = [1, 1]} : vector<16x142xf32> to vector<16x56xf32>
    %c128_247 = arith.constant 128 : index
    %c56_248 = arith.constant 56 : index
    %297 = vector.load %arg28[%c128_247, %c56_248] : memref<256x112xf32, #tpu.memory_space<vmem>>, vector<16x56xf32>
    tpu.vector_store %arg28[%c128_247, %c56_248], %296 {strides = array<i32>} : memref<256x112xf32, #tpu.memory_space<vmem>>, vector<16x56xf32>,
    %298 = vector.extract_strided_slice %261 {offsets = [0, 9], sizes = [16, 56], strides = [1, 1]} : vector<16x142xf32> to vector<16x56xf32>
    %c144_249 = arith.constant 144 : index
    %c0_250 = arith.constant 0 : index
    %299 = vector.load %arg28[%c144_249, %c0_250] : memref<256x112xf32, #tpu.memory_space<vmem>>, vector<16x56xf32>
    tpu.vector_store %arg28[%c144_249, %c0_250], %298 {strides = array<i32>} : memref<256x112xf32, #tpu.memory_space<vmem>>, vector<16x56xf32>,
    %300 = vector.extract_strided_slice %261 {offsets = [0, 80], sizes = [16, 56], strides = [1, 1]} : vector<16x142xf32> to vector<16x56xf32>
    %c144_251 = arith.constant 144 : index
    %c56_252 = arith.constant 56 : index
    %301 = vector.load %arg28[%c144_251, %c56_252] : memref<256x112xf32, #tpu.memory_space<vmem>>, vector<16x56xf32>
    tpu.vector_store %arg28[%c144_251, %c56_252], %300 {strides = array<i32>} : memref<256x112xf32, #tpu.memory_space<vmem>>, vector<16x56xf32>,
    %302 = vector.extract_strided_slice %261 {offsets = [0, 10], sizes = [16, 56], strides = [1, 1]} : vector<16x142xf32> to vector<16x56xf32>
    %c160_253 = arith.constant 160 : index
    %c0_254 = arith.constant 0 : index
    %303 = vector.load %arg28[%c160_253, %c0_254] : memref<256x112xf32, #tpu.memory_space<vmem>>, vector<16x56xf32>
    tpu.vector_store %arg28[%c160_253, %c0_254], %302 {strides = array<i32>} : memref<256x112xf32, #tpu.memory_space<vmem>>, vector<16x56xf32>,
    %304 = vector.extract_strided_slice %261 {offsets = [0, 81], sizes = [16, 56], strides = [1, 1]} : vector<16x142xf32> to vector<16x56xf32>
    %c160_255 = arith.constant 160 : index
    %c56_256 = arith.constant 56 : index
    %305 = vector.load %arg28[%c160_255, %c56_256] : memref<256x112xf32, #tpu.memory_space<vmem>>, vector<16x56xf32>
    tpu.vector_store %arg28[%c160_255, %c56_256], %304 {strides = array<i32>} : memref<256x112xf32, #tpu.memory_space<vmem>>, vector<16x56xf32>,
    %306 = vector.extract_strided_slice %261 {offsets = [0, 11], sizes = [16, 56], strides = [1, 1]} : vector<16x142xf32> to vector<16x56xf32>
    %c176_257 = arith.constant 176 : index
    %c0_258 = arith.constant 0 : index
    %307 = vector.load %arg28[%c176_257, %c0_258] : memref<256x112xf32, #tpu.memory_space<vmem>>, vector<16x56xf32>
    tpu.vector_store %arg28[%c176_257, %c0_258], %306 {strides = array<i32>} : memref<256x112xf32, #tpu.memory_space<vmem>>, vector<16x56xf32>,
    %308 = vector.extract_strided_slice %261 {offsets = [0, 82], sizes = [16, 56], strides = [1, 1]} : vector<16x142xf32> to vector<16x56xf32>
    %c176_259 = arith.constant 176 : index
    %c56_260 = arith.constant 56 : index
    %309 = vector.load %arg28[%c176_259, %c56_260] : memref<256x112xf32, #tpu.memory_space<vmem>>, vector<16x56xf32>
    tpu.vector_store %arg28[%c176_259, %c56_260], %308 {strides = array<i32>} : memref<256x112xf32, #tpu.memory_space<vmem>>, vector<16x56xf32>,
    %310 = vector.extract_strided_slice %261 {offsets = [0, 12], sizes = [16, 56], strides = [1, 1]} : vector<16x142xf32> to vector<16x56xf32>
    %c192_261 = arith.constant 192 : index
    %c0_262 = arith.constant 0 : index
    %311 = vector.load %arg28[%c192_261, %c0_262] : memref<256x112xf32, #tpu.memory_space<vmem>>, vector<16x56xf32>
    tpu.vector_store %arg28[%c192_261, %c0_262], %310 {strides = array<i32>} : memref<256x112xf32, #tpu.memory_space<vmem>>, vector<16x56xf32>,
    %312 = vector.extract_strided_slice %261 {offsets = [0, 83], sizes = [16, 56], strides = [1, 1]} : vector<16x142xf32> to vector<16x56xf32>
    %c192_263 = arith.constant 192 : index
    %c56_264 = arith.constant 56 : index
    %313 = vector.load %arg28[%c192_263, %c56_264] : memref<256x112xf32, #tpu.memory_space<vmem>>, vector<16x56xf32>
    tpu.vector_store %arg28[%c192_263, %c56_264], %312 {strides = array<i32>} : memref<256x112xf32, #tpu.memory_space<vmem>>, vector<16x56xf32>,
    %314 = vector.extract_strided_slice %261 {offsets = [0, 13], sizes = [16, 56], strides = [1, 1]} : vector<16x142xf32> to vector<16x56xf32>
    %c208_265 = arith.constant 208 : index
    %c0_266 = arith.constant 0 : index
    %315 = vector.load %arg28[%c208_265, %c0_266] : memref<256x112xf32, #tpu.memory_space<vmem>>, vector<16x56xf32>
    tpu.vector_store %arg28[%c208_265, %c0_266], %314 {strides = array<i32>} : memref<256x112xf32, #tpu.memory_space<vmem>>, vector<16x56xf32>,
    %316 = vector.extract_strided_slice %261 {offsets = [0, 84], sizes = [16, 56], strides = [1, 1]} : vector<16x142xf32> to vector<16x56xf32>
    %c208_267 = arith.constant 208 : index
    %c56_268 = arith.constant 56 : index
    %317 = vector.load %arg28[%c208_267, %c56_268] : memref<256x112xf32, #tpu.memory_space<vmem>>, vector<16x56xf32>
    tpu.vector_store %arg28[%c208_267, %c56_268], %316 {strides = array<i32>} : memref<256x112xf32, #tpu.memory_space<vmem>>, vector<16x56xf32>,
    %318 = vector.extract_strided_slice %261 {offsets = [0, 14], sizes = [16, 56], strides = [1, 1]} : vector<16x142xf32> to vector<16x56xf32>
    %c224_269 = arith.constant 224 : index
    %c0_270 = arith.constant 0 : index
    %319 = vector.load %arg28[%c224_269, %c0_270] : memref<256x112xf32, #tpu.memory_space<vmem>>, vector<16x56xf32>
    tpu.vector_store %arg28[%c224_269, %c0_270], %318 {strides = array<i32>} : memref<256x112xf32, #tpu.memory_space<vmem>>, vector<16x56xf32>,
    %320 = vector.extract_strided_slice %261 {offsets = [0, 85], sizes = [16, 56], strides = [1, 1]} : vector<16x142xf32> to vector<16x56xf32>
    %c224_271 = arith.constant 224 : index
    %c56_272 = arith.constant 56 : index
    %321 = vector.load %arg28[%c224_271, %c56_272] : memref<256x112xf32, #tpu.memory_space<vmem>>, vector<16x56xf32>
    tpu.vector_store %arg28[%c224_271, %c56_272], %320 {strides = array<i32>} : memref<256x112xf32, #tpu.memory_space<vmem>>, vector<16x56xf32>,
    %322 = vector.extract_strided_slice %261 {offsets = [0, 15], sizes = [16, 56], strides = [1, 1]} : vector<16x142xf32> to vector<16x56xf32>
    %c240_273 = arith.constant 240 : index
    %c0_274 = arith.constant 0 : index
    %323 = vector.load %arg28[%c240_273, %c0_274] : memref<256x112xf32, #tpu.memory_space<vmem>>, vector<16x56xf32>
    tpu.vector_store %arg28[%c240_273, %c0_274], %322 {strides = array<i32>} : memref<256x112xf32, #tpu.memory_space<vmem>>, vector<16x56xf32>,
    %324 = vector.extract_strided_slice %261 {offsets = [0, 86], sizes = [16, 56], strides = [1, 1]} : vector<16x142xf32> to vector<16x56xf32>
    %c240_275 = arith.constant 240 : index
    %c56_276 = arith.constant 56 : index
    %325 = vector.load %arg28[%c240_275, %c56_276] : memref<256x112xf32, #tpu.memory_space<vmem>>, vector<16x56xf32>
    tpu.vector_store %arg28[%c240_275, %c56_276], %324 {strides = array<i32>} : memref<256x112xf32, #tpu.memory_space<vmem>>, vector<16x56xf32>,
    %c0_277 = arith.constant 0 : index
    %c0_278 = arith.constant 0 : index
    %326 = vector.load %arg7[%c0_277, %c0_278] : memref<32x256xf32, #tpu.memory_space<vmem>>, vector<32x256xf32>
    %c0_279 = arith.constant 0 : index
    %c0_280 = arith.constant 0 : index
    %327 = vector.load %arg28[%c0_279, %c0_280] : memref<256x112xf32, #tpu.memory_space<vmem>>, vector<256x112xf32>
    %cst_281 = arith.constant dense<0.000000e+00> : vector<32x112xf32>
    %328 = tpu.matmul %326, %327, %cst_281 {dimension_numbers = #tpu.dot_dimension_numbers<[1], [0], [0], [1], [0, 0, 1, 1], [], []>} : vector<32x256xf32>, vector<256x112xf32>, vector<32x112xf32> -> vector<32x112xf32>
    %c0_282 = arith.constant 0 : index
    %c0_283 = arith.constant 0 : index
    %329 = vector.load %arg8[%c0_282, %c0_283] : memref<32x1xf32, #tpu.memory_space<vmem>>, vector<32x1xf32>
    %330 = vector.broadcast %329 : vector<32x1xf32> to vector<32x112xf32>
    %331 = arith.mulf %328, %330 : vector<32x112xf32>
    %c0_284 = arith.constant 0 : index
    %c0_285 = arith.constant 0 : index
    %332 = vector.load %arg9[%c0_284, %c0_285] : memref<32x1xf32, #tpu.memory_space<vmem>>, vector<32x1xf32>
    %333 = vector.broadcast %332 : vector<32x1xf32> to vector<32x112xf32>
    %334 = arith.addf %331, %333 : vector<32x112xf32>
    %cst_286 = arith.constant 0.000000e+00 : f32
    %335 = vector.broadcast %cst_286 : f32 to vector<32x112xf32>
    %336 = arith.maximumf %334, %335 : vector<32x112xf32>
    %337 = tpu.iota {dimensions = array<i32: 0>} : vector<52x18xi32>
    %338 = tpu.iota {dimensions = array<i32: 1>} : vector<52x18xi32>
    %c3_i32_287 = arith.constant 3 : i32
    %339 = vector.broadcast %c3_i32_287 : i32 to vector<52x18xi32>
    %340 = arith.muli %339, %338 : vector<52x18xi32>
    %341 = arith.cmpi eq, %337, %340 : vector<52x18xi32>
    %342 = arith.extui %341 : vector<52x18xi1> to vector<52x18xi32>
    %343 = arith.sitofp %342 : vector<52x18xi32> to vector<52x18xf32>
    %344 = vector.extract_strided_slice %336 {offsets = [0, 0], sizes = [32, 56], strides = [1, 1]} : vector<32x112xf32> to vector<32x56xf32>
    %345 = vector.extract_strided_slice %344 {offsets = [0, 0], sizes = [32, 52], strides = [1, 1]} : vector<32x56xf32> to vector<32x52xf32>
    %346 = vector.extract_strided_slice %344 {offsets = [0, 1], sizes = [32, 52], strides = [1, 1]} : vector<32x56xf32> to vector<32x52xf32>
    %347 = arith.maximumf %345, %346 : vector<32x52xf32>
    %348 = vector.extract_strided_slice %344 {offsets = [0, 2], sizes = [32, 52], strides = [1, 1]} : vector<32x56xf32> to vector<32x52xf32>
    %349 = arith.maximumf %347, %348 : vector<32x52xf32>
    %cst_288 = arith.constant dense<0.000000e+00> : vector<32x18xf32>
    %350 = tpu.matmul %349, %343, %cst_288 {dimension_numbers = #tpu.dot_dimension_numbers<[1], [0], [0], [1], [0, 0, 1, 1], [], []>} : vector<32x52xf32>, vector<52x18xf32>, vector<32x18xf32> -> vector<32x18xf32>
    %351 = vector.extract_strided_slice %336 {offsets = [0, 56], sizes = [32, 56], strides = [1, 1]} : vector<32x112xf32> to vector<32x56xf32>
    %352 = vector.extract_strided_slice %351 {offsets = [0, 0], sizes = [32, 52], strides = [1, 1]} : vector<32x56xf32> to vector<32x52xf32>
    %353 = vector.extract_strided_slice %351 {offsets = [0, 1], sizes = [32, 52], strides = [1, 1]} : vector<32x56xf32> to vector<32x52xf32>
    %354 = arith.maximumf %352, %353 : vector<32x52xf32>
    %355 = vector.extract_strided_slice %351 {offsets = [0, 2], sizes = [32, 52], strides = [1, 1]} : vector<32x56xf32> to vector<32x52xf32>
    %356 = arith.maximumf %354, %355 : vector<32x52xf32>
    %cst_289 = arith.constant dense<0.000000e+00> : vector<32x18xf32>
    %357 = tpu.matmul %356, %343, %cst_289 {dimension_numbers = #tpu.dot_dimension_numbers<[1], [0], [0], [1], [0, 0, 1, 1], [], []>} : vector<32x52xf32>, vector<52x18xf32>, vector<32x18xf32> -> vector<32x18xf32>
    %358 = tpu.concatenate %350, %357 in 1 : vector<32x18xf32>, vector<32x18xf32> -> vector<32x36xf32>
    %359 = vector.extract_strided_slice %358 {offsets = [0, 0], sizes = [32, 11], strides = [1, 1]} : vector<32x36xf32> to vector<32x11xf32>
    %c0_290 = arith.constant 0 : index
    %c0_291 = arith.constant 0 : index
    %360 = vector.load %arg29[%c0_290, %c0_291] : memref<256x22xf32, #tpu.memory_space<vmem>>, vector<32x11xf32>
    tpu.vector_store %arg29[%c0_290, %c0_291], %359 {strides = array<i32>} : memref<256x22xf32, #tpu.memory_space<vmem>>, vector<32x11xf32>,
    %361 = vector.extract_strided_slice %358 {offsets = [0, 18], sizes = [32, 11], strides = [1, 1]} : vector<32x36xf32> to vector<32x11xf32>
    %c0_292 = arith.constant 0 : index
    %c11 = arith.constant 11 : index
    %362 = vector.load %arg29[%c0_292, %c11] : memref<256x22xf32, #tpu.memory_space<vmem>>, vector<32x11xf32>
    tpu.vector_store %arg29[%c0_292, %c11], %361 {strides = array<i32>} : memref<256x22xf32, #tpu.memory_space<vmem>>, vector<32x11xf32>,
    %363 = vector.extract_strided_slice %358 {offsets = [0, 1], sizes = [32, 11], strides = [1, 1]} : vector<32x36xf32> to vector<32x11xf32>
    %c32_293 = arith.constant 32 : index
    %c0_294 = arith.constant 0 : index
    %364 = vector.load %arg29[%c32_293, %c0_294] : memref<256x22xf32, #tpu.memory_space<vmem>>, vector<32x11xf32>
    tpu.vector_store %arg29[%c32_293, %c0_294], %363 {strides = array<i32>} : memref<256x22xf32, #tpu.memory_space<vmem>>, vector<32x11xf32>,
    %365 = vector.extract_strided_slice %358 {offsets = [0, 19], sizes = [32, 11], strides = [1, 1]} : vector<32x36xf32> to vector<32x11xf32>
    %c32_295 = arith.constant 32 : index
    %c11_296 = arith.constant 11 : index
    %366 = vector.load %arg29[%c32_295, %c11_296] : memref<256x22xf32, #tpu.memory_space<vmem>>, vector<32x11xf32>
    tpu.vector_store %arg29[%c32_295, %c11_296], %365 {strides = array<i32>} : memref<256x22xf32, #tpu.memory_space<vmem>>, vector<32x11xf32>,
    %367 = vector.extract_strided_slice %358 {offsets = [0, 2], sizes = [32, 11], strides = [1, 1]} : vector<32x36xf32> to vector<32x11xf32>
    %c64_297 = arith.constant 64 : index
    %c0_298 = arith.constant 0 : index
    %368 = vector.load %arg29[%c64_297, %c0_298] : memref<256x22xf32, #tpu.memory_space<vmem>>, vector<32x11xf32>
    tpu.vector_store %arg29[%c64_297, %c0_298], %367 {strides = array<i32>} : memref<256x22xf32, #tpu.memory_space<vmem>>, vector<32x11xf32>,
    %369 = vector.extract_strided_slice %358 {offsets = [0, 20], sizes = [32, 11], strides = [1, 1]} : vector<32x36xf32> to vector<32x11xf32>
    %c64_299 = arith.constant 64 : index
    %c11_300 = arith.constant 11 : index
    %370 = vector.load %arg29[%c64_299, %c11_300] : memref<256x22xf32, #tpu.memory_space<vmem>>, vector<32x11xf32>
    tpu.vector_store %arg29[%c64_299, %c11_300], %369 {strides = array<i32>} : memref<256x22xf32, #tpu.memory_space<vmem>>, vector<32x11xf32>,
    %371 = vector.extract_strided_slice %358 {offsets = [0, 3], sizes = [32, 11], strides = [1, 1]} : vector<32x36xf32> to vector<32x11xf32>
    %c96_301 = arith.constant 96 : index
    %c0_302 = arith.constant 0 : index
    %372 = vector.load %arg29[%c96_301, %c0_302] : memref<256x22xf32, #tpu.memory_space<vmem>>, vector<32x11xf32>
    tpu.vector_store %arg29[%c96_301, %c0_302], %371 {strides = array<i32>} : memref<256x22xf32, #tpu.memory_space<vmem>>, vector<32x11xf32>,
    %373 = vector.extract_strided_slice %358 {offsets = [0, 21], sizes = [32, 11], strides = [1, 1]} : vector<32x36xf32> to vector<32x11xf32>
    %c96_303 = arith.constant 96 : index
    %c11_304 = arith.constant 11 : index
    %374 = vector.load %arg29[%c96_303, %c11_304] : memref<256x22xf32, #tpu.memory_space<vmem>>, vector<32x11xf32>
    tpu.vector_store %arg29[%c96_303, %c11_304], %373 {strides = array<i32>} : memref<256x22xf32, #tpu.memory_space<vmem>>, vector<32x11xf32>,
    %375 = vector.extract_strided_slice %358 {offsets = [0, 4], sizes = [32, 11], strides = [1, 1]} : vector<32x36xf32> to vector<32x11xf32>
    %c128_305 = arith.constant 128 : index
    %c0_306 = arith.constant 0 : index
    %376 = vector.load %arg29[%c128_305, %c0_306] : memref<256x22xf32, #tpu.memory_space<vmem>>, vector<32x11xf32>
    tpu.vector_store %arg29[%c128_305, %c0_306], %375 {strides = array<i32>} : memref<256x22xf32, #tpu.memory_space<vmem>>, vector<32x11xf32>,
    %377 = vector.extract_strided_slice %358 {offsets = [0, 22], sizes = [32, 11], strides = [1, 1]} : vector<32x36xf32> to vector<32x11xf32>
    %c128_307 = arith.constant 128 : index
    %c11_308 = arith.constant 11 : index
    %378 = vector.load %arg29[%c128_307, %c11_308] : memref<256x22xf32, #tpu.memory_space<vmem>>, vector<32x11xf32>
    tpu.vector_store %arg29[%c128_307, %c11_308], %377 {strides = array<i32>} : memref<256x22xf32, #tpu.memory_space<vmem>>, vector<32x11xf32>,
    %379 = vector.extract_strided_slice %358 {offsets = [0, 5], sizes = [32, 11], strides = [1, 1]} : vector<32x36xf32> to vector<32x11xf32>
    %c160_309 = arith.constant 160 : index
    %c0_310 = arith.constant 0 : index
    %380 = vector.load %arg29[%c160_309, %c0_310] : memref<256x22xf32, #tpu.memory_space<vmem>>, vector<32x11xf32>
    tpu.vector_store %arg29[%c160_309, %c0_310], %379 {strides = array<i32>} : memref<256x22xf32, #tpu.memory_space<vmem>>, vector<32x11xf32>,
    %381 = vector.extract_strided_slice %358 {offsets = [0, 23], sizes = [32, 11], strides = [1, 1]} : vector<32x36xf32> to vector<32x11xf32>
    %c160_311 = arith.constant 160 : index
    %c11_312 = arith.constant 11 : index
    %382 = vector.load %arg29[%c160_311, %c11_312] : memref<256x22xf32, #tpu.memory_space<vmem>>, vector<32x11xf32>
    tpu.vector_store %arg29[%c160_311, %c11_312], %381 {strides = array<i32>} : memref<256x22xf32, #tpu.memory_space<vmem>>, vector<32x11xf32>,
    %383 = vector.extract_strided_slice %358 {offsets = [0, 6], sizes = [32, 11], strides = [1, 1]} : vector<32x36xf32> to vector<32x11xf32>
    %c192_313 = arith.constant 192 : index
    %c0_314 = arith.constant 0 : index
    %384 = vector.load %arg29[%c192_313, %c0_314] : memref<256x22xf32, #tpu.memory_space<vmem>>, vector<32x11xf32>
    tpu.vector_store %arg29[%c192_313, %c0_314], %383 {strides = array<i32>} : memref<256x22xf32, #tpu.memory_space<vmem>>, vector<32x11xf32>,
    %385 = vector.extract_strided_slice %358 {offsets = [0, 24], sizes = [32, 11], strides = [1, 1]} : vector<32x36xf32> to vector<32x11xf32>
    %c192_315 = arith.constant 192 : index
    %c11_316 = arith.constant 11 : index
    %386 = vector.load %arg29[%c192_315, %c11_316] : memref<256x22xf32, #tpu.memory_space<vmem>>, vector<32x11xf32>
    tpu.vector_store %arg29[%c192_315, %c11_316], %385 {strides = array<i32>} : memref<256x22xf32, #tpu.memory_space<vmem>>, vector<32x11xf32>,
    %387 = vector.extract_strided_slice %358 {offsets = [0, 7], sizes = [32, 11], strides = [1, 1]} : vector<32x36xf32> to vector<32x11xf32>
    %c224_317 = arith.constant 224 : index
    %c0_318 = arith.constant 0 : index
    %388 = vector.load %arg29[%c224_317, %c0_318] : memref<256x22xf32, #tpu.memory_space<vmem>>, vector<32x11xf32>
    tpu.vector_store %arg29[%c224_317, %c0_318], %387 {strides = array<i32>} : memref<256x22xf32, #tpu.memory_space<vmem>>, vector<32x11xf32>,
    %389 = vector.extract_strided_slice %358 {offsets = [0, 25], sizes = [32, 11], strides = [1, 1]} : vector<32x36xf32> to vector<32x11xf32>
    %c224_319 = arith.constant 224 : index
    %c11_320 = arith.constant 11 : index
    %390 = vector.load %arg29[%c224_319, %c11_320] : memref<256x22xf32, #tpu.memory_space<vmem>>, vector<32x11xf32>
    tpu.vector_store %arg29[%c224_319, %c11_320], %389 {strides = array<i32>} : memref<256x22xf32, #tpu.memory_space<vmem>>, vector<32x11xf32>,
    %c0_321 = arith.constant 0 : index
    %c0_322 = arith.constant 0 : index
    %391 = vector.load %arg10[%c0_321, %c0_322] : memref<64x256xf32, #tpu.memory_space<vmem>>, vector<64x256xf32>
    %c0_323 = arith.constant 0 : index
    %c0_324 = arith.constant 0 : index
    %392 = vector.load %arg29[%c0_323, %c0_324] : memref<256x22xf32, #tpu.memory_space<vmem>>, vector<256x22xf32>
    %cst_325 = arith.constant dense<0.000000e+00> : vector<64x22xf32>
    %393 = tpu.matmul %391, %392, %cst_325 {dimension_numbers = #tpu.dot_dimension_numbers<[1], [0], [0], [1], [0, 0, 1, 1], [], []>} : vector<64x256xf32>, vector<256x22xf32>, vector<64x22xf32> -> vector<64x22xf32>
    %c0_326 = arith.constant 0 : index
    %c0_327 = arith.constant 0 : index
    %394 = vector.load %arg11[%c0_326, %c0_327] : memref<64x1xf32, #tpu.memory_space<vmem>>, vector<64x1xf32>
    %395 = vector.broadcast %394 : vector<64x1xf32> to vector<64x22xf32>
    %396 = arith.mulf %393, %395 : vector<64x22xf32>
    %c0_328 = arith.constant 0 : index
    %c0_329 = arith.constant 0 : index
    %397 = vector.load %arg12[%c0_328, %c0_329] : memref<64x1xf32, #tpu.memory_space<vmem>>, vector<64x1xf32>
    %398 = vector.broadcast %397 : vector<64x1xf32> to vector<64x22xf32>
    %399 = arith.addf %396, %398 : vector<64x22xf32>
    %cst_330 = arith.constant 0.000000e+00 : f32
    %400 = vector.broadcast %cst_330 : f32 to vector<64x22xf32>
    %401 = arith.maximumf %399, %400 : vector<64x22xf32>
    %402 = tpu.iota {dimensions = array<i32: 0>} : vector<7x3xi32>
    %403 = tpu.iota {dimensions = array<i32: 1>} : vector<7x3xi32>
    %c3_i32_331 = arith.constant 3 : i32
    %404 = vector.broadcast %c3_i32_331 : i32 to vector<7x3xi32>
    %405 = arith.muli %404, %403 : vector<7x3xi32>
    %406 = arith.cmpi eq, %402, %405 : vector<7x3xi32>
    %407 = arith.extui %406 : vector<7x3xi1> to vector<7x3xi32>
    %408 = arith.sitofp %407 : vector<7x3xi32> to vector<7x3xf32>
    %409 = vector.extract_strided_slice %401 {offsets = [0, 0], sizes = [64, 11], strides = [1, 1]} : vector<64x22xf32> to vector<64x11xf32>
    %410 = vector.extract_strided_slice %409 {offsets = [0, 0], sizes = [64, 7], strides = [1, 1]} : vector<64x11xf32> to vector<64x7xf32>
    %411 = vector.extract_strided_slice %409 {offsets = [0, 1], sizes = [64, 7], strides = [1, 1]} : vector<64x11xf32> to vector<64x7xf32>
    %412 = arith.maximumf %410, %411 : vector<64x7xf32>
    %413 = vector.extract_strided_slice %409 {offsets = [0, 2], sizes = [64, 7], strides = [1, 1]} : vector<64x11xf32> to vector<64x7xf32>
    %414 = arith.maximumf %412, %413 : vector<64x7xf32>
    %cst_332 = arith.constant dense<0.000000e+00> : vector<64x3xf32>
    %415 = tpu.matmul %414, %408, %cst_332 {dimension_numbers = #tpu.dot_dimension_numbers<[1], [0], [0], [1], [0, 0, 1, 1], [], []>} : vector<64x7xf32>, vector<7x3xf32>, vector<64x3xf32> -> vector<64x3xf32>
    %416 = vector.extract_strided_slice %401 {offsets = [0, 11], sizes = [64, 11], strides = [1, 1]} : vector<64x22xf32> to vector<64x11xf32>
    %417 = vector.extract_strided_slice %416 {offsets = [0, 0], sizes = [64, 7], strides = [1, 1]} : vector<64x11xf32> to vector<64x7xf32>
    %418 = vector.extract_strided_slice %416 {offsets = [0, 1], sizes = [64, 7], strides = [1, 1]} : vector<64x11xf32> to vector<64x7xf32>
    %419 = arith.maximumf %417, %418 : vector<64x7xf32>
    %420 = vector.extract_strided_slice %416 {offsets = [0, 2], sizes = [64, 7], strides = [1, 1]} : vector<64x11xf32> to vector<64x7xf32>
    %421 = arith.maximumf %419, %420 : vector<64x7xf32>
    %cst_333 = arith.constant dense<0.000000e+00> : vector<64x3xf32>
    %422 = tpu.matmul %421, %408, %cst_333 {dimension_numbers = #tpu.dot_dimension_numbers<[1], [0], [0], [1], [0, 0, 1, 1], [], []>} : vector<64x7xf32>, vector<7x3xf32>, vector<64x3xf32> -> vector<64x3xf32>
    %423 = tpu.concatenate %415, %422 in 1 : vector<64x3xf32>, vector<64x3xf32> -> vector<64x6xf32>
    %424 = arith.truncf %423 : vector<64x6xf32> to vector<64x6xbf16>
    %c0_334 = arith.constant 0 : index
    %c0_335 = arith.constant 0 : index
    %425 = vector.load %arg13[%c0_334, %c0_335] : memref<64x512xbf16, #tpu.memory_space<vmem>>, vector<64x512xbf16>
    %cst_336 = arith.constant dense<0.000000e+00> : vector<6x512xf32>
    %426 = tpu.matmul %424, %425, %cst_336 {dimension_numbers = #tpu.dot_dimension_numbers<[0], [0], [1], [1], [0, 1, 1, 1], [], []>} : vector<64x6xbf16>, vector<64x512xbf16>, vector<6x512xf32> -> vector<6x512xf32>
    %c0_337 = arith.constant 0 : index
    %c0_338 = arith.constant 0 : index
    %427 = vector.load %arg15[%c0_337, %c0_338] : memref<1x512xf32, #tpu.memory_space<vmem>>, vector<1x512xf32>
    %428 = vector.broadcast %427 : vector<1x512xf32> to vector<6x512xf32>
    %429 = arith.addf %426, %428 : vector<6x512xf32>
    %430 = vector.extract_strided_slice %429 {offsets = [0, 0], sizes = [1, 512], strides = [1, 1]} : vector<6x512xf32> to vector<1x512xf32>
    %431 = vector.extract_strided_slice %429 {offsets = [3, 0], sizes = [1, 512], strides = [1, 1]} : vector<6x512xf32> to vector<1x512xf32>
    %432 = vector.extract_strided_slice %429 {offsets = [1, 0], sizes = [1, 512], strides = [1, 1]} : vector<6x512xf32> to vector<1x512xf32>
    %433 = vector.extract_strided_slice %429 {offsets = [4, 0], sizes = [1, 512], strides = [1, 1]} : vector<6x512xf32> to vector<1x512xf32>
    %434 = vector.extract_strided_slice %429 {offsets = [2, 0], sizes = [1, 512], strides = [1, 1]} : vector<6x512xf32> to vector<1x512xf32>
    %435 = vector.extract_strided_slice %429 {offsets = [5, 0], sizes = [1, 512], strides = [1, 1]} : vector<6x512xf32> to vector<1x512xf32>
    %436 = tpu.concatenate %430, %431, %432, %433, %434, %435 in 0 : vector<1x512xf32>, vector<1x512xf32>, vector<1x512xf32>, vector<1x512xf32>, vector<1x512xf32>, vector<1x512xf32> -> vector<6x512xf32>
    %c0_339 = arith.constant 0 : index
    %c0_340 = arith.constant 0 : index
    %c0_341 = arith.constant 0 : index
    %437 = vector.load %arg18[%c0_339, %c0_340, %c0_341] : memref<1x2x128xf32, #tpu.memory_space<vmem>>, vector<1x2x128xf32>
    %438 = vector.shape_cast %437 : vector<1x2x128xf32> to vector<2x128xf32>
    %c0_342 = arith.constant 0 : index
    %c0_343 = arith.constant 0 : index
    %c0_344 = arith.constant 0 : index
    %439 = vector.load %arg19[%c0_342, %c0_343, %c0_344] : memref<1x2x128xf32, #tpu.memory_space<vmem>>, vector<1x2x128xf32>
    %440 = vector.shape_cast %439 : vector<1x2x128xf32> to vector<2x128xf32>
    %441 = arith.truncf %438 : vector<2x128xf32> to vector<2x128xbf16>
    %c0_345 = arith.constant 0 : index
    %c0_346 = arith.constant 0 : index
    %442 = vector.load %arg14[%c0_345, %c0_346] : memref<128x1024xbf16, #tpu.memory_space<vmem>>, vector<128x1024xbf16>
    %cst_347 = arith.constant dense<0.000000e+00> : vector<2x1024xf32>
    %443 = tpu.matmul %441, %442, %cst_347 {dimension_numbers = #tpu.dot_dimension_numbers<[1], [0], [0], [1], [0, 0, 1, 1], [], []>} : vector<2x128xbf16>, vector<128x1024xbf16>, vector<2x1024xf32> -> vector<2x1024xf32>
    %444 = vector.extract_strided_slice %436 {offsets = [0, 0], sizes = [2, 512], strides = [1, 1]} : vector<6x512xf32> to vector<2x512xf32>
    %445 = vector.extract_strided_slice %443 {offsets = [0, 0], sizes = [2, 512], strides = [1, 1]} : vector<2x1024xf32> to vector<2x512xf32>
    %446 = arith.addf %444, %445 : vector<2x512xf32>
    %447 = vector.extract_strided_slice %446 {offsets = [0, 0], sizes = [2, 128], strides = [1, 1]} : vector<2x512xf32> to vector<2x128xf32>
    %448 = arith.negf %447 : vector<2x128xf32>
    %449 = math.exp %448 : vector<2x128xf32>
    %cst_348 = arith.constant 1.000000e+00 : f32
    %450 = vector.broadcast %cst_348 : f32 to vector<2x128xf32>
    %451 = arith.addf %450, %449 : vector<2x128xf32>
    %452 = arith.divf %450, %451 : vector<2x128xf32>
    %453 = vector.extract_strided_slice %446 {offsets = [0, 128], sizes = [2, 128], strides = [1, 1]} : vector<2x512xf32> to vector<2x128xf32>
    %454 = arith.negf %453 : vector<2x128xf32>
    %455 = math.exp %454 : vector<2x128xf32>
    %cst_349 = arith.constant 1.000000e+00 : f32
    %456 = vector.broadcast %cst_349 : f32 to vector<2x128xf32>
    %457 = arith.addf %456, %455 : vector<2x128xf32>
    %458 = arith.divf %456, %457 : vector<2x128xf32>
    %459 = vector.extract_strided_slice %446 {offsets = [0, 256], sizes = [2, 128], strides = [1, 1]} : vector<2x512xf32> to vector<2x128xf32>
    %460 = math.tanh %459 : vector<2x128xf32>
    %461 = vector.extract_strided_slice %446 {offsets = [0, 384], sizes = [2, 128], strides = [1, 1]} : vector<2x512xf32> to vector<2x128xf32>
    %462 = arith.negf %461 : vector<2x128xf32>
    %463 = math.exp %462 : vector<2x128xf32>
    %cst_350 = arith.constant 1.000000e+00 : f32
    %464 = vector.broadcast %cst_350 : f32 to vector<2x128xf32>
    %465 = arith.addf %464, %463 : vector<2x128xf32>
    %466 = arith.divf %464, %465 : vector<2x128xf32>
    %467 = arith.mulf %458, %440 : vector<2x128xf32>
    %468 = arith.mulf %452, %460 : vector<2x128xf32>
    %469 = arith.addf %467, %468 : vector<2x128xf32>
    %470 = math.tanh %469 : vector<2x128xf32>
    %471 = arith.mulf %466, %470 : vector<2x128xf32>
    %472 = arith.truncf %471 : vector<2x128xf32> to vector<2x128xbf16>
    %c0_351 = arith.constant 0 : index
    %c0_352 = arith.constant 0 : index
    %473 = vector.load %arg14[%c0_351, %c0_352] : memref<128x1024xbf16, #tpu.memory_space<vmem>>, vector<128x1024xbf16>
    %cst_353 = arith.constant dense<0.000000e+00> : vector<2x1024xf32>
    %474 = tpu.matmul %472, %473, %cst_353 {dimension_numbers = #tpu.dot_dimension_numbers<[1], [0], [0], [1], [0, 0, 1, 1], [], []>} : vector<2x128xbf16>, vector<128x1024xbf16>, vector<2x1024xf32> -> vector<2x1024xf32>
    %475 = vector.extract_strided_slice %474 {offsets = [0, 512], sizes = [2, 512], strides = [1, 1]} : vector<2x1024xf32> to vector<2x512xf32>
    %c0_354 = arith.constant 0 : index
    %c0_355 = arith.constant 0 : index
    %476 = vector.load %arg17[%c0_354, %c0_355] : memref<1x512xf32, #tpu.memory_space<vmem>>, vector<1x512xf32>
    %477 = vector.broadcast %476 : vector<1x512xf32> to vector<2x512xf32>
    %478 = arith.addf %475, %477 : vector<2x512xf32>
    %479 = vector.extract_strided_slice %436 {offsets = [2, 0], sizes = [2, 512], strides = [1, 1]} : vector<6x512xf32> to vector<2x512xf32>
    %480 = vector.extract_strided_slice %474 {offsets = [0, 0], sizes = [2, 512], strides = [1, 1]} : vector<2x1024xf32> to vector<2x512xf32>
    %481 = arith.addf %479, %480 : vector<2x512xf32>
    %482 = vector.extract_strided_slice %481 {offsets = [0, 0], sizes = [2, 128], strides = [1, 1]} : vector<2x512xf32> to vector<2x128xf32>
    %483 = arith.negf %482 : vector<2x128xf32>
    %484 = math.exp %483 : vector<2x128xf32>
    %cst_356 = arith.constant 1.000000e+00 : f32
    %485 = vector.broadcast %cst_356 : f32 to vector<2x128xf32>
    %486 = arith.addf %485, %484 : vector<2x128xf32>
    %487 = arith.divf %485, %486 : vector<2x128xf32>
    %488 = vector.extract_strided_slice %481 {offsets = [0, 128], sizes = [2, 128], strides = [1, 1]} : vector<2x512xf32> to vector<2x128xf32>
    %489 = arith.negf %488 : vector<2x128xf32>
    %490 = math.exp %489 : vector<2x128xf32>
    %cst_357 = arith.constant 1.000000e+00 : f32
    %491 = vector.broadcast %cst_357 : f32 to vector<2x128xf32>
    %492 = arith.addf %491, %490 : vector<2x128xf32>
    %493 = arith.divf %491, %492 : vector<2x128xf32>
    %494 = vector.extract_strided_slice %481 {offsets = [0, 256], sizes = [2, 128], strides = [1, 1]} : vector<2x512xf32> to vector<2x128xf32>
    %495 = math.tanh %494 : vector<2x128xf32>
    %496 = vector.extract_strided_slice %481 {offsets = [0, 384], sizes = [2, 128], strides = [1, 1]} : vector<2x512xf32> to vector<2x128xf32>
    %497 = arith.negf %496 : vector<2x128xf32>
    %498 = math.exp %497 : vector<2x128xf32>
    %cst_358 = arith.constant 1.000000e+00 : f32
    %499 = vector.broadcast %cst_358 : f32 to vector<2x128xf32>
    %500 = arith.addf %499, %498 : vector<2x128xf32>
    %501 = arith.divf %499, %500 : vector<2x128xf32>
    %502 = arith.mulf %493, %469 : vector<2x128xf32>
    %503 = arith.mulf %487, %495 : vector<2x128xf32>
    %504 = arith.addf %502, %503 : vector<2x128xf32>
    %505 = math.tanh %504 : vector<2x128xf32>
    %506 = arith.mulf %501, %505 : vector<2x128xf32>
    %507 = arith.truncf %506 : vector<2x128xf32> to vector<2x128xbf16>
    %c0_359 = arith.constant 0 : index
    %c0_360 = arith.constant 0 : index
    %508 = vector.load %arg14[%c0_359, %c0_360] : memref<128x1024xbf16, #tpu.memory_space<vmem>>, vector<128x1024xbf16>
    %cst_361 = arith.constant dense<0.000000e+00> : vector<2x1024xf32>
    %509 = tpu.matmul %507, %508, %cst_361 {dimension_numbers = #tpu.dot_dimension_numbers<[1], [0], [0], [1], [0, 0, 1, 1], [], []>} : vector<2x128xbf16>, vector<128x1024xbf16>, vector<2x1024xf32> -> vector<2x1024xf32>
    %510 = vector.extract_strided_slice %509 {offsets = [0, 512], sizes = [2, 512], strides = [1, 1]} : vector<2x1024xf32> to vector<2x512xf32>
    %c0_362 = arith.constant 0 : index
    %c0_363 = arith.constant 0 : index
    %511 = vector.load %arg17[%c0_362, %c0_363] : memref<1x512xf32, #tpu.memory_space<vmem>>, vector<1x512xf32>
    %512 = vector.broadcast %511 : vector<1x512xf32> to vector<2x512xf32>
    %513 = arith.addf %510, %512 : vector<2x512xf32>
    %514 = vector.extract_strided_slice %436 {offsets = [4, 0], sizes = [2, 512], strides = [1, 1]} : vector<6x512xf32> to vector<2x512xf32>
    %515 = vector.extract_strided_slice %509 {offsets = [0, 0], sizes = [2, 512], strides = [1, 1]} : vector<2x1024xf32> to vector<2x512xf32>
    %516 = arith.addf %514, %515 : vector<2x512xf32>
    %517 = vector.extract_strided_slice %516 {offsets = [0, 0], sizes = [2, 128], strides = [1, 1]} : vector<2x512xf32> to vector<2x128xf32>
    %518 = arith.negf %517 : vector<2x128xf32>
    %519 = math.exp %518 : vector<2x128xf32>
    %cst_364 = arith.constant 1.000000e+00 : f32
    %520 = vector.broadcast %cst_364 : f32 to vector<2x128xf32>
    %521 = arith.addf %520, %519 : vector<2x128xf32>
    %522 = arith.divf %520, %521 : vector<2x128xf32>
    %523 = vector.extract_strided_slice %516 {offsets = [0, 128], sizes = [2, 128], strides = [1, 1]} : vector<2x512xf32> to vector<2x128xf32>
    %524 = arith.negf %523 : vector<2x128xf32>
    %525 = math.exp %524 : vector<2x128xf32>
    %cst_365 = arith.constant 1.000000e+00 : f32
    %526 = vector.broadcast %cst_365 : f32 to vector<2x128xf32>
    %527 = arith.addf %526, %525 : vector<2x128xf32>
    %528 = arith.divf %526, %527 : vector<2x128xf32>
    %529 = vector.extract_strided_slice %516 {offsets = [0, 256], sizes = [2, 128], strides = [1, 1]} : vector<2x512xf32> to vector<2x128xf32>
    %530 = math.tanh %529 : vector<2x128xf32>
    %531 = vector.extract_strided_slice %516 {offsets = [0, 384], sizes = [2, 128], strides = [1, 1]} : vector<2x512xf32> to vector<2x128xf32>
    %532 = arith.negf %531 : vector<2x128xf32>
    %533 = math.exp %532 : vector<2x128xf32>
    %cst_366 = arith.constant 1.000000e+00 : f32
    %534 = vector.broadcast %cst_366 : f32 to vector<2x128xf32>
    %535 = arith.addf %534, %533 : vector<2x128xf32>
    %536 = arith.divf %534, %535 : vector<2x128xf32>
    %537 = arith.mulf %528, %504 : vector<2x128xf32>
    %538 = arith.mulf %522, %530 : vector<2x128xf32>
    %539 = arith.addf %537, %538 : vector<2x128xf32>
    %540 = math.tanh %539 : vector<2x128xf32>
    %541 = arith.mulf %536, %540 : vector<2x128xf32>
    %542 = arith.truncf %541 : vector<2x128xf32> to vector<2x128xbf16>
    %c0_367 = arith.constant 0 : index
    %c0_368 = arith.constant 0 : index
    %543 = vector.load %arg14[%c0_367, %c0_368] : memref<128x1024xbf16, #tpu.memory_space<vmem>>, vector<128x1024xbf16>
    %cst_369 = arith.constant dense<0.000000e+00> : vector<2x1024xf32>
    %544 = tpu.matmul %542, %543, %cst_369 {dimension_numbers = #tpu.dot_dimension_numbers<[1], [0], [0], [1], [0, 0, 1, 1], [], []>} : vector<2x128xbf16>, vector<128x1024xbf16>, vector<2x1024xf32> -> vector<2x1024xf32>
    %545 = vector.extract_strided_slice %544 {offsets = [0, 512], sizes = [2, 512], strides = [1, 1]} : vector<2x1024xf32> to vector<2x512xf32>
    %c0_370 = arith.constant 0 : index
    %c0_371 = arith.constant 0 : index
    %546 = vector.load %arg17[%c0_370, %c0_371] : memref<1x512xf32, #tpu.memory_space<vmem>>, vector<1x512xf32>
    %547 = vector.broadcast %546 : vector<1x512xf32> to vector<2x512xf32>
    %548 = arith.addf %545, %547 : vector<2x512xf32>
    %cst_372 = arith.constant 0.000000e+00 : f32
    %549 = vector.broadcast %cst_372 : f32 to vector<2x128xf32>
    %550 = arith.truncf %541 : vector<2x128xf32> to vector<2x128xbf16>
    %c0_373 = arith.constant 0 : index
    %c0_374 = arith.constant 0 : index
    %551 = vector.load %arg16[%c0_373, %c0_374] : memref<128x512xbf16, #tpu.memory_space<vmem>>, vector<128x512xbf16>
    %cst_375 = arith.constant dense<0.000000e+00> : vector<2x512xf32>
    %552 = tpu.matmul %550, %551, %cst_375 {dimension_numbers = #tpu.dot_dimension_numbers<[1], [0], [0], [1], [0, 0, 1, 1], [], []>} : vector<2x128xbf16>, vector<128x512xbf16>, vector<2x512xf32> -> vector<2x512xf32>
    %553 = arith.addf %478, %552 : vector<2x512xf32>
    %554 = vector.extract_strided_slice %553 {offsets = [0, 0], sizes = [2, 128], strides = [1, 1]} : vector<2x512xf32> to vector<2x128xf32>
    %555 = arith.negf %554 : vector<2x128xf32>
    %556 = math.exp %555 : vector<2x128xf32>
    %cst_376 = arith.constant 1.000000e+00 : f32
    %557 = vector.broadcast %cst_376 : f32 to vector<2x128xf32>
    %558 = arith.addf %557, %556 : vector<2x128xf32>
    %559 = arith.divf %557, %558 : vector<2x128xf32>
    %560 = vector.extract_strided_slice %553 {offsets = [0, 128], sizes = [2, 128], strides = [1, 1]} : vector<2x512xf32> to vector<2x128xf32>
    %561 = arith.negf %560 : vector<2x128xf32>
    %562 = math.exp %561 : vector<2x128xf32>
    %cst_377 = arith.constant 1.000000e+00 : f32
    %563 = vector.broadcast %cst_377 : f32 to vector<2x128xf32>
    %564 = arith.addf %563, %562 : vector<2x128xf32>
    %565 = arith.divf %563, %564 : vector<2x128xf32>
    %566 = vector.extract_strided_slice %553 {offsets = [0, 256], sizes = [2, 128], strides = [1, 1]} : vector<2x512xf32> to vector<2x128xf32>
    %567 = math.tanh %566 : vector<2x128xf32>
    %568 = vector.extract_strided_slice %553 {offsets = [0, 384], sizes = [2, 128], strides = [1, 1]} : vector<2x512xf32> to vector<2x128xf32>
    %569 = arith.negf %568 : vector<2x128xf32>
    %570 = math.exp %569 : vector<2x128xf32>
    %cst_378 = arith.constant 1.000000e+00 : f32
    %571 = vector.broadcast %cst_378 : f32 to vector<2x128xf32>
    %572 = arith.addf %571, %570 : vector<2x128xf32>
    %573 = arith.divf %571, %572 : vector<2x128xf32>
    %574 = arith.mulf %565, %539 : vector<2x128xf32>
    %575 = arith.mulf %559, %567 : vector<2x128xf32>
    %576 = arith.addf %574, %575 : vector<2x128xf32>
    %577 = math.tanh %576 : vector<2x128xf32>
    %578 = arith.mulf %573, %577 : vector<2x128xf32>
    %579 = arith.addf %549, %578 : vector<2x128xf32>
    %580 = arith.truncf %578 : vector<2x128xf32> to vector<2x128xbf16>
    %c0_379 = arith.constant 0 : index
    %c0_380 = arith.constant 0 : index
    %581 = vector.load %arg16[%c0_379, %c0_380] : memref<128x512xbf16, #tpu.memory_space<vmem>>, vector<128x512xbf16>
    %cst_381 = arith.constant dense<0.000000e+00> : vector<2x512xf32>
    %582 = tpu.matmul %580, %581, %cst_381 {dimension_numbers = #tpu.dot_dimension_numbers<[1], [0], [0], [1], [0, 0, 1, 1], [], []>} : vector<2x128xbf16>, vector<128x512xbf16>, vector<2x512xf32> -> vector<2x512xf32>
    %583 = arith.addf %513, %582 : vector<2x512xf32>
    %584 = vector.extract_strided_slice %583 {offsets = [0, 0], sizes = [2, 128], strides = [1, 1]} : vector<2x512xf32> to vector<2x128xf32>
    %585 = arith.negf %584 : vector<2x128xf32>
    %586 = math.exp %585 : vector<2x128xf32>
    %cst_382 = arith.constant 1.000000e+00 : f32
    %587 = vector.broadcast %cst_382 : f32 to vector<2x128xf32>
    %588 = arith.addf %587, %586 : vector<2x128xf32>
    %589 = arith.divf %587, %588 : vector<2x128xf32>
    %590 = vector.extract_strided_slice %583 {offsets = [0, 128], sizes = [2, 128], strides = [1, 1]} : vector<2x512xf32> to vector<2x128xf32>
    %591 = arith.negf %590 : vector<2x128xf32>
    %592 = math.exp %591 : vector<2x128xf32>
    %cst_383 = arith.constant 1.000000e+00 : f32
    %593 = vector.broadcast %cst_383 : f32 to vector<2x128xf32>
    %594 = arith.addf %593, %592 : vector<2x128xf32>
    %595 = arith.divf %593, %594 : vector<2x128xf32>
    %596 = vector.extract_strided_slice %583 {offsets = [0, 256], sizes = [2, 128], strides = [1, 1]} : vector<2x512xf32> to vector<2x128xf32>
    %597 = math.tanh %596 : vector<2x128xf32>
    %598 = vector.extract_strided_slice %583 {offsets = [0, 384], sizes = [2, 128], strides = [1, 1]} : vector<2x512xf32> to vector<2x128xf32>
    %599 = arith.negf %598 : vector<2x128xf32>
    %600 = math.exp %599 : vector<2x128xf32>
    %cst_384 = arith.constant 1.000000e+00 : f32
    %601 = vector.broadcast %cst_384 : f32 to vector<2x128xf32>
    %602 = arith.addf %601, %600 : vector<2x128xf32>
    %603 = arith.divf %601, %602 : vector<2x128xf32>
    %604 = arith.mulf %595, %576 : vector<2x128xf32>
    %605 = arith.mulf %589, %597 : vector<2x128xf32>
    %606 = arith.addf %604, %605 : vector<2x128xf32>
    %607 = math.tanh %606 : vector<2x128xf32>
    %608 = arith.mulf %603, %607 : vector<2x128xf32>
    %609 = arith.addf %579, %608 : vector<2x128xf32>
    %610 = arith.truncf %608 : vector<2x128xf32> to vector<2x128xbf16>
    %c0_385 = arith.constant 0 : index
    %c0_386 = arith.constant 0 : index
    %611 = vector.load %arg16[%c0_385, %c0_386] : memref<128x512xbf16, #tpu.memory_space<vmem>>, vector<128x512xbf16>
    %cst_387 = arith.constant dense<0.000000e+00> : vector<2x512xf32>
    %612 = tpu.matmul %610, %611, %cst_387 {dimension_numbers = #tpu.dot_dimension_numbers<[1], [0], [0], [1], [0, 0, 1, 1], [], []>} : vector<2x128xbf16>, vector<128x512xbf16>, vector<2x512xf32> -> vector<2x512xf32>
    %613 = arith.addf %548, %612 : vector<2x512xf32>
    %614 = vector.extract_strided_slice %613 {offsets = [0, 0], sizes = [2, 128], strides = [1, 1]} : vector<2x512xf32> to vector<2x128xf32>
    %615 = arith.negf %614 : vector<2x128xf32>
    %616 = math.exp %615 : vector<2x128xf32>
    %cst_388 = arith.constant 1.000000e+00 : f32
    %617 = vector.broadcast %cst_388 : f32 to vector<2x128xf32>
    %618 = arith.addf %617, %616 : vector<2x128xf32>
    %619 = arith.divf %617, %618 : vector<2x128xf32>
    %620 = vector.extract_strided_slice %613 {offsets = [0, 128], sizes = [2, 128], strides = [1, 1]} : vector<2x512xf32> to vector<2x128xf32>
    %621 = arith.negf %620 : vector<2x128xf32>
    %622 = math.exp %621 : vector<2x128xf32>
    %cst_389 = arith.constant 1.000000e+00 : f32
    %623 = vector.broadcast %cst_389 : f32 to vector<2x128xf32>
    %624 = arith.addf %623, %622 : vector<2x128xf32>
    %625 = arith.divf %623, %624 : vector<2x128xf32>
    %626 = vector.extract_strided_slice %613 {offsets = [0, 256], sizes = [2, 128], strides = [1, 1]} : vector<2x512xf32> to vector<2x128xf32>
    %627 = math.tanh %626 : vector<2x128xf32>
    %628 = vector.extract_strided_slice %613 {offsets = [0, 384], sizes = [2, 128], strides = [1, 1]} : vector<2x512xf32> to vector<2x128xf32>
    %629 = arith.negf %628 : vector<2x128xf32>
    %630 = math.exp %629 : vector<2x128xf32>
    %cst_390 = arith.constant 1.000000e+00 : f32
    %631 = vector.broadcast %cst_390 : f32 to vector<2x128xf32>
    %632 = arith.addf %631, %630 : vector<2x128xf32>
    %633 = arith.divf %631, %632 : vector<2x128xf32>
    %634 = arith.mulf %625, %606 : vector<2x128xf32>
    %635 = arith.mulf %619, %627 : vector<2x128xf32>
    %636 = arith.addf %634, %635 : vector<2x128xf32>
    %637 = math.tanh %636 : vector<2x128xf32>
    %638 = arith.mulf %633, %637 : vector<2x128xf32>
    %639 = arith.addf %609, %638 : vector<2x128xf32>
    %cst_391 = arith.constant 0.333333343 : f32
    %640 = vector.broadcast %cst_391 : f32 to vector<2x128xf32>
    %641 = arith.mulf %639, %640 : vector<2x128xf32>
    %c0_392 = arith.constant 0 : index
    %c0_393 = arith.constant 0 : index
    %642 = vector.load %arg20[%c0_392, %c0_393] : memref<128x5xf32, #tpu.memory_space<vmem>>, vector<128x5xf32>
    %cst_394 = arith.constant dense<0.000000e+00> : vector<2x5xf32>
    %643 = tpu.matmul %641, %642, %cst_394 {dimension_numbers = #tpu.dot_dimension_numbers<[1], [0], [0], [1], [0, 0, 1, 1], [], []>} : vector<2x128xf32>, vector<128x5xf32>, vector<2x5xf32> -> vector<2x5xf32>
    %c0_395 = arith.constant 0 : index
    %c0_396 = arith.constant 0 : index
    %644 = vector.load %arg21[%c0_395, %c0_396] : memref<1x5xf32, #tpu.memory_space<vmem>>, vector<1x5xf32>
    %645 = vector.broadcast %644 : vector<1x5xf32> to vector<2x5xf32>
    %646 = arith.addf %643, %645 : vector<2x5xf32>
    %c0_397 = arith.constant 0 : index
    %c0_398 = arith.constant 0 : index
    %647 = vector.load %arg22[%c0_397, %c0_398] : memref<2x5xf32, #tpu.memory_space<vmem>>, vector<2x5xf32>
    tpu.vector_store %arg22[%c0_397, %c0_398], %646 {strides = array<i32>} : memref<2x5xf32, #tpu.memory_space<vmem>>, vector<2x5xf32>,
    %c0_399 = arith.constant 0 : index
    %c0_400 = arith.constant 0 : index
    %c0_401 = arith.constant 0 : index
    %648 = vector.load %arg23[%c0_399, %c0_400, %c0_401] : memref<1x2x128xf32, #tpu.memory_space<vmem>>, vector<1x2x128xf32>
    %649 = vector.shape_cast %648 : vector<1x2x128xf32> to vector<2x128xf32>
    %650 = vector.shape_cast %638 : vector<2x128xf32> to vector<1x2x128xf32>
    tpu.vector_store %arg23[%c0_399, %c0_400, %c0_401], %650 {strides = array<i32>} : memref<1x2x128xf32, #tpu.memory_space<vmem>>, vector<1x2x128xf32>,
    %c0_402 = arith.constant 0 : index
    %c0_403 = arith.constant 0 : index
    %c0_404 = arith.constant 0 : index
    %651 = vector.load %arg24[%c0_402, %c0_403, %c0_404] : memref<1x2x128xf32, #tpu.memory_space<vmem>>, vector<1x2x128xf32>
    %652 = vector.shape_cast %651 : vector<1x2x128xf32> to vector<2x128xf32>
    %653 = vector.shape_cast %636 : vector<2x128xf32> to vector<1x2x128xf32>
    tpu.vector_store %arg24[%c0_402, %c0_403, %c0_404], %653 {strides = array<i32>} : memref<1x2x128xf32, #tpu.memory_space<vmem>>, vector<1x2x128xf32>,
    return
  }
}

</mosaic_0001>

<bundles_post_ra>
// kernel: tpu_custom_call.1
= control target key start
LH: loop header
LB: loop body
LE: loop exit
PB: predicated region body
PF: predicated region fallthrough
CT: control target
= control target key end

     0   :  { %s15247_s0 = inlined_call_operand.vmem [shape: f32[2,1,800], index: 0, kind: input, shape index: {}]   ;;  %s15248_s1 = inlined_call_operand.hbm [shape: f32[8,64], index: 1, kind: input, shape index: {}]   ;;  %s15249_s2 = inlined_call_operand.vmem [shape: f32[8,1], index: 2, kind: input, shape index: {}]   ;;  %s15250_s3 = inlined_call_operand.vmem [shape: f32[8,1], index: 3, kind: input, shape index: {}]   ;;  %s15251_s4 = inlined_call_operand.hbm [shape: f32[16,256], index: 4, kind: input, shape index: {}]   ;;  %s15252_s5 = inlined_call_operand.vmem [shape: f32[16,1], index: 5, kind: input, shape index: {}]   ;;  %s15253_s6 = inlined_call_operand.vmem [shape: f32[16,1], index: 6, kind: input, shape index: {}]   ;;  %s15254_s7 = inlined_call_operand.hbm [shape: f32[32,256], index: 7, kind: input, shape index: {}]   ;;  %s15255_s8 = inlined_call_operand.vmem [shape: f32[32,1], index: 8, kind: input, shape index: {}]   ;;  %s15256_s9 = inlined_call_operand.vmem [shape: f32[32,1], index: 9, kind: input, shape index: {}]   ;;  %s15257_s10 = inlined_call_operand.vmem [shape: f32[64,256], index: 10, kind: input, shape index: {}]   ;;  %s15258_s11 = inlined_call_operand.vmem [shape: f32[64,1], index: 11, kind: input, shape index: {}]   ;;  %s15259_s12 = inlined_call_operand.vmem [shape: f32[64,1], index: 12, kind: input, shape index: {}]   ;;  %s15260_s13 = inlined_call_operand.hbm [shape: bf16[64,512], index: 13, kind: input, shape index: {}]   ;;  %s15261_s14 = inlined_call_operand.hbm [shape: bf16[128,1024], index: 14, kind: input, shape index: {}]   ;;  %s15262_s15 = inlined_call_operand.vmem [shape: f32[1,512], index: 15, kind: input, shape index: {}]   ;;  %s15263_s16 = inlined_call_operand.vmem [shape: bf16[128,512], index: 16, kind: input, shape index: {}]   ;;  %s15264_s17 = inlined_call_operand.hbm [shape: f32[1,512], index: 17, kind: input, shape index: {}]   ;;  %s15265_s18 = inlined_call_operand.vmem [shape: f32[1,2,128], index: 18, kind: input, shape index: {}]   ;;  %s15266_s19 = inlined_call_operand.vmem [shape: f32[1,2,128], index: 19, kind: input, shape index: {}]   ;;  %s15267_s20 = inlined_call_operand.vmem [shape: f32[128,5], index: 20, kind: input, shape index: {}]   ;;  %s15268_s21 = inlined_call_operand.vmem [shape: f32[1,5], index: 21, kind: input, shape index: {}]   ;;  %s15269_s22 = inlined_call_operand.hbm [shape: f32[2,5], index: 22, kind: output, shape index: {0}]   ;;  %s15270_s23 = inlined_call_operand.hbm [shape: f32[1,2,128], index: 23, kind: output, shape index: {1}]   ;;  %s15271_s24 = inlined_call_operand.hbm [shape: f32[1,2,128], index: 24, kind: output, shape index: {2}]  }
   0x1   :  { %15807 = sst [smem:[#allocation111_spill]] %s15247_s0 }
   0x2   :  { %15808 = sst [smem:[#allocation112_spill]] %s15248_s1 }
   0x3   :  { %15809 = sst [smem:[#allocation113_spill]] %s15249_s2 }
   0x4   :  { %15810 = sst [smem:[#allocation114_spill]] %s15250_s3 }
   0x5   :  { %15811 = sst [smem:[#allocation115_spill]] %s15251_s4 }
   0x6   :  { %15812 = sst [smem:[#allocation116_spill]] %s15252_s5 }
   0x7   :  { %15813 = sst [smem:[#allocation117_spill]] %s15253_s6 }
   0x8   :  { %15814 = sst [smem:[#allocation118_spill]] %s15254_s7 }
   0x9   :  { %15815 = sst [smem:[#allocation119_spill]] %s15255_s8 }
   0xa   :  { %15816 = sst [smem:[#allocation120_spill]] %s15257_s10 }
   0xb   :  { %15817 = sst [smem:[#allocation121_spill]] %s15258_s11 }
   0xc   :  { %15818 = sst [smem:[#allocation122_spill]] %s15259_s12 }
   0xd   :  { %15819 = sst [smem:[#allocation123_spill]] %s15262_s15 }
   0xe   :  { %15820 = sst [smem:[#allocation124_spill]] %s15263_s16 }
   0xf   :  { %15821 = sst [smem:[#allocation125_spill]] %s15265_s18 }
  0x10   :  { %15822 = sst [smem:[#allocation126_spill]] %s15266_s19 }
  0x11   :  { %15823 = sst [smem:[#allocation127_spill]] %s15267_s20 }
  0x12   :  { %15824 = sst [smem:[#allocation128_spill]] %s15268_s21 }
  0x13   :  { %15825 = sst [smem:[#allocation129_spill]] %s15269_s22 }
  0x14   :  { %15826 = sst [smem:[#allocation130_spill]] %s15270_s23 }
  0x15   :  { %15827 = sst [smem:[#allocation131_spill]] %s15271_s24 }
  0x16   :  { %30 = vsyncpa [#allocation8], 0 }
  0x17   :  { %31 = vsyncpa [#allocation11], 0 }
  0x18   :  { %32 = vsyncpa [#allocation14], 0 }
  0x19   :  { %33 = vsyncpa [#allocation17], 0 }
  0x1a   :  { %34 = vsyncpa [#allocation9], 0 }
  0x1b   :  { %35 = vsyncpa [#allocation20], 0  ;;  %s9388_s5 = smov [#allocation10]  }
  0x1c   :  { %s57_s26 = sshll.u32 %s9388_s5, 4  ;;  %s58_s26 = int_to_ptr.vmem [resolvable:$true] %s57_s26 }
  0x1d   :  { %s9204_s27 = scalar_lea.vmem %s58_s26, 512  ;;  %p9209_p1 = scmp.lt.s32.totalorder %s58_s26, %s58_s26 }
  0x1e   :  { %p9205_p0 = scmp.ne.s32.totalorder %s58_s26, %s9204_s27  ;;  %p9210_p2 = scmp.lt.s32.totalorder %s9204_s27, %s9204_s27 }
  0x20   :  { %p9211_p3 = por %p9210_p2, %p9209_p1 }
  0x22   :  { %p9212_p4 = pnand %p9211_p3, %p9205_p0 }
  0x24   :  { %9215 = shalt.err (!%p9212_p4)
}
  0x25   :  { %s9389_s28 = smov 256   ;;  %s9390_s6 = smov 16  }
  0x26   :  { %s15828_s0 = sld [smem:[#allocation115_spill]]  ;;  %s9391_s7 = smov [#allocation13]  }
  0x27   :  { %s95_s30 = sshll.u32 %s9391_s7, 4  ;;  %s9392_s3 = smov [#allocation7]   ;;  %s96_s30 = int_to_ptr.vmem [resolvable:$true] %s95_s30 }
  0x28   :  { %s44_s25 = sshll.u32 %s9392_s3, 4  ;;  %s9224_s8 = scalar_lea.vmem %s96_s30, 2048  ;;  %s45_s25 = int_to_ptr.vmem [resolvable:$true] %s44_s25 }
  0x29   :  { %p9225_p5 = scmp.ne.s32.totalorder %s96_s30, %s9224_s8  ;;  %p9229_p6 = scmp.lt.s32.totalorder %s96_s30, %s96_s30 }
  0x2a   :  { %p9230_p7 = scmp.lt.s32.totalorder %s9224_s8, %s9224_s8 }
  0x2c   :  { %63 = dma.hbm_to_vmem [thread:$0]  %s15828_s0, 512, %s58_s26, [#allocation11], %s9389_s28, %s9389_s28, %s9390_s6  }
  0x2d   :  { %p9231_p8 = por %p9230_p7, %p9229_p6 }
  0x2f   :  { %p9232_p9 = pnand %p9231_p8, %p9225_p5 }
  0x31   :  { %9235 = shalt.err (!%p9232_p9)
}
  0x32   :  { %101 = dma.hbm_to_vmem [thread:$0]  %s15260_s13, 2048, %s96_s30, [#allocation14], %s9389_s28, %s9389_s28, %s9390_s6  }
  0x33   :  { %s9244_s5 = scalar_lea.vmem %s45_s25, 128  ;;  %p9249_p11 = scmp.lt.s32.totalorder %s45_s25, %s45_s25 }
  0x34   :  { %p9245_p10 = scmp.ne.s32.totalorder %s45_s25, %s9244_s5  ;;  %p9250_p12 = scmp.lt.s32.totalorder %s9244_s5, %s9244_s5 }
  0x36   :  { %p9251_p13 = por %p9250_p12, %p9249_p11 }
  0x38   :  { %p9252_p0 = pnand %p9251_p13, %p9245_p10 }
  0x3a   :  { %9255 = shalt.err (!%p9252_p0)
}
  0x3b   :  { %s15829_s2 = sld [smem:[#allocation112_spill]]  ;;  %s9393_s29 = smov [#allocation12]  }
  0x3c   :  { %s73_s0 = sshll.u32 %s9393_s29, 4  ;;  %s9394_s7 = smov [#allocation15]   ;;  %s74_s0 = int_to_ptr.vmem [resolvable:$true] %s73_s0 }
  0x3d   :  { %s107_s3 = sshll.u32 %s9394_s7, 4  ;;  %s9264_s8 = scalar_lea.vmem %s74_s0, 1024  ;;  %s108_s3 = int_to_ptr.vmem [resolvable:$true] %s107_s3 }
  0x3e   :  { %p9265_p1 = scmp.ne.s32.totalorder %s74_s0, %s9264_s8  ;;  %p9269_p2 = scmp.lt.s32.totalorder %s74_s0, %s74_s0 }
  0x3f   :  { %p9270_p3 = scmp.lt.s32.totalorder %s9264_s8, %s9264_s8 }
  0x41   :  { %47 = dma.hbm_to_vmem [thread:$0]  %s15829_s2, 128, %s45_s25, [#allocation8]  }
  0x42   :  { %p9271_p4 = por %p9270_p3, %p9269_p2 }
  0x44   :  { %p9272_p5 = pnand %p9271_p4, %p9265_p1 }
  0x46   :  { %9275 = shalt.err (!%p9272_p5)
}
  0x47   :  { %s15830_s4 = sld [smem:[#allocation118_spill]]  ;;  %s9284_s25 = scalar_lea.vmem %s108_s3, 8192 }
  0x48   :  { %p9285_p6 = scmp.ne.s32.totalorder %s108_s3, %s9284_s25  ;;  %p9289_p7 = scmp.lt.s32.totalorder %s108_s3, %s108_s3 }
  0x49   :  { %p9290_p8 = scmp.lt.s32.totalorder %s9284_s25, %s9284_s25 }
  0x4b   :  { %p9291_p9 = por %p9290_p8, %p9289_p7 }
  0x4d   :  { %79 = dma.hbm_to_vmem [thread:$0]  %s15830_s4, 1024, %s74_s0, [#allocation11], %s9389_s28, %s9389_s28, %s9390_s6  }
  0x4e   :  { %p9292_p10 = pnand %p9291_p9, %p9285_p6 }
  0x50   :  { %9295 = shalt.err (!%p9292_p10)
}
  0x51   :  { %s9395_s1 = smov 512   ;;  %s9396_s5 = smov 32  }
  0x52   :  { %113 = dma.hbm_to_vmem [thread:$0]  %s15261_s14, 8192, %s108_s3, [#allocation14], %s9395_s1, %s9395_s1, %s9396_s5  }
  0x53   :  { %s9397_s2 = smov [#allocation16]  }
  0x54   :  { %s124_s29 = sshll.u32 %s9397_s2, 4  ;;  %s125_s29 = int_to_ptr.vmem [resolvable:$true] %s124_s29 }
  0x55   :  { %s9304_s7 = scalar_lea.vmem %s125_s29, 64  ;;  %p9309_p12 = scmp.lt.s32.totalorder %s125_s29, %s125_s29 }
  0x56   :  { %p9305_p11 = scmp.ne.s32.totalorder %s125_s29, %s9304_s7  ;;  %p9310_p13 = scmp.lt.s32.totalorder %s9304_s7, %s9304_s7 }
  0x58   :  { %p9311_p0 = por %p9310_p13, %p9309_p12 }
  0x5a   :  { %p9312_p1 = pnand %p9311_p0, %p9305_p11 }
  0x5c   :  { %9315 = shalt.err (!%p9312_p1)
}
  0x5d   :  { %127 = dma.hbm_to_vmem [thread:$0]  %s15264_s17, 64, %s125_s29, [#allocation17]  }
  0x5e   :  { %9376 = dma.done.wait [#allocation8], 128  }
  0x5f   :  { %9377 = vsyncadd [#allocation8], 4294967168 }
  0x60   :  { %9378 = dma.done.wait [#allocation11], 1536  }
  0x61   :  { %9379 = vsyncadd [#allocation11], 4294965760 }
  0x62   :  { %9380 = dma.done.wait [#allocation14], 10240  }
  0x63   :  { %9381 = vsyncadd [#allocation14], 4294957056 }
  0x64   :  { %9382 = dma.done.wait [#allocation17], 64  }
  0x65   :  { %9383 = vsyncadd [#allocation17], 4294967232  ;;  %v156_v0 = vlaneseq  ;;  %s15831_s3 = sld [smem:[#allocation111_spill]]  ;;  %s15641_s8 = smov 127   ;;  %vm15746_vm1 = vcmask 1039360   ;;  %vm15302_vm2 = vcmask 1022976  }
  0x66   :  { %s15669_s17 = smov 125   ;;  %s15633_s13 = smov 126   ;;  %vm15630_vm3 = vcmask 1031168   ;;  %vm15294_vm4 = vcmask 1014784   ;;  %vm15304_vm5 = vcmask 1006592   ;;  %vm15295_vm6 = vcmask 998400  }
  0x67   :  { %vm9631_vm0 = vcmp.lt.s32.totalorder %v156_v0, 793  ;;  %s15635_s30 = smov 124   ;;  %s15663_s1 = smov 123   ;;  %vm15305_vm7 = vcmask 990208   ;;  %vm15301_vm8 = vcmask 793600   ;;  %v15379_v53 = vmov 0.0  }
  0x68   :  { %s15637_s5 = smov 122   ;;  %s15667_s26 = smov 121   ;;  %1145 = vmatprep.mubr.f32.mxu0 %v15379_v53  ;;  %1216 = vmatprep.mubr.f32.mxu1 %v15379_v53  ;;  %vm15290_vm9 = vcmask 588800   ;;  %vm15288_vm10 = vcmask 654336   ;;  %vm15293_vm11 = vcmask 719872   ;;  %vm15291_vm12 = vcmask 785408  }
  0x69   :  { %s15280_s27 = smov 72   ;;  %s15276_s2 = smov 80   ;;  %vm15292_vm13 = vcmask 850944   ;;  %vm15289_vm14 = vcmask 916480   ;;  %vm15303_vm15 = vcmask 982016  }
  0x6a   :  { %s15639_s29 = smov 88   ;;  %s15282_s7 = smov 96  }
  0x6b   :  { %v155_v1 = vld [vmem:[%s15831_s3] sm:$0x7f]  ;;  %v9646_v3 = vld [vmem:[%s15831_s3 + $0x7] sm:$0x7f]  ;;  %s15686_s28 = smov 104   ;;  %s15278_s6 = smov 112  }
  0x6c   :  { %163 = vrot.lane.b32.xlu0 %v155_v1, %s15641_s8  ;;  %160 = vst.msk [vmem:[#allocation2] ss:$8 sm:$0xf] %vm9631_vm0, %v155_v1  ;;  %161 = vst.msk [vmem:[#allocation2] ss:$8 sm:$0x70] %vm9631_vm0, %v155_v1  ;;  %181 = vrot.lane.b32.xlu1 %v155_v1, %s15669_s17 }
  0x6d   :  { %s15631_s14 = smov 120   ;;  %s9413_s0 = smov 49  }
  0x6e   :  { %s9414_s3 = smov 65   ;;  %s9415_s4 = smov 41  }
  0x6f   :  { %s15286_s25 = smov 73   ;;  %s15701_s22 = smov 108  }
  0x70   :  { %172 = vrot.lane.b32.xlu0 %v155_v1, %s15633_s13  ;;  %190 = vrot.lane.b32.xlu1 %v155_v1, %s15635_s30  ;;  %s15710_s21 = smov 110   ;;  %s15707_s24 = smov 111  }
  0x71   :  { %s16207_s23 = smov 82   ;;  %s16208_s20 = smov 83  }
  0x72   :  { %s16342_s16 = smov 114   ;;  %s16343_s19 = smov 115  }
  0x73   :  { %s16344_s15 = smov 123   ;;  %s16345_s18 = smov 116  }
  0x74   :  { %199 = vrot.lane.b32.xlu0 %v155_v1, %s15663_s1  ;;  %208 = vrot.lane.b32.xlu1 %v155_v1, %s15637_s5  ;;  %s16346_s12 = smov 117   ;;  %s16347_s11 = smov 125  }
  0x75   :  { %s16348_s10 = smov 118  }
  0x78   :  { %217 = vrot.lane.b32.xlu0 %v155_v1, %s15667_s26  ;;  %558 = vrot.lane.b32.xlu1 %v9646_v3, %s15641_s8 }
  0x7c   :  { %572 = vrot.lane.b32.xlu1 %v9646_v3, %s15669_s17  ;;  %565 = vrot.lane.b32.xlu0 %v9646_v3, %s15633_s13 }
  0x80   :  { %586 = vrot.lane.b32.xlu1 %v9646_v3, %s15663_s1  ;;  %579 = vrot.lane.b32.xlu0 %v9646_v3, %s15635_s30 }
  0x84   :  { %600 = vrot.lane.b32.xlu1 %v9646_v3, %s15667_s26  ;;  %593 = vrot.lane.b32.xlu0 %v9646_v3, %s15637_s5 }
  0xde   :  { %v164_v4 = vpop.permute.xlu0 %163  ;;  %v182_v5 = vpop.permute.xlu1 %181 }
  0xdf   :  { %v165_v6 = vrot.slane %v164_v4, 1  ;;  %v183_v7 = vrot.slane %v182_v5, 1 }
  0xe1   :  { %v167_v8 = vsel %vm15746_vm1, %v164_v4, %v165_v6  ;;  %v185_v9 = vsel %vm15302_vm2, %v182_v5, %v183_v7 }
  0xe2   :  { %170 = vst.msk [vmem:[#allocation2 + $0x1] ss:$8 sm:$0xf] %vm9631_vm0, %v167_v8  ;;  %171 = vst.msk [vmem:[#allocation2 + $0x1] ss:$8 sm:$0x70] %vm9631_vm0, %v167_v8  ;;  %v173_v10 = vpop.permute.xlu0 %172  ;;  %v191_v11 = vpop.permute.xlu1 %190 }
  0xe3   :  { %188 = vst.msk [vmem:[#allocation2 + $0x3] ss:$8 sm:$0xf] %vm9631_vm0, %v185_v9  ;;  %189 = vst.msk [vmem:[#allocation2 + $0x3] ss:$8 sm:$0x70] %vm9631_vm0, %v185_v9 }
  0xe4   :  { %v174_v12 = vrot.slane %v173_v10, 1  ;;  %v192_v13 = vrot.slane %v191_v11, 1 }
  0xe6   :  { %v176_v14 = vsel %vm15630_vm3, %v173_v10, %v174_v12  ;;  %v194_v15 = vsel %vm15294_vm4, %v191_v11, %v192_v13  ;;  %v200_v16 = vpop.permute.xlu0 %199  ;;  %v209_v17 = vpop.permute.xlu1 %208 }
  0xe7   :  { %179 = vst.msk [vmem:[#allocation2 + $0x2] ss:$8 sm:$0xf] %vm9631_vm0, %v176_v14  ;;  %180 = vst.msk [vmem:[#allocation2 + $0x2] ss:$8 sm:$0x70] %vm9631_vm0, %v176_v14 }
  0xe8   :  { %197 = vst.msk [vmem:[#allocation2 + $0x4] ss:$8 sm:$0xf] %vm9631_vm0, %v194_v15  ;;  %198 = vst.msk [vmem:[#allocation2 + $0x4] ss:$8 sm:$0x70] %vm9631_vm0, %v194_v15 }
  0xe9   :  { %v201_v18 = vrot.slane %v200_v16, 1  ;;  %v210_v19 = vrot.slane %v209_v17, 1 }
  0xea   :  { %v218_v22 = vpop.permute.xlu0 %217  ;;  %v559_v23 = vpop.permute.xlu1 %558 }
  0xeb   :  { %v203_v20 = vsel %vm15304_vm5, %v200_v16, %v201_v18  ;;  %v212_v21 = vsel %vm15295_vm6, %v209_v17, %v210_v19  ;;  %v219_v24 = vrot.slane %v218_v22, 1  ;;  %v560_v28 = vrot.slane %v559_v23, 1 }
  0xec   :  { %206 = vst.msk [vmem:[#allocation2 + $0x5] ss:$8 sm:$0xf] %vm9631_vm0, %v203_v20  ;;  %207 = vst.msk [vmem:[#allocation2 + $0x5] ss:$8 sm:$0x70] %vm9631_vm0, %v203_v20 }
  0xed   :  { %215 = vst.msk [vmem:[#allocation2 + $0x6] ss:$8 sm:$0xf] %vm9631_vm0, %v212_v21  ;;  %216 = vst.msk [vmem:[#allocation2 + $0x6] ss:$8 sm:$0x70] %vm9631_vm0, %v212_v21  ;;  %v221_v25 = vsel %vm15305_vm7, %v218_v22, %v219_v24  ;;  %v561_v35 = vsel %vm15746_vm1, %v559_v23, %v560_v28 }
  0xee   :  { %224 = vst.msk [vmem:[#allocation2 + $0x7] ss:$8 sm:$0xf] %vm9631_vm0, %v221_v25  ;;  %225 = vst.msk [vmem:[#allocation2 + $0x7] ss:$8 sm:$0x70] %vm9631_vm0, %v221_v25  ;;  %v573_v26 = vpop.permute.xlu1 %572  ;;  %v566_v27 = vpop.permute.xlu0 %565 }
  0xef   :  { %v574_v29 = vrot.slane %v573_v26, 1  ;;  %v567_v30 = vrot.slane %v566_v27, 1  ;;  %v15372_v23 = vmov 0  }
  0xf0   :  { %8956 = vset.pattern.permute.xlu0 %v15372_v23  ;;  %8957 = vset.pattern.permute.xlu1 %v15372_v23 }
  0xf1   :  { %v575_v36 = vsel %vm15302_vm2, %v573_v26, %v574_v29  ;;  %v568_v37 = vsel %vm15630_vm3, %v566_v27, %v567_v30 }
  0xf2   :  { %v587_v31 = vpop.permute.xlu1 %586  ;;  %v580_v32 = vpop.permute.xlu0 %579 }
  0xf3   :  { %v588_v33 = vrot.slane %v587_v31, 1  ;;  %v581_v34 = vrot.slane %v580_v32, 1 }
  0xf5   :  { %v9703_v38 = vld [vmem:[#allocation2 + $0x20] sm:$0xff]  ;;  %v9705_v39 = vld [vmem:[#allocation2 + $0x28] sm:$0xff]  ;;  %v9707_v40 = vld [vmem:[#allocation2 + $0x10] sm:$0xff]  ;;  %v589_v41 = vsel %vm15304_vm5, %v587_v31, %v588_v33  ;;  %v582_v42 = vsel %vm15294_vm4, %v580_v32, %v581_v34  ;;  %vm15298_vm4 = vcmask 728064  }
  0xf6   :  { %236 = vst [vmem:[#allocation3 + $0x20] sm:$0xff] %v9703_v38  ;;  %524 = vrot.lane.b32.xlu1 %v9707_v40, %s15280_s27  ;;  %v9714_v43 = vld [vmem:[#allocation2 + $0x8] sm:$0xff]  ;;  %v9716_v44 = vld [vmem:[#allocation2] sm:$0xff]  ;;  %v9718_v45 = vld [vmem:[#allocation2 + $0x18] sm:$0xff]  ;;  %v601_v46 = vpop.permute.xlu1 %600  ;;  %v594_v47 = vpop.permute.xlu0 %593 }
  0xf7   :  { %238 = vst.msk [vmem:[#allocation3 + $0x28] sm:$0xff] %vm15301_vm8, %v9705_v39  ;;  %522 = vrot.lane.b32.xlu0 %v9714_v43, %s15280_s27  ;;  %v512_v48 = vld [vmem:[#allocation2 + $0x30] sm:$0xff]  ;;  %v602_v49 = vrot.slane %v601_v46, 1  ;;  %v595_v50 = vrot.slane %v594_v47, 1  ;;  %v9953_v34 = vld [vmem:[#allocation7] sm:$0xff] }
  0xf8   :  { %555 = vst.msk [vmem:[#allocation2] ss:$8 sm:$0xf] %vm9631_vm0, %v9646_v3  ;;  %563 = vst.msk [vmem:[#allocation2 + $0x1] ss:$8 sm:$0xf] %vm9631_vm0, %v561_v35 }
  0xf9   :  { %570 = vst.msk [vmem:[#allocation2 + $0x2] ss:$8 sm:$0xf] %vm9631_vm0, %v568_v37  ;;  %577 = vst.msk [vmem:[#allocation2 + $0x3] ss:$8 sm:$0xf] %vm9631_vm0, %v575_v36  ;;  %v603_v51 = vsel %vm15305_vm7, %v601_v46, %v602_v49  ;;  %v596_v52 = vsel %vm15295_vm6, %v594_v47, %v595_v50 }
  0xfa   :  { %584 = vst.msk [vmem:[#allocation2 + $0x4] ss:$8 sm:$0xf] %vm9631_vm0, %v582_v42  ;;  %591 = vst.msk [vmem:[#allocation2 + $0x5] ss:$8 sm:$0xf] %vm9631_vm0, %v589_v41  ;;  %475 = vrot.lane.b32.xlu1 %v9714_v43, %s15276_s2 }
  0xfb   :  { %556 = vst.msk [vmem:[#allocation2] ss:$8 sm:$0x70] %vm9631_vm0, %v9646_v3  ;;  %564 = vst.msk [vmem:[#allocation2 + $0x1] ss:$8 sm:$0x70] %vm9631_vm0, %v561_v35  ;;  %520 = vrot.lane.b32.xlu0 %v9716_v44, %s15280_s27 }
  0xfc   :  { %571 = vst.msk [vmem:[#allocation2 + $0x2] ss:$8 sm:$0x70] %vm9631_vm0, %v568_v37  ;;  %578 = vst.msk [vmem:[#allocation2 + $0x3] ss:$8 sm:$0x70] %vm9631_vm0, %v575_v36 }
  0xfd   :  { %585 = vst.msk [vmem:[#allocation2 + $0x4] ss:$8 sm:$0x70] %vm9631_vm0, %v582_v42  ;;  %592 = vst.msk [vmem:[#allocation2 + $0x5] ss:$8 sm:$0x70] %vm9631_vm0, %v589_v41 }
  0xfe   :  { %598 = vst.msk [vmem:[#allocation2 + $0x6] ss:$8 sm:$0xf] %vm9631_vm0, %v596_v52  ;;  %605 = vst.msk [vmem:[#allocation2 + $0x7] ss:$8 sm:$0xf] %vm9631_vm0, %v603_v51  ;;  %473 = vrot.lane.b32.xlu1 %v9716_v44, %s15276_s2 }
  0xff   :  { %599 = vst.msk [vmem:[#allocation2 + $0x6] ss:$8 sm:$0x70] %vm9631_vm0, %v596_v52  ;;  %606 = vst.msk [vmem:[#allocation2 + $0x7] ss:$8 sm:$0x70] %vm9631_vm0, %v603_v51  ;;  %477 = vrot.lane.b32.xlu0 %v9707_v40, %s15276_s2 }
 0x100   :  { %vm15296_vm0 = vcmask 523264   ;;  %vm15300_vm6 = vcmask 539648  }
 0x102   :  { %430 = vrot.lane.b32.xlu1 %v9707_v40, %s15639_s29 }
 0x103   :  { %428 = vrot.lane.b32.xlu0 %v9714_v43, %s15639_s29 }
 0x105   :  { %v882_v54 = vld [vmem:[#allocation2] sm:$0xff]  ;;  %v9852_v55 = vld [vmem:[#allocation2 + $0x8] sm:$0xff]  ;;  %v9857_v56 = vld [vmem:[#allocation2 + $0x10] sm:$0xff] }
 0x106   :  { %381 = vrot.lane.b32.xlu1 %v9714_v43, %s15282_s7  ;;  %v9868_v59 = vld [vmem:[#allocation2 + $0x20] sm:$0xff]  ;;  %v9872_v61 = vld [vmem:[#allocation2 + $0x18] sm:$0xff]  ;;  %v937_v51 = vld [vmem:[#allocation2 + $0x30] sm:$0xff] }
 0x107   :  { %426 = vrot.lane.b32.xlu0 %v9716_v44, %s15639_s29 }
 0x10a   :  { %379 = vrot.lane.b32.xlu1 %v9716_v44, %s15282_s7 }
 0x10b   :  { %383 = vrot.lane.b32.xlu0 %v9707_v40, %s15282_s7 }
 0x10e   :  { %339 = vrot.lane.b32.xlu1 %v9707_v40, %s15686_s28 }
 0x10f   :  { %337 = vrot.lane.b32.xlu0 %v9714_v43, %s15686_s28 }
 0x112   :  { %295 = vrot.lane.b32.xlu1 %v9714_v43, %s15278_s6 }
 0x113   :  { %335 = vrot.lane.b32.xlu0 %v9716_v44, %s15686_s28 }
 0x116   :  { %293 = vrot.lane.b32.xlu1 %v9716_v44, %s15278_s6 }
 0x117   :  { %297 = vrot.lane.b32.xlu0 %v9707_v40, %s15278_s6 }
 0x11a   :  { %255 = vrot.lane.b32.xlu1 %v9707_v40, %s15631_s14 }
 0x11b   :  { %253 = vrot.lane.b32.xlu0 %v9714_v43, %s15631_s14 }
 0x11e   :  { %526 = vrot.lane.b32.xlu1 %v9718_v45, %s15280_s27 }
 0x11f   :  { %251 = vrot.lane.b32.xlu0 %v9716_v44, %s15631_s14 }
 0x122   :  { %530 = vrot.lane.b32.xlu1 %v9705_v39, %s15280_s27 }
 0x123   :  { %528 = vrot.lane.b32.xlu0 %v9703_v38, %s15280_s27 }
 0x126   :  { %479 = vrot.lane.b32.xlu1 %v9718_v45, %s15276_s2 }
 0x127   :  { %532 = vrot.lane.b32.xlu0 %v512_v48, %s15280_s27  ;;  %s15678_s27 = smov 89  }
 0x12a   :  { %483 = vrot.lane.b32.xlu1 %v9705_v39, %s15276_s2 }
 0x12b   :  { %481 = vrot.lane.b32.xlu0 %v9703_v38, %s15276_s2 }
 0x12e   :  { %434 = vrot.lane.b32.xlu1 %v9703_v38, %s15639_s29 }
 0x12f   :  { %485 = vrot.lane.b32.xlu0 %v512_v48, %s15276_s2  ;;  %s9417_s2 = smov 57  }
 0x132   :  { %438 = vrot.lane.b32.xlu1 %v512_v48, %s15639_s29 }
 0x133   :  { %432 = vrot.lane.b32.xlu0 %v9718_v45, %s15639_s29 }
 0x136   :  { %385 = vrot.lane.b32.xlu1 %v9718_v45, %s15282_s7 }
 0x137   :  { %436 = vrot.lane.b32.xlu0 %v9705_v39, %s15639_s29  ;;  %s15649_s29 = smov 101  }
 0x13a   :  { %389 = vrot.lane.b32.xlu1 %v9705_v39, %s15282_s7 }
 0x13b   :  { %387 = vrot.lane.b32.xlu0 %v9703_v38, %s15282_s7 }
 0x13e   :  { %343 = vrot.lane.b32.xlu1 %v9703_v38, %s15686_s28 }
 0x13f   :  { %391 = vrot.lane.b32.xlu0 %v512_v48, %s15282_s7  ;;  %s15643_s7 = smov 97  }
 0x142   :  { %299 = vrot.lane.b32.xlu1 %v9718_v45, %s15278_s6 }
 0x143   :  { %341 = vrot.lane.b32.xlu0 %v9718_v45, %s15686_s28 }
 0x146   :  { %345 = vrot.lane.b32.xlu1 %v9705_v39, %s15686_s28 }
 0x147   :  { %301 = vrot.lane.b32.xlu0 %v9703_v38, %s15278_s6 }
 0x14a   :  { %257 = vrot.lane.b32.xlu1 %v9718_v45, %s15631_s14 }
 0x14b   :  { %259 = vrot.lane.b32.xlu0 %v9703_v38, %s15631_s14 }
 0x14e   :  { %303 = vrot.lane.b32.xlu1 %v9705_v39, %s15278_s6  ;;  %s15284_s6 = smov 81  }
 0x14f   :  { %896 = vrot.lane.b32.xlu0 %v882_v54, %s9413_s0 }
 0x152   :  { %261 = vrot.lane.b32.xlu1 %v9705_v39, %s15631_s14 }
 0x153   :  { %798 = vrot.lane.b32.xlu0 %v882_v54, %s9414_s3 }
 0x156   :  { %945 = vrot.lane.b32.xlu1 %v882_v54, %s9415_s4 }
 0x157   :  { %752 = vrot.lane.b32.xlu0 %v882_v54, %s15286_s25 }
 0x15a   :  { %847 = vrot.lane.b32.xlu1 %v882_v54, %s9417_s2 }
 0x15b   :  { %708 = vrot.lane.b32.xlu0 %v882_v54, %s15284_s6 }
 0x15e   :  { %947 = vrot.lane.b32.xlu1 %v9852_v55, %s9415_s4 }
 0x15f   :  { %664 = vrot.lane.b32.xlu0 %v882_v54, %s15678_s27 }
 0x162   :  { %619 = vrot.lane.b32.xlu1 %v882_v54, %s15643_s7  ;;  %v936_v54 = vld [vmem:[#allocation2 + $0x28] sm:$0xff] }
 0x163   :  { %949 = vrot.lane.b32.xlu0 %v9857_v56, %s9415_s4 }
 0x166   :  { %900 = vrot.lane.b32.xlu1 %v9857_v56, %s9413_s0 }
 0x167   :  { %898 = vrot.lane.b32.xlu0 %v9852_v55, %s9413_s0 }
 0x168   :  { %v9866_v57 = vpop.permute.xlu1 %524 }
 0x169   :  { %v523_v58 = vpop.permute.xlu0 %522 }
 0x16a   :  { %v536_v60 = vsel %vm15290_vm9, %v523_v58, %v9866_v57  ;;  %953 = vrot.lane.b32.xlu1 %v9868_v59, %s9415_s4 }
 0x16b   :  { %951 = vrot.lane.b32.xlu0 %v9872_v61, %s9415_s4  ;;  %1097 = vmatprep.subr.mxu0 %v536_v60 }
 0x16c   :  { %v476_v62 = vpop.permute.xlu1 %475 }
 0x16d   :  { %v521_v63 = vpop.permute.xlu0 %520 }
 0x16e   :  { %v535_v1 = vsel %vm15290_vm9, %v521_v63, %v523_v58  ;;  %851 = vrot.lane.b32.xlu1 %v9857_v56, %s9417_s2 }
 0x16f   :  { %849 = vrot.lane.b32.xlu0 %v9852_v55, %s9417_s2  ;;  %1098 = vmatpush1.msra.mxu0 %v535_v1 }
 0x170   :  { %v474_v2 = vpop.permute.xlu1 %473 }
 0x171   :  { %v9883_v3 = vpop.permute.xlu0 %477  ;;  %v488_v4 = vsel %vm15288_vm10, %v474_v2, %v476_v62 }
 0x172   :  { %v489_v5 = vsel %vm15288_vm10, %v476_v62, %v9883_v3  ;;  %904 = vrot.lane.b32.xlu1 %v9868_v59, %s9413_s0 }
 0x173   :  { %902 = vrot.lane.b32.xlu0 %v9872_v61, %s9413_s0  ;;  %1099 = vmatprep.subr.mxu0 %v489_v5 }
 0x174   :  { %v9892_v6 = vpop.permute.xlu1 %430  ;;  %1100 = vmatpush1.msra.mxu0 %v488_v4 }
 0x175   :  { %v429_v7 = vpop.permute.xlu0 %428 }
 0x176   :  { %v442_v8 = vsel %vm15293_vm11, %v429_v7, %v9892_v6  ;;  %802 = vrot.lane.b32.xlu1 %v9857_v56, %s9414_s3 }
 0x177   :  { %800 = vrot.lane.b32.xlu0 %v9852_v55, %s9414_s3  ;;  %1101 = vmatprep.subr.mxu0 %v442_v8 }
 0x178   :  { %v382_v9 = vpop.permute.xlu1 %381 }
 0x179   :  { %v427_v10 = vpop.permute.xlu0 %426 }
 0x17a   :  { %v441_v11 = vsel %vm15293_vm11, %v427_v10, %v429_v7  ;;  %855 = vrot.lane.b32.xlu1 %v9868_v59, %s9417_s2 }
 0x17b   :  { %853 = vrot.lane.b32.xlu0 %v9872_v61, %s9417_s2  ;;  %1102 = vmatpush1.msra.mxu0 %v441_v11 }
 0x17c   :  { %v380_v12 = vpop.permute.xlu1 %379 }
 0x17d   :  { %v9905_v13 = vpop.permute.xlu0 %383  ;;  %v394_v14 = vsel %vm15291_vm12, %v380_v12, %v382_v9 }
 0x17e   :  { %v395_v15 = vsel %vm15291_vm12, %v382_v9, %v9905_v13  ;;  %756 = vrot.lane.b32.xlu1 %v9857_v56, %s15286_s25 }
 0x17f   :  { %754 = vrot.lane.b32.xlu0 %v9852_v55, %s15286_s25  ;;  %1103 = vmatprep.subr.mxu0 %v395_v15 }
 0x180   :  { %v9914_v16 = vpop.permute.xlu1 %339  ;;  %1104 = vmatpush1.msra.mxu0 %v394_v14 }
 0x181   :  { %v338_v17 = vpop.permute.xlu0 %337 }
 0x182   :  { %v349_v18 = vsel %vm15292_vm13, %v338_v17, %v9914_v16  ;;  %806 = vrot.lane.b32.xlu1 %v9868_v59, %s9414_s3 }
 0x183   :  { %804 = vrot.lane.b32.xlu0 %v9872_v61, %s9414_s3  ;;  %1105 = vmatprep.subr.mxu0 %v349_v18 }
 0x184   :  { %v296_v19 = vpop.permute.xlu1 %295 }
 0x185   :  { %v336_v20 = vpop.permute.xlu0 %335 }
 0x186   :  { %v348_v21 = vsel %vm15292_vm13, %v336_v20, %v338_v17  ;;  %712 = vrot.lane.b32.xlu1 %v9857_v56, %s15284_s6 }
 0x187   :  { %710 = vrot.lane.b32.xlu0 %v9852_v55, %s15284_s6  ;;  %1106 = vmatpush1.msra.mxu0 %v348_v21 }
 0x188   :  { %v294_v22 = vpop.permute.xlu1 %293 }
 0x189   :  { %v9929_v24 = vpop.permute.xlu0 %297  ;;  %v306_v25 = vsel %vm15289_vm14, %v294_v22, %v296_v19 }
 0x18a   :  { %v307_v26 = vsel %vm15289_vm14, %v296_v19, %v9929_v24  ;;  %760 = vrot.lane.b32.xlu1 %v9868_v59, %s15286_s25 }
 0x18b   :  { %758 = vrot.lane.b32.xlu0 %v9872_v61, %s15286_s25  ;;  %1107 = vmatprep.subr.mxu0 %v307_v26 }
 0x18c   :  { %v9938_v27 = vpop.permute.xlu1 %255  ;;  %1108 = vmatpush1.msra.mxu0 %v306_v25 }
 0x18d   :  { %v254_v28 = vpop.permute.xlu0 %253 }
 0x18e   :  { %v265_v29 = vsel %vm15303_vm15, %v254_v28, %v9938_v27  ;;  %668 = vrot.lane.b32.xlu1 %v9857_v56, %s15678_s27 }
 0x18f   :  { %666 = vrot.lane.b32.xlu0 %v9852_v55, %s15678_s27  ;;  %1109 = vmatprep.subr.mxu0 %v265_v29 }
 0x190   :  { %v527_v30 = vpop.permute.xlu1 %526 }
 0x191   :  { %v537_v31 = vsel %vm15290_vm9, %v9866_v57, %v527_v30  ;;  %v252_v32 = vpop.permute.xlu0 %251 }
 0x192   :  { %v264_v33 = vsel %vm15303_vm15, %v252_v32, %v254_v28  ;;  %716 = vrot.lane.b32.xlu1 %v9868_v59, %s15284_s6 }
 0x193   :  { %714 = vrot.lane.b32.xlu0 %v9872_v61, %s15284_s6  ;;  %1110 = vmatpush1.msra.mxu0 %v264_v33 }
 0x194   :  { %v531_v35 = vpop.permute.xlu1 %530  ;;  %1111 = vmatprep.subr.mxu0 %v9714_v43 }
 0x195   :  { %v529_v36 = vpop.permute.xlu0 %528  ;;  %1112 = vmatpush1.msra.mxu0 %v9716_v44 }
 0x196   :  { %v538_v37 = vsel %vm15290_vm9, %v527_v30, %v529_v36  ;;  %v9959_v38 = vsel %vm15290_vm9, %v529_v36, %v531_v35  ;;  %623 = vrot.lane.b32.xlu1 %v9857_v56, %s15643_s7  ;;  %7818 = vmatmul.mubr.msk.f32.vlgmr.msra.gmra.mxu0 %vm15296_vm0, %v9953_v34 }
 0x197   :  { %621 = vrot.lane.b32.xlu0 %v9852_v55, %s15643_s7  ;;  %1168 = vmatprep.subr.mxu1 %v538_v37 }
 0x198   :  { %v480_v39 = vpop.permute.xlu1 %479  ;;  %1169 = vmatpush1.msra.mxu1 %v537_v31  ;;  %1287 = vmatprep.mubr.f32.mxu0 %v15379_v53 }
 0x199   :  { %v490_v41 = vsel %vm15288_vm10, %v9883_v3, %v480_v39  ;;  %v533_v42 = vpop.permute.xlu0 %532 }
 0x19a   :  { %v540_v43 = vsel %vm15290_vm9, %v531_v35, %v533_v42  ;;  %672 = vrot.lane.b32.xlu1 %v9868_v59, %s15678_s27  ;;  %vm910_vm9 = vcmask 400384  }
 0x19b   :  { %552 = vst.msk [vmem:[#allocation3 + $0x2c8] sm:$0xff] %vm15301_vm8, %v540_v43  ;;  %670 = vrot.lane.b32.xlu0 %v9872_v61, %s15678_s27 }
 0x19c   :  { %v484_v44 = vpop.permute.xlu1 %483 }
 0x19d   :  { %v482_v46 = vpop.permute.xlu0 %481 }
 0x19e   :  { %v491_v47 = vsel %vm15288_vm10, %v480_v39, %v482_v46  ;;  %v9978_v48 = vsel %vm15288_vm10, %v482_v46, %v484_v44  ;;  %627 = vrot.lane.b32.xlu1 %v9868_v59, %s15643_s7 }
 0x19f   :  { %625 = vrot.lane.b32.xlu0 %v9872_v61, %s15643_s7  ;;  %1170 = vmatprep.subr.mxu1 %v491_v47 }
 0x1a0   :  { %v435_v49 = vpop.permute.xlu1 %434  ;;  %1171 = vmatpush1.msra.mxu1 %v490_v41 }
 0x1a1   :  { %v486_v50 = vpop.permute.xlu0 %485 }
 0x1a2   :  { %v493_v52 = vsel %vm15288_vm10, %v484_v44, %v486_v50  ;;  %957 = vrot.lane.b32.xlu1 %v937_v51, %s9415_s4  ;;  %vm643_vm10 = vcmask 1048328  }
 0x1a3   :  { %505 = vst.msk [vmem:[#allocation3 + $0x268] sm:$0xff] %vm15301_vm8, %v493_v52  ;;  %955 = vrot.lane.b32.xlu0 %v936_v54, %s9415_s4  ;;  %s15655_s4 = smov 116  }
 0x1a4   :  { %v439_v55 = vpop.permute.xlu1 %438 }
 0x1a5   :  { %v433_v56 = vpop.permute.xlu0 %432 }
 0x1a6   :  { %v443_v57 = vsel %vm15293_vm11, %v9892_v6, %v433_v56  ;;  %v444_v58 = vsel %vm15293_vm11, %v433_v56, %v435_v49  ;;  %908 = vrot.lane.b32.xlu1 %v937_v51, %s9413_s0 }
 0x1a7   :  { %906 = vrot.lane.b32.xlu0 %v936_v54, %s9413_s0  ;;  %1172 = vmatprep.subr.mxu1 %v444_v58  ;;  %v985_v58 = vld [vmem:[#allocation3 + $0x20] sm:$0xff]  ;;  %s15665_s0 = smov 114  }
 0x1a8   :  { %v386_v59 = vpop.permute.xlu1 %385  ;;  %1173 = vmatpush1.msra.mxu1 %v443_v57 }
 0x1a9   :  { %v396_v60 = vsel %vm15291_vm12, %v9905_v13, %v386_v59  ;;  %v437_v61 = vpop.permute.xlu0 %436 }
 0x1aa   :  { %v9996_v62 = vsel %vm15293_vm11, %v435_v49, %v437_v61  ;;  %v446_v63 = vsel %vm15293_vm11, %v437_v61, %v439_v55  ;;  %859 = vrot.lane.b32.xlu1 %v937_v51, %s9417_s2  ;;  %vm15297_vm11 = vcmask 662528  }
 0x1ab   :  { %458 = vst.msk [vmem:[#allocation3 + $0x208] sm:$0xff] %vm15301_vm8, %v446_v63  ;;  %857 = vrot.lane.b32.xlu0 %v936_v54, %s9417_s2  ;;  %s15671_s2 = smov 113  }
 0x1ac   :  { %v390_v1 = vpop.permute.xlu1 %389 }
 0x1ad   :  { %v388_v2 = vpop.permute.xlu0 %387 }
 0x1ae   :  { %v397_v3 = vsel %vm15291_vm12, %v386_v59, %v388_v2  ;;  %v10004_v4 = vsel %vm15291_vm12, %v388_v2, %v390_v1  ;;  %810 = vrot.lane.b32.xlu1 %v937_v51, %s9414_s3 }
 0x1af   :  { %808 = vrot.lane.b32.xlu0 %v936_v54, %s9414_s3  ;;  %1174 = vmatprep.subr.mxu1 %v397_v3  ;;  %s15834_s3 = sld [smem:[#allocation114_spill]] }
 0x1b0   :  { %v344_v5 = vpop.permute.xlu1 %343  ;;  %1175 = vmatpush1.msra.mxu1 %v396_v60 }
 0x1b1   :  { %v392_v6 = vpop.permute.xlu0 %391 }
 0x1b2   :  { %v399_v7 = vsel %vm15291_vm12, %v390_v1, %v392_v6  ;;  %718 = vrot.lane.b32.xlu1 %v936_v54, %s15284_s6  ;;  %vm812_vm12 = vcmask 531456   ;;  %s9423_s6 = smov 31  }
 0x1b3   :  { %411 = vst.msk [vmem:[#allocation3 + $0x1a8] sm:$0xff] %vm15301_vm8, %v399_v7  ;;  %762 = vrot.lane.b32.xlu0 %v936_v54, %s15286_s25  ;;  %s15835_s25 = sld [smem:[#allocation113_spill]] }
 0x1b4   :  { %v300_v8 = vpop.permute.xlu1 %299 }
 0x1b5   :  { %v308_v9 = vsel %vm15289_vm14, %v9929_v24, %v300_v8  ;;  %v342_v10 = vpop.permute.xlu0 %341  ;;  %v1525_v13 = vld [vmem:[%s15834_s3] sm:$0xff]  ;;  %s15657_s3 = smov 115  }
 0x1b6   :  { %v350_v11 = vsel %vm15292_vm13, %v9914_v16, %v342_v10  ;;  %v351_v12 = vsel %vm15292_vm13, %v342_v10, %v344_v5  ;;  %629 = vrot.lane.b32.xlu1 %v936_v54, %s15643_s7 }
 0x1b7   :  { %674 = vrot.lane.b32.xlu0 %v936_v54, %s15678_s27  ;;  %1176 = vmatprep.subr.mxu1 %v351_v12 }
 0x1b8   :  { %v346_v14 = vpop.permute.xlu1 %345  ;;  %1177 = vmatpush1.msra.mxu1 %v350_v11 }
 0x1b9   :  { %v1507_v15 = vld [vmem:[%s15835_s25] sm:$0xff]  ;;  %v10026_v17 = vsel %vm15292_vm13, %v344_v5, %v346_v14  ;;  %364 = vst.msk [vmem:[#allocation3 + $0x148] sm:$0xff] %vm15301_vm8, %v346_v14  ;;  %v302_v16 = vpop.permute.xlu0 %301  ;;  %vm15299_vm13 = vcmask 596992   ;;  %s15661_s25 = smov 118  }
 0x1ba   :  { %v309_v18 = vsel %vm15289_vm14, %v300_v8, %v302_v16  ;;  %1528 = vperm.xlu1 %8957, %v1525_v13  }
 0x1bb   :  { %1178 = vmatprep.subr.mxu1 %v309_v18  ;;  %1510 = vperm.xlu0 %8956, %v1507_v15  }
 0x1bc   :  { %v258_v19 = vpop.permute.xlu1 %257  ;;  %1179 = vmatpush1.msra.mxu1 %v308_v9 }
 0x1bd   :  { %v266_v20 = vsel %vm15303_vm15, %v9938_v27, %v258_v19  ;;  %v260_v21 = vpop.permute.xlu0 %259 }
 0x1be   :  { %v267_v22 = vsel %vm15303_vm15, %v258_v19, %v260_v21 }
 0x1bf   :  { %1180 = vmatprep.subr.mxu1 %v267_v22 }
 0x1c0   :  { %v304_v24 = vpop.permute.xlu1 %303  ;;  %1181 = vmatpush1.msra.mxu1 %v266_v20 }
 0x1c1   :  { %v310_v25 = vsel %vm15289_vm14, %v302_v16, %v304_v24  ;;  %322 = vst.msk [vmem:[#allocation3 + $0xe8] sm:$0xff] %vm15301_vm8, %v304_v24  ;;  %v897_v26 = vpop.permute.xlu0 %896  ;;  %1182 = vmatprep.subr.mxu1 %v9718_v45  ;;  %vm959_vm14 = vcmask 334848  }
 0x1c2   :  { %924 = vst.msk [vmem:[#allocation3 + $0x268] sm:$0xff] %vm643_vm10, %v897_v26  ;;  %1183 = vmatpush1.msra.mxu1 %v9707_v40 }
 0x1c3   :  { %7819 = vmatmul.mubr.msk.f32.vlgmr.msra.gmra.mxu1 %vm15296_vm0, %v9953_v34 }
 0x1c4   :  { %v262_v27 = vpop.permute.xlu1 %261  ;;  %1358 = vmatprep.mubr.f32.mxu1 %v15379_v53 }
 0x1c5   :  { %v268_v28 = vsel %vm15303_vm15, %v260_v21, %v262_v27  ;;  %280 = vst.msk [vmem:[#allocation3 + $0x88] sm:$0xff] %vm15301_vm8, %v262_v27  ;;  %v10043_v29 = vpop.permute.xlu0 %798 }
 0x1c6   :  { %826 = vst.msk [vmem:[#allocation3 + $0x1a8] sm:$0xff] %vm643_vm10, %v10043_v29 }
 0x1c8   :  { %v946_v45 = vpop.permute.xlu1 %945 }
 0x1c9   :  { %973 = vst.msk [vmem:[#allocation3 + $0x2c8] sm:$0xff] %vm643_vm10, %v946_v45  ;;  %v10048_v30 = vpop.permute.xlu0 %752  ;;  %v1058_v37 = vld [vmem:[#allocation3 + $0x268] sm:$0xff] }
 0x1ca   :  { %777 = vst.msk [vmem:[#allocation3 + $0x148] sm:$0xff] %vm643_vm10, %v10048_v30 }
 0x1cc   :  { %v848_v40 = vpop.permute.xlu1 %847 }
 0x1cd   :  { %875 = vst.msk [vmem:[#allocation3 + $0x208] sm:$0xff] %vm643_vm10, %v848_v40  ;;  %v10053_v31 = vpop.permute.xlu0 %708  ;;  %v1034_v44 = vld [vmem:[#allocation3 + $0x1a8] sm:$0xff] }
 0x1ce   :  { %733 = vst.msk [vmem:[#allocation3 + $0xe8] sm:$0xff] %vm643_vm10, %v10053_v31 }
 0x1d0   :  { %v948_v32 = vpop.permute.xlu1 %947  ;;  %v1070_v33 = vld [vmem:[#allocation3 + $0x2c8] sm:$0xff] }
 0x1d1   :  { %v960_v35 = vsel %vm959_vm14, %v946_v45, %v948_v32  ;;  %v10058_v36 = vpop.permute.xlu0 %664  ;;  %1239 = vmatprep.subr.mxu0 %v1070_v33  ;;  %v1022_v46 = vld [vmem:[#allocation3 + $0x148] sm:$0xff] }
 0x1d2   :  { %689 = vst.msk [vmem:[#allocation3 + $0x88] sm:$0xff] %vm643_vm10, %v10058_v36  ;;  %1240 = vmatpush1.msra.mxu0 %v9959_v38 }
 0x1d3   :  { %1241 = vmatprep.subr.mxu0 %v1058_v37 }
 0x1d4   :  { %v10063_v39 = vpop.permute.xlu1 %619  ;;  %1242 = vmatpush1.msra.mxu0 %v9978_v48  ;;  %v1046_v41 = vld [vmem:[#allocation3 + $0x208] sm:$0xff] }
 0x1d5   :  { %v950_v42 = vpop.permute.xlu0 %949  ;;  %644 = vst.msk [vmem:[#allocation3 + $0x28] sm:$0xff] %vm643_vm10, %v10063_v39  ;;  %1243 = vmatprep.subr.mxu0 %v1046_v41  ;;  %v1010_v50 = vld [vmem:[#allocation3 + $0xe8] sm:$0xff]  ;;  %vm861_vm10 = vcmask 465920  }
 0x1d6   :  { %v961_v43 = vsel %vm959_vm14, %v948_v32, %v950_v42  ;;  %1244 = vmatpush1.msra.mxu0 %v9996_v62 }
 0x1d7   :  { %1245 = vmatprep.subr.mxu0 %v1034_v44  ;;  %1310 = vmatprep.subr.mxu1 %v961_v43 }
 0x1d8   :  { %v901_v38 = vpop.permute.xlu1 %900  ;;  %1246 = vmatpush1.msra.mxu0 %v10004_v4  ;;  %1311 = vmatpush1.msra.mxu1 %v960_v35 }
 0x1d9   :  { %v899_v47 = vpop.permute.xlu0 %898  ;;  %1247 = vmatprep.subr.mxu0 %v1022_v46  ;;  %v998_v52 = vld [vmem:[#allocation3 + $0x88] sm:$0xff] }
 0x1da   :  { %v911_v48 = vsel %vm910_vm9, %v897_v26, %v899_v47  ;;  %v912_v49 = vsel %vm910_vm9, %v899_v47, %v901_v38  ;;  %1248 = vmatpush1.msra.mxu0 %v10026_v17 }
 0x1db   :  { %1249 = vmatprep.subr.mxu0 %v1010_v50  ;;  %1312 = vmatprep.subr.mxu1 %v912_v49 }
 0x1dc   :  { %v10074_v51 = vpop.permute.xlu1 %953  ;;  %1250 = vmatpush1.msra.mxu0 %v310_v25  ;;  %1313 = vmatpush1.msra.mxu1 %v911_v48  ;;  %v986_v57 = vld [vmem:[#allocation3 + $0x28] sm:$0xff] }
 0x1dd   :  { %v952_v54 = vpop.permute.xlu0 %951  ;;  %1251 = vmatprep.subr.mxu0 %v998_v52 }
 0x1de   :  { %v962_v55 = vsel %vm959_vm14, %v950_v42, %v952_v54  ;;  %v963_v56 = vsel %vm959_vm14, %v952_v54, %v10074_v51  ;;  %1252 = vmatpush1.msra.mxu0 %v268_v28 }
 0x1df   :  { %1253 = vmatprep.subr.mxu0 %v986_v57 }
 0x1e0   :  { %v852_v59 = vpop.permute.xlu1 %851  ;;  %1254 = vmatpush1.msra.mxu0 %v985_v58 }
 0x1e1   :  { %v850_v60 = vpop.permute.xlu0 %849  ;;  %1381 = vmatprep.subr.mxu0 %v963_v56  ;;  %7820 = vmatmul.mubr.msk.f32.vlgmr.msra.gmra.mxu0 %vm15296_vm0, %v9953_v34 }
 0x1e2   :  { %v862_v61 = vsel %vm861_vm10, %v848_v40, %v850_v60  ;;  %v863_v62 = vsel %vm861_vm10, %v850_v60, %v852_v59  ;;  %1382 = vmatpush1.msra.mxu0 %v962_v55  ;;  %1429 = vmatprep.mubr.f32.mxu0 %v15379_v53 }
 0x1e3   :  { %1314 = vmatprep.subr.mxu1 %v863_v62  ;;  %v1649_v62 = vand.u32 127, %v156_v0 }
 0x1e4   :  { %v10084_v63 = vpop.permute.xlu1 %904  ;;  %1315 = vmatpush1.msra.mxu1 %v862_v61 }
 0x1e5   :  { %v903_v1 = vpop.permute.xlu0 %902 }
 0x1e6   :  { %v913_v2 = vsel %vm910_vm9, %v901_v38, %v903_v1  ;;  %v914_v3 = vsel %vm910_vm9, %v903_v1, %v10084_v63 }
 0x1e7   :  { %1383 = vmatprep.subr.mxu0 %v914_v3 }
 0x1e8   :  { %v803_v4 = vpop.permute.xlu1 %802  ;;  %1384 = vmatpush1.msra.mxu0 %v913_v2 }
 0x1e9   :  { %v801_v5 = vpop.permute.xlu0 %800 }
 0x1ea   :  { %v813_v6 = vsel %vm812_vm12, %v10043_v29, %v801_v5  ;;  %v814_v7 = vsel %vm812_vm12, %v801_v5, %v803_v4 }
 0x1eb   :  { %1316 = vmatprep.subr.mxu1 %v814_v7 }
 0x1ec   :  { %v10092_v8 = vpop.permute.xlu1 %855  ;;  %1317 = vmatpush1.msra.mxu1 %v813_v6 }
 0x1ed   :  { %v854_v9 = vpop.permute.xlu0 %853 }
 0x1ee   :  { %v864_v10 = vsel %vm861_vm10, %v852_v59, %v854_v9  ;;  %v865_v11 = vsel %vm861_vm10, %v854_v9, %v10092_v8 }
 0x1ef   :  { %1385 = vmatprep.subr.mxu0 %v865_v11 }
 0x1f0   :  { %v757_v12 = vpop.permute.xlu1 %756  ;;  %1386 = vmatpush1.msra.mxu0 %v864_v10 }
 0x1f1   :  { %v755_v13 = vpop.permute.xlu0 %754 }
 0x1f2   :  { %v765_v14 = vsel %vm15299_vm13, %v10048_v30, %v755_v13  ;;  %v766_v15 = vsel %vm15299_vm13, %v755_v13, %v757_v12 }
 0x1f3   :  { %1318 = vmatprep.subr.mxu1 %v766_v15 }
 0x1f4   :  { %v10100_v17 = vpop.permute.xlu1 %806  ;;  %1319 = vmatpush1.msra.mxu1 %v765_v14 }
 0x1f5   :  { %v805_v16 = vpop.permute.xlu0 %804 }
 0x1f6   :  { %v815_v18 = vsel %vm812_vm12, %v803_v4, %v805_v16  ;;  %v816_v19 = vsel %vm812_vm12, %v805_v16, %v10100_v17  ;;  %v1650_v4 = vadd.s32 128, %v1649_v62 }
 0x1f7   :  { %1387 = vmatprep.subr.mxu0 %v816_v19 }
 0x1f8   :  { %v713_v20 = vpop.permute.xlu1 %712  ;;  %1388 = vmatpush1.msra.mxu0 %v815_v18  ;;  %v10157_v13 = vmul.u32 3, %v1650_v4 }
 0x1f9   :  { %v711_v21 = vpop.permute.xlu0 %710 }
 0x1fa   :  { %v721_v22 = vsel %vm15297_vm11, %v10053_v31, %v711_v21  ;;  %v722_v24 = vsel %vm15297_vm11, %v711_v21, %v713_v20  ;;  %v15487_v21 = vmov 1.0  }
 0x1fb   :  { %1320 = vmatprep.subr.mxu1 %v722_v24 }
 0x1fc   :  { %v10108_v25 = vpop.permute.xlu1 %760  ;;  %1321 = vmatpush1.msra.mxu1 %v721_v22 }
 0x1fd   :  { %v759_v26 = vpop.permute.xlu0 %758 }
 0x1fe   :  { %v767_v27 = vsel %vm15299_vm13, %v757_v12, %v759_v26  ;;  %v768_v28 = vsel %vm15299_vm13, %v759_v26, %v10108_v25  ;;  %v10155_v12 = vmul.u32 3, %v1649_v62 }
 0x1ff   :  { %1389 = vmatprep.subr.mxu0 %v768_v28 }
 0x200   :  { %v669_v29 = vpop.permute.xlu1 %668  ;;  %1390 = vmatpush1.msra.mxu0 %v767_v27 }
 0x201   :  { %v667_v45 = vpop.permute.xlu0 %666 }
 0x202   :  { %v677_v30 = vsel %vm15298_vm4, %v10058_v36, %v667_v45  ;;  %v678_v40 = vsel %vm15298_vm4, %v667_v45, %v669_v29 }
 0x203   :  { %1322 = vmatprep.subr.mxu1 %v678_v40 }
 0x204   :  { %v717_v31 = vpop.permute.xlu1 %716  ;;  %1323 = vmatpush1.msra.mxu1 %v677_v30 }
 0x205   :  { %v715_v32 = vpop.permute.xlu0 %714 }
 0x206   :  { %v723_v33 = vsel %vm15297_vm11, %v713_v20, %v715_v32  ;;  %v724_v35 = vsel %vm15297_vm11, %v715_v32, %v717_v31 }
 0x207   :  { %1391 = vmatprep.subr.mxu0 %v724_v35 }
 0x208   :  { %v624_v37 = vpop.permute.xlu1 %623  ;;  %1392 = vmatpush1.msra.mxu0 %v723_v33  ;;  %v15845_v33 = vmov 0 }
 0x209   :  { %v622_v41 = vpop.permute.xlu0 %621 }
 0x20a   :  { %v631_v42 = vsel %vm15301_vm8, %v10063_v39, %v622_v41  ;;  %v632_v43 = vsel %vm15301_vm8, %v622_v41, %v624_v37  ;;  %v15848_v41 = vmov 0 }
 0x20b   :  { %1324 = vmatprep.subr.mxu1 %v632_v43 }
 0x20c   :  { %v10121_v36 = vpop.permute.xlu1 %672  ;;  %1325 = vmatpush1.msra.mxu1 %v631_v42  ;;  %v15851_v42 = vmov 0 }
 0x20d   :  { %v671_v44 = vpop.permute.xlu0 %670  ;;  %7821 = vmatmul.mubr.msk.f32.vlgmr.msra.gmra.mxu1 %vm15296_vm0, %v9953_v34 }
 0x20e   :  { %v679_v38 = vsel %vm15298_vm4, %v669_v29, %v671_v44  ;;  %v680_v46 = vsel %vm15298_vm4, %v671_v44, %v10121_v36  ;;  %1500 = vmatprep.mubr.f32.mxu1 %v15379_v53  ;;  %v15854_v44 = vmov 0 }
 0x20f   :  { %1393 = vmatprep.subr.mxu0 %v680_v46 }
 0x210   :  { %v628_v47 = vpop.permute.xlu1 %627  ;;  %1394 = vmatpush1.msra.mxu0 %v679_v38  ;;  %v15857_v38 = vmov 0 }
 0x211   :  { %v626_v39 = vpop.permute.xlu0 %625 }
 0x212   :  { %v633_v48 = vsel %vm15301_vm8, %v624_v37, %v626_v39  ;;  %v634_v49 = vsel %vm15301_vm8, %v626_v39, %v628_v47  ;;  %v15861_v39 = vmov 0 }
 0x213   :  { %1395 = vmatprep.subr.mxu0 %v634_v49  ;;  %v15865_v49 = vmov 0 }
 0x214   :  { %v958_v50 = vpop.permute.xlu1 %957  ;;  %1396 = vmatpush1.msra.mxu0 %v633_v48 }
 0x215   :  { %v956_v52 = vpop.permute.xlu0 %955  ;;  %7822 = vmatmul.mubr.msk.f32.vlgmr.msra.gmra.mxu0 %vm15296_vm0, %v9953_v34 }
 0x216   :  { %v964_v54 = vsel %vm959_vm14, %v10074_v51, %v956_v52  ;;  %v965_v55 = vsel %vm959_vm14, %v956_v52, %v958_v50 }
 0x217   :  { %979 = vst.msk [vmem:[#allocation3 + $0x2f8] sm:$0xff] %vm15300_vm6, %v965_v55 }
 0x218   :  { %v909_v56 = vpop.permute.xlu1 %908 }
 0x219   :  { %v907_v57 = vpop.permute.xlu0 %906 }
 0x21a   :  { %v915_v58 = vsel %vm910_vm9, %v10084_v63, %v907_v57  ;;  %v916_v59 = vsel %vm910_vm9, %v907_v57, %v909_v56 }
 0x21b   :  { %930 = vst.msk [vmem:[#allocation3 + $0x298] sm:$0xff] %vm15300_vm6, %v916_v59 }
 0x21c   :  { %v860_v60 = vpop.permute.xlu1 %859 }
 0x21d   :  { %v858_v61 = vpop.permute.xlu0 %857 }
 0x21e   :  { %v866_v51 = vsel %vm861_vm10, %v10092_v8, %v858_v61  ;;  %v867_v1 = vsel %vm861_vm10, %v858_v61, %v860_v60  ;;  %v1076_v2 = vld [vmem:[#allocation3 + $0x2f8] sm:$0xff]  ;;  %v10151_v8 = vshrl.u32 %v156_v0, 7 }
 0x21f   :  { %881 = vst.msk [vmem:[#allocation3 + $0x238] sm:$0xff] %vm15300_vm6, %v867_v1  ;;  %1452 = vmatprep.subr.mxu1 %v1076_v2 }
 0x220   :  { %1453 = vmatpush1.msra.mxu1 %v964_v54  ;;  %v811_v3 = vpop.permute.xlu1 %810  ;;  %15836 = vst [vmem:[#allocation28_spill] sm:$0xff] %v10151_v8  ;;  %v10185_v27 = vadd.s32 112, %v10151_v8  ;;  %v10190_v28 = vadd.s32 104, %v10151_v8  ;;  %v10220_v29 = vadd.s32 88, %v10151_v8  ;;  %v10235_v45 = vadd.s32 80, %v10151_v8 }
 0x221   :  { %v809_v63 = vpop.permute.xlu0 %808  ;;  %v10250_v30 = vadd.s32 72, %v10151_v8  ;;  %v10265_v40 = vadd.s32 64, %v10151_v8  ;;  %v10295_v32 = vadd.s32 48, %v10151_v8  ;;  %v10316_v35 = vadd.s32 40, %v10151_v8 }
 0x222   :  { %v817_v5 = vsel %vm812_vm12, %v10100_v17, %v809_v63  ;;  %v818_v6 = vsel %vm812_vm12, %v809_v63, %v811_v3  ;;  %v1064_v7 = vld [vmem:[#allocation3 + $0x298] sm:$0xff]  ;;  %v10163_v17 = vadd.s32 120, %v10151_v8  ;;  %15837 = vst [vmem:[#allocation29_spill] sm:$0xff] %v10185_v27  ;;  %vm15360_vm14 = vcmp.eq.s32.totalorder %v10185_v27, %v10157_v13  ;;  %15838 = vst [vmem:[#allocation30_spill] sm:$0xff] %v10190_v28 }
 0x223   :  { %832 = vst.msk [vmem:[#allocation3 + $0x1d8] sm:$0xff] %vm15300_vm6, %v818_v6  ;;  %1454 = vmatprep.subr.mxu1 %v1064_v7  ;;  %vm15326_vm10 = vcmp.eq.s32.totalorder %v10185_v27, %v10155_v12  ;;  %15840 = vst [vmem:[#allocation32_spill] sm:$0xff] %v10220_v29  ;;  %vm15311_vm2 = vcmp.eq.s32.totalorder %v10235_v45, %v10157_v13  ;;  %vm15306_vm15 = vcmp.eq.s32.totalorder %v10235_v45, %v10155_v12 }
 0x224   :  { %1455 = vmatpush1.msra.mxu1 %v915_v58  ;;  %v719_v9 = vpop.permute.xlu1 %718  ;;  %vm1684_vm9 = vcmp.eq.s32.totalorder %v10163_v17, %v10157_v13  ;;  %vm15361_vm12 = vcmp.eq.s32.totalorder %v10163_v17, %v10155_v12  ;;  %15841 = vst [vmem:[#allocation33_spill] sm:$0xff] %v10235_v45  ;;  %15842 = vst [vmem:[#allocation34_spill] sm:$0xff] %v10250_v30  ;;  %vm15307_vm5 = vcmp.eq.s32.totalorder %v10250_v30, %v10157_v13 }
 0x225   :  { %v763_v10 = vpop.permute.xlu0 %762  ;;  %v725_v11 = vsel %vm15297_vm11, %v717_v31, %v719_v9  ;;  %739 = vst.msk [vmem:[#allocation3 + $0x118] sm:$0xff] %vm15300_vm6, %v719_v9  ;;  %8008 = vmatprep.subr.msk.mxu0 %vm1684_vm9, %v15487_v21  ;;  %vm15322_vm11 = vcmp.eq.s32.totalorder %v10190_v28, %v10155_v12  ;;  %15843 = vst [vmem:[#allocation35_spill] sm:$0xff] %v10265_v40  ;;  %vm15308_vm7 = vcmp.eq.s32.totalorder %v10250_v30, %v10155_v12 }
 0x226   :  { %v769_v14 = vsel %vm15299_vm13, %v10108_v25, %v763_v10  ;;  %783 = vst.msk [vmem:[#allocation3 + $0x178] sm:$0xff] %vm15300_vm6, %v763_v10  ;;  %v1052_v15 = vld [vmem:[#allocation3 + $0x238] sm:$0xff]  ;;  %8009 = vmatpush1.msk.msra.mxu0 %vm15361_vm12, %v15487_v21  ;;  %v10280_v31 = vadd.s32 56, %v10151_v8  ;;  %v10323_v37 = vadd.s32 32, %v10151_v8  ;;  %v10352_v43 = vadd.s32 24, %v10151_v8 }
 0x227   :  { %1456 = vmatprep.subr.mxu1 %v1052_v15  ;;  %8010 = vmatprep.subr.msk.mxu0 %vm15360_vm14, %v15487_v21  ;;  %v10388_v46 = vadd.s32 8, %v10151_v8  ;;  %v10411_v48 = vadd.s32 240, %v10151_v8  ;;  %v10448_v50 = vadd.s32 232, %v10151_v8  ;;  %v10463_v52 = vadd.s32 224, %v10151_v8 }
 0x228   :  { %1457 = vmatpush1.msra.mxu1 %v866_v51  ;;  %v630_v0 = vpop.permute.xlu1 %629  ;;  %8011 = vmatpush1.msk.msra.mxu0 %vm15326_vm10, %v15487_v21  ;;  %15844 = vst [vmem:[#allocation36_spill] sm:$0xff] %v10280_v31  ;;  %v10478_v54 = vadd.s32 216, %v10151_v8  ;;  %v10493_v55 = vadd.s32 208, %v10151_v8  ;;  %v10508_v56 = vadd.s32 200, %v10151_v8  ;;  %v10523_v58 = vadd.s32 192, %v10151_v8 }
 0x229   :  { %v675_v16 = vpop.permute.xlu0 %674  ;;  %v635_v18 = vsel %vm15301_vm8, %v628_v47, %v630_v0  ;;  %651 = vst.msk [vmem:[#allocation3 + $0x58] sm:$0xff] %vm15300_vm6, %v630_v0  ;;  %vm15315_vm8 = vcmp.eq.s32.totalorder %v10220_v29, %v10155_v12  ;;  %v10395_v47 = vadd.s32 248, %v10151_v8  ;;  %15864 = vst [vmem:[#allocation44_spill] sm:$0xff] %v10411_v48  ;;  %vm15329_vm10 = vcmp.eq.s32.totalorder %v10411_v48, %v10157_v13 }
 0x22a   :  { %v681_v19 = vsel %vm15298_vm4, %v10121_v36, %v675_v16  ;;  %695 = vst.msk [vmem:[#allocation3 + $0xb8] sm:$0xff] %vm15300_vm6, %v675_v16  ;;  %v1040_v20 = vld [vmem:[#allocation3 + $0x1d8] sm:$0xff]  ;;  %vm15317_vm6 = vcmp.eq.s32.totalorder %v10220_v29, %v10157_v13  ;;  %v10359_v36 = vadd.s32 16, %v10151_v8  ;;  %15868 = vst [vmem:[#allocation46_spill] sm:$0xff] %v10448_v50  ;;  %v10538_v59 = vadd.s32 184, %v10151_v8 }
 0x22b   :  { %1458 = vmatprep.subr.mxu1 %v1040_v20  ;;  %15860 = vst [vmem:[#allocation42_spill] sm:$0xff] %v10395_v47  ;;  %15869 = vst [vmem:[#allocation47_spill] sm:$0xff] %v10463_v52  ;;  %v10555_v62 = vadd.s32 176, %v10151_v8  ;;  %v10570_v51 = vadd.s32 168, %v10151_v8  ;;  %v10588_v3 = vadd.s32 160, %v10151_v8  ;;  %v10604_v4 = vadd.s32 152, %v10151_v8 }
 0x22c   :  { %1459 = vmatpush1.msra.mxu1 %v817_v5  ;;  %v1016_v24 = vld [vmem:[#allocation3 + $0x118] sm:$0xff]  ;;  %15870 = vst [vmem:[#allocation48_spill] sm:$0xff] %v10478_v54  ;;  %15871 = vst [vmem:[#allocation49_spill] sm:$0xff] %v10493_v55  ;;  %v10622_v7 = vadd.s32 144, %v10151_v8  ;;  %v10818_v23 = vadd.s32 304, %v10151_v8  ;;  %v10848_v53 = vadd.s32 288, %v10151_v8 }
 0x22d   :  { %v1028_v22 = vld [vmem:[#allocation3 + $0x178] sm:$0xff]  ;;  %15872 = vst [vmem:[#allocation50_spill] sm:$0xff] %v10508_v56  ;;  %15873 = vst [vmem:[#allocation51_spill] sm:$0xff] %v10523_v58 }
 0x22e   :  { %1460 = vmatprep.subr.mxu1 %v1028_v22  ;;  %15874 = vst [vmem:[#allocation52_spill] sm:$0xff] %v10538_v59  ;;  %15875 = vst [vmem:[#allocation53_spill] sm:$0xff] %v10555_v62 }
 0x22f   :  { %1461 = vmatpush1.msra.mxu1 %v769_v14  ;;  %15876 = vst [vmem:[#allocation54_spill] sm:$0xff] %v10570_v51  ;;  %15877 = vst [vmem:[#allocation55_spill] sm:$0xff] %v10588_v3  ;;  %v10641_v14 = vadd.s32 136, %v10151_v8 }
 0x230   :  { %1462 = vmatprep.subr.mxu1 %v1016_v24  ;;  %v992_v26 = vld [vmem:[#allocation3 + $0x58] sm:$0xff]  ;;  %15878 = vst [vmem:[#allocation56_spill] sm:$0xff] %v10604_v4  ;;  %15879 = vst [vmem:[#allocation57_spill] sm:$0xff] %v10622_v7 }
 0x231   :  { %1463 = vmatpush1.msra.mxu1 %v725_v11  ;;  %v1004_v25 = vld [vmem:[#allocation3 + $0xb8] sm:$0xff]  ;;  %15880 = vst [vmem:[#allocation58_spill] sm:$0xff] %v10641_v14 }
 0x232   :  { %1464 = vmatprep.subr.mxu1 %v1004_v25 }
 0x233   :  { %1465 = vmatpush1.msra.mxu1 %v681_v19 }
 0x234   :  { %1466 = vmatprep.subr.mxu1 %v992_v26  ;;  %v10696_v26 = vadd.s32 376, %v10151_v8 }
 0x235   :  { %1467 = vmatpush1.msra.mxu1 %v635_v18  ;;  %v10579_v2 = vpop.permute.xlu1 %1528  ;;  %v10663_v18 = vadd.s32 128, %v10151_v8 }
 0x236   :  { %7823 = vmatmul.mubr.msk.f32.vlgmr.msra.gmra.mxu1 %vm15296_vm0, %v9953_v34  ;;  %vm15324_vm0 = vcmp.eq.s32.totalorder %v10190_v28, %v10157_v13  ;;  %v10205_v34 = vadd.s32 96, %v10151_v8  ;;  %v10546_v60 = vpop.permute.xlu0 %1510 }
 0x237   :  { %8012 = vmatprep.subr.msk.mxu0 %vm15324_vm0, %v15487_v21  ;;  %vm15328_vm0 = vcmp.eq.s32.totalorder %v10395_v47, %v10157_v13  ;;  %15881 = vst [vmem:[#allocation59_spill] sm:$0xff] %v10663_v18 }
 0x238   :  { %15839 = vst [vmem:[#allocation31_spill] sm:$0xff] %v10205_v34  ;;  %8013 = vmatpush1.msk.msra.mxu0 %vm15322_vm11, %v15487_v21  ;;  %vm15321_vm4 = vcmp.eq.s32.totalorder %v10205_v34, %v10157_v13  ;;  %vm15319_vm13 = vcmp.eq.s32.totalorder %v10205_v34, %v10155_v12  ;;  %vm15327_vm11 = vcmp.eq.s32.totalorder %v10151_v8, %v10157_v13 }
 0x239   :  { %8014 = vmatprep.subr.msk.mxu0 %vm15321_vm4, %v15487_v21  ;;  %vm15325_vm4 = vcmp.eq.s32.totalorder %v10388_v46, %v10157_v13 }
 0x23a   :  { %8015 = vmatpush1.msk.msra.mxu0 %vm15319_vm13, %v15487_v21  ;;  %vm15323_vm13 = vcmp.eq.s32.totalorder %v10359_v36, %v10157_v13 }
 0x23b   :  { %8016 = vmatprep.subr.msk.mxu0 %vm15317_vm6, %v15487_v21  ;;  %vm15320_vm6 = vcmp.eq.s32.totalorder %v10352_v43, %v10157_v13 }
 0x23c   :  { %8017 = vmatpush1.msk.msra.mxu0 %vm15315_vm8, %v15487_v21  ;;  %vm15318_vm8 = vcmp.eq.s32.totalorder %v10323_v37, %v10157_v13 }
 0x23d   :  { %8018 = vmatprep.subr.msk.mxu0 %vm15311_vm2, %v15487_v21  ;;  %vm10311_vm2 = vcmp.eq.s32.totalorder %v10295_v32, %v10155_v12 }
 0x23e   :  { %8019 = vmatpush1.msk.msra.mxu0 %vm15306_vm15, %v15487_v21  ;;  %vm15309_vm15 = vcmp.eq.s32.totalorder %v10265_v40, %v10157_v13  ;;  %v15846_v33 = vsel %vm10311_vm2, 4294967295, %v15845_v33 }
 0x23f   :  { %8020 = vmatprep.subr.msk.mxu0 %vm15307_vm5, %v15487_v21  ;;  %vm15310_vm5 = vcmp.eq.s32.totalorder %v10265_v40, %v10155_v12  ;;  %15847 = vst [vmem:[#allocation37_spill] sm:$0xff] %v15846_v33 }
 0x240   :  { %8021 = vmatpush1.msk.msra.mxu0 %vm15308_vm7, %v15487_v21  ;;  %vm15313_vm7 = vcmp.eq.s32.totalorder %v10280_v31, %v10157_v13 }
 0x241   :  { %8022 = vmatprep.subr.msk.mxu0 %vm15309_vm15, %v15487_v21  ;;  %vm15312_vm15 = vcmp.eq.s32.totalorder %v10280_v31, %v10155_v12 }
 0x242   :  { %8023 = vmatpush1.msk.msra.mxu0 %vm15310_vm5, %v15487_v21  ;;  %vm15314_vm5 = vcmp.eq.s32.totalorder %v10295_v32, %v10157_v13 }
 0x243   :  { %8024 = vmatprep.subr.msk.mxu0 %vm15313_vm7, %v15487_v21  ;;  %vm15316_vm7 = vcmp.eq.s32.totalorder %v10316_v35, %v10157_v13 }
 0x244   :  { %8025 = vmatpush1.msk.msra.mxu0 %vm15312_vm15, %v15487_v21  ;;  %vm10330_vm15 = vcmp.eq.s32.totalorder %v10316_v35, %v10155_v12 }
 0x245   :  { %8026 = vmatprep.subr.msk.mxu0 %vm15314_vm5, %v15487_v21  ;;  %v15849_v41 = vsel %vm10330_vm15, 4294967295, %v15848_v41  ;;  %vm10342_vm5 = vcmp.eq.s32.totalorder %v10323_v37, %v10155_v12 }
 0x246   :  { %8027 = vmatpush1.msk.msra.mxu0 %vm10311_vm2, %v15487_v21  ;;  %15850 = vst [vmem:[#allocation38_spill] sm:$0xff] %v15849_v41  ;;  %v15852_v42 = vsel %vm10342_vm5, 4294967295, %v15851_v42 }
 0x247   :  { %8028 = vmatprep.subr.msk.mxu0 %vm15316_vm7, %v15487_v21  ;;  %15853 = vst [vmem:[#allocation39_spill] sm:$0xff] %v15852_v42  ;;  %vm10366_vm7 = vcmp.eq.s32.totalorder %v10352_v43, %v10155_v12 }
 0x248   :  { %8029 = vmatpush1.msk.msra.mxu0 %vm10330_vm15, %v15487_v21  ;;  %v15855_v44 = vsel %vm10366_vm7, 4294967295, %v15854_v44 }
 0x249   :  { %8030 = vmatprep.subr.msk.mxu0 %vm15318_vm8, %v15487_v21  ;;  %15856 = vst [vmem:[#allocation40_spill] sm:$0xff] %v15855_v44  ;;  %vm10378_vm8 = vcmp.eq.s32.totalorder %v10359_v36, %v10155_v12 }
 0x24a   :  { %8031 = vmatpush1.msk.msra.mxu0 %vm10342_vm5, %v15487_v21  ;;  %v15858_v38 = vsel %vm10378_vm8, 4294967295, %v15857_v38 }
 0x24b   :  { %8032 = vmatprep.subr.msk.mxu0 %vm15320_vm6, %v15487_v21  ;;  %15859 = vst [vmem:[#allocation41_spill] sm:$0xff] %v15858_v38  ;;  %vm10402_vm6 = vcmp.eq.s32.totalorder %v10388_v46, %v10155_v12 }
 0x24c   :  { %8033 = vmatpush1.msk.msra.mxu0 %vm10366_vm7, %v15487_v21  ;;  %v15862_v39 = vsel %vm10402_vm6, 4294967295, %v15861_v39 }
 0x24d   :  { %8034 = vmatprep.subr.msk.mxu0 %vm15323_vm13, %v15487_v21  ;;  %15863 = vst [vmem:[#allocation43_spill] sm:$0xff] %v15862_v39  ;;  %vm10419_vm13 = vcmp.eq.s32.totalorder %v10151_v8, %v10155_v12 }
 0x24e   :  { %8035 = vmatpush1.msk.msra.mxu0 %vm10378_vm8, %v15487_v21  ;;  %v15866_v49 = vsel %vm10419_vm13, 4294967295, %v15865_v49 }
 0x24f   :  { %8036 = vmatprep.subr.msk.mxu0 %vm15325_vm4, %v15487_v21  ;;  %15867 = vst [vmem:[#allocation45_spill] sm:$0xff] %v15866_v49  ;;  %vm15353_vm4 = vcmp.eq.s32.totalorder %v10395_v47, %v10155_v12 }
 0x250   :  { %8037 = vmatpush1.msk.msra.mxu0 %vm10402_vm6, %v15487_v21 }
 0x251   :  { %8038 = vmatprep.subr.msk.mxu0 %vm15327_vm11, %v15487_v21  ;;  %vm15330_vm11 = vcmp.eq.s32.totalorder %v10411_v48, %v10155_v12 }
 0x252   :  { %8039 = vmatpush1.msk.msra.mxu0 %vm10419_vm13, %v15487_v21 }
 0x253   :  { %8040 = vmatprep.subr.msk.mxu0 %vm15328_vm0, %v15487_v21  ;;  %vm15331_vm0 = vcmp.eq.s32.totalorder %v10448_v50, %v10157_v13 }
 0x254   :  { %8041 = vmatpush2.msk.msra.mxu0 %vm15353_vm4, %v15487_v21  ;;  %vm15358_vm4 = vcmp.eq.s32.totalorder %v10641_v14, %v10155_v12 }
 0x255   :  { %8042 = vmatprep.subr.msk.mxu0 %vm15329_vm10, %v15487_v21  ;;  %vm15332_vm10 = vcmp.eq.s32.totalorder %v10448_v50, %v10155_v12 }
 0x256   :  { %8043 = vmatpush2.msk.msra.mxu0 %vm15330_vm11, %v15487_v21  ;;  %vm15333_vm11 = vcmp.eq.s32.totalorder %v10463_v52, %v10157_v13  ;;  %v1147_v57 = vpop.f32.mrf.mxu0 }
 0x257   :  { %8044 = vmatprep.subr.msk.mxu0 %vm15331_vm0, %v15487_v21  ;;  %vm15334_vm0 = vcmp.eq.s32.totalorder %v10463_v52, %v10155_v12  ;;  %v1513_v63 = vmul.f32 %v10546_v60, %v1147_v57  ;;  %v10699_v57 = vadd.s32 368, %v10151_v8 }
 0x258   :  { %8045 = vmatpush2.msk.msra.mxu0 %vm15332_vm10, %v15487_v21  ;;  %vm15335_vm10 = vcmp.eq.s32.totalorder %v10478_v54, %v10157_v13  ;;  %v1149_v61 = vpop.f32.mrf.mxu0 }
 0x259   :  { %8046 = vmatprep.subr.msk.mxu0 %vm15333_vm11, %v15487_v21  ;;  %vm15336_vm11 = vcmp.eq.s32.totalorder %v10478_v54, %v10155_v12  ;;  %v1514_v1 = vmul.f32 %v10546_v60, %v1149_v61  ;;  %v10626_v10 = vadd.f32 %v10579_v2, %v1513_v63  ;;  %v10702_v61 = vadd.s32 360, %v10151_v8 }
 0x25a   :  { %8047 = vmatpush2.msk.msra.mxu0 %vm15334_vm0, %v15487_v21  ;;  %vm15337_vm0 = vcmp.eq.s32.totalorder %v10493_v55, %v10157_v13  ;;  %v10716_v63 = vadd.s32 352, %v10151_v8 }
 0x25b   :  { %8048 = vmatprep.subr.msk.mxu0 %vm15335_vm10, %v15487_v21  ;;  %vm15338_vm10 = vcmp.eq.s32.totalorder %v10493_v55, %v10155_v12  ;;  %v10607_v5 = vadd.f32 %v10579_v2, %v1514_v1  ;;  %v15389_v22 = vmax.f32 %v10626_v10, 0.0  ;;  %vm15444_vm14 = vcmp.eq.s32.totalorder %v10702_v61, %v10157_v13 }
 0x25c   :  { %8049 = vmatpush2.msk.msra.mxu0 %vm15336_vm11, %v15487_v21  ;;  %vm15339_vm11 = vcmp.eq.s32.totalorder %v10508_v56, %v10157_v13  ;;  %vm15367_vm12 = vcmp.eq.s32.totalorder %v10702_v61, %v10155_v12  ;;  %v15905_v49 = vmax.f32 %v10626_v10, 0.0 }
 0x25d   :  { %8050 = vmatprep.subr.msk.mxu0 %vm15337_vm0, %v15487_v21  ;;  %vm15340_vm0 = vcmp.eq.s32.totalorder %v10508_v56, %v10155_v12  ;;  %v15383_v16 = vmax.f32 %v10607_v5, 0.0  ;;  %v11043_v56 = vadd.s32 440, %v10151_v8 }
 0x25e   :  { %8051 = vmatpush2.msk.msra.mxu0 %vm15338_vm10, %v15487_v21  ;;  %vm15341_vm10 = vcmp.eq.s32.totalorder %v10523_v58, %v10157_v13 }
 0x25f   :  { %8052 = vmatprep.subr.msk.mxu0 %vm15339_vm11, %v15487_v21  ;;  %vm15342_vm11 = vcmp.eq.s32.totalorder %v10523_v58, %v10155_v12  ;;  %v11028_v58 = vadd.s32 448, %v10151_v8  ;;  %15894 = vst [vmem:[#allocation72_spill] sm:$0xff] %v11043_v56 }
 0x260   :  { %8053 = vmatpush2.msk.msra.mxu0 %vm15340_vm0, %v15487_v21  ;;  %vm15343_vm0 = vcmp.eq.s32.totalorder %v10538_v59, %v10157_v13 }
 0x261   :  { %8054 = vmatprep.subr.msk.mxu0 %vm15341_vm10, %v15487_v21  ;;  %vm15344_vm10 = vcmp.eq.s32.totalorder %v10538_v59, %v10155_v12  ;;  %v11013_v59 = vadd.s32 456, %v10151_v8  ;;  %15893 = vst [vmem:[#allocation71_spill] sm:$0xff] %v11028_v58 }
 0x262   :  { %8055 = vmatpush2.msk.msra.mxu0 %vm15342_vm11, %v15487_v21  ;;  %vm15345_vm11 = vcmp.eq.s32.totalorder %v10555_v62, %v10157_v13 }
 0x263   :  { %8056 = vmatprep.subr.msk.mxu0 %vm15343_vm0, %v15487_v21  ;;  %vm15346_vm0 = vcmp.eq.s32.totalorder %v10555_v62, %v10155_v12  ;;  %v10998_v62 = vadd.s32 464, %v10151_v8  ;;  %15892 = vst [vmem:[#allocation70_spill] sm:$0xff] %v11013_v59 }
 0x264   :  { %8057 = vmatpush2.msk.msra.mxu0 %vm15344_vm10, %v15487_v21  ;;  %vm15347_vm10 = vcmp.eq.s32.totalorder %v10570_v51, %v10157_v13 }
 0x265   :  { %8058 = vmatprep.subr.msk.mxu0 %vm15345_vm11, %v15487_v21  ;;  %vm15348_vm11 = vcmp.eq.s32.totalorder %v10570_v51, %v10155_v12  ;;  %v10983_v51 = vadd.s32 472, %v10151_v8  ;;  %15891 = vst [vmem:[#allocation69_spill] sm:$0xff] %v10998_v62 }
 0x266   :  { %8059 = vmatpush2.msk.msra.mxu0 %vm15346_vm0, %v15487_v21  ;;  %vm15349_vm0 = vcmp.eq.s32.totalorder %v10588_v3, %v10157_v13 }
 0x267   :  { %8060 = vmatprep.subr.msk.mxu0 %vm15347_vm10, %v15487_v21  ;;  %vm15350_vm10 = vcmp.eq.s32.totalorder %v10588_v3, %v10155_v12  ;;  %v10968_v3 = vadd.s32 480, %v10151_v8  ;;  %15890 = vst [vmem:[#allocation68_spill] sm:$0xff] %v10983_v51 }
 0x268   :  { %8061 = vmatpush2.msk.msra.mxu0 %vm15348_vm11, %v15487_v21  ;;  %vm15352_vm11 = vcmp.eq.s32.totalorder %v10604_v4, %v10157_v13 }
 0x269   :  { %8062 = vmatprep.subr.msk.mxu0 %vm15349_vm0, %v15487_v21  ;;  %vm15351_vm0 = vcmp.eq.s32.totalorder %v10604_v4, %v10155_v12  ;;  %v10953_v4 = vadd.s32 488, %v10151_v8  ;;  %15889 = vst [vmem:[#allocation67_spill] sm:$0xff] %v10968_v3 }
 0x26a   :  { %8063 = vmatpush2.msk.msra.mxu0 %vm15350_vm10, %v15487_v21  ;;  %vm15355_vm10 = vcmp.eq.s32.totalorder %v10622_v7, %v10157_v13 }
 0x26b   :  { %8064 = vmatprep.subr.msk.mxu0 %vm15352_vm11, %v15487_v21  ;;  %vm15359_vm11 = vcmp.eq.s32.totalorder %v10641_v14, %v10157_v13  ;;  %v10923_v14 = vadd.s32 504, %v10151_v8  ;;  %15888 = vst [vmem:[#allocation66_spill] sm:$0xff] %v10953_v4 }
 0x26c   :  { %8065 = vmatpush2.msk.msra.mxu0 %vm15351_vm0, %v15487_v21  ;;  %vm15354_vm0 = vcmp.eq.s32.totalorder %v10622_v7, %v10155_v12  ;;  %v10938_v7 = vadd.s32 496, %v10151_v8 }
 0x26d   :  { %8066 = vmatprep.subr.msk.mxu0 %vm15355_vm10, %v15487_v21  ;;  %vm15357_vm10 = vcmp.eq.s32.totalorder %v10663_v18, %v10155_v12  ;;  %15886 = vst [vmem:[#allocation64_spill] sm:$0xff] %v10923_v14 }
 0x26e   :  { %8067 = vmatpush2.msk.msra.mxu0 %vm15354_vm0, %v15487_v21  ;;  %vm15356_vm0 = vcmp.eq.s32.totalorder %v10663_v18, %v10157_v13  ;;  %v10908_v18 = vadd.s32 256, %v10151_v8  ;;  %15887 = vst [vmem:[#allocation65_spill] sm:$0xff] %v10938_v7 }
 0x26f   :  { %8068 = vmatprep.subr.msk.mxu0 %vm15359_vm11, %v15487_v21  ;;  %vm15364_vm11 = vcmp.eq.s32.totalorder %v10699_v57, %v10155_v12 }
 0x270   :  { %8069 = vmatpush2.msk.msra.mxu0 %vm15358_vm4, %v15487_v21  ;;  %vm15365_vm4 = vcmp.eq.s32.totalorder %v10699_v57, %v10157_v13  ;;  %15885 = vst [vmem:[#allocation63_spill] sm:$0xff] %v10908_v18 }
 0x271   :  { %8070 = vmatprep.subr.msk.mxu0 %vm15356_vm0, %v15487_v21  ;;  %vm15362_vm0 = vcmp.eq.s32.totalorder %v10696_v26, %v10157_v13 }
 0x272   :  { %8071 = vmatpush2.msk.msra.mxu0 %vm15357_vm10, %v15487_v21  ;;  %vm15363_vm10 = vcmp.eq.s32.totalorder %v10696_v26, %v10155_v12  ;;  %8072 = vmatprep.subr.msk.mxu1 %vm15362_vm0, %v15487_v21 }
 0x273   :  { %8073 = vmatpush1.msk.msra.mxu1 %vm15363_vm10, %v15487_v21  ;;  %vm15368_vm10 = vcmp.eq.s32.totalorder %v10716_v63, %v10157_v13 }
 0x274   :  { %8074 = vmatprep.subr.msk.mxu1 %vm15365_vm4, %v15487_v21 }
 0x275   :  { %8075 = vmatpush1.msk.msra.mxu1 %vm15364_vm11, %v15487_v21  ;;  %vm15369_vm11 = vcmp.eq.s32.totalorder %v10716_v63, %v10155_v12 }
 0x276   :  { %8076 = vmatprep.subr.msk.mxu1 %vm15444_vm14, %v15487_v21 }
 0x277   :  { %8077 = vmatpush1.msk.msra.mxu1 %vm15367_vm12, %v15487_v21 }
 0x278   :  { %8078 = vmatprep.subr.msk.mxu1 %vm15368_vm10, %v15487_v21 }
 0x279   :  { %8079 = vmatpush1.msk.msra.mxu1 %vm15369_vm11, %v15487_v21 }
 0x283   :  { %v1218_v6 = vpop.f32.mrf.mxu1 }
 0x284   :  { %v1515_v9 = vmul.f32 %v10546_v60, %v1218_v6  ;;  %v10726_v6 = vadd.s32 632, %v10151_v8 }
 0x285   :  { %v1220_v11 = vpop.f32.mrf.mxu1 }
 0x286   :  { %v1516_v15 = vmul.f32 %v10546_v60, %v1220_v11  ;;  %v10645_v0 = vadd.f32 %v10579_v2, %v1515_v9  ;;  %15882 = vst [vmem:[#allocation60_spill] sm:$0xff] %v10726_v6  ;;  %v10735_v9 = vadd.s32 344, %v10151_v8  ;;  %vm15366_vm0 = vcmp.eq.s32.totalorder %v10726_v6, %v10157_v13 }
 0x287   :  { %v10753_v11 = vadd.s32 336, %v10151_v8  ;;  %8136 = vmatprep.subr.msk.mxu0 %vm15366_vm0, %v15487_v21 }
 0x288   :  { %v15386_v19 = vmax.f32 %v10645_v0, 0.0  ;;  %v10667_v20 = vadd.f32 %v10579_v2, %v1516_v15  ;;  %vm15370_vm4 = vcmp.eq.s32.totalorder %v10735_v9, %v10157_v13  ;;  %v10773_v15 = vadd.s32 328, %v10151_v8 }
 0x289   :  { %vm15371_vm0 = vcmp.eq.s32.totalorder %v10735_v9, %v10155_v12  ;;  %vm15374_vm12 = vcmp.eq.s32.totalorder %v10753_v11, %v10157_v13  ;;  %8080 = vmatprep.subr.msk.mxu1 %vm15370_vm4, %v15487_v21  ;;  %vm15375_vm10 = vcmp.eq.s32.totalorder %v10753_v11, %v10155_v12 }
 0x28a   :  { %v8958_v24 = vpack.i.bf16 %v15386_v19, %v15383_v16  ;;  %v15376_v25 = vmax.f32 %v10667_v20, 0.0  ;;  %8081 = vmatpush1.msk.msra.mxu1 %vm15371_vm0, %v15487_v21  ;;  %vm15377_vm11 = vcmp.eq.s32.totalorder %v10773_v15, %v10157_v13  ;;  %vm15378_vm4 = vcmp.eq.s32.totalorder %v10773_v15, %v10155_v12 }
 0x28b   :  { %8082 = vmatprep.subr.msk.mxu1 %vm15374_vm12, %v15487_v21  ;;  %v10863_v16 = vadd.s32 280, %v10151_v8  ;;  %v10878_v19 = vadd.s32 272, %v10151_v8 }
 0x28c   :  { %8959 = vrot.lane.b32.xlu1 %v8958_v24, %s15641_s8  ;;  %v8963_v1 = vpack.i.bf16 %v15376_v25, %v15389_v22  ;;  %8083 = vmatpush1.msk.msra.mxu1 %vm15375_vm10, %v15487_v21  ;;  %v10833_v25 = vadd.s32 296, %v10151_v8  ;;  %v10893_v22 = vadd.s32 264, %v10151_v8 }
 0x28d   :  { %8084 = vmatprep.subr.msk.mxu1 %vm15377_vm11, %v15487_v21  ;;  %15883 = vst [vmem:[#allocation61_spill] sm:$0xff] %v10878_v19 }
 0x28e   :  { %8964 = vrot.lane.b32.xlu0 %v8963_v1, %s15641_s8  ;;  %8085 = vmatpush1.msk.msra.mxu1 %vm15378_vm4, %v15487_v21  ;;  %vm15387_vm4 = vcmp.eq.s32.totalorder %v10818_v23, %v10157_v13  ;;  %15884 = vst [vmem:[#allocation62_spill] sm:$0xff] %v10893_v22 }
 0x290   :  { %8974 = vrot.lane.b32.xlu1 %v8963_v1, %s15633_s13  ;;  %v10803_v1 = vadd.s32 312, %v10151_v8 }
 0x292   :  { %8969 = vrot.lane.b32.xlu0 %v8958_v24, %s15633_s13  ;;  %v10788_v24 = vadd.s32 320, %v10151_v8  ;;  %vm15384_vm10 = vcmp.eq.s32.totalorder %v10803_v1, %v10157_v13  ;;  %vm15385_vm11 = vcmp.eq.s32.totalorder %v10803_v1, %v10155_v12 }
 0x294   :  { %vm15381_vm0 = vcmp.eq.s32.totalorder %v10788_v24, %v10157_v13  ;;  %vm15382_vm12 = vcmp.eq.s32.totalorder %v10788_v24, %v10155_v12 }
 0x295   :  { %8086 = vmatprep.subr.msk.mxu1 %vm15381_vm0, %v15487_v21  ;;  %vm15388_vm0 = vcmp.eq.s32.totalorder %v10818_v23, %v10155_v12 }
 0x296   :  { %8087 = vmatpush1.msk.msra.mxu1 %vm15382_vm12, %v15487_v21  ;;  %vm15390_vm12 = vcmp.eq.s32.totalorder %v10833_v25, %v10157_v13 }
 0x297   :  { %8088 = vmatprep.subr.msk.mxu1 %vm15384_vm10, %v15487_v21  ;;  %vm15391_vm10 = vcmp.eq.s32.totalorder %v10833_v25, %v10155_v12 }
 0x298   :  { %8089 = vmatpush1.msk.msra.mxu1 %vm15385_vm11, %v15487_v21  ;;  %vm15394_vm11 = vcmp.eq.s32.totalorder %v10848_v53, %v10157_v13 }
 0x299   :  { %8090 = vmatprep.subr.msk.mxu1 %vm15387_vm4, %v15487_v21  ;;  %vm15395_vm4 = vcmp.eq.s32.totalorder %v10848_v53, %v10155_v12 }
 0x29a   :  { %8091 = vmatpush1.msk.msra.mxu1 %vm15388_vm0, %v15487_v21  ;;  %vm15398_vm0 = vcmp.eq.s32.totalorder %v10863_v16, %v10157_v13 }
 0x29b   :  { %8092 = vmatprep.subr.msk.mxu1 %vm15390_vm12, %v15487_v21  ;;  %vm15399_vm12 = vcmp.eq.s32.totalorder %v10863_v16, %v10155_v12 }
 0x29c   :  { %8093 = vmatpush1.msk.msra.mxu1 %vm15391_vm10, %v15487_v21  ;;  %vm15402_vm10 = vcmp.eq.s32.totalorder %v10878_v19, %v10157_v13 }
 0x29d   :  { %8094 = vmatprep.subr.msk.mxu1 %vm15394_vm11, %v15487_v21  ;;  %vm15403_vm11 = vcmp.eq.s32.totalorder %v10878_v19, %v10155_v12 }
 0x29e   :  { %8095 = vmatpush1.msk.msra.mxu1 %vm15395_vm4, %v15487_v21  ;;  %vm15406_vm4 = vcmp.eq.s32.totalorder %v10893_v22, %v10157_v13 }
 0x29f   :  { %8096 = vmatprep.subr.msk.mxu1 %vm15398_vm0, %v15487_v21  ;;  %vm15407_vm0 = vcmp.eq.s32.totalorder %v10893_v22, %v10155_v12 }
 0x2a0   :  { %8097 = vmatpush1.msk.msra.mxu1 %vm15399_vm12, %v15487_v21  ;;  %vm15410_vm12 = vcmp.eq.s32.totalorder %v10908_v18, %v10157_v13 }
 0x2a1   :  { %8098 = vmatprep.subr.msk.mxu1 %vm15402_vm10, %v15487_v21  ;;  %vm15411_vm10 = vcmp.eq.s32.totalorder %v10908_v18, %v10155_v12 }
 0x2a2   :  { %8099 = vmatpush1.msk.msra.mxu1 %vm15403_vm11, %v15487_v21  ;;  %vm15414_vm11 = vcmp.eq.s32.totalorder %v10923_v14, %v10157_v13 }
 0x2a3   :  { %8100 = vmatprep.subr.msk.mxu1 %vm15406_vm4, %v15487_v21  ;;  %vm15415_vm4 = vcmp.eq.s32.totalorder %v10923_v14, %v10155_v12 }
 0x2a4   :  { %8101 = vmatpush1.msk.msra.mxu1 %vm15407_vm0, %v15487_v21  ;;  %vm15418_vm0 = vcmp.eq.s32.totalorder %v10938_v7, %v10157_v13 }
 0x2a5   :  { %8102 = vmatprep.subr.msk.mxu1 %vm15410_vm12, %v15487_v21  ;;  %vm15419_vm12 = vcmp.eq.s32.totalorder %v10938_v7, %v10155_v12 }
 0x2a6   :  { %8103 = vmatpush1.msk.msra.mxu1 %vm15411_vm10, %v15487_v21  ;;  %vm15422_vm10 = vcmp.eq.s32.totalorder %v10953_v4, %v10157_v13 }
 0x2a7   :  { %8104 = vmatprep.subr.msk.mxu1 %vm15414_vm11, %v15487_v21  ;;  %vm15423_vm11 = vcmp.eq.s32.totalorder %v10953_v4, %v10155_v12 }
 0x2a8   :  { %8105 = vmatpush2.msk.msra.mxu1 %vm15415_vm4, %v15487_v21  ;;  %vm15426_vm4 = vcmp.eq.s32.totalorder %v10968_v3, %v10157_v13 }
 0x2a9   :  { %8106 = vmatprep.subr.msk.mxu1 %vm15418_vm0, %v15487_v21  ;;  %vm15427_vm0 = vcmp.eq.s32.totalorder %v10968_v3, %v10155_v12 }
 0x2aa   :  { %8107 = vmatpush2.msk.msra.mxu1 %vm15419_vm12, %v15487_v21  ;;  %vm15430_vm12 = vcmp.eq.s32.totalorder %v10983_v51, %v10157_v13 }
 0x2ab   :  { %8108 = vmatprep.subr.msk.mxu1 %vm15422_vm10, %v15487_v21  ;;  %vm15431_vm10 = vcmp.eq.s32.totalorder %v10983_v51, %v10155_v12  ;;  %v11058_v51 = vadd.s32 432, %v10151_v8 }
 0x2ac   :  { %8109 = vmatpush2.msk.msra.mxu1 %vm15423_vm11, %v15487_v21  ;;  %vm15434_vm11 = vcmp.eq.s32.totalorder %v10998_v62, %v10157_v13 }
 0x2ad   :  { %8110 = vmatprep.subr.msk.mxu1 %vm15426_vm4, %v15487_v21  ;;  %vm15435_vm4 = vcmp.eq.s32.totalorder %v10998_v62, %v10155_v12  ;;  %15895 = vst [vmem:[#allocation73_spill] sm:$0xff] %v11058_v51  ;;  %v11073_v62 = vadd.s32 424, %v10151_v8 }
 0x2ae   :  { %8111 = vmatpush2.msk.msra.mxu1 %vm15427_vm0, %v15487_v21  ;;  %vm15438_vm0 = vcmp.eq.s32.totalorder %v11013_v59, %v10157_v13 }
 0x2af   :  { %8112 = vmatprep.subr.msk.mxu1 %vm15430_vm12, %v15487_v21  ;;  %vm15439_vm12 = vcmp.eq.s32.totalorder %v11013_v59, %v10155_v12  ;;  %15896 = vst [vmem:[#allocation74_spill] sm:$0xff] %v11073_v62  ;;  %v11088_v59 = vadd.s32 416, %v10151_v8  ;;  %vm15452_vm14 = vcmp.eq.s32.totalorder %v11073_v62, %v10155_v12 }
 0x2b0   :  { %8113 = vmatpush2.msk.msra.mxu1 %vm15431_vm10, %v15487_v21  ;;  %vm15442_vm10 = vcmp.eq.s32.totalorder %v11028_v58, %v10157_v13 }
 0x2b1   :  { %8114 = vmatprep.subr.msk.mxu1 %vm15434_vm11, %v15487_v21  ;;  %vm15443_vm11 = vcmp.eq.s32.totalorder %v11028_v58, %v10155_v12  ;;  %15897 = vst [vmem:[#allocation75_spill] sm:$0xff] %v11088_v59 }
 0x2b2   :  { %8115 = vmatpush2.msk.msra.mxu1 %vm15435_vm4, %v15487_v21  ;;  %vm15445_vm4 = vcmp.eq.s32.totalorder %v11043_v56, %v10157_v13 }
 0x2b3   :  { %8116 = vmatprep.subr.msk.mxu1 %vm15438_vm0, %v15487_v21  ;;  %vm15446_vm0 = vcmp.eq.s32.totalorder %v11043_v56, %v10155_v12  ;;  %v1289_v56 = vpop.f32.mrf.mxu0 }
 0x2b4   :  { %8117 = vmatpush2.msk.msra.mxu1 %vm15439_vm12, %v15487_v21  ;;  %vm15544_vm12 = vcmp.eq.s32.totalorder %v11058_v51, %v10157_v13  ;;  %v1517_v58 = vmul.f32 %v10546_v60, %v1289_v56 }
 0x2b5   :  { %8118 = vmatprep.subr.msk.mxu1 %vm15442_vm10, %v15487_v21  ;;  %vm15541_vm10 = vcmp.eq.s32.totalorder %v11058_v51, %v10155_v12  ;;  %v11133_v51 = vadd.s32 408, %v10151_v8  ;;  %v1291_v56 = vpop.f32.mrf.mxu0 }
 0x2b6   :  { %8119 = vmatpush2.msk.msra.mxu1 %vm15443_vm11, %v15487_v21  ;;  %vm15451_vm11 = vcmp.eq.s32.totalorder %v11073_v62, %v10157_v13  ;;  %v11140_v62 = vadd.s32 400, %v10151_v8  ;;  %v11172_v3 = vadd.f32 %v10579_v2, %v1517_v58 }
 0x2b7   :  { %8120 = vmatprep.subr.msk.mxu1 %vm15445_vm4, %v15487_v21  ;;  %vm15458_vm4 = vcmp.eq.s32.totalorder %v11088_v59, %v10157_v13  ;;  %15898 = vst [vmem:[#allocation76_spill] sm:$0xff] %v11133_v51 }
 0x2b8   :  { %8121 = vmatpush2.msk.msra.mxu1 %vm15446_vm0, %v15487_v21  ;;  %vm15457_vm0 = vcmp.eq.s32.totalorder %v11088_v59, %v10155_v12  ;;  %15899 = vst [vmem:[#allocation77_spill] sm:$0xff] %v11140_v62  ;;  %v11156_v59 = vadd.s32 392, %v10151_v8 }
 0x2b9   :  { %8122 = vmatprep.subr.msk.mxu1 %vm15544_vm12, %v15487_v21 }
 0x2ba   :  { %8123 = vmatpush2.msk.msra.mxu1 %vm15541_vm10, %v15487_v21  ;;  %15900 = vst [vmem:[#allocation78_spill] sm:$0xff] %v11156_v59 }
 0x2bb   :  { %8124 = vmatprep.subr.msk.mxu1 %vm15451_vm11, %v15487_v21  ;;  %vm15474_vm11 = vcmp.eq.s32.totalorder %v11133_v51, %v10157_v13 }
 0x2bc   :  { %8125 = vmatpush2.msk.msra.mxu1 %vm15452_vm14, %v15487_v21  ;;  %vm15463_vm14 = vcmp.eq.s32.totalorder %v11133_v51, %v10155_v12  ;;  %v11169_v51 = vadd.s32 384, %v10151_v8 }
 0x2bd   :  { %8126 = vmatprep.subr.msk.mxu1 %vm15458_vm4, %v15487_v21  ;;  %vm15473_vm4 = vcmp.eq.s32.totalorder %v11140_v62, %v10155_v12 }
 0x2be   :  { %8127 = vmatpush2.msk.msra.mxu1 %vm15457_vm0, %v15487_v21  ;;  %vm15470_vm0 = vcmp.eq.s32.totalorder %v11140_v62, %v10157_v13  ;;  %15901 = vst [vmem:[#allocation79_spill] sm:$0xff] %v11169_v51 }
 0x2bf   :  { %8128 = vmatprep.subr.msk.mxu1 %vm15474_vm11, %v15487_v21  ;;  %vm15513_vm11 = vcmp.eq.s32.totalorder %v11169_v51, %v10155_v12 }
 0x2c0   :  { %8129 = vmatpush2.msk.msra.mxu1 %vm15463_vm14, %v15487_v21  ;;  %vm15516_vm14 = vcmp.eq.s32.totalorder %v11156_v59, %v10157_v13 }
 0x2c1   :  { %8130 = vmatprep.subr.msk.mxu1 %vm15470_vm0, %v15487_v21  ;;  %vm15515_vm0 = vcmp.eq.s32.totalorder %v11156_v59, %v10155_v12  ;;  %v15492_v59 = vmax.f32 %v11172_v3, 0.0 }
 0x2c2   :  { %8131 = vmatpush2.msk.msra.mxu1 %vm15473_vm4, %v15487_v21  ;;  %vm15514_vm4 = vcmp.eq.s32.totalorder %v11169_v51, %v10157_v13 }
 0x2c3   :  { %8132 = vmatprep.subr.msk.mxu1 %vm15516_vm14, %v15487_v21 }
 0x2c4   :  { %8133 = vmatpush2.msk.msra.mxu1 %vm15515_vm0, %v15487_v21 }
 0x2c5   :  { %8134 = vmatprep.subr.msk.mxu1 %vm15514_vm4, %v15487_v21 }
 0x2c6   :  { %8135 = vmatpush2.msk.msra.mxu1 %vm15513_vm11, %v15487_v21 }
 0x2c7   :  { %8193 = vmatprep.subr.msk.mxu1 %vm1684_vm9, %v15487_v21  ;;  %vm15517_vm9 = vcmp.eq.s32.totalorder %v10726_v6, %v10155_v12 }
 0x2cd   :  { %v1360_v55 = vpop.f32.mrf.mxu1 }
 0x2ce   :  { %v1519_v54 = vmul.f32 %v10546_v60, %v1360_v55  ;;  %v1518_v55 = vmul.f32 %v10546_v60, %v1291_v56 }
 0x2cf   :  { %v1362_v62 = vpop.f32.mrf.mxu1 }
 0x2d0   :  { %v11191_v58 = vadd.f32 %v10579_v2, %v1519_v54  ;;  %v1520_v52 = vmul.f32 %v10546_v60, %v1362_v62  ;;  %v1536_v54 = vadd.f32 %v10579_v2, %v1518_v55 }
 0x2d2   :  { %v15491_v4 = vmax.f32 %v11191_v58, 0.0  ;;  %v11214_v7 = vadd.f32 %v10579_v2, %v1520_v52  ;;  %v11219_v62 = vmax.f32 %v1536_v54, 0.0 }
 0x2d4   :  { %v8983_v56 = vpack.i.bf16 %v15491_v4, %v15492_v59  ;;  %v15494_v14 = vmax.f32 %v11214_v7, 0.0 }
 0x2d5   :  { %v1431_v51 = vpop.f32.mrf.mxu0 }
 0x2d6   :  { %v1521_v50 = vmul.f32 %v10546_v60, %v1431_v51  ;;  %8984 = vrot.lane.b32.xlu0 %v8983_v56, %s15633_s13  ;;  %8979 = vrot.lane.b32.xlu1 %v8983_v56, %s15641_s8 }
 0x2d7   :  { %v1433_v55 = vpop.f32.mrf.mxu0 }
 0x2d8   :  { %v11222_v21 = vadd.f32 %v10579_v2, %v1521_v50  ;;  %v1522_v52 = vmul.f32 %v10546_v60, %v1433_v55 }
 0x2da   :  { %15902 = vst [vmem:[#allocation80_spill] sm:$0xff] %v11222_v21  ;;  %v15493_v4 = vmax.f32 %v11222_v21, 0.0  ;;  %2221 = vrot.lane.b32.xlu0 %v11219_v62, %s15641_s8  ;;  %v1540_v50 = vadd.f32 %v10579_v2, %v1522_v52 }
 0x2dc   :  { %v8988_v51 = vpack.i.bf16 %v15493_v4, %v15494_v14  ;;  %v11238_v54 = vmax.f32 %v1540_v50, 0.0 }
 0x2de   :  { %2250 = vrot.lane.b32.xlu0 %v11219_v62, %s15633_s13  ;;  %8989 = vrot.lane.b32.xlu1 %v8988_v51, %s15641_s8  ;;  %15903 = vst [vmem:[#allocation81_spill] sm:$0xff] %v11238_v54 }
 0x2e2   :  { %8994 = vrot.lane.b32.xlu1 %v8988_v51, %s15633_s13 }
 0x2e6   :  { %2505 = vrot.lane.b32.xlu1 %v11238_v54, %s15641_s8 }
 0x2f6   :  { %v1502_v56 = vpop.f32.mrf.mxu1 }
 0x2f7   :  { %v1523_v55 = vmul.f32 %v10546_v60, %v1502_v56 }
 0x2f8   :  { %v1504_v59 = vpop.f32.mrf.mxu1 }
 0x2f9   :  { %v1541_v4 = vadd.f32 %v10579_v2, %v1523_v55  ;;  %v1524_v14 = vmul.f32 %v10546_v60, %v1504_v59 }
 0x2fb   :  { %v11245_v21 = vmax.f32 %v1541_v4, 0.0  ;;  %v1542_v48 = vadd.f32 %v10579_v2, %v1524_v14 }
 0x2fd   :  { %15904 = vst [vmem:[#allocation82_spill] sm:$0xff] %v11245_v21  ;;  %v11248_v52 = vmax.f32 %v1542_v48, 0.0  ;;  %2507 = vrot.lane.b32.xlu0 %v11245_v21, %s15641_s8 }
 0x2fe   :  { %v8960_v51 = vpop.permute.xlu1 %8959 }
 0x2ff   :  { %2509 = vrot.lane.b32.xlu1 %v11248_v52, %s15641_s8  ;;  %v8962_v50 = vunpack.i.h.bf16 %v8960_v51  ;;  %v8961_v56 = vunpack.i.l.bf16 %v8960_v51 }
 0x300   :  { %v11254_v18 = vpop.permute.xlu0 %8964 }
 0x301   :  { %2537 = vrot.lane.b32.xlu0 %v11238_v54, %s15633_s13  ;;  %v15510_v59 = vunpack.i.h.bf16 %v11254_v18  ;;  %v8966_v60 = vunpack.i.l.bf16 %v11254_v18  ;;  %v2224_v2 = vsel %vm15746_vm1, %v8961_v56, %v8962_v50 }
 0x302   :  { %v11260_v48 = vpop.permute.xlu1 %8974 }
 0x303   :  { %2539 = vrot.lane.b32.xlu1 %v11245_v21, %s15633_s13  ;;  %v2223_v4 = vsel %vm15746_vm1, %v8966_v60, %v8961_v56  ;;  %v2225_v14 = vsel %vm15746_vm1, %v8962_v50, %v15510_v59  ;;  %v15538_v55 = vunpack.i.h.bf16 %v11260_v48  ;;  %v8976_v51 = vunpack.i.l.bf16 %v11260_v48 }
 0x304   :  { %v8970_v54 = vpop.permute.xlu0 %8969  ;;  %v2234_v19 = vmax.f32 %v15905_v49, %v2223_v4  ;;  %v15906_v21 = vmax.f32 %v10645_v0, 0.0  ;;  %v15907_v60 = vmax.f32 %v10607_v5, 0.0  ;;  %v11282_v59 = vadd.s32 624, %v10151_v8 }
 0x305   :  { %2541 = vrot.lane.b32.xlu0 %v11248_v52, %s15633_s13  ;;  %v8972_v47 = vunpack.i.h.bf16 %v8970_v54  ;;  %v8971_v22 = vunpack.i.l.bf16 %v8970_v54  ;;  %v11301_v0 = vadd.s32 608, %v10151_v8  ;;  %v1647_v5 = vadd.s32 728, %v10151_v8 }
 0x306   :  { %v11277_v56 = vmax.f32 %v15906_v21, %v2225_v14  ;;  %v2235_v50 = vmax.f32 %v15907_v60, %v2224_v2  ;;  %15908 = vst [vmem:[#allocation83_spill] sm:$0xff] %v11282_v59  ;;  %v11292_v21 = vadd.s32 616, %v10151_v8  ;;  %vm15518_vm11 = vcmp.eq.s32.totalorder %v11282_v59, %v10157_v13 }
 0x307   :  { %v11287_v39 = vsel %vm15630_vm3, %v8972_v47, %v15538_v55  ;;  %v2252_v54 = vsel %vm15630_vm3, %v8976_v51, %v8971_v22  ;;  %v2253_v10 = vsel %vm15630_vm3, %v8971_v22, %v8972_v47  ;;  %15910 = vst [vmem:[#allocation85_spill] sm:$0xff] %v11301_v0  ;;  %vm15519_vm4 = vcmp.eq.s32.totalorder %v11282_v59, %v10155_v12 }
 0x308   :  { %v2264_v49 = vmax.f32 %v2235_v50, %v2253_v10  ;;  %v2263_v4 = vmax.f32 %v2234_v19, %v2252_v54  ;;  %15909 = vst [vmem:[#allocation84_spill] sm:$0xff] %v11292_v21  ;;  %v15911_v47 = vmov 1.0   ;;  %vm15520_vm0 = vcmp.eq.s32.totalorder %v11292_v21, %v10157_v13 }
 0x309   :  { %v11312_v19 = vadd.s32 600, %v10151_v8  ;;  %vm15521_vm14 = vcmp.eq.s32.totalorder %v11292_v21, %v10155_v12  ;;  %v11327_v22 = vadd.s32 592, %v10151_v8  ;;  %v11342_v2 = vadd.s32 584, %v10151_v8 }
 0x30a   :  { %2344 = vmatprep.mubr.f32.mxu0 %v2264_v49  ;;  %v11357_v14 = vadd.s32 576, %v10151_v8  ;;  %v11372_v51 = vadd.s32 568, %v10151_v8  ;;  %v11387_v60 = vadd.s32 560, %v10151_v8  ;;  %v11402_v50 = vadd.s32 552, %v10151_v8 }
 0x30b   :  { %2345 = vmatmul.mubr.f32.vlgmr.msra.gmra.mxu0 %v2263_v4  ;;  %15912 = vst [vmem:[#allocation86_spill] sm:$0xff] %v11312_v19  ;;  %15913 = vst [vmem:[#allocation87_spill] sm:$0xff] %v11327_v22  ;;  %v11417_v54 = vadd.s32 544, %v10151_v8  ;;  %v11432_v10 = vadd.s32 536, %v10151_v8  ;;  %v11447_v49 = vadd.s32 528, %v10151_v8  ;;  %v11462_v4 = vadd.s32 520, %v10151_v8 }
 0x30c   :  { %8137 = vmatpush1.msk.msra.mxu0 %vm15517_vm9, %v15911_v47  ;;  %vm15522_vm9 = vcmp.eq.s32.totalorder %v11301_v0, %v10157_v13  ;;  %15914 = vst [vmem:[#allocation88_spill] sm:$0xff] %v11342_v2  ;;  %15915 = vst [vmem:[#allocation89_spill] sm:$0xff] %v11357_v14  ;;  %v11478_v55 = vadd.s32 512, %v10151_v8  ;;  %vm1835_vm12 = vcmp.eq.s32.totalorder %v1647_v5, %v10155_v12 }
 0x30d   :  { %8138 = vmatprep.subr.msk.mxu0 %vm15518_vm11, %v15911_v47  ;;  %vm15523_vm11 = vcmp.eq.s32.totalorder %v11301_v0, %v10155_v12  ;;  %15916 = vst [vmem:[#allocation90_spill] sm:$0xff] %v11372_v51  ;;  %15917 = vst [vmem:[#allocation91_spill] sm:$0xff] %v11387_v60  ;;  %vm15588_vm10 = vcmp.eq.s32.totalorder %v11462_v4, %v10155_v12 }
 0x30e   :  { %8139 = vmatpush1.msk.msra.mxu0 %vm15519_vm4, %v15911_v47  ;;  %vm15524_vm4 = vcmp.eq.s32.totalorder %v11312_v19, %v10157_v13  ;;  %15918 = vst [vmem:[#allocation92_spill] sm:$0xff] %v11402_v50  ;;  %15919 = vst [vmem:[#allocation93_spill] sm:$0xff] %v11417_v54 }
 0x30f   :  { %8140 = vmatprep.subr.msk.mxu0 %vm15520_vm0, %v15911_v47  ;;  %vm15525_vm0 = vcmp.eq.s32.totalorder %v11312_v19, %v10155_v12  ;;  %15920 = vst [vmem:[#allocation94_spill] sm:$0xff] %v11432_v10  ;;  %15921 = vst [vmem:[#allocation95_spill] sm:$0xff] %v11447_v49  ;;  %v15941_v19 = vunpack.i.h.bf16 %v11260_v48 }
 0x310   :  { %8141 = vmatpush1.msk.msra.mxu0 %vm15521_vm14, %v15911_v47  ;;  %vm15526_vm14 = vcmp.eq.s32.totalorder %v11327_v22, %v10157_v13  ;;  %15922 = vst [vmem:[#allocation96_spill] sm:$0xff] %v11462_v4  ;;  %15923 = vst [vmem:[#allocation97_spill] sm:$0xff] %v11478_v55 }
 0x311   :  { %8142 = vmatprep.subr.msk.mxu0 %vm15522_vm9, %v15911_v47  ;;  %vm15527_vm9 = vcmp.eq.s32.totalorder %v11327_v22, %v10155_v12 }
 0x312   :  { %8143 = vmatpush1.msk.msra.mxu0 %vm15523_vm11, %v15911_v47  ;;  %vm15528_vm11 = vcmp.eq.s32.totalorder %v11342_v2, %v10157_v13 }
 0x313   :  { %8144 = vmatprep.subr.msk.mxu0 %vm15524_vm4, %v15911_v47  ;;  %vm15529_vm4 = vcmp.eq.s32.totalorder %v11342_v2, %v10155_v12 }
 0x314   :  { %8145 = vmatpush1.msk.msra.mxu0 %vm15525_vm0, %v15911_v47  ;;  %vm15530_vm0 = vcmp.eq.s32.totalorder %v11357_v14, %v10157_v13 }
 0x315   :  { %8146 = vmatprep.subr.msk.mxu0 %vm15526_vm14, %v15911_v47  ;;  %vm15531_vm14 = vcmp.eq.s32.totalorder %v11357_v14, %v10155_v12  ;;  %v15940_v14 = vmax.f32 %v10667_v20, 0.0 }
 0x316   :  { %8147 = vmatpush1.msk.msra.mxu0 %vm15527_vm9, %v15911_v47  ;;  %vm15532_vm9 = vcmp.eq.s32.totalorder %v11372_v51, %v10157_v13 }
 0x317   :  { %8148 = vmatprep.subr.msk.mxu0 %vm15528_vm11, %v15911_v47  ;;  %vm15533_vm11 = vcmp.eq.s32.totalorder %v11372_v51, %v10155_v12 }
 0x318   :  { %8149 = vmatpush1.msk.msra.mxu0 %vm15529_vm4, %v15911_v47  ;;  %vm15534_vm4 = vcmp.eq.s32.totalorder %v11387_v60, %v10157_v13 }
 0x319   :  { %8150 = vmatprep.subr.msk.mxu0 %vm15530_vm0, %v15911_v47  ;;  %vm15535_vm0 = vcmp.eq.s32.totalorder %v11387_v60, %v10155_v12 }
 0x31a   :  { %8151 = vmatpush1.msk.msra.mxu0 %vm15531_vm14, %v15911_v47  ;;  %vm15536_vm14 = vcmp.eq.s32.totalorder %v11402_v50, %v10157_v13 }
 0x31b   :  { %8152 = vmatprep.subr.msk.mxu0 %vm15532_vm9, %v15911_v47  ;;  %vm15537_vm9 = vcmp.eq.s32.totalorder %v11402_v50, %v10155_v12 }
 0x31c   :  { %8153 = vmatpush1.msk.msra.mxu0 %vm15533_vm11, %v15911_v47  ;;  %vm15539_vm11 = vcmp.eq.s32.totalorder %v11417_v54, %v10157_v13 }
 0x31d   :  { %8154 = vmatprep.subr.msk.mxu0 %vm15534_vm4, %v15911_v47  ;;  %vm15540_vm4 = vcmp.eq.s32.totalorder %v11417_v54, %v10155_v12 }
 0x31e   :  { %8155 = vmatpush1.msk.msra.mxu0 %vm15535_vm0, %v15911_v47  ;;  %vm15542_vm0 = vcmp.eq.s32.totalorder %v11432_v10, %v10157_v13 }
 0x31f   :  { %8156 = vmatprep.subr.msk.mxu0 %vm15536_vm14, %v15911_v47  ;;  %vm15543_vm14 = vcmp.eq.s32.totalorder %v11432_v10, %v10155_v12  ;;  %v11507_v10 = vadd.s32 720, %v10151_v8 }
 0x320   :  { %8157 = vmatpush1.msk.msra.mxu0 %vm15537_vm9, %v15911_v47  ;;  %vm15547_vm9 = vcmp.eq.s32.totalorder %v11447_v49, %v10157_v13 }
 0x321   :  { %8158 = vmatprep.subr.msk.mxu0 %vm15539_vm11, %v15911_v47  ;;  %vm15552_vm11 = vcmp.eq.s32.totalorder %v11447_v49, %v10155_v12  ;;  %15924 = vst [vmem:[#allocation98_spill] sm:$0xff] %v11507_v10  ;;  %v15925_v49 = vmov 0.0  }
 0x322   :  { %8159 = vmatpush1.msk.msra.mxu0 %vm15540_vm4, %v15911_v47  ;;  %vm1784_vm4 = vcmp.eq.s32.totalorder %v11462_v4, %v10157_v13  ;;  %v11530_v50 = vsel %vm1835_vm12, 1.0, %v15925_v49  ;;  %v11539_v4 = vadd.s32 704, %v10151_v8 }
 0x323   :  { %8160 = vmatprep.subr.msk.mxu0 %vm15542_vm0, %v15911_v47  ;;  %vm1836_vm0 = vcmp.eq.s32.totalorder %v1647_v5, %v10157_v13  ;;  %v11523_v5 = vadd.s32 712, %v10151_v8  ;;  %15928 = vst [vmem:[#allocation101_spill] sm:$0xff] %v11530_v50 }
 0x324   :  { %8161 = vmatpush1.msk.msra.mxu0 %vm15543_vm14, %v15911_v47  ;;  %vm15557_vm14 = vcmp.eq.s32.totalorder %v11478_v55, %v10157_v13  ;;  %v11520_v54 = vsel %vm1836_vm0, 1.0, %v15925_v49  ;;  %vm15562_vm0 = vcmp.eq.s32.totalorder %v11507_v10, %v10157_v13  ;;  %15929 = vst [vmem:[#allocation102_spill] sm:$0xff] %v11539_v4  ;;  %v11550_v49 = vadd.s32 696, %v10151_v8 }
 0x325   :  { %8162 = vmatprep.subr.msk.mxu0 %vm15547_vm9, %v15911_v47  ;;  %vm15559_vm9 = vcmp.eq.s32.totalorder %v11478_v55, %v10155_v12  ;;  %15926 = vst [vmem:[#allocation99_spill] sm:$0xff] %v11520_v54  ;;  %15927 = vst [vmem:[#allocation100_spill] sm:$0xff] %v11523_v5  ;;  %vm15566_vm12 = vcmp.eq.s32.totalorder %v11523_v5, %v10157_v13  ;;  %v15939_v55 = vunpack.i.h.bf16 %v11254_v18  ;;  %v15942_v18 = vmax.f32 %v11172_v3, 0.0 }
 0x326   :  { %8163 = vmatpush1.msk.msra.mxu0 %vm15552_vm11, %v15911_v47  ;;  %vm15560_vm11 = vcmask 1044480   ;;  %15930 = vst [vmem:[#allocation103_spill] sm:$0xff] %v11550_v49 }
 0x327   :  { %8164 = vmatprep.subr.msk.mxu0 %vm1784_vm4, %v15911_v47 }
 0x328   :  { %8165 = vmatpush1.msk.msra.mxu0 %vm15588_vm10, %v15911_v47 }
 0x329   :  { %8166 = vmatprep.subr.msk.mxu0 %vm15557_vm14, %v15911_v47  ;;  %vm15563_vm14 = vcmp.eq.s32.totalorder %v11507_v10, %v10155_v12  ;;  %v11580_v10 = vadd.s32 680, %v10151_v8 }
 0x32a   :  { %8167 = vmatpush1.msk.msra.mxu0 %vm15559_vm9, %v15911_v47  ;;  %vm15567_vm9 = vcmp.eq.s32.totalorder %v11523_v5, %v10155_v12  ;;  %v11595_v5 = vadd.s32 672, %v10151_v8 }
 0x32b   :  { %8168 = vmatprep.subr.msk.mxu0 %vm15560_vm11, %v11520_v54  ;;  %15932 = vst [vmem:[#allocation105_spill] sm:$0xff] %v11580_v10 }
 0x32c   :  { %8169 = vmatpush2.msk.msra.mxu0 %vm15560_vm11, %v11530_v50  ;;  %vm15570_vm11 = vcmp.eq.s32.totalorder %v11539_v4, %v10157_v13  ;;  %v11565_v50 = vadd.s32 688, %v10151_v8  ;;  %15933 = vst [vmem:[#allocation106_spill] sm:$0xff] %v11595_v5 }
 0x32d   :  { %8170 = vmatprep.subr.msk.mxu0 %vm15562_vm0, %v15911_v47  ;;  %vm15571_vm0 = vcmp.eq.s32.totalorder %v11539_v4, %v10155_v12  ;;  %v11610_v4 = vadd.s32 664, %v10151_v8 }
 0x32e   :  { %8171 = vmatpush2.msk.msra.mxu0 %vm15563_vm14, %v15911_v47  ;;  %15931 = vst [vmem:[#allocation104_spill] sm:$0xff] %v11565_v50  ;;  %vm15574_vm14 = vcmp.eq.s32.totalorder %v11550_v49, %v10157_v13 }
 0x32f   :  { %8172 = vmatprep.subr.msk.mxu0 %vm15566_vm12, %v15911_v47  ;;  %vm15575_vm12 = vcmp.eq.s32.totalorder %v11550_v49, %v10155_v12  ;;  %15934 = vst [vmem:[#allocation107_spill] sm:$0xff] %v11610_v4  ;;  %v11625_v49 = vadd.s32 656, %v10151_v8 }
 0x330   :  { %8173 = vmatpush2.msk.msra.mxu0 %vm15567_vm9, %v15911_v47  ;;  %vm15578_vm9 = vcmp.eq.s32.totalorder %v11565_v50, %v10157_v13 }
 0x331   :  { %8174 = vmatprep.subr.msk.mxu0 %vm15570_vm11, %v15911_v47  ;;  %vm15579_vm11 = vcmp.eq.s32.totalorder %v11565_v50, %v10155_v12  ;;  %15935 = vst [vmem:[#allocation108_spill] sm:$0xff] %v11625_v49  ;;  %v11640_v50 = vadd.s32 648, %v10151_v8 }
 0x332   :  { %8175 = vmatpush2.msk.msra.mxu0 %vm15571_vm0, %v15911_v47  ;;  %vm15582_vm0 = vcmp.eq.s32.totalorder %v11580_v10, %v10157_v13 }
 0x333   :  { %8176 = vmatprep.subr.msk.mxu0 %vm15574_vm14, %v15911_v47  ;;  %vm15583_vm14 = vcmp.eq.s32.totalorder %v11580_v10, %v10155_v12  ;;  %15936 = vst [vmem:[#allocation109_spill] sm:$0xff] %v11640_v50  ;;  %v11655_v10 = vadd.s32 640, %v10151_v8  ;;  %vm15627_vm10 = vcmp.eq.s32.totalorder %v11640_v50, %v10155_v12 }
 0x334   :  { %8177 = vmatpush2.msk.msra.mxu0 %vm15575_vm12, %v15911_v47  ;;  %vm15586_vm12 = vcmp.eq.s32.totalorder %v11595_v5, %v10157_v13 }
 0x335   :  { %8178 = vmatprep.subr.msk.mxu0 %vm15578_vm9, %v15911_v47  ;;  %vm15587_vm9 = vcmp.eq.s32.totalorder %v11595_v5, %v10155_v12  ;;  %15937 = vst [vmem:[#allocation110_spill] sm:$0xff] %v11655_v10 }
 0x336   :  { %8179 = vmatpush2.msk.msra.mxu0 %vm15579_vm11, %v15911_v47  ;;  %vm15589_vm11 = vcmp.eq.s32.totalorder %v11610_v4, %v10157_v13 }
 0x337   :  { %8180 = vmatprep.subr.msk.mxu0 %vm15582_vm0, %v15911_v47  ;;  %vm15590_vm0 = vcmp.eq.s32.totalorder %v11610_v4, %v10155_v12 }
 0x338   :  { %8181 = vmatpush2.msk.msra.mxu0 %vm15583_vm14, %v15911_v47  ;;  %vm15629_vm14 = vcmp.eq.s32.totalorder %v11625_v49, %v10157_v13 }
 0x339   :  { %8182 = vmatprep.subr.msk.mxu0 %vm15586_vm12, %v15911_v47  ;;  %vm15628_vm12 = vcmp.eq.s32.totalorder %v11625_v49, %v10155_v12 }
 0x33a   :  { %8183 = vmatpush2.msk.msra.mxu0 %vm15587_vm9, %v15911_v47  ;;  %vm15591_vm9 = vcmp.eq.s32.totalorder %v11640_v50, %v10157_v13 }
 0x33b   :  { %8184 = vmatprep.subr.msk.mxu0 %vm15589_vm11, %v15911_v47  ;;  %vm15626_vm11 = vcmp.eq.s32.totalorder %v11655_v10, %v10157_v13 }
 0x33c   :  { %8185 = vmatpush2.msk.msra.mxu0 %vm15590_vm0, %v15911_v47  ;;  %vm15625_vm0 = vcmp.eq.s32.totalorder %v11655_v10, %v10155_v12 }
 0x33d   :  { %8186 = vmatprep.subr.msk.mxu0 %vm15629_vm14, %v15911_v47  ;;  %vm15966_vm14 = vcmp.eq.s32.totalorder %v10735_v9, %v10155_v12 }
 0x33e   :  { %8187 = vmatpush2.msk.msra.mxu0 %vm15628_vm12, %v15911_v47  ;;  %vm15955_vm12 = vcmp.eq.s32.totalorder %v10702_v61, %v10157_v13 }
 0x33f   :  { %8188 = vmatprep.subr.msk.mxu0 %vm15591_vm9, %v15911_v47  ;;  %vm15938_vm9 = vcmp.eq.s32.totalorder %v10696_v26, %v10157_v13 }
 0x340   :  { %8189 = vmatpush2.msk.msra.mxu0 %vm15627_vm10, %v15911_v47  ;;  %vm15950_vm10 = vcmp.eq.s32.totalorder %v10190_v28, %v10157_v13 }
 0x341   :  { %8190 = vmatprep.subr.msk.mxu0 %vm15626_vm11, %v15911_v47  ;;  %vm15945_vm11 = vcmp.eq.s32.totalorder %v10185_v27, %v10157_v13 }
 0x342   :  { %8191 = vmatpush2.msk.msra.mxu0 %vm15625_vm0, %v15911_v47  ;;  %vm15944_vm0 = vcmp.eq.s32.totalorder %v10163_v17, %v10155_v12 }
 0x343   :  { %8257 = vmatprep.subr.msk.mxu0 %vm15938_vm9, %v15911_v47  ;;  %vm15749_vm9 = vcmask 760832  }
 0x348   :  { %v8985_v49 = vpop.permute.xlu0 %8984  ;;  %v8980_v4 = vpop.permute.xlu1 %8979 }
 0x349   :  { %v8986_v5 = vunpack.i.l.bf16 %v8985_v49  ;;  %v8981_v50 = vunpack.i.l.bf16 %v8980_v4  ;;  %v8982_v54 = vunpack.i.h.bf16 %v8980_v4  ;;  %v8987_v59 = vunpack.i.h.bf16 %v8985_v49 }
 0x34b   :  { %v2226_v60 = vsel %vm15746_vm1, %v15939_v55, %v8981_v50  ;;  %v2255_v0 = vsel %vm15630_vm3, %v15941_v19, %v8986_v5  ;;  %v15943_v19 = vmax.f32 %v11277_v56, %v11287_v39 }
 0x34c   :  { %v2222_v51 = vpop.permute.xlu0 %2221  ;;  %v2237_v2 = vmax.f32 %v15940_v14, %v2226_v60 }
 0x34d   :  { %v2227_v10 = vsel %vm15746_vm1, %v8981_v50, %v2222_v51  ;;  %v2511_v22 = vsel %vm15746_vm1, %v2222_v51, %v8982_v54  ;;  %v2239_v4 = vmax.f32 %v11219_v62, %v2222_v51  ;;  %v15948_v51 = vmax.f32 %v11191_v58, 0.0 }
 0x34e   :  { %v2266_v21 = vmax.f32 %v2237_v2, %v2255_v0  ;;  %v2238_v6 = vmax.f32 %v15942_v18, %v2227_v10  ;;  %v2524_v55 = vmax.f32 %v11219_v62, %v2511_v22  ;;  %v15949_v10 = vmax.f32 %v11214_v7, 0.0 }
 0x350   :  { %2415 = vmatprep.mubr.f32.mxu1 %v2266_v21  ;;  %v2251_v20 = vpop.permute.xlu0 %2250  ;;  %v11717_v14 = vpop.permute.xlu1 %8989 }
 0x351   :  { %v2256_v60 = vsel %vm15630_vm3, %v8986_v5, %v2251_v20  ;;  %v2268_v50 = vmax.f32 %v2239_v4, %v2251_v20  ;;  %v2543_v48 = vsel %vm15630_vm3, %v2251_v20, %v8987_v59  ;;  %v8992_v0 = vunpack.i.h.bf16 %v11717_v14  ;;  %2416 = vmatmul.mubr.f32.vlgmr.msra.gmra.mxu1 %v15943_v19  ;;  %v16013_v4 = vld [vmem:[#allocation81_spill] sm:$0xff]  ;;  %v16015_v20 = vld [vmem:[#allocation64_spill] sm:$0xff] }
 0x352   :  { %v2267_v3 = vmax.f32 %v2238_v6, %v2256_v60  ;;  %v2556_v2 = vmax.f32 %v2524_v55, %v2543_v48  ;;  %v8991_v62 = vunpack.i.l.bf16 %v11717_v14  ;;  %8194 = vmatpush1.msk.msra.mxu1 %vm15944_vm0, %v15911_v47  ;;  %vm15947_vm0 = vcmp.eq.s32.totalorder %v10696_v26, %v10155_v12  ;;  %v16017_v60 = vld [vmem:[#allocation46_spill] sm:$0xff] }
 0x353   :  { %8192 = vmatprep.mubr.msk.f32.mxu0 %vm15749_vm9, %v2268_v50  ;;  %8195 = vmatprep.subr.msk.mxu1 %vm15945_vm11, %v15911_v47  ;;  %vm15946_vm11 = vcmp.eq.s32.totalorder %v10185_v27, %v10155_v12  ;;  %v16020_v50 = vld [vmem:[#allocation82_spill] sm:$0xff] }
 0x354   :  { %v2512_v21 = vsel %vm15746_vm1, %v8982_v54, %v8991_v62  ;;  %v2513_v39 = vsel %vm15746_vm1, %v8991_v62, %v8992_v0  ;;  %2487 = vmatmul.mubr.f32.vlgmr.msra.gmra.mxu0 %v2267_v3  ;;  %v11739_v6 = vpop.permute.xlu1 %8994  ;;  %2570 = vrot.lane.b32.xlu0 %v2556_v2, %s9423_s6  ;;  %v16022_v2 = vld [vmem:[#allocation65_spill] sm:$0xff] }
 0x355   :  { %v8997_v56 = vunpack.i.h.bf16 %v11739_v6  ;;  %v8996_v22 = vunpack.i.l.bf16 %v11739_v6  ;;  %8196 = vmatpush1.msk.msra.mxu1 %vm15946_vm11, %v15911_v47  ;;  %8258 = vmatpush1.msk.msra.mxu0 %vm15947_vm0, %v15911_v47  ;;  %v2525_v54 = vmax.f32 %v15948_v51, %v2512_v21  ;;  %v2526_v49 = vmax.f32 %v15949_v10, %v2513_v39  ;;  %v16024_v21 = vld [vmem:[#allocation47_spill] sm:$0xff] }
 0x356   :  { %8197 = vmatprep.subr.msk.mxu1 %vm15950_vm10, %v15911_v47  ;;  %vm15951_vm11 = vcmp.eq.s32.totalorder %v10699_v57, %v10157_v13  ;;  %vm15952_vm0 = vcmp.eq.s32.totalorder %v10190_v28, %v10155_v12  ;;  %vm15953_vm10 = vcmp.eq.s32.totalorder %v10699_v57, %v10155_v12 }
 0x357   :  { %8259 = vmatprep.subr.msk.mxu0 %vm15951_vm11, %v15911_v47  ;;  %v2544_v5 = vsel %vm15630_vm3, %v8987_v59, %v8996_v22  ;;  %v2545_v26 = vsel %vm15630_vm3, %v8996_v22, %v8997_v56  ;;  %8198 = vmatpush1.msk.msra.mxu1 %vm15952_vm0, %v15911_v47  ;;  %vm15954_vm11 = vcmp.eq.s32.totalorder %v10205_v34, %v10157_v13  ;;  %v16030_v22 = vld [vmem:[#allocation48_spill] sm:$0xff] }
 0x358   :  { %8260 = vmatpush1.msk.msra.mxu0 %vm15953_vm10, %v15911_v47  ;;  %v2557_v7 = vmax.f32 %v2525_v54, %v2544_v5  ;;  %v2558_v58 = vmax.f32 %v2526_v49, %v2545_v26  ;;  %8199 = vmatprep.subr.msk.mxu1 %vm15954_vm11, %v15911_v47  ;;  %vm15956_vm0 = vcmp.eq.s32.totalorder %v10205_v34, %v10155_v12  ;;  %v16034_v54 = vld [vmem:[#allocation67_spill] sm:$0xff]  ;;  %v16036_v49 = vld [vmem:[#allocation49_spill] sm:$0xff]  ;;  %v16042_v5 = vld [vmem:[#allocation50_spill] sm:$0xff] }
 0x359   :  { %8261 = vmatprep.subr.msk.mxu0 %vm15955_vm12, %v15911_v47  ;;  %8200 = vmatpush1.msk.msra.mxu1 %vm15956_vm0, %v15911_v47  ;;  %vm15957_vm10 = vcmp.eq.s32.totalorder %v10702_v61, %v10155_v12  ;;  %vm15958_vm11 = vcmp.eq.s32.totalorder %v10220_v29, %v10157_v13  ;;  %vm15959_vm12 = vcmp.eq.s32.totalorder %v10716_v63, %v10157_v13  ;;  %v16046_v26 = vld [vmem:[#allocation51_spill] sm:$0xff] }
 0x35a   :  { %8262 = vmatpush1.msk.msra.mxu0 %vm15957_vm10, %v15911_v47  ;;  %v8998_v57 = vpack.i.bf16 %v2558_v58, %v2557_v7  ;;  %8201 = vmatprep.subr.msk.mxu1 %vm15958_vm11, %v15911_v47  ;;  %vm15960_vm0 = vcmp.eq.s32.totalorder %v10220_v29, %v10155_v12  ;;  %vm15961_vm10 = vcmp.eq.s32.totalorder %v10716_v63, %v10155_v12  ;;  %v16006_v63 = vld [vmem:[#allocation63_spill] sm:$0xff]  ;;  %v16048_v7 = vld [vmem:[#allocation69_spill] sm:$0xff]  ;;  %v16052_v58 = vld [vmem:[#allocation52_spill] sm:$0xff] }
 0x35b   :  { %8263 = vmatprep.subr.msk.mxu0 %vm15959_vm12, %v15911_v47  ;;  %8202 = vmatpush1.msk.msra.mxu1 %vm15960_vm0, %v15911_v47  ;;  %vm15962_vm11 = vcmp.eq.s32.totalorder %v10235_v45, %v10157_v13  ;;  %vm15963_vm12 = vcmp.eq.s32.totalorder %v10235_v45, %v10155_v12  ;;  %vm15964_vm0 = vcmp.eq.s32.totalorder %v10735_v9, %v10157_v13 }
 0x35c   :  { %8264 = vmatpush1.msk.msra.mxu0 %vm15961_vm10, %v15911_v47  ;;  %8999 = vrot.lane.b32.xlu1 %v8998_v57, %s9423_s6  ;;  %vm15965_vm10 = vcmp.eq.s32.totalorder %v10250_v30, %v10157_v13  ;;  %v16054_v57 = vld [vmem:[#allocation70_spill] sm:$0xff] }
 0x35d   :  { %8203 = vmatprep.subr.msk.mxu1 %vm15962_vm11, %v15911_v47  ;;  %8265 = vmatprep.subr.msk.mxu0 %vm15964_vm0, %v15911_v47  ;;  %vm15967_vm11 = vcmp.eq.s32.totalorder %v10250_v30, %v10155_v12  ;;  %vm15969_vm0 = vcmp.eq.s32.totalorder %v10265_v40, %v10157_v13 }
 0x35e   :  { %8204 = vmatpush1.msk.msra.mxu1 %vm15963_vm12, %v15911_v47  ;;  %8266 = vmatpush1.msk.msra.mxu0 %vm15966_vm14, %v15911_v47  ;;  %vm15968_vm12 = vcmp.eq.s32.totalorder %v10753_v11, %v10157_v13  ;;  %vm15971_vm14 = vcmp.eq.s32.totalorder %v10265_v40, %v10155_v12 }
 0x35f   :  { %8205 = vmatprep.subr.msk.mxu1 %vm15965_vm10, %v15911_v47  ;;  %8267 = vmatprep.subr.msk.mxu0 %vm15968_vm12, %v15911_v47  ;;  %vm15970_vm10 = vcmp.eq.s32.totalorder %v10753_v11, %v10155_v12  ;;  %vm15973_vm12 = vcmp.eq.s32.totalorder %v10280_v31, %v10157_v13 }
 0x360   :  { %8206 = vmatpush1.msk.msra.mxu1 %vm15967_vm11, %v15911_v47  ;;  %8268 = vmatpush1.msk.msra.mxu0 %vm15970_vm10, %v15911_v47  ;;  %vm15972_vm11 = vcmp.eq.s32.totalorder %v10773_v15, %v10157_v13  ;;  %vm15975_vm10 = vcmp.eq.s32.totalorder %v10280_v31, %v10155_v12 }
 0x361   :  { %8207 = vmatprep.subr.msk.mxu1 %vm15969_vm0, %v15911_v47  ;;  %8269 = vmatprep.subr.msk.mxu0 %vm15972_vm11, %v15911_v47  ;;  %vm15974_vm0 = vcmp.eq.s32.totalorder %v10773_v15, %v10155_v12  ;;  %vm15977_vm11 = vcmp.eq.s32.totalorder %v10295_v32, %v10157_v13  ;;  %v16008_v15 = vld [vmem:[#allocation44_spill] sm:$0xff] }
 0x362   :  { %8208 = vmatpush1.msk.msra.mxu1 %vm15971_vm14, %v15911_v47  ;;  %8270 = vmatpush1.msk.msra.mxu0 %vm15974_vm0, %v15911_v47  ;;  %vm15976_vm14 = vcmp.eq.s32.totalorder %v10788_v24, %v10157_v13  ;;  %vm15979_vm0 = vcmp.eq.s32.totalorder %v10803_v1, %v10157_v13 }
 0x363   :  { %8209 = vmatprep.subr.msk.mxu1 %vm15973_vm12, %v15911_v47  ;;  %8271 = vmatprep.subr.msk.mxu0 %vm15976_vm14, %v15911_v47  ;;  %vm15978_vm12 = vcmp.eq.s32.totalorder %v10788_v24, %v10155_v12  ;;  %vm15981_vm14 = vcmp.eq.s32.totalorder %v10803_v1, %v10155_v12  ;;  %v16011_v24 = vld [vmem:[#allocation80_spill] sm:$0xff] }
 0x364   :  { %8210 = vmatpush1.msk.msra.mxu1 %vm15975_vm10, %v15911_v47  ;;  %8272 = vmatpush1.msk.msra.mxu0 %vm15978_vm12, %v15911_v47  ;;  %vm15980_vm10 = vcmp.eq.s32.totalorder %v10316_v35, %v10157_v13  ;;  %vm15983_vm12 = vcmp.eq.s32.totalorder %v10323_v37, %v10157_v13  ;;  %v15995_v35 = vld [vmem:[#allocation61_spill] sm:$0xff]  ;;  %v16012_v1 = vmax.f32 %v16011_v24, 0.0 }
 0x365   :  { %8211 = vmatprep.subr.msk.mxu1 %vm15977_vm11, %v15911_v47  ;;  %8273 = vmatprep.subr.msk.mxu0 %vm15979_vm0, %v15911_v47  ;;  %vm15982_vm11 = vcmp.eq.s32.totalorder %v10818_v23, %v10157_v13  ;;  %vm15984_vm0 = vcmp.eq.s32.totalorder %v10818_v23, %v10155_v12  ;;  %v2506_v23 = vpop.permute.xlu1 %2505  ;;  %v16096_v24 = vld [vmem:[#allocation77_spill] sm:$0xff] }
 0x366   :  { %8212 = vmatpush1.msk.msra.mxu1 %vm10311_vm2, %v15911_v47  ;;  %8274 = vmatpush1.msk.msra.mxu0 %vm15981_vm14, %v15911_v47  ;;  %vm15986_vm14 = vcmp.eq.s32.totalorder %v10352_v43, %v10157_v13 }
 0x367   :  { %8213 = vmatprep.subr.msk.mxu1 %vm15980_vm10, %v15911_v47  ;;  %8275 = vmatprep.subr.msk.mxu0 %vm15982_vm11, %v15911_v47  ;;  %vm15985_vm10 = vcmp.eq.s32.totalorder %v10833_v25, %v10157_v13  ;;  %vm15987_vm11 = vcmp.eq.s32.totalorder %v10833_v25, %v10155_v12  ;;  %v16002_v25 = vld [vmem:[#allocation42_spill] sm:$0xff] }
 0x368   :  { %8214 = vmatpush1.msk.msra.mxu1 %vm10330_vm15, %v15911_v47  ;;  %8276 = vmatpush1.msk.msra.mxu0 %vm15984_vm0, %v15911_v47  ;;  %vm15989_vm0 = vcmp.eq.s32.totalorder %v10359_v36, %v10157_v13  ;;  %v16000_v36 = vld [vmem:[#allocation62_spill] sm:$0xff] }
 0x369   :  { %8215 = vmatprep.subr.msk.mxu1 %vm15983_vm12, %v15911_v47  ;;  %8277 = vmatprep.subr.msk.mxu0 %vm15985_vm10, %v15911_v47  ;;  %vm15988_vm12 = vcmp.eq.s32.totalorder %v10848_v53, %v10157_v13  ;;  %vm15990_vm10 = vcmp.eq.s32.totalorder %v10848_v53, %v10155_v12 }
 0x36a   :  { %8216 = vmatpush1.msk.msra.mxu1 %vm10342_vm5, %v15911_v47  ;;  %8278 = vmatpush1.msk.msra.mxu0 %vm15987_vm11, %v15911_v47  ;;  %vm15992_vm11 = vcmp.eq.s32.totalorder %v10388_v46, %v10157_v13  ;;  %v2514_v46 = vsel %vm15746_vm1, %v8992_v0, %v2506_v23 }
 0x36b   :  { %8217 = vmatprep.subr.msk.mxu1 %vm15986_vm14, %v15911_v47  ;;  %8279 = vmatprep.subr.msk.mxu0 %vm15988_vm12, %v15911_v47  ;;  %vm15991_vm14 = vcmp.eq.s32.totalorder %v10863_v16, %v10157_v13  ;;  %vm15993_vm12 = vcmp.eq.s32.totalorder %v10863_v16, %v10155_v12  ;;  %v2527_v59 = vmax.f32 %v16012_v1, %v2514_v46  ;;  %v16072_v46 = vld [vmem:[#allocation73_spill] sm:$0xff]  ;;  %v16100_v1 = vld [vmem:[#allocation60_spill] sm:$0xff] }
 0x36c   :  { %8218 = vmatpush1.msk.msra.mxu1 %vm10366_vm7, %v15911_v47  ;;  %8280 = vmatpush1.msk.msra.mxu0 %vm15990_vm10, %v15911_v47  ;;  %vm15997_vm10 = vcmp.eq.s32.totalorder %v10151_v8, %v10157_v13 }
 0x36d   :  { %8219 = vmatprep.subr.msk.mxu1 %vm15989_vm0, %v15911_v47  ;;  %8281 = vmatprep.subr.msk.mxu0 %vm15991_vm14, %v15911_v47  ;;  %vm15996_vm0 = vcmp.eq.s32.totalorder %v15995_v35, %v10157_v13  ;;  %vm15998_vm14 = vcmp.eq.s32.totalorder %v15995_v35, %v10155_v12  ;;  %v16064_v35 = vld [vmem:[#allocation54_spill] sm:$0xff] }
 0x36e   :  { %8220 = vmatpush1.msk.msra.mxu1 %vm10378_vm8, %v15911_v47  ;;  %8282 = vmatpush1.msk.msra.mxu0 %vm15993_vm12, %v15911_v47  ;;  %vm16003_vm12 = vcmp.eq.s32.totalorder %v16002_v25, %v10157_v13 }
 0x36f   :  { %8221 = vmatprep.subr.msk.mxu1 %vm15992_vm11, %v15911_v47  ;;  %v2508_v53 = vpop.permute.xlu0 %2507  ;;  %8283 = vmatprep.subr.msk.mxu0 %vm15996_vm0, %v15911_v47  ;;  %vm16001_vm11 = vcmp.eq.s32.totalorder %v16000_v36, %v10157_v13  ;;  %vm16004_vm0 = vcmp.eq.s32.totalorder %v16000_v36, %v10155_v12  ;;  %v16070_v36 = vld [vmem:[#allocation55_spill] sm:$0xff] }
 0x370   :  { %8222 = vmatpush1.msk.msra.mxu1 %vm10402_vm6, %v15911_v47  ;;  %8284 = vmatpush1.msk.msra.mxu0 %vm15998_vm14, %v15911_v47  ;;  %v2515_v16 = vsel %vm15746_vm1, %v2506_v23, %v2508_v53  ;;  %vm16007_vm14 = vcmp.eq.s32.totalorder %v16006_v63, %v10157_v13  ;;  %v16058_v23 = vld [vmem:[#allocation53_spill] sm:$0xff] }
 0x371   :  { %8223 = vmatprep.subr.msk.mxu1 %vm15997_vm10, %v15911_v47  ;;  %v2510_v37 = vpop.permute.xlu1 %2509  ;;  %8285 = vmatprep.subr.msk.mxu0 %vm16001_vm11, %v15911_v47  ;;  %vm16005_vm10 = vcmp.eq.s32.totalorder %v16002_v25, %v10155_v12  ;;  %vm16009_vm11 = vcmp.eq.s32.totalorder %v16008_v15, %v10157_v13  ;;  %v2528_v18 = vmax.f32 %v16013_v4, %v2515_v16  ;;  %v16076_v16 = vld [vmem:[#allocation56_spill] sm:$0xff]  ;;  %v16078_v25 = vld [vmem:[#allocation74_spill] sm:$0xff]  ;;  %v16105_v4 = vld [vmem:[#allocation79_spill] sm:$0xff] }
 0x372   :  { %8224 = vmatpush1.msk.msra.mxu1 %vm10419_vm13, %v15911_v47  ;;  %8286 = vmatpush1.msk.msra.mxu0 %vm16004_vm0, %v15911_v47  ;;  %v2516_v9 = vsel %vm15746_vm1, %v2508_v53, %v2510_v37  ;;  %vm16014_vm0 = vcmp.eq.s32.totalorder %v16008_v15, %v10155_v12  ;;  %v2530_v51 = vmax.f32 %v11248_v52, %v2510_v37  ;;  %v16040_v52 = vld [vmem:[#allocation68_spill] sm:$0xff]  ;;  %v16060_v53 = vld [vmem:[#allocation71_spill] sm:$0xff] }
 0x373   :  { %8225 = vmatprep.subr.msk.mxu1 %vm16003_vm12, %v15911_v47  ;;  %v2538_v61 = vpop.permute.xlu0 %2537  ;;  %8287 = vmatprep.subr.msk.mxu0 %vm16007_vm14, %v15911_v47  ;;  %vm16010_vm12 = vcmp.eq.s32.totalorder %v16006_v63, %v10155_v12  ;;  %vm16018_vm14 = vcmp.eq.s32.totalorder %v16017_v60, %v10157_v13  ;;  %v2529_v48 = vmax.f32 %v16020_v50, %v2516_v9  ;;  %v16066_v37 = vld [vmem:[#allocation72_spill] sm:$0xff]  ;;  %v16084_v63 = vld [vmem:[#allocation75_spill] sm:$0xff]  ;;  %v16088_v9 = vld [vmem:[#allocation58_spill] sm:$0xff] }
 0x374   :  { %8226 = vmatpush2.msk.msra.mxu1 %vm16005_vm10, %v15911_v47  ;;  %v2546_v11 = vsel %vm15630_vm3, %v8997_v56, %v2538_v61  ;;  %8288 = vmatpush1.msk.msra.mxu0 %vm16010_vm12, %v15911_v47  ;;  %vm16016_vm10 = vcmp.eq.s32.totalorder %v16015_v20, %v10157_v13  ;;  %vm16021_vm12 = vcmp.eq.s32.totalorder %v16017_v60, %v10155_v12  ;;  %v16028_v56 = vld [vmem:[#allocation66_spill] sm:$0xff]  ;;  %v16094_v15 = vld [vmem:[#allocation59_spill] sm:$0xff] }
 0x375   :  { %8227 = vmatprep.subr.msk.mxu1 %vm16009_vm11, %v15911_v47  ;;  %v2540_v55 = vpop.permute.xlu1 %2539  ;;  %8289 = vmatprep.subr.msk.mxu0 %vm16016_vm10, %v15911_v47  ;;  %vm16019_vm11 = vcmp.eq.s32.totalorder %v16015_v20, %v10155_v12  ;;  %v2559_v0 = vmax.f32 %v2527_v59, %v2546_v11  ;;  %vm16025_vm10 = vcmp.eq.s32.totalorder %v16024_v21, %v10157_v13  ;;  %v16090_v11 = vld [vmem:[#allocation76_spill] sm:$0xff]  ;;  %v16102_v59 = vld [vmem:[#allocation78_spill] sm:$0xff] }
 0x376   :  { %8228 = vmatpush2.msk.msra.mxu1 %vm16014_vm0, %v15911_v47  ;;  %v2547_v14 = vsel %vm15630_vm3, %v2538_v61, %v2540_v55  ;;  %8290 = vmatpush2.msk.msra.mxu0 %vm16019_vm11, %v15911_v47  ;;  %vm16023_vm0 = vcmp.eq.s32.totalorder %v16022_v2, %v10157_v13  ;;  %vm16027_vm11 = vcmp.eq.s32.totalorder %v16024_v21, %v10155_v12  ;;  %v16082_v61 = vld [vmem:[#allocation57_spill] sm:$0xff] }
 0x377   :  { %8229 = vmatprep.subr.msk.mxu1 %vm16018_vm14, %v15911_v47  ;;  %v2560_v19 = vmax.f32 %v2528_v18, %v2547_v14  ;;  %v2542_v3 = vpop.permute.xlu0 %2541  ;;  %8291 = vmatprep.subr.msk.mxu0 %vm16023_vm0, %v15911_v47  ;;  %vm16026_vm14 = vcmp.eq.s32.totalorder %v16022_v2, %v10155_v12  ;;  %vm16031_vm0 = vcmp.eq.s32.totalorder %v16030_v22, %v10157_v13  ;;  %v16121_v2 = vld [vmem:[#allocation87_spill] sm:$0xff]  ;;  %v16127_v21 = vld [vmem:[#allocation89_spill] sm:$0xff] }
 0x378   :  { %8230 = vmatpush2.msk.msra.mxu1 %vm16021_vm12, %v15911_v47  ;;  %v2548_v62 = vsel %vm15630_vm3, %v2540_v55, %v2542_v3  ;;  %8292 = vmatpush2.msk.msra.mxu0 %vm16026_vm14, %v15911_v47  ;;  %vm16029_vm12 = vcmp.eq.s32.totalorder %v16028_v56, %v10157_v13  ;;  %vm16033_vm14 = vcmp.eq.s32.totalorder %v16030_v22, %v10155_v12  ;;  %v16139_v22 = vld [vmem:[#allocation93_spill] sm:$0xff] }
 0x379   :  { %8231 = vmatprep.subr.msk.mxu1 %vm16025_vm10, %v15911_v47  ;;  %v9003_v39 = vpack.i.bf16 %v2560_v19, %v2559_v0  ;;  %v2561_v6 = vmax.f32 %v2529_v48, %v2548_v62  ;;  %8293 = vmatprep.subr.msk.mxu0 %vm16029_vm12, %v15911_v47  ;;  %vm16032_vm10 = vcmp.eq.s32.totalorder %v16028_v56, %v10155_v12  ;;  %v16109_v48 = vld [vmem:[#allocation83_spill] sm:$0xff]  ;;  %v16112_v0 = vld [vmem:[#allocation84_spill] sm:$0xff]  ;;  %v16115_v19 = vld [vmem:[#allocation85_spill] sm:$0xff] }
 0x37a   :  { %8232 = vmatpush2.msk.msra.mxu1 %vm16027_vm11, %v15911_v47  ;;  %8294 = vmatpush2.msk.msra.mxu0 %vm16032_vm10, %v15911_v47  ;;  %vm16035_vm11 = vcmp.eq.s32.totalorder %v16034_v54, %v10157_v13  ;;  %v2562_v10 = vmax.f32 %v2530_v51, %v2542_v3  ;;  %vm16037_vm12 = vcmp.eq.s32.totalorder %v16036_v49, %v10157_v13  ;;  %v16118_v3 = vld [vmem:[#allocation86_spill] sm:$0xff]  ;;  %v16124_v62 = vld [vmem:[#allocation88_spill] sm:$0xff] }
 0x37b   :  { %8233 = vmatprep.subr.msk.mxu1 %vm16031_vm0, %v15911_v47  ;;  %2580 = vrot.lane.b32.xlu0 %v2561_v6, %s9423_s6  ;;  %vm16038_vm0 = vcmp.eq.s32.totalorder %v16034_v54, %v10155_v12  ;;  %vm16039_vm10 = vcmp.eq.s32.totalorder %v16036_v49, %v10155_v12  ;;  %vm16114_vm3 = vcmp.eq.s32.totalorder %v16112_v0, %v10155_v12  ;;  %v16133_v6 = vld [vmem:[#allocation91_spill] sm:$0xff]  ;;  %v16136_v56 = vld [vmem:[#allocation92_spill] sm:$0xff]  ;;  %v16142_v51 = vld [vmem:[#allocation94_spill] sm:$0xff] }
 0x37c   :  { %9004 = vrot.lane.b32.xlu1 %v9003_v39, %s9423_s6  ;;  %8234 = vmatpush2.msk.msra.mxu1 %vm16033_vm14, %v15911_v47  ;;  %vm16041_vm14 = vcmp.eq.s32.totalorder %v16040_v52, %v10157_v13  ;;  %v16130_v39 = vld [vmem:[#allocation90_spill] sm:$0xff] }
 0x37d   :  { %8295 = vmatprep.subr.msk.mxu0 %vm16035_vm11, %v15911_v47  ;;  %8235 = vmatprep.subr.msk.mxu1 %vm16037_vm12, %v15911_v47  ;;  %vm16043_vm11 = vcmp.eq.s32.totalorder %v16042_v5, %v10157_v13  ;;  %vm16044_vm12 = vcmp.eq.s32.totalorder %v16042_v5, %v10155_v12 }
 0x37e   :  { %8296 = vmatpush2.msk.msra.mxu0 %vm16038_vm0, %v15911_v47  ;;  %8236 = vmatpush2.msk.msra.mxu1 %vm16039_vm10, %v15911_v47  ;;  %vm16045_vm0 = vcmp.eq.s32.totalorder %v16040_v52, %v10155_v12  ;;  %vm16047_vm10 = vcmp.eq.s32.totalorder %v16046_v26, %v10157_v13 }
 0x37f   :  { %8297 = vmatprep.subr.msk.mxu0 %vm16041_vm14, %v15911_v47  ;;  %8237 = vmatprep.subr.msk.mxu1 %vm16043_vm11, %v15911_v47  ;;  %vm16049_vm14 = vcmp.eq.s32.totalorder %v16048_v7, %v10157_v13  ;;  %vm16050_vm11 = vcmp.eq.s32.totalorder %v16046_v26, %v10155_v12 }
 0x380   :  { %2582 = vrot.lane.b32.xlu1 %v2562_v10, %s9423_s6  ;;  %8238 = vmatpush2.msk.msra.mxu1 %vm16044_vm12, %v15911_v47  ;;  %vm16051_vm12 = vcmp.eq.s32.totalorder %v16048_v7, %v10155_v12  ;;  %v16145_v10 = vld [vmem:[#allocation95_spill] sm:$0xff]  ;;  %s15659_s6 = smov 117  }
 0x381   :  { %8298 = vmatpush2.msk.msra.mxu0 %vm16045_vm0, %v15911_v47  ;;  %8239 = vmatprep.subr.msk.mxu1 %vm16047_vm10, %v15911_v47  ;;  %vm16053_vm0 = vcmp.eq.s32.totalorder %v16052_v58, %v10157_v13  ;;  %vm16055_vm10 = vcmp.eq.s32.totalorder %v16054_v57, %v10157_v13 }
 0x382   :  { %8299 = vmatprep.subr.msk.mxu0 %vm16049_vm14, %v15911_v47  ;;  %8240 = vmatpush2.msk.msra.mxu1 %vm16050_vm11, %v15911_v47  ;;  %vm16056_vm14 = vcmp.eq.s32.totalorder %v16052_v58, %v10155_v12  ;;  %vm16057_vm11 = vcmp.eq.s32.totalorder %v16054_v57, %v10155_v12  ;;  %v16148_v57 = vld [vmem:[#allocation96_spill] sm:$0xff] }
 0x383   :  { %8300 = vmatpush2.msk.msra.mxu0 %vm16051_vm12, %v15911_v47  ;;  %8241 = vmatprep.subr.msk.mxu1 %vm16053_vm0, %v15911_v47  ;;  %vm16059_vm12 = vcmp.eq.s32.totalorder %v16058_v23, %v10157_v13  ;;  %vm16061_vm0 = vcmp.eq.s32.totalorder %v16060_v53, %v10157_v13 }
 0x384   :  { %8301 = vmatprep.subr.msk.mxu0 %vm16055_vm10, %v15911_v47  ;;  %8242 = vmatpush2.msk.msra.mxu1 %vm16056_vm14, %v15911_v47  ;;  %vm16062_vm10 = vcmp.eq.s32.totalorder %v16058_v23, %v10155_v12  ;;  %vm16063_vm14 = vcmp.eq.s32.totalorder %v16060_v53, %v10155_v12 }
 0x385   :  { %8302 = vmatpush2.msk.msra.mxu0 %vm16057_vm11, %v15911_v47  ;;  %8243 = vmatprep.subr.msk.mxu1 %vm16059_vm12, %v15911_v47  ;;  %vm16065_vm11 = vcmp.eq.s32.totalorder %v16064_v35, %v10157_v13  ;;  %vm16067_vm12 = vcmp.eq.s32.totalorder %v16066_v37, %v10157_v13 }
 0x386   :  { %8303 = vmatprep.subr.msk.mxu0 %vm16061_vm0, %v15911_v47  ;;  %8244 = vmatpush2.msk.msra.mxu1 %vm16062_vm10, %v15911_v47  ;;  %vm16068_vm0 = vcmp.eq.s32.totalorder %v16064_v35, %v10155_v12  ;;  %vm16069_vm10 = vcmp.eq.s32.totalorder %v16066_v37, %v10155_v12 }
 0x387   :  { %8304 = vmatpush2.msk.msra.mxu0 %vm16063_vm14, %v15911_v47  ;;  %8245 = vmatprep.subr.msk.mxu1 %vm16065_vm11, %v15911_v47  ;;  %vm16071_vm14 = vcmp.eq.s32.totalorder %v16070_v36, %v10157_v13  ;;  %vm16073_vm11 = vcmp.eq.s32.totalorder %v16072_v46, %v10157_v13 }
 0x388   :  { %8305 = vmatprep.subr.msk.mxu0 %vm16067_vm12, %v15911_v47  ;;  %8246 = vmatpush2.msk.msra.mxu1 %vm16068_vm0, %v15911_v47  ;;  %vm16074_vm12 = vcmp.eq.s32.totalorder %v16070_v36, %v10155_v12  ;;  %vm16075_vm0 = vcmp.eq.s32.totalorder %v16072_v46, %v10155_v12 }
 0x389   :  { %8306 = vmatpush2.msk.msra.mxu0 %vm16069_vm10, %v15911_v47  ;;  %8247 = vmatprep.subr.msk.mxu1 %vm16071_vm14, %v15911_v47  ;;  %vm16077_vm10 = vcmp.eq.s32.totalorder %v16076_v16, %v10157_v13  ;;  %vm16079_vm14 = vcmp.eq.s32.totalorder %v16078_v25, %v10157_v13 }
 0x38a   :  { %8307 = vmatprep.subr.msk.mxu0 %vm16073_vm11, %v15911_v47  ;;  %8248 = vmatpush2.msk.msra.mxu1 %vm16074_vm12, %v15911_v47  ;;  %vm16080_vm11 = vcmp.eq.s32.totalorder %v16076_v16, %v10155_v12  ;;  %vm16081_vm12 = vcmp.eq.s32.totalorder %v16078_v25, %v10155_v12 }
 0x38b   :  { %8308 = vmatpush2.msk.msra.mxu0 %vm16075_vm0, %v15911_v47  ;;  %8249 = vmatprep.subr.msk.mxu1 %vm16077_vm10, %v15911_v47  ;;  %vm16083_vm0 = vcmp.eq.s32.totalorder %v16082_v61, %v10157_v13  ;;  %vm16085_vm10 = vcmp.eq.s32.totalorder %v16084_v63, %v10157_v13 }
 0x38c   :  { %8309 = vmatprep.subr.msk.mxu0 %vm16079_vm14, %v15911_v47  ;;  %8250 = vmatpush2.msk.msra.mxu1 %vm16080_vm11, %v15911_v47  ;;  %vm16086_vm14 = vcmp.eq.s32.totalorder %v16082_v61, %v10155_v12  ;;  %vm16087_vm11 = vcmp.eq.s32.totalorder %v16084_v63, %v10155_v12  ;;  %v16150_v63 = vld [vmem:[#allocation97_spill] sm:$0xff] }
 0x38d   :  { %8310 = vmatpush2.msk.msra.mxu0 %vm16081_vm12, %v15911_v47  ;;  %8251 = vmatprep.subr.msk.mxu1 %vm16083_vm0, %v15911_v47  ;;  %vm16089_vm12 = vcmp.eq.s32.totalorder %v16088_v9, %v10157_v13  ;;  %vm16091_vm0 = vcmp.eq.s32.totalorder %v16090_v11, %v10157_v13 }
 0x38e   :  { %8311 = vmatprep.subr.msk.mxu0 %vm16085_vm10, %v15911_v47  ;;  %8252 = vmatpush2.msk.msra.mxu1 %vm16086_vm14, %v15911_v47  ;;  %vm16092_vm10 = vcmp.eq.s32.totalorder %v16088_v9, %v10155_v12  ;;  %vm16093_vm14 = vcmp.eq.s32.totalorder %v16090_v11, %v10155_v12 }
 0x38f   :  { %8312 = vmatpush2.msk.msra.mxu0 %vm16087_vm11, %v15911_v47  ;;  %8253 = vmatprep.subr.msk.mxu1 %vm16089_vm12, %v15911_v47  ;;  %vm16095_vm11 = vcmp.eq.s32.totalorder %v16094_v15, %v10157_v13  ;;  %vm16097_vm12 = vcmp.eq.s32.totalorder %v16096_v24, %v10157_v13 }
 0x390   :  { %8313 = vmatprep.subr.msk.mxu0 %vm16091_vm0, %v15911_v47  ;;  %8254 = vmatpush2.msk.msra.mxu1 %vm16092_vm10, %v15911_v47  ;;  %vm16098_vm0 = vcmp.eq.s32.totalorder %v16094_v15, %v10155_v12  ;;  %vm16099_vm10 = vcmp.eq.s32.totalorder %v16096_v24, %v10155_v12  ;;  %v16153_v24 = vld [vmem:[#allocation99_spill] sm:$0xff] }
 0x391   :  { %8314 = vmatpush2.msk.msra.mxu0 %vm16093_vm14, %v15911_v47  ;;  %8255 = vmatprep.subr.msk.mxu1 %vm16095_vm11, %v15911_v47  ;;  %vm16101_vm14 = vcmp.eq.s32.totalorder %v16100_v1, %v10157_v13  ;;  %vm16103_vm11 = vcmp.eq.s32.totalorder %v16102_v59, %v10157_v13 }
 0x392   :  { %8315 = vmatprep.subr.msk.mxu0 %vm16097_vm12, %v15911_v47  ;;  %8256 = vmatpush2.msk.msra.mxu1 %vm16098_vm0, %v15911_v47  ;;  %vm16104_vm12 = vcmp.eq.s32.totalorder %v16102_v59, %v10155_v12  ;;  %vm16106_vm0 = vcmp.eq.s32.totalorder %v16105_v4, %v10157_v13  ;;  %v16157_v59 = vld [vmem:[#allocation98_spill] sm:$0xff] }
 0x393   :  { %8316 = vmatpush2.msk.msra.mxu0 %vm16099_vm10, %v15911_v47  ;;  %8321 = vmatprep.subr.msk.mxu1 %vm16101_vm14, %v15911_v47  ;;  %vm16107_vm10 = vcmp.eq.s32.totalorder %v16105_v4, %v10155_v12  ;;  %vm2584_vm14 = vcmask 252928   ;;  %v16160_v4 = vld [vmem:[#allocation100_spill] sm:$0xff] }
 0x394   :  { %8317 = vmatprep.subr.msk.mxu0 %vm16103_vm11, %v15911_v47  ;;  %vm16108_vm11 = vcmp.eq.s32.totalorder %v16100_v1, %v10155_v12  ;;  %v16155_v1 = vld [vmem:[#allocation101_spill] sm:$0xff] }
 0x395   :  { %8318 = vmatpush2.msk.msra.mxu0 %vm16104_vm12, %v15911_v47  ;;  %vm16110_vm12 = vcmp.eq.s32.totalorder %v16109_v48, %v10157_v13 }
 0x396   :  { %8319 = vmatprep.subr.msk.mxu0 %vm16106_vm0, %v15911_v47  ;;  %vm16111_vm0 = vcmp.eq.s32.totalorder %v16109_v48, %v10155_v12  ;;  %v16181_v48 = vld [vmem:[#allocation108_spill] sm:$0xff] }
 0x397   :  { %8320 = vmatpush2.msk.msra.mxu0 %vm16107_vm10, %v15911_v47  ;;  %vm16113_vm10 = vcmp.eq.s32.totalorder %v16112_v0, %v10157_v13  ;;  %v16184_v0 = vld [vmem:[#allocation109_spill] sm:$0xff] }
 0x3c6   :  { %v2571_v14 = vpop.permute.xlu0 %2570 }
 0x3ce   :  { %v9000_v18 = vpop.permute.xlu1 %8999 }
 0x3cf   :  { %v9002_v55 = vunpack.i.h.bf16 %v9000_v18  ;;  %v9001_v20 = vunpack.i.l.bf16 %v9000_v18  ;;  %v16163_v18 = vld [vmem:[#allocation102_spill] sm:$0xff] }
 0x3d1   :  { %v2586_v60 = vsel %vm2584_vm14, %v9001_v20, %v9002_v55  ;;  %v2585_v50 = vsel %vm2584_vm14, %v2571_v14, %v9001_v20  ;;  %v16169_v20 = vld [vmem:[#allocation104_spill] sm:$0xff]  ;;  %v16172_v14 = vld [vmem:[#allocation105_spill] sm:$0xff] }
 0x3d2   :  { %2662 = vmatprep.mubr.f32.mxu1 %v2586_v60  ;;  %v16175_v60 = vld [vmem:[#allocation106_spill] sm:$0xff] }
 0x3d3   :  { %2663 = vmatmul.mubr.f32.vlgmr.msra.gmra.mxu1 %v2585_v50  ;;  %v16178_v50 = vld [vmem:[#allocation107_spill] sm:$0xff] }
 0x3d4   :  { %8322 = vmatpush1.msk.msra.mxu1 %vm16108_vm11, %v15911_v47  ;;  %vm16116_vm11 = vcmp.eq.s32.totalorder %v16115_v19, %v10157_v13 }
 0x3d5   :  { %8323 = vmatprep.subr.msk.mxu1 %vm16110_vm12, %v15911_v47  ;;  %vm16117_vm12 = vcmp.eq.s32.totalorder %v16115_v19, %v10155_v12  ;;  %v16187_v19 = vld [vmem:[#allocation110_spill] sm:$0xff] }
 0x3d6   :  { %8324 = vmatpush1.msk.msra.mxu1 %vm16111_vm0, %v15911_v47  ;;  %vm16119_vm0 = vcmp.eq.s32.totalorder %v16118_v3, %v10157_v13 }
 0x3d7   :  { %8325 = vmatprep.subr.msk.mxu1 %vm16113_vm10, %v15911_v47  ;;  %vm16120_vm10 = vcmp.eq.s32.totalorder %v16118_v3, %v10155_v12 }
 0x3d8   :  { %8326 = vmatpush1.msk.msra.mxu1 %vm16114_vm3, %v15911_v47  ;;  %vm16122_vm3 = vcmp.eq.s32.totalorder %v16121_v2, %v10157_v13 }
 0x3d9   :  { %8327 = vmatprep.subr.msk.mxu1 %vm16116_vm11, %v15911_v47  ;;  %vm16123_vm11 = vcmp.eq.s32.totalorder %v16121_v2, %v10155_v12  ;;  %v2346_v2 = vpop.f32.mrf.mxu0 }
 0x3da   :  { %8328 = vmatpush1.msk.msra.mxu1 %vm16117_vm12, %v15911_v47  ;;  %vm16125_vm12 = vcmp.eq.s32.totalorder %v16124_v62, %v10157_v13 }
 0x3db   :  { %8329 = vmatprep.subr.msk.mxu1 %vm16119_vm0, %v15911_v47  ;;  %vm16126_vm0 = vcmp.eq.s32.totalorder %v16124_v62, %v10155_v12 }
 0x3dc   :  { %8330 = vmatpush1.msk.msra.mxu1 %vm16120_vm10, %v15911_v47  ;;  %vm16128_vm10 = vcmp.eq.s32.totalorder %v16127_v21, %v10157_v13 }
 0x3dd   :  { %8331 = vmatprep.subr.msk.mxu1 %vm16122_vm3, %v15911_v47  ;;  %vm16129_vm3 = vcmp.eq.s32.totalorder %v16127_v21, %v10155_v12  ;;  %v12487_v21 = vpop.f32.mrf.mxu0 }
 0x3de   :  { %8332 = vmatpush1.msk.msra.mxu1 %vm16123_vm11, %v15911_v47  ;;  %vm16131_vm11 = vcmp.eq.s32.totalorder %v16130_v39, %v10157_v13 }
 0x3df   :  { %8333 = vmatprep.subr.msk.mxu1 %vm16125_vm12, %v15911_v47  ;;  %vm16132_vm12 = vcmp.eq.s32.totalorder %v16130_v39, %v10155_v12 }
 0x3e0   :  { %8334 = vmatpush1.msk.msra.mxu1 %vm16126_vm0, %v15911_v47  ;;  %vm16134_vm0 = vcmp.eq.s32.totalorder %v16133_v6, %v10157_v13 }
 0x3e1   :  { %8335 = vmatprep.subr.msk.mxu1 %vm16128_vm10, %v15911_v47  ;;  %vm16135_vm10 = vcmp.eq.s32.totalorder %v16133_v6, %v10155_v12 }
 0x3e2   :  { %8336 = vmatpush1.msk.msra.mxu1 %vm16129_vm3, %v15911_v47  ;;  %vm16137_vm3 = vcmp.eq.s32.totalorder %v16136_v56, %v10157_v13 }
 0x3e3   :  { %8337 = vmatprep.subr.msk.mxu1 %vm16131_vm11, %v15911_v47  ;;  %vm16138_vm11 = vcmp.eq.s32.totalorder %v16136_v56, %v10155_v12 }
 0x3e4   :  { %8338 = vmatpush1.msk.msra.mxu1 %vm16132_vm12, %v15911_v47  ;;  %vm16140_vm12 = vcmp.eq.s32.totalorder %v16139_v22, %v10157_v13 }
 0x3e5   :  { %8339 = vmatprep.subr.msk.mxu1 %vm16134_vm0, %v15911_v47  ;;  %vm16141_vm0 = vcmp.eq.s32.totalorder %v16139_v22, %v10155_v12 }
 0x3e6   :  { %8340 = vmatpush1.msk.msra.mxu1 %vm16135_vm10, %v15911_v47  ;;  %vm16143_vm10 = vcmp.eq.s32.totalorder %v16142_v51, %v10157_v13 }
 0x3e7   :  { %8341 = vmatprep.subr.msk.mxu1 %vm16137_vm3, %v15911_v47  ;;  %vm16144_vm3 = vcmp.eq.s32.totalorder %v16142_v51, %v10155_v12 }
 0x3e8   :  { %8342 = vmatpush1.msk.msra.mxu1 %vm16138_vm11, %v15911_v47  ;;  %vm16146_vm11 = vcmp.eq.s32.totalorder %v16145_v10, %v10157_v13 }
 0x3e9   :  { %8343 = vmatprep.subr.msk.mxu1 %vm16140_vm12, %v15911_v47  ;;  %vm16147_vm12 = vcmp.eq.s32.totalorder %v16145_v10, %v10155_v12 }
 0x3ea   :  { %8344 = vmatpush1.msk.msra.mxu1 %vm16141_vm0, %v15911_v47  ;;  %vm16149_vm0 = vcmp.eq.s32.totalorder %v16148_v57, %v10155_v12 }
 0x3eb   :  { %8345 = vmatprep.subr.msk.mxu1 %vm16143_vm10, %v15911_v47  ;;  %vm16151_vm10 = vcmp.eq.s32.totalorder %v16150_v63, %v10157_v13 }
 0x3ec   :  { %8346 = vmatpush1.msk.msra.mxu1 %vm16144_vm3, %v15911_v47  ;;  %vm16154_vm3 = vcmask 1044480  }
 0x3ed   :  { %8347 = vmatprep.subr.msk.mxu1 %vm16146_vm11, %v15911_v47  ;;  %v2581_v46 = vpop.permute.xlu0 %2580  ;;  %vm16156_vm11 = vmmov %vm16154_vm3 }
 0x3ee   :  { %v9005_v54 = vpop.permute.xlu1 %9004  ;;  %8348 = vmatpush1.msk.msra.mxu1 %vm16147_vm12, %v15911_v47  ;;  %vm16158_vm12 = vcmp.eq.s32.totalorder %v16157_v59, %v10157_v13 }
 0x3ef   :  { %v9007_v52 = vunpack.i.h.bf16 %v9005_v54  ;;  %v9006_v7 = vunpack.i.l.bf16 %v9005_v54  ;;  %8349 = vmatprep.subr.msk.mxu1 %vm1784_vm4, %v15911_v47  ;;  %vm16152_vm4 = vcmp.eq.s32.totalorder %v16150_v63, %v10155_v12 }
 0x3f0   :  { %8350 = vmatpush1.msk.msra.mxu1 %vm16149_vm0, %v15911_v47  ;;  %vm16159_vm0 = vcmp.eq.s32.totalorder %v16157_v59, %v10155_v12 }
 0x3f1   :  { %v2588_v53 = vsel %vm2584_vm14, %v9006_v7, %v9007_v52  ;;  %v2587_v37 = vsel %vm2584_vm14, %v9002_v55, %v9006_v7  ;;  %8351 = vmatprep.subr.msk.mxu1 %vm16151_vm10, %v15911_v47  ;;  %vm16161_vm10 = vcmp.eq.s32.totalorder %v16160_v4, %v10157_v13  ;;  %v16166_v55 = vld [vmem:[#allocation103_spill] sm:$0xff]  ;;  %v2589_v3 = vsel %vm2584_vm14, %v9007_v52, %v2581_v46 }
 0x3f2   :  { %v2583_v25 = vpop.permute.xlu1 %2582  ;;  %2733 = vmatprep.mubr.f32.mxu0 %v2588_v53  ;;  %8352 = vmatpush1.msk.msra.mxu1 %vm16152_vm4, %v15911_v47  ;;  %vm16162_vm4 = vcmp.eq.s32.totalorder %v16160_v4, %v10155_v12 }
 0x3f3   :  { %v2590_v11 = vsel %vm2584_vm14, %v2581_v46, %v2583_v25  ;;  %2734 = vmatmul.mubr.f32.vlgmr.msra.gmra.mxu0 %v2587_v37  ;;  %8353 = vmatprep.subr.msk.mxu1 %vm16154_vm3, %v16153_v24  ;;  %vm16164_vm3 = vcmp.eq.s32.totalorder %v16163_v18, %v10157_v13  ;;  %vm2817_vm14 = vcmask 957440  }
 0x3f4   :  { %8377 = vmatprep.mubr.msk.f32.mxu1 %vm15749_vm9, %v2590_v11  ;;  %8354 = vmatpush2.msk.msra.mxu1 %vm16156_vm11, %v16155_v1  ;;  %vm16165_vm11 = vcmp.eq.s32.totalorder %v16163_v18, %v10155_v12  ;;  %vm3180_vm9 = vcmask 670720  }
 0x3f5   :  { %8355 = vmatprep.subr.msk.mxu1 %vm16158_vm12, %v15911_v47  ;;  %vm16167_vm12 = vcmp.eq.s32.totalorder %v16166_v55, %v10157_v13 }
 0x3f6   :  { %8356 = vmatpush2.msk.msra.mxu1 %vm16159_vm0, %v15911_v47  ;;  %vm16168_vm0 = vcmp.eq.s32.totalorder %v16166_v55, %v10155_v12 }
 0x3f7   :  { %8357 = vmatprep.subr.msk.mxu1 %vm16161_vm10, %v15911_v47  ;;  %vm16170_vm10 = vcmp.eq.s32.totalorder %v16169_v20, %v10157_v13 }
 0x3f8   :  { %8358 = vmatpush2.msk.msra.mxu1 %vm16162_vm4, %v15911_v47  ;;  %vm16171_vm4 = vcmp.eq.s32.totalorder %v16169_v20, %v10155_v12 }
 0x3f9   :  { %8359 = vmatprep.subr.msk.mxu1 %vm16164_vm3, %v15911_v47  ;;  %vm16173_vm3 = vcmp.eq.s32.totalorder %v16172_v14, %v10157_v13 }
 0x3fa   :  { %8360 = vmatpush2.msk.msra.mxu1 %vm16165_vm11, %v15911_v47  ;;  %vm16174_vm11 = vcmp.eq.s32.totalorder %v16172_v14, %v10155_v12 }
 0x3fb   :  { %8361 = vmatprep.subr.msk.mxu1 %vm16167_vm12, %v15911_v47  ;;  %vm16176_vm12 = vcmp.eq.s32.totalorder %v16175_v60, %v10157_v13 }
 0x3fc   :  { %8362 = vmatpush2.msk.msra.mxu1 %vm16168_vm0, %v15911_v47  ;;  %vm16177_vm0 = vcmp.eq.s32.totalorder %v16175_v60, %v10155_v12 }
 0x3fd   :  { %8363 = vmatprep.subr.msk.mxu1 %vm16170_vm10, %v15911_v47  ;;  %vm16179_vm10 = vcmp.eq.s32.totalorder %v16178_v50, %v10157_v13 }
 0x3fe   :  { %8364 = vmatpush2.msk.msra.mxu1 %vm16171_vm4, %v15911_v47  ;;  %vm16180_vm4 = vcmp.eq.s32.totalorder %v16178_v50, %v10155_v12 }
 0x3ff   :  { %8365 = vmatprep.subr.msk.mxu1 %vm16173_vm3, %v15911_v47  ;;  %vm16182_vm3 = vcmp.eq.s32.totalorder %v16181_v48, %v10157_v13 }
 0x400   :  { %8366 = vmatpush2.msk.msra.mxu1 %vm16174_vm11, %v15911_v47  ;;  %vm16183_vm11 = vcmp.eq.s32.totalorder %v16181_v48, %v10155_v12 }
 0x401   :  { %8367 = vmatprep.subr.msk.mxu1 %vm16176_vm12, %v15911_v47  ;;  %vm16185_vm12 = vcmp.eq.s32.totalorder %v16184_v0, %v10157_v13 }
 0x402   :  { %8368 = vmatpush2.msk.msra.mxu1 %vm16177_vm0, %v15911_v47  ;;  %vm16186_vm0 = vcmp.eq.s32.totalorder %v16184_v0, %v10155_v12 }
 0x403   :  { %8369 = vmatprep.subr.msk.mxu1 %vm16179_vm10, %v15911_v47  ;;  %vm16188_vm10 = vcmp.eq.s32.totalorder %v16187_v19, %v10157_v13 }
 0x404   :  { %8370 = vmatpush2.msk.msra.mxu1 %vm16180_vm4, %v15911_v47  ;;  %vm16189_vm4 = vcmp.eq.s32.totalorder %v16187_v19, %v10155_v12 }
 0x405   :  { %8371 = vmatprep.subr.msk.mxu1 %vm16182_vm3, %v15911_v47  ;;  %vm2822_vm3 = vcmask 703488  }
 0x406   :  { %8372 = vmatpush2.msk.msra.mxu1 %vm16183_vm11, %v15911_v47  ;;  %vm3170_vm11 = vcmask 924672  }
 0x407   :  { %8373 = vmatprep.subr.msk.mxu1 %vm16185_vm12, %v15911_v47  ;;  %vm3148_vm12 = vcmask 932864  }
 0x408   :  { %8374 = vmatpush2.msk.msra.mxu1 %vm16186_vm0, %v15911_v47  ;;  %vm3035_vm0 = vcmask 973824  }
 0x409   :  { %8375 = vmatprep.subr.msk.mxu1 %vm16188_vm10, %v15911_v47  ;;  %vm3126_vm10 = vcmask 941056  }
 0x40a   :  { %8376 = vmatpush2.msk.msra.mxu1 %vm16189_vm4, %v15911_v47  ;;  %vm3104_vm4 = vcmask 949248  }
 0x40b   :  { %2805 = vmatmul.mubr.f32.vlgmr.msra.gmra.mxu1 %v2589_v3 }
 0x411   :  { %v2417_v62 = vpop.f32.mrf.mxu1 }
 0x412   :  { %v2418_v39 = vadd.f32 %v2417_v62, %v2346_v2 }
 0x413   :  { %v2419_v13 = vpop.f32.mrf.mxu1 }
 0x414   :  { %v2488_v6 = vpop.f32.mrf.mxu0  ;;  %v2420_v62 = vadd.f32 %v2419_v13, %v12487_v21 }
 0x415   :  { %v12489_v56 = vadd.f32 %v2488_v6, %v2418_v39 }
 0x416   :  { %v2490_v22 = vpop.f32.mrf.mxu0 }
 0x417   :  { %2821 = vst [vmem:[#allocation4] sm:$0xff] %v12489_v56  ;;  %3055 = vrot.lane.b32.xlu0 %v12489_v56, %s15661_s25  ;;  %3166 = vrot.lane.b32.xlu1 %v12489_v56, %s15671_s2 }
 0x41b   :  { %3008 = vrot.lane.b32.xlu0 %v12489_v56, %s15631_s14  ;;  %3144 = vrot.lane.b32.xlu1 %v12489_v56, %s15665_s0  ;;  %s15653_s14 = smov 119  }
 0x41f   :  { %2960 = vrot.lane.b32.xlu0 %v12489_v56, %s15637_s5  ;;  %3122 = vrot.lane.b32.xlu1 %v12489_v56, %s15657_s3  ;;  %s15647_s5 = smov 100  }
 0x423   :  { %2913 = vrot.lane.b32.xlu0 %v12489_v56, %s15635_s30  ;;  %3100 = vrot.lane.b32.xlu1 %v12489_v56, %s15655_s4  ;;  %s15645_s30 = smov 99  }
 0x427   :  { %2865 = vrot.lane.b32.xlu0 %v12489_v56, %s15633_s13  ;;  %3080 = vrot.lane.b32.xlu1 %v12489_v56, %s15659_s6  ;;  %s15689_s13 = smov 98  }
 0x42b   :  { %3031 = vrot.lane.b32.xlu1 %v12489_v56, %s15653_s14 }
 0x42f   :  { %2984 = vrot.lane.b32.xlu1 %v12489_v56, %s15667_s26 }
 0x433   :  { %2936 = vrot.lane.b32.xlu1 %v12489_v56, %s15663_s1 }
 0x437   :  { %2889 = vrot.lane.b32.xlu1 %v12489_v56, %s15669_s17 }
 0x43b   :  { %2842 = vrot.lane.b32.xlu1 %v12489_v56, %s15641_s8  ;;  %s15695_s8 = smov 102  }
 0x43f   :  { %3512 = vrot.lane.b32.xlu1 %v12489_v56, %s15643_s7  ;;  %s15697_s7 = smov 103  }
 0x443   :  { %3490 = vrot.lane.b32.xlu1 %v12489_v56, %s15689_s13 }
 0x447   :  { %3468 = vrot.lane.b32.xlu1 %v12489_v56, %s15645_s30  ;;  %s15675_s30 = smov 105  }
 0x44b   :  { %3446 = vrot.lane.b32.xlu1 %v12489_v56, %s15647_s5  ;;  %s15673_s5 = smov 106  }
 0x44f   :  { %3424 = vrot.lane.b32.xlu1 %v12489_v56, %s15649_s29  ;;  %s15651_s29 = smov 107  }
 0x453   :  { %3402 = vrot.lane.b32.xlu1 %v12489_v56, %s15695_s8 }
 0x457   :  { %3381 = vrot.lane.b32.xlu1 %v12489_v56, %s15697_s7 }
 0x45b   :  { %3361 = vrot.lane.b32.xlu1 %v12489_v56, %s15686_s28  ;;  %s15691_s28 = smov 85  }
 0x45f   :  { %3339 = vrot.lane.b32.xlu1 %v12489_v56, %s15675_s30  ;;  %s16195_s30 = smov 126  }
 0x463   :  { %3317 = vrot.lane.b32.xlu1 %v12489_v56, %s15673_s5  ;;  %s15681_s5 = smov 94  }
 0x467   :  { %3295 = vrot.lane.b32.xlu1 %v12489_v56, %s15651_s29  ;;  %s15677_s29 = smov 87  }
 0x489   :  { %v12546_v63 = vpop.permute.xlu1 %3166  ;;  %v12566_v60 = vpop.permute.xlu0 %3055 }
 0x48d   :  { %v12548_v11 = vpop.permute.xlu1 %3144  ;;  %v12570_v48 = vpop.permute.xlu0 %3008 }
 0x491   :  { %v12550_v24 = vpop.permute.xlu1 %3122  ;;  %v12574_v19 = vpop.permute.xlu0 %2960 }
 0x493   :  { %v2664_v51 = vpop.f32.mrf.mxu1 }
 0x495   :  { %v2666_v10 = vpop.f32.mrf.mxu1  ;;  %v12552_v1 = vpop.permute.xlu1 %3100 }
 0x496   :  { %v12578_v2 = vpop.permute.xlu0 %2913 }
 0x499   :  { %v12554_v59 = vpop.permute.xlu1 %3080 }
 0x49a   :  { %v12583_v6 = vpop.permute.xlu0 %2865 }
 0x49d   :  { %v12556_v4 = vpop.permute.xlu1 %3031 }
 0x4a1   :  { %v12558_v18 = vpop.permute.xlu1 %2984 }
 0x4a5   :  { %v12560_v55 = vpop.permute.xlu1 %2936 }
 0x4a9   :  { %v12562_v20 = vpop.permute.xlu1 %2889 }
 0x4ad   :  { %v12564_v14 = vpop.permute.xlu1 %2842 }
 0x4b1   :  { %v12568_v50 = vpop.permute.xlu1 %3512 }
 0x4b3   :  { %v2735_v54 = vpop.f32.mrf.mxu0 }
 0x4b4   :  { %v2736_v7 = vadd.f32 %v2735_v54, %v2664_v51  ;;  %v2491_v51 = vadd.f32 %v2490_v22, %v2420_v62 }
 0x4b5   :  { %v2737_v52 = vpop.f32.mrf.mxu0  ;;  %v12572_v0 = vpop.permute.xlu1 %3490 }
 0x4b6   :  { %v2738_v53 = vadd.f32 %v2737_v52, %v2666_v10 }
 0x4b9   :  { %v12576_v3 = vpop.permute.xlu1 %3468 }
 0x4bd   :  { %v12581_v39 = vpop.permute.xlu1 %3446 }
 0x4c1   :  { %v12585_v10 = vpop.permute.xlu1 %3424 }
 0x4c5   :  { %v12600_v21 = vpop.permute.xlu1 %3402 }
 0x4c9   :  { %v12606_v13 = vpop.permute.xlu1 %3381 }
 0x4cb   :  { %v2806_v57 = vpop.f32.mrf.mxu1 }
 0x4cc   :  { %v2807_v37 = vadd.f32 %v2806_v57, %v2736_v7 }
 0x4cd   :  { %v2808_v46 = vpop.f32.mrf.mxu1  ;;  %v12616_v22 = vpop.permute.xlu1 %3361 }
 0x4ce   :  { %v2809_v25 = vadd.f32 %v2808_v46, %v2738_v53  ;;  %2813 = vrot.lane.b32.xlu0 %v2807_v37, %s15659_s6 }
 0x4d0   :  { %2815 = vrot.lane.b32.xlu1 %v2809_v25, %s15659_s6 }
 0x4d1   :  { %v12622_v7 = vpop.permute.xlu1 %3339 }
 0x4d5   :  { %v12632_v57 = vpop.permute.xlu1 %3317 }
 0x4d9   :  { %v12638_v53 = vpop.permute.xlu1 %3295 }
 0x540   :  { %v2814_v54 = vpop.permute.xlu0 %2813 }
 0x541   :  { %v12588_v52 = vsel %vm2817_vm14, %v2491_v51, %v2814_v54 }
 0x542   :  { %3168 = vrot.lane.b32.xlu0 %v12588_v52, %s15671_s2  ;;  %3065 = vrot.lane.b32.xlu1 %v12588_v52, %s15677_s29  ;;  %2823 = vst.msk [vmem:[#allocation4 + $0x8] sm:$0xff] %vm2822_vm3, %v12588_v52  ;;  %v12644_v37 = vpop.permute.xlu1 %2815  ;;  %s16194_s2 = smov 124  }
 0x543   :  { %v12668_v46 = vsel %vm2817_vm14, %v2814_v54, %v12644_v37 }
 0x546   :  { %3146 = vrot.lane.b32.xlu0 %v12588_v52, %s15665_s0  ;;  %3033 = vrot.lane.b32.xlu1 %v12588_v52, %s15653_s14  ;;  %s15679_s14 = smov 91   ;;  %s16192_s0 = smov 122  }
 0x54a   :  { %3124 = vrot.lane.b32.xlu0 %v12588_v52, %s15657_s3  ;;  %3017 = vrot.lane.b32.xlu1 %v12588_v52, %s15678_s27  ;;  %s15680_s3 = smov 93  }
 0x54e   :  { %3102 = vrot.lane.b32.xlu0 %v12588_v52, %s15655_s4  ;;  %2986 = vrot.lane.b32.xlu1 %v12588_v52, %s15667_s26  ;;  %s16190_s4 = smov 88   ;;  %s16193_s26 = smov 127  }
 0x552   :  { %3082 = vrot.lane.b32.xlu0 %v12588_v52, %s15659_s6  ;;  %2969 = vrot.lane.b32.xlu1 %v12588_v52, %s15679_s14  ;;  %s16191_s6 = smov 120  }
 0x556   :  { %3057 = vrot.lane.b32.xlu0 %v12588_v52, %s15661_s25  ;;  %2938 = vrot.lane.b32.xlu1 %v12588_v52, %s15663_s1  ;;  %s15699_s25 = smov 90   ;;  %s15683_s1 = smov 95  }
 0x55a   :  { %3041 = vrot.lane.b32.xlu0 %v12588_v52, %s16190_s4  ;;  %2922 = vrot.lane.b32.xlu1 %v12588_v52, %s15680_s3 }
 0x55e   :  { %3010 = vrot.lane.b32.xlu0 %v12588_v52, %s16191_s6  ;;  %2891 = vrot.lane.b32.xlu1 %v12588_v52, %s15669_s17  ;;  %s15684_s17 = smov 92  }
 0x562   :  { %2993 = vrot.lane.b32.xlu0 %v12588_v52, %s15699_s25  ;;  %2874 = vrot.lane.b32.xlu1 %v12588_v52, %s15683_s1 }
 0x566   :  { %2962 = vrot.lane.b32.xlu0 %v12588_v52, %s16192_s0  ;;  %2844 = vrot.lane.b32.xlu1 %v12588_v52, %s16193_s26 }
 0x56a   :  { %2945 = vrot.lane.b32.xlu0 %v12588_v52, %s15684_s17  ;;  %3069 = vrot.lane.b32.xlu1 %v12644_v37, %s15677_s29  ;;  %s16196_s29 = smov 96   ;;  %s16199_s17 = smov 100  }
 0x56e   :  { %2915 = vrot.lane.b32.xlu0 %v12588_v52, %s16194_s2  ;;  %3021 = vrot.lane.b32.xlu1 %v12644_v37, %s15678_s27  ;;  %s16197_s27 = smov 97  }
 0x572   :  { %2898 = vrot.lane.b32.xlu0 %v12588_v52, %s15681_s5  ;;  %2973 = vrot.lane.b32.xlu1 %v12644_v37, %s15679_s14  ;;  %s15688_s14 = smov 82   ;;  %s16198_s5 = smov 99  }
 0x576   :  { %2867 = vrot.lane.b32.xlu0 %v12588_v52, %s16195_s30  ;;  %2926 = vrot.lane.b32.xlu1 %v12644_v37, %s15680_s3  ;;  %s15693_s3 = smov 83  }
 0x57a   :  { %2851 = vrot.lane.b32.xlu0 %v12588_v52, %s16196_s29  ;;  %2878 = vrot.lane.b32.xlu1 %v12644_v37, %s15683_s1  ;;  %s15692_s1 = smov 84  }
 0x57e   :  { %2825 = vrot.lane.b32.xlu0 %v12588_v52, %s16197_s27  ;;  %3176 = vrot.lane.b32.xlu1 %v12668_v46, %s15688_s14  ;;  %s16200_s14 = smov 101  }
 0x582   :  { %3492 = vrot.lane.b32.xlu0 %v12588_v52, %s15689_s13  ;;  %3154 = vrot.lane.b32.xlu1 %v12668_v46, %s15693_s3  ;;  %s15694_s13 = smov 86   ;;  %s16203_s3 = smov 105  }
 0x586   :  { %3470 = vrot.lane.b32.xlu0 %v12588_v52, %s16198_s5  ;;  %3132 = vrot.lane.b32.xlu1 %v12668_v46, %s15692_s1  ;;  %s16202_s1 = smov 92  }
 0x58a   :  { %3448 = vrot.lane.b32.xlu0 %v12588_v52, %s16199_s17  ;;  %3110 = vrot.lane.b32.xlu1 %v12668_v46, %s15691_s28  ;;  %s16201_s28 = smov 104  }
 0x58e   :  { %3426 = vrot.lane.b32.xlu0 %v12588_v52, %s16200_s14  ;;  %3089 = vrot.lane.b32.xlu1 %v12668_v46, %s15694_s13  ;;  %s16204_s13 = smov 94  }
 0x592   :  { %3404 = vrot.lane.b32.xlu0 %v12588_v52, %s15695_s8  ;;  %3043 = vrot.lane.b32.xlu1 %v12668_v46, %s16190_s4  ;;  %s16205_s8 = smov 106  }
 0x596   :  { %3383 = vrot.lane.b32.xlu0 %v12588_v52, %s15697_s7  ;;  %2995 = vrot.lane.b32.xlu1 %v12668_v46, %s15699_s25  ;;  %s16206_s7 = smov 107   ;;  %s15734_s25 = smov 109  }
 0x59a   :  { %3363 = vrot.lane.b32.xlu0 %v12588_v52, %s16201_s28  ;;  %2947 = vrot.lane.b32.xlu1 %v12668_v46, %s16202_s1 }
 0x59e   :  { %3341 = vrot.lane.b32.xlu0 %v12588_v52, %s16203_s3  ;;  %2900 = vrot.lane.b32.xlu1 %v12668_v46, %s16204_s13 }
 0x5a2   :  { %3319 = vrot.lane.b32.xlu0 %v12588_v52, %s16205_s8  ;;  %3273 = vrot.lane.b32.xlu1 %v12489_v56, %s15701_s22 }
 0x5a6   :  { %3297 = vrot.lane.b32.xlu0 %v12588_v52, %s16206_s7  ;;  %3251 = vrot.lane.b32.xlu1 %v12489_v56, %s15734_s25  ;;  %s16226_s25 = sld [smem:[#allocation117_spill]] }
 0x5aa   :  { %3275 = vrot.lane.b32.xlu0 %v12588_v52, %s15701_s22  ;;  %3229 = vrot.lane.b32.xlu1 %v12489_v56, %s15710_s21  ;;  %s16209_s22 = smov 84   ;;  %s16213_s21 = smov 90  }
 0x5ae   :  { %3208 = vrot.lane.b32.xlu1 %v12489_v56, %s15707_s24  ;;  %3178 = vrot.lane.b32.xlu0 %v12644_v37, %s16207_s23  ;;  %s16210_s23 = smov 85   ;;  %s16211_s24 = smov 86  }
 0x5b2   :  { %2853 = vrot.lane.b32.xlu1 %v12668_v46, %s16196_s29  ;;  %3156 = vrot.lane.b32.xlu0 %v12644_v37, %s16208_s20  ;;  %s9456_s20 = smov 66  }
 0x5b4   :  { %v3169_v25 = vpop.permute.xlu0 %3168  ;;  %v12726_v62 = vpop.permute.xlu1 %3065 }
 0x5b5   :  { %v12729_v51 = vsel %vm3170_vm11, %v12546_v63, %v3169_v25  ;;  %3175 = vst.msk [vmem:[#allocation4 + $0x1e8] sm:$0xff] %vm2822_vm3, %v3169_v25  ;;  %vm16212_vm11 = vcmask 990208  }
 0x5b6   :  { %2827 = vrot.lane.b32.xlu1 %v12668_v46, %s16197_s27  ;;  %3134 = vrot.lane.b32.xlu0 %v12644_v37, %s16209_s22  ;;  %s9457_s22 = smov 67  }
 0x5b8   :  { %v3147_v54 = vpop.permute.xlu0 %3146  ;;  %v3034_v8 = vpop.permute.xlu1 %3033 }
 0x5b9   :  { %v12737_v15 = vsel %vm3148_vm12, %v12548_v11, %v3147_v54  ;;  %3153 = vst.msk [vmem:[#allocation4 + $0x1c8] sm:$0xff] %vm2822_vm3, %v3147_v54  ;;  %v12741_v63 = vsel %vm3035_vm0, %v12556_v4, %v3034_v8  ;;  %3040 = vst.msk [vmem:[#allocation4 + $0x128] sm:$0xff] %vm2822_vm3, %v3034_v8  ;;  %vm3059_vm12 = vcmask 965632   ;;  %vm16215_vm0 = vcmask 982016  }
 0x5ba   :  { %3519 = vrot.lane.b32.xlu1 %v12668_v46, %s9456_s20  ;;  %3112 = vrot.lane.b32.xlu0 %v12644_v37, %s16210_s23  ;;  %s9458_s23 = smov 68  }
 0x5bc   :  { %v3125_v25 = vpop.permute.xlu0 %3124  ;;  %v12748_v9 = vpop.permute.xlu1 %3017 }
 0x5bd   :  { %v12751_v11 = vsel %vm3126_vm10, %v12550_v24, %v3125_v25  ;;  %3131 = vst.msk [vmem:[#allocation4 + $0x1a8] sm:$0xff] %vm2822_vm3, %v3125_v25  ;;  %vm16216_vm10 = vcmask 1022976  }
 0x5be   :  { %3500 = vrot.lane.b32.xlu1 %v12668_v46, %s9457_s22  ;;  %3091 = vrot.lane.b32.xlu0 %v12644_v37, %s16211_s24  ;;  %s9459_s24 = smov 69  }
 0x5c0   :  { %v3103_v8 = vpop.permute.xlu0 %3102  ;;  %v2987_v4 = vpop.permute.xlu1 %2986 }
 0x5c1   :  { %v12759_v54 = vsel %vm3104_vm4, %v12552_v1, %v3103_v8  ;;  %3109 = vst.msk [vmem:[#allocation4 + $0x188] sm:$0xff] %vm2822_vm3, %v3103_v8  ;;  %v12764_v24 = vsel %vm16212_vm11, %v12558_v18, %v2987_v4  ;;  %2992 = vst.msk [vmem:[#allocation4 + $0xe8] sm:$0xff] %vm2822_vm3, %v2987_v4  ;;  %vm16219_vm4 = vcmask 998400   ;;  %vm2839_vm11 = vcmask 359424  }
 0x5c2   :  { %3478 = vrot.lane.b32.xlu1 %v12668_v46, %s9458_s23  ;;  %3045 = vrot.lane.b32.xlu0 %v12644_v37, %s16190_s4  ;;  %s9460_s4 = smov 70  }
 0x5c4   :  { %v3083_v25 = vpop.permute.xlu0 %3082  ;;  %v12771_v61 = vpop.permute.xlu1 %2969 }
 0x5c5   :  { %v12775_v1 = vsel %vm2817_vm14, %v12554_v59, %v3083_v25  ;;  %3088 = vst.msk [vmem:[#allocation4 + $0x168] sm:$0xff] %vm2822_vm3, %v3083_v25  ;;  %vm16214_vm14 = vcmask 1006592  }
 0x5c6   :  { %3456 = vrot.lane.b32.xlu1 %v12668_v46, %s9459_s24  ;;  %2997 = vrot.lane.b32.xlu0 %v12644_v37, %s16213_s21  ;;  %s15724_s21 = smov 71  }
 0x5c8   :  { %v3058_v18 = vpop.permute.xlu0 %3057  ;;  %v2939_v8 = vpop.permute.xlu1 %2938 }
 0x5c9   :  { %v12783_v4 = vsel %vm3059_vm12, %v12566_v60, %v3058_v18  ;;  %3064 = vst.msk [vmem:[#allocation4 + $0x148] sm:$0xff] %vm2822_vm3, %v3058_v18  ;;  %v12788_v59 = vsel %vm16214_vm14, %v12560_v55, %v2939_v8  ;;  %2944 = vst.msk [vmem:[#allocation4 + $0xa8] sm:$0xff] %vm2822_vm3, %v2939_v8  ;;  %vm16220_vm12 = vcmask 1014784   ;;  %vm16221_vm14 = vcmask 1031168  }
 0x5ca   :  { %3434 = vrot.lane.b32.xlu1 %v12668_v46, %s9460_s4  ;;  %2949 = vrot.lane.b32.xlu0 %v12644_v37, %s16202_s1  ;;  %s16217_s1 = smov 72  }
 0x5cc   :  { %v12795_v25 = vpop.permute.xlu0 %3041  ;;  %v12797_v16 = vpop.permute.xlu1 %2922 }
 0x5ce   :  { %3412 = vrot.lane.b32.xlu1 %v12668_v46, %s15724_s21  ;;  %2902 = vrot.lane.b32.xlu0 %v12644_v37, %s16204_s13  ;;  %s16218_s13 = smov 73  }
 0x5d0   :  { %v3011_v55 = vpop.permute.xlu0 %3010  ;;  %v2892_v60 = vpop.permute.xlu1 %2891 }
 0x5d1   :  { %v12805_v18 = vsel %vm16215_vm0, %v12570_v48, %v3011_v55  ;;  %3016 = vst.msk [vmem:[#allocation4 + $0x108] sm:$0xff] %vm2822_vm3, %v3011_v55  ;;  %v12810_v8 = vsel %vm16216_vm10, %v12562_v20, %v2892_v60  ;;  %2897 = vst.msk [vmem:[#allocation4 + $0x68] sm:$0xff] %vm2822_vm3, %v2892_v60  ;;  %vm2836_vm0 = vcmask 1048240   ;;  %vm16222_vm10 = vcmask 793600  }
 0x5d2   :  { %3391 = vrot.lane.b32.xlu1 %v12668_v46, %s16217_s1  ;;  %2855 = vrot.lane.b32.xlu0 %v12644_v37, %s16196_s29  ;;  %s9462_s29 = smov 74  }
 0x5d4   :  { %v12817_v36 = vpop.permute.xlu0 %2993  ;;  %v12819_v35 = vpop.permute.xlu1 %2874 }
 0x5d6   :  { %3370 = vrot.lane.b32.xlu1 %v12668_v46, %s16218_s13  ;;  %2829 = vrot.lane.b32.xlu0 %v12644_v37, %s16197_s27  ;;  %s9463_s27 = smov 75  }
 0x5d8   :  { %v2963_v20 = vpop.permute.xlu0 %2962  ;;  %v2845_v48 = vpop.permute.xlu1 %2844 }
 0x5d9   :  { %v12827_v55 = vsel %vm16219_vm4, %v12574_v19, %v2963_v20  ;;  %2968 = vst.msk [vmem:[#allocation4 + $0xc8] sm:$0xff] %vm2822_vm3, %v2963_v20  ;;  %v12832_v60 = vsel %vm15746_vm1, %v12564_v14, %v2845_v48  ;;  %2850 = vst.msk [vmem:[#allocation4 + $0x28] sm:$0xff] %vm2822_vm3, %v2845_v48  ;;  %vm15743_vm4 = vcmask 801792   ;;  %vm2904_vm1 = vcmask 769024  }
 0x5da   :  { %3349 = vrot.lane.b32.xlu1 %v12668_v46, %s9462_s29  ;;  %3521 = vrot.lane.b32.xlu0 %v12644_v37, %s9456_s20  ;;  %s9464_s20 = smov 76  }
 0x5dc   :  { %v12839_v23 = vpop.permute.xlu0 %2945  ;;  %v12841_v19 = vpop.permute.xlu1 %3069 }
 0x5dd   :  { %3079 = vst.msk [vmem:[#allocation4 + $0x158] sm:$0xff] %vm2839_vm11, %v12841_v19 }
 0x5de   :  { %3327 = vrot.lane.b32.xlu1 %v12668_v46, %s9463_s27  ;;  %3502 = vrot.lane.b32.xlu0 %v12644_v37, %s9457_s22  ;;  %s9465_s22 = smov 77  }
 0x5e0   :  { %v2916_v14 = vpop.permute.xlu0 %2915  ;;  %v12849_v20 = vpop.permute.xlu1 %3021 }
 0x5e1   :  { %v12853_v48 = vsel %vm16220_vm12, %v12578_v2, %v2916_v14  ;;  %2921 = vst.msk [vmem:[#allocation4 + $0x88] sm:$0xff] %vm2822_vm3, %v2916_v14  ;;  %vm15742_vm12 = vcmask 809984  }
 0x5e2   :  { %3030 = vst.msk [vmem:[#allocation4 + $0x118] sm:$0xff] %vm2839_vm11, %v12849_v20  ;;  %3305 = vrot.lane.b32.xlu1 %v12668_v46, %s9464_s20  ;;  %3480 = vrot.lane.b32.xlu0 %v12644_v37, %s9458_s23  ;;  %s15733_s23 = smov 78  }
 0x5e4   :  { %v12862_v58 = vpop.permute.xlu0 %2898  ;;  %v12864_v26 = vpop.permute.xlu1 %2973 }
 0x5e5   :  { %2983 = vst.msk [vmem:[#allocation4 + $0xd8] sm:$0xff] %vm2839_vm11, %v12864_v26 }
 0x5e6   :  { %3283 = vrot.lane.b32.xlu1 %v12668_v46, %s9465_s22  ;;  %3458 = vrot.lane.b32.xlu0 %v12644_v37, %s9459_s24  ;;  %s15732_s24 = smov 79  }
 0x5e8   :  { %v2868_v2 = vpop.permute.xlu0 %2867  ;;  %v12872_v14 = vpop.permute.xlu1 %2926 }
 0x5e9   :  { %v12876_v5 = vsel %vm16221_vm14, %v12583_v6, %v2868_v2  ;;  %2873 = vst.msk [vmem:[#allocation4 + $0x48] sm:$0xff] %vm2822_vm3, %v2868_v2  ;;  %vm15740_vm14 = vcmask 818176  }
 0x5ea   :  { %2935 = vst.msk [vmem:[#allocation4 + $0x98] sm:$0xff] %vm2839_vm11, %v12872_v14  ;;  %3261 = vrot.lane.b32.xlu1 %v12668_v46, %s15733_s23  ;;  %3436 = vrot.lane.b32.xlu0 %v12644_v37, %s9460_s4  ;;  %s16223_s4 = smov 80   ;;  %s16234_s23 = smov 109  }
 0x5ec   :  { %v12885_v49 = vpop.permute.xlu0 %2851  ;;  %v12887_v43 = vpop.permute.xlu1 %2878 }
 0x5ed   :  { %2888 = vst.msk [vmem:[#allocation4 + $0x58] sm:$0xff] %vm2839_vm11, %v12887_v43 }
 0x5ee   :  { %3239 = vrot.lane.b32.xlu1 %v12668_v46, %s15732_s24  ;;  %3414 = vrot.lane.b32.xlu0 %v12644_v37, %s15724_s21  ;;  %s16224_s21 = smov 81   ;;  %s16225_s24 = smov 112  }
 0x5f0   :  { %v12895_v6 = vpop.permute.xlu0 %2825  ;;  %v12897_v2 = vpop.permute.xlu1 %3176 }
 0x5f1   :  { %v12902_v32 = vsel %vm16222_vm10, %v12568_v50, %v12895_v6  ;;  %3518 = vst.msk [vmem:[#allocation4 + $0x3e8] sm:$0xff] %vm2822_vm3, %v12895_v6  ;;  %vm15741_vm10 = vcmask 826368  }
 0x5f2   :  { %3185 = vst.msk [vmem:[#allocation4 + $0x1e8] sm:$0xff] %vm2836_vm0, %v12897_v2  ;;  %3218 = vrot.lane.b32.xlu1 %v12668_v46, %s16223_s4  ;;  %3393 = vrot.lane.b32.xlu0 %v12644_v37, %s16217_s1  ;;  %s16349_s1 = smov 119  }
 0x5f4   :  { %v3493_v38 = vpop.permute.xlu0 %3492  ;;  %v12912_v44 = vpop.permute.xlu1 %3154 }
 0x5f5   :  { %v12916_v50 = vsel %vm15743_vm4, %v12572_v0, %v3493_v38  ;;  %3499 = vst.msk [vmem:[#allocation4 + $0x3c8] sm:$0xff] %vm2822_vm3, %v3493_v38  ;;  %v3836_v38 = vld [vmem:[%s16226_s25] sm:$0xff]  ;;  %vm2999_vm4 = vcmask 736256  }
 0x5f6   :  { %3163 = vst.msk [vmem:[#allocation4 + $0x1c8] sm:$0xff] %vm2836_vm0, %v12912_v44  ;;  %3197 = vrot.lane.b32.xlu1 %v12668_v46, %s16224_s21  ;;  %3372 = vrot.lane.b32.xlu0 %v12644_v37, %s16218_s13  ;;  %s16232_s13 = smov 93  }
 0x5f8   :  { %v3471_v42 = vpop.permute.xlu0 %3470  ;;  %v12925_v41 = vpop.permute.xlu1 %3132 }
 0x5f9   :  { %v3595_v33 = vld [vmem:[#allocation4 + $0x1e8] sm:$0xff]  ;;  %v12929_v0 = vsel %vm15742_vm12, %v12576_v3, %v3471_v42  ;;  %3477 = vst.msk [vmem:[#allocation4 + $0x3a8] sm:$0xff] %vm2822_vm3, %v3471_v42  ;;  %vm15744_vm12 = vcmask 842752  }
 0x5fa   :  { %3141 = vst.msk [vmem:[#allocation4 + $0x1a8] sm:$0xff] %vm2836_vm0, %v12925_v41  ;;  %3662 = vmatprep.subr.mxu0 %v3595_v33  ;;  %3188 = vrot.lane.b32.xlu1 %v12489_v56, %s16225_s24  ;;  %v3837_v56 = vld [vmem:[%s16226_s25 + $0x8] sm:$0xff]  ;;  %s16228_s25 = smov 87  }
 0x5fb   :  { %3351 = vrot.lane.b32.xlu0 %v12644_v37, %s9462_s29  ;;  %3663 = vmatpush1.msra.mxu0 %v12729_v51  ;;  %s16233_s29 = smov 95  }
 0x5fc   :  { %v3449_v3 = vpop.permute.xlu0 %3448  ;;  %v12942_v31 = vpop.permute.xlu1 %3110 }
 0x5fd   :  { %v3591_v42 = vld [vmem:[#allocation4 + $0x1c8] sm:$0xff]  ;;  %v12946_v33 = vsel %vm15740_vm14, %v12581_v39, %v3449_v3  ;;  %3455 = vst.msk [vmem:[#allocation4 + $0x388] sm:$0xff] %vm2822_vm3, %v3449_v3  ;;  %vm15745_vm14 = vcmask 834560  }
 0x5fe   :  { %3119 = vst.msk [vmem:[#allocation4 + $0x188] sm:$0xff] %vm2836_vm0, %v12942_v31  ;;  %3664 = vmatprep.subr.mxu0 %v3591_v42  ;;  %3840 = vperm.xlu1 %8957, %v3836_v38  }
 0x5ff   :  { %3329 = vrot.lane.b32.xlu0 %v12644_v37, %s9463_s27  ;;  %3665 = vmatpush1.msra.mxu0 %v12737_v15  ;;  %s16229_s27 = smov 89  }
 0x600   :  { %v3427_v51 = vpop.permute.xlu0 %3426  ;;  %v12957_v39 = vpop.permute.xlu1 %3089 }
 0x601   :  { %v3587_v40 = vld [vmem:[#allocation4 + $0x1a8] sm:$0xff]  ;;  %v12961_v3 = vsel %vm15741_vm10, %v12585_v10, %v3427_v51  ;;  %3433 = vst.msk [vmem:[#allocation4 + $0x368] sm:$0xff] %vm2822_vm3, %v3427_v51  ;;  %vm16227_vm10 = vcmask 719872  }
 0x602   :  { %3097 = vst.msk [vmem:[#allocation4 + $0x168] sm:$0xff] %vm2836_vm0, %v12957_v39  ;;  %3666 = vmatprep.subr.mxu0 %v3587_v40  ;;  %3845 = vperm.xlu1 %8957, %v3837_v56  }
 0x603   :  { %3307 = vrot.lane.b32.xlu0 %v12644_v37, %s9464_s20  ;;  %3667 = vmatpush1.msra.mxu0 %v12751_v11  ;;  %s16231_s20 = smov 91  }
 0x604   :  { %v3405_v15 = vpop.permute.xlu0 %3404  ;;  %v12969_v38 = vpop.permute.xlu1 %3043 }
 0x605   :  { %v3583_v42 = vld [vmem:[#allocation4 + $0x188] sm:$0xff]  ;;  %v12973_v10 = vsel %vm15745_vm14, %v12600_v21, %v3405_v15  ;;  %3411 = vst.msk [vmem:[#allocation4 + $0x348] sm:$0xff] %vm2822_vm3, %v3405_v15  ;;  %v3047_v40 = vsel %vm16227_vm10, %v12795_v25, %v12969_v38  ;;  %vm2951_vm10 = vcmask 752640   ;;  %vm15747_vm14 = vcmask 859136  }
 0x606   :  { %3668 = vmatprep.subr.mxu0 %v3583_v42  ;;  %3052 = vst.msk [vmem:[#allocation4 + $0x128] sm:$0xff] %vm2836_vm0, %v3047_v40 }
 0x607   :  { %3067 = vrot.lane.b32.xlu0 %v12668_v46, %s16228_s25  ;;  %3669 = vmatpush1.msra.mxu0 %v12759_v54  ;;  %s16237_s25 = smov 110  }
 0x608   :  { %v3384_v11 = vpop.permute.xlu0 %3383  ;;  %v12983_v56 = vpop.permute.xlu1 %2995 }
 0x609   :  { %v3579_v21 = vld [vmem:[#allocation4 + $0x168] sm:$0xff]  ;;  %v12987_v51 = vsel %vm15744_vm12, %v12606_v13, %v3384_v11  ;;  %3390 = vst.msk [vmem:[#allocation4 + $0x328] sm:$0xff] %vm2822_vm3, %v3384_v11  ;;  %v3000_v25 = vsel %vm2999_vm4, %v12817_v36, %v12983_v56  ;;  %vm16230_vm12 = vcmask 850944  }
 0x60a   :  { %3670 = vmatprep.subr.mxu0 %v3579_v21  ;;  %3005 = vst.msk [vmem:[#allocation4 + $0xe8] sm:$0xff] %vm2836_vm0, %v3000_v25 }
 0x60b   :  { %3019 = vrot.lane.b32.xlu0 %v12668_v46, %s16229_s27  ;;  %3671 = vmatpush1.msra.mxu0 %v12775_v1  ;;  %s16239_s27 = smov 79  }
 0x60c   :  { %v3364_v54 = vpop.permute.xlu0 %3363  ;;  %v12997_v15 = vpop.permute.xlu1 %2947 }
 0x60d   :  { %v13001_v13 = vsel %vm16230_vm12, %v12616_v22, %v3364_v54  ;;  %3369 = vst.msk [vmem:[#allocation4 + $0x308] sm:$0xff] %vm2822_vm3, %v3364_v54  ;;  %v2952_v36 = vsel %vm2951_vm10, %v12839_v23, %v12997_v15  ;;  %vm15748_vm12 = vcmask 867328  }
 0x60e   :  { %2957 = vst.msk [vmem:[#allocation4 + $0xa8] sm:$0xff] %vm2836_vm0, %v2952_v36 }
 0x60f   :  { %2971 = vrot.lane.b32.xlu0 %v12668_v46, %s16231_s20  ;;  %s16240_s20 = smov 111  }
 0x610   :  { %v3342_v1 = vpop.permute.xlu0 %3341  ;;  %v13010_v42 = vpop.permute.xlu1 %2900 }
 0x611   :  { %v13014_v22 = vsel %vm15747_vm14, %v12622_v7, %v3342_v1  ;;  %3348 = vst.msk [vmem:[#allocation4 + $0x2e8] sm:$0xff] %vm2822_vm3, %v3342_v1  ;;  %v2905_v23 = vsel %vm2904_vm1, %v12862_v58, %v13010_v42  ;;  %vm15750_vm14 = vcmask 875520  }
 0x612   :  { %2910 = vst.msk [vmem:[#allocation4 + $0x68] sm:$0xff] %vm2836_vm0, %v2905_v23 }
 0x613   :  { %2924 = vrot.lane.b32.xlu0 %v12668_v46, %s16232_s13  ;;  %s16336_s13 = smov 98  }
 0x614   :  { %v3320_v40 = vpop.permute.xlu0 %3319  ;;  %v3274_v11 = vpop.permute.xlu1 %3273 }
 0x615   :  { %v13025_v21 = vsel %vm15748_vm12, %v12632_v57, %v3320_v40  ;;  %3326 = vst.msk [vmem:[#allocation4 + $0x2c8] sm:$0xff] %vm2822_vm3, %v3320_v40  ;;  %vm15751_vm12 = vcmask 883712  }
 0x617   :  { %2876 = vrot.lane.b32.xlu0 %v12668_v46, %s16233_s29  ;;  %s16242_s29 = sld [smem:[#allocation116_spill]] }
 0x618   :  { %v3298_v7 = vpop.permute.xlu0 %3297  ;;  %v13030_v58 = vpop.permute.xlu1 %3251 }
 0x619   :  { %v13034_v25 = vsel %vm15750_vm14, %v12638_v53, %v3298_v7  ;;  %3304 = vst.msk [vmem:[#allocation4 + $0x2a8] sm:$0xff] %vm2822_vm3, %v3298_v7  ;;  %vm15754_vm14 = vcmask 678912  }
 0x61b   :  { %3285 = vrot.lane.b32.xlu0 %v12644_v37, %s9465_s22  ;;  %s16235_s22 = smov 78  }
 0x61c   :  { %v3276_v57 = vpop.permute.xlu0 %3275  ;;  %v13039_v54 = vpop.permute.xlu1 %3229 }
 0x61d   :  { %v13042_v36 = vsel %vm15751_vm12, %v3274_v11, %v3276_v57  ;;  %3282 = vst.msk [vmem:[#allocation4 + $0x288] sm:$0xff] %vm2822_vm3, %v3276_v57  ;;  %vm16236_vm12 = vcmask 785408  }
 0x61f   :  { %3253 = vrot.lane.b32.xlu0 %v12588_v52, %s16234_s23 }
 0x620   :  { %v3179_v53 = vpop.permute.xlu0 %3178  ;;  %v13047_v46 = vpop.permute.xlu1 %3208 }
 0x621   :  { %v3181_v1 = vsel %vm3180_vm9, %v12897_v2, %v3179_v53  ;;  %3187 = vst.msk [vmem:[#allocation4 + $0x1f8] sm:$0xff] %vm2839_vm11, %v3179_v53  ;;  %vm3136_vm9 = vcmask 687104  }
 0x623   :  { %3263 = vrot.lane.b32.xlu0 %v12644_v37, %s16235_s22  ;;  %s16338_s22 = smov 102  }
 0x624   :  { %v3157_v23 = vpop.permute.xlu0 %3156  ;;  %v13053_v40 = vpop.permute.xlu1 %2853 }
 0x625   :  { %v3159_v11 = vsel %vm15754_vm14, %v12912_v44, %v3157_v23  ;;  %3165 = vst.msk [vmem:[#allocation4 + $0x1d8] sm:$0xff] %vm2839_vm11, %v3157_v23  ;;  %v2857_v7 = vsel %vm16236_vm12, %v12885_v49, %v13053_v40  ;;  %vm16238_vm14 = vcmask 793600   ;;  %vm3114_vm12 = vcmask 695296  }
 0x626   :  { %2862 = vst.msk [vmem:[#allocation4 + $0x28] sm:$0xff] %vm2836_vm0, %v2857_v7 }
 0x627   :  { %3231 = vrot.lane.b32.xlu0 %v12588_v52, %s16237_s25 }
 0x628   :  { %v3135_v2 = vpop.permute.xlu0 %3134  ;;  %v13064_v57 = vpop.permute.xlu1 %2827  ;;  %v3597_v53 = vld [vmem:[#allocation4 + $0x1f8] sm:$0xff] }
 0x629   :  { %v3137_v30 = vsel %vm3136_vm9, %v12925_v41, %v3135_v2  ;;  %3143 = vst.msk [vmem:[#allocation4 + $0x1b8] sm:$0xff] %vm2839_vm11, %v3135_v2  ;;  %v2831_v44 = vsel %vm16238_vm14, %v12895_v6, %v13064_v57  ;;  %3739 = vmatprep.subr.mxu1 %v3597_v53  ;;  %vm16241_vm14 = vcmask 719872   ;;  %vm3504_vm9 = vcmask 547840  }
 0x62a   :  { %2837 = vst.msk [vmem:[#allocation4 + $0x8] sm:$0xff] %vm2836_vm0, %v2831_v44  ;;  %3740 = vmatpush1.msra.mxu1 %v3181_v1 }
 0x62b   :  { %3241 = vrot.lane.b32.xlu0 %v12644_v37, %s16239_s27  ;;  %s9468_s27 = smov 42  }
 0x62c   :  { %v3113_v49 = vpop.permute.xlu0 %3112  ;;  %v13074_v23 = vpop.permute.xlu1 %3519  ;;  %v3593_v7 = vld [vmem:[#allocation4 + $0x1d8] sm:$0xff] }
 0x62d   :  { %v3115_v41 = vsel %vm3114_vm12, %v12942_v31, %v3113_v49  ;;  %3121 = vst.msk [vmem:[#allocation4 + $0x198] sm:$0xff] %vm2839_vm11, %v3113_v49  ;;  %3741 = vmatprep.subr.mxu1 %v3593_v7  ;;  %vm3482_vm12 = vcmask 556032  }
 0x62e   :  { %3527 = vst.msk [vmem:[#allocation4 + $0x3e8] sm:$0xff] %vm2836_vm0, %v13074_v23  ;;  %3742 = vmatpush1.msra.mxu1 %v3159_v11 }
 0x62f   :  { %3210 = vrot.lane.b32.xlu0 %v12588_v52, %s16240_s20 }
 0x630   :  { %v3092_v6 = vpop.permute.xlu0 %3091  ;;  %v13082_v2 = vpop.permute.xlu1 %3500  ;;  %v3589_v1 = vld [vmem:[#allocation4 + $0x1b8] sm:$0xff] }
 0x631   :  { %v3093_v53 = vsel %vm2822_vm3, %v12957_v39, %v3092_v6  ;;  %3099 = vst.msk [vmem:[#allocation4 + $0x178] sm:$0xff] %vm2839_vm11, %v3092_v6  ;;  %3743 = vmatprep.subr.mxu1 %v3589_v1  ;;  %v3531_v39 = vld [vmem:[#allocation10 + $0x8] sm:$0xff] }
 0x632   :  { %3509 = vst.msk [vmem:[#allocation4 + $0x3c8] sm:$0xff] %vm2836_vm0, %v13082_v2  ;;  %3744 = vmatpush1.msra.mxu1 %v3137_v30  ;;  %3803 = vmatprep.mubr.f32.mxu1 %v3531_v39 }
 0x633   :  { %3220 = vrot.lane.b32.xlu0 %v12644_v37, %s16223_s4  ;;  %3726 = vmatprep.mubr.f32.mxu0 %v3531_v39  ;;  %s16335_s4 = smov 71  }
 0x634   :  { %v3046_v31 = vpop.permute.xlu0 %3045  ;;  %v3479_v44 = vpop.permute.xlu1 %3478  ;;  %v3585_v11 = vld [vmem:[#allocation4 + $0x198] sm:$0xff] }
 0x635   :  { %v13093_v49 = vsel %vm16241_vm14, %v12969_v38, %v3046_v31  ;;  %3054 = vst.msk [vmem:[#allocation4 + $0x138] sm:$0xff] %vm2839_vm11, %v3046_v31  ;;  %3745 = vmatprep.subr.mxu1 %v3585_v11  ;;  %v3816_v38 = vld [vmem:[%s16242_s29] sm:$0xff]  ;;  %vm3460_vm14 = vcmask 564224  }
 0x636   :  { %3487 = vst.msk [vmem:[#allocation4 + $0x3a8] sm:$0xff] %vm2836_vm0, %v3479_v44  ;;  %3746 = vmatpush1.msra.mxu1 %v3115_v41 }
 0x637   :  { %3190 = vrot.lane.b32.xlu0 %v12588_v52, %s16225_s24  ;;  %v3577_v52 = vld [vmem:[#allocation4 + $0x158] sm:$0xff] }
 0x638   :  { %v2998_v30 = vpop.permute.xlu0 %2997  ;;  %v3457_v7 = vpop.permute.xlu1 %3456  ;;  %v3581_v6 = vld [vmem:[#allocation4 + $0x178] sm:$0xff] }
 0x639   :  { %v13101_v1 = vsel %vm2999_vm4, %v12983_v56, %v2998_v30  ;;  %3007 = vst.msk [vmem:[#allocation4 + $0xf8] sm:$0xff] %vm2839_vm11, %v2998_v30  ;;  %3747 = vmatprep.subr.mxu1 %v3581_v6  ;;  %vm16243_vm4 = vcmask 785408  }
 0x63a   :  { %3465 = vst.msk [vmem:[#allocation4 + $0x388] sm:$0xff] %vm2836_vm0, %v3457_v7  ;;  %3748 = vmatpush1.msra.mxu1 %v3093_v53 }
 0x63b   :  { %3199 = vrot.lane.b32.xlu0 %v12644_v37, %s16224_s21  ;;  %3749 = vmatprep.subr.mxu1 %v3577_v52  ;;  %v3817_v37 = vld [vmem:[%s16242_s29 + $0x8] sm:$0xff]  ;;  %s16337_s29 = smov 108   ;;  %s16339_s21 = smov 103  }
 0x63c   :  { %v2950_v41 = vpop.permute.xlu0 %2949  ;;  %v3435_v31 = vpop.permute.xlu1 %3434 }
 0x63d   :  { %v13112_v56 = vsel %vm2951_vm10, %v12997_v15, %v2950_v41  ;;  %2959 = vst.msk [vmem:[#allocation4 + $0xb8] sm:$0xff] %vm2839_vm11, %v2950_v41  ;;  %vm16245_vm10 = vcmask 539648  }
 0x63e   :  { %3443 = vst.msk [vmem:[#allocation4 + $0x368] sm:$0xff] %vm2836_vm0, %v3435_v31 }
 0x63f   :  { %3820 = vperm.xlu0 %8956, %v3816_v38  }
 0x640   :  { %v2903_v53 = vpop.permute.xlu0 %2902  ;;  %v3413_v11 = vpop.permute.xlu1 %3412 }
 0x641   :  { %v13121_v39 = vsel %vm2904_vm1, %v13010_v42, %v2903_v53  ;;  %2912 = vst.msk [vmem:[#allocation4 + $0x78] sm:$0xff] %vm2839_vm11, %v2903_v53  ;;  %vm16244_vm1 = vcmask 793600  }
 0x642   :  { %3421 = vst.msk [vmem:[#allocation4 + $0x348] sm:$0xff] %vm2836_vm0, %v3413_v11 }
 0x643   :  { %3825 = vperm.xlu0 %8956, %v3817_v37  }
 0x644   :  { %v2856_v15 = vpop.permute.xlu0 %2855  ;;  %v3392_v30 = vpop.permute.xlu1 %3391 }
 0x645   :  { %v13127_v6 = vsel %vm16243_vm4, %v13053_v40, %v2856_v15  ;;  %2864 = vst.msk [vmem:[#allocation4 + $0x38] sm:$0xff] %vm2839_vm11, %v2856_v15  ;;  %vm3438_vm4 = vcmask 572416  }
 0x646   :  { %3399 = vst.msk [vmem:[#allocation4 + $0x328] sm:$0xff] %vm2836_vm0, %v3392_v30 }
 0x648   :  { %v2830_v52 = vpop.permute.xlu0 %2829  ;;  %v3371_v38 = vpop.permute.xlu1 %3370 }
 0x649   :  { %v13133_v42 = vsel %vm16244_vm1, %v13064_v57, %v2830_v52  ;;  %2840 = vst.msk [vmem:[#allocation4 + $0x18] sm:$0xff] %vm2839_vm11, %v2830_v52  ;;  %vm3416_vm1 = vcmask 580608  }
 0x64a   :  { %3378 = vst.msk [vmem:[#allocation4 + $0x308] sm:$0xff] %vm2836_vm0, %v3371_v38 }
 0x64c   :  { %v3522_v41 = vpop.permute.xlu0 %3521  ;;  %v3350_v37 = vpop.permute.xlu1 %3349 }
 0x64d   :  { %v13139_v40 = vsel %vm16245_vm10, %v13074_v23, %v3522_v41  ;;  %3529 = vst.msk [vmem:[#allocation4 + $0x3f8] sm:$0xff] %vm2839_vm11, %v3522_v41  ;;  %vm16246_vm10 = vcmask 588800  }
 0x64e   :  { %3358 = vst.msk [vmem:[#allocation4 + $0x2e8] sm:$0xff] %vm2836_vm0, %v3350_v37 }
 0x650   :  { %v3503_v53 = vpop.permute.xlu0 %3502  ;;  %v3328_v15 = vpop.permute.xlu1 %3327 }
 0x651   :  { %v13144_v57 = vsel %vm3504_vm9, %v13082_v2, %v3503_v53  ;;  %3511 = vst.msk [vmem:[#allocation4 + $0x3d8] sm:$0xff] %vm2839_vm11, %v3503_v53  ;;  %vm16247_vm9 = vcmask 596992  }
 0x652   :  { %3336 = vst.msk [vmem:[#allocation4 + $0x2c8] sm:$0xff] %vm2836_vm0, %v3328_v15 }
 0x654   :  { %v3481_v52 = vpop.permute.xlu0 %3480  ;;  %v3306_v45 = vpop.permute.xlu1 %3305 }
 0x655   :  { %v13148_v29 = vsel %vm3482_vm12, %v3479_v44, %v3481_v52  ;;  %3489 = vst.msk [vmem:[#allocation4 + $0x3b8] sm:$0xff] %vm2839_vm11, %v3481_v52  ;;  %vm3353_vm12 = vcmask 605184  }
 0x656   :  { %3314 = vst.msk [vmem:[#allocation4 + $0x2a8] sm:$0xff] %vm2836_vm0, %v3306_v45 }
 0x658   :  { %v3459_v23 = vpop.permute.xlu0 %3458  ;;  %v13152_v41 = vpop.permute.xlu1 %3283 }
 0x659   :  { %v13154_v34 = vsel %vm3460_vm14, %v3457_v7, %v3459_v23  ;;  %3467 = vst.msk [vmem:[#allocation4 + $0x398] sm:$0xff] %vm2839_vm11, %v3459_v23  ;;  %vm3331_vm14 = vcmask 613376  }
 0x65a   :  { %3292 = vst.msk [vmem:[#allocation4 + $0x288] sm:$0xff] %vm2836_vm0, %v13152_v41 }
 0x65c   :  { %v3437_v2 = vpop.permute.xlu0 %3436 }
 0x65d   :  { %v13159_v53 = vsel %vm3438_vm4, %v3435_v31, %v3437_v2  ;;  %3445 = vst.msk [vmem:[#allocation4 + $0x378] sm:$0xff] %vm2839_vm11, %v3437_v2  ;;  %vm3309_vm4 = vcmask 621568  }
 0x660   :  { %v3415_v44 = vpop.permute.xlu0 %3414 }
 0x661   :  { %v13163_v52 = vsel %vm3416_vm1, %v3413_v11, %v3415_v44  ;;  %3423 = vst.msk [vmem:[#allocation4 + $0x358] sm:$0xff] %vm2839_vm11, %v3415_v44 }
 0x664   :  { %v3394_v7 = vpop.permute.xlu0 %3393 }
 0x665   :  { %v13167_v28 = vsel %vm16246_vm10, %v3392_v30, %v3394_v7  ;;  %3401 = vst.msk [vmem:[#allocation4 + $0x338] sm:$0xff] %vm2839_vm11, %v3394_v7  ;;  %vm3071_vm10 = vcmask 711680  }
 0x668   :  { %v3373_v23 = vpop.permute.xlu0 %3372 }
 0x669   :  { %v13171_v27 = vsel %vm16247_vm9, %v3371_v38, %v3373_v23  ;;  %3380 = vst.msk [vmem:[#allocation4 + $0x318] sm:$0xff] %vm2839_vm11, %v3373_v23  ;;  %vm16248_vm9 = vcmask 728064  }
 0x66d   :  { %v3352_v31 = vpop.permute.xlu0 %3351 }
 0x66e   :  { %v13174_v2 = vsel %vm3353_vm12, %v3350_v37, %v3352_v31  ;;  %3360 = vst.msk [vmem:[#allocation4 + $0x2f8] sm:$0xff] %vm2839_vm11, %v3352_v31  ;;  %v3573_v31 = vld [vmem:[#allocation4 + $0x138] sm:$0xff]  ;;  %vm16249_vm12 = vmmov %vm16248_vm9 }
 0x671   :  { %v3330_v11 = vpop.permute.xlu0 %3329 }
 0x672   :  { %v13177_v44 = vsel %vm3331_vm14, %v3328_v15, %v3330_v11  ;;  %3338 = vst.msk [vmem:[#allocation4 + $0x2d8] sm:$0xff] %vm2839_vm11, %v3330_v11  ;;  %v3569_v11 = vld [vmem:[#allocation4 + $0x118] sm:$0xff]  ;;  %vm2975_vm14 = vcmask 744448  }
 0x675   :  { %v3308_v30 = vpop.permute.xlu0 %3307 }
 0x676   :  { %v13180_v7 = vsel %vm3309_vm4, %v3306_v45, %v3308_v30  ;;  %3316 = vst.msk [vmem:[#allocation4 + $0x2b8] sm:$0xff] %vm2839_vm11, %v3308_v30  ;;  %vm16250_vm4 = vcmask 760832  }
 0x679   :  { %v3068_v38 = vpop.permute.xlu0 %3067 }
 0x67a   :  { %v3072_v23 = vsel %vm3071_vm10, %v12726_v62, %v3068_v38  ;;  %v3073_v37 = vsel %vm3071_vm10, %v3068_v38, %v12841_v19  ;;  %v3565_v62 = vld [vmem:[#allocation4 + $0xf8] sm:$0xff]  ;;  %vm16251_vm10 = vmmov %vm16250_vm4 }
 0x67b   :  { %3077 = vst.msk [vmem:[#allocation4 + $0x148] sm:$0xff] %vm2836_vm0, %v3072_v23  ;;  %3750 = vmatpush1.msra.mxu1 %v3073_v37  ;;  %v3561_v38 = vld [vmem:[#allocation4 + $0xd8] sm:$0xff] }
 0x67c   :  { %3751 = vmatprep.subr.mxu1 %v3573_v31 }
 0x67d   :  { %v3020_v15 = vpop.permute.xlu0 %3019  ;;  %3752 = vmatpush1.msra.mxu1 %v13093_v49 }
 0x67e   :  { %v3023_v45 = vsel %vm16248_vm9, %v12748_v9, %v3020_v15  ;;  %v3024_v30 = vsel %vm16249_vm12, %v3020_v15, %v12849_v20  ;;  %3753 = vmatprep.subr.mxu1 %v3569_v11  ;;  %v3557_v9 = vld [vmem:[#allocation4 + $0xb8] sm:$0xff]  ;;  %v3571_v20 = vld [vmem:[#allocation4 + $0x128] sm:$0xff]  ;;  %vm2880_vm9 = vcmask 777216   ;;  %vm3287_vm12 = vcmask 629760  }
 0x67f   :  { %3028 = vst.msk [vmem:[#allocation4 + $0x108] sm:$0xff] %vm2836_vm0, %v3023_v45  ;;  %3754 = vmatpush1.msra.mxu1 %v3024_v30  ;;  %v3555_v30 = vld [vmem:[#allocation4 + $0xa8] sm:$0xff] }
 0x680   :  { %3755 = vmatprep.subr.mxu1 %v3565_v62  ;;  %v3547_v62 = vld [vmem:[#allocation4 + $0x68] sm:$0xff] }
 0x681   :  { %v2972_v19 = vpop.permute.xlu0 %2971  ;;  %3756 = vmatpush1.msra.mxu1 %v13101_v1  ;;  %v3553_v1 = vld [vmem:[#allocation4 + $0x98] sm:$0xff] }
 0x682   :  { %v2976_v49 = vsel %vm2975_vm14, %v12771_v61, %v2972_v19  ;;  %v2977_v23 = vsel %vm2975_vm14, %v2972_v19, %v12864_v26  ;;  %v3575_v37 = vld [vmem:[#allocation4 + $0x148] sm:$0xff]  ;;  %3757 = vmatprep.subr.mxu1 %v3561_v38  ;;  %vm3255_vm14 = vcmask 891904  }
 0x683   :  { %2981 = vst.msk [vmem:[#allocation4 + $0xc8] sm:$0xff] %vm2836_vm0, %v2976_v49  ;;  %3672 = vmatprep.subr.mxu0 %v3575_v37  ;;  %3758 = vmatpush1.msra.mxu1 %v2977_v23  ;;  %v3659_v37 = vld [vmem:[#allocation4 + $0x3e8] sm:$0xff] }
 0x684   :  { %3673 = vmatpush1.msra.mxu0 %v12783_v4  ;;  %3759 = vmatprep.subr.mxu1 %v3557_v9  ;;  %v3549_v4 = vld [vmem:[#allocation4 + $0x78] sm:$0xff] }
 0x685   :  { %v2925_v31 = vpop.permute.xlu0 %2924  ;;  %3674 = vmatprep.subr.mxu0 %v3571_v20  ;;  %3760 = vmatpush1.msra.mxu1 %v13112_v56  ;;  %v3563_v56 = vld [vmem:[#allocation4 + $0xe8] sm:$0xff]  ;;  %v3641_v9 = vld [vmem:[#allocation4 + $0x358] sm:$0xff] }
 0x686   :  { %v2928_v61 = vsel %vm16250_vm4, %v12797_v16, %v2925_v31  ;;  %v2929_v26 = vsel %vm16251_vm10, %v2925_v31, %v12872_v14  ;;  %3675 = vmatpush1.msra.mxu0 %v12741_v63  ;;  %v3567_v15 = vld [vmem:[#allocation4 + $0x108] sm:$0xff]  ;;  %3761 = vmatprep.subr.mxu1 %v3553_v1  ;;  %v3545_v16 = vld [vmem:[#allocation4 + $0x58] sm:$0xff]  ;;  %vm3265_vm4 = vcmask 637952   ;;  %vm3233_vm10 = vcmask 900096  }
 0x687   :  { %2933 = vst.msk [vmem:[#allocation4 + $0x88] sm:$0xff] %vm2836_vm0, %v2928_v61  ;;  %3676 = vmatprep.subr.mxu0 %v3567_v15  ;;  %3762 = vmatpush1.msra.mxu1 %v2929_v26  ;;  %v3655_v20 = vld [vmem:[#allocation4 + $0x3c8] sm:$0xff]  ;;  %v3633_v1 = vld [vmem:[#allocation4 + $0x318] sm:$0xff] }
 0x688   :  { %3677 = vmatpush1.msra.mxu0 %v12805_v18  ;;  %3763 = vmatprep.subr.mxu1 %v3549_v4  ;;  %v3541_v18 = vld [vmem:[#allocation4 + $0x38] sm:$0xff]  ;;  %v3647_v61 = vld [vmem:[#allocation4 + $0x388] sm:$0xff] }
 0x689   :  { %v2877_v11 = vpop.permute.xlu0 %2876  ;;  %3678 = vmatprep.subr.mxu0 %v3563_v56  ;;  %3764 = vmatpush1.msra.mxu1 %v13121_v39  ;;  %v3631_v56 = vld [vmem:[#allocation4 + $0x308] sm:$0xff] }
 0x68a   :  { %v2881_v14 = vsel %vm2880_vm9, %v12819_v35, %v2877_v11  ;;  %v2882_v63 = vsel %vm2880_vm9, %v2877_v11, %v12887_v43  ;;  %3679 = vmatpush1.msra.mxu0 %v12764_v24  ;;  %v3559_v45 = vld [vmem:[#allocation4 + $0xc8] sm:$0xff]  ;;  %3765 = vmatprep.subr.mxu1 %v3545_v16  ;;  %v3537_v35 = vld [vmem:[#allocation4 + $0x18] sm:$0xff]  ;;  %vm3243_vm9 = vcmask 646144  }
 0x68b   :  { %2886 = vst.msk [vmem:[#allocation4 + $0x48] sm:$0xff] %vm2836_vm0, %v2881_v14  ;;  %3680 = vmatprep.subr.mxu0 %v3559_v45  ;;  %3766 = vmatpush1.msra.mxu1 %v2882_v63 }
 0x68c   :  { %3681 = vmatpush1.msra.mxu0 %v12827_v55  ;;  %3767 = vmatprep.subr.mxu1 %v3541_v18  ;;  %v3661_v55 = vld [vmem:[#allocation4 + $0x3f8] sm:$0xff] }
 0x68d   :  { %v3286_v39 = vpop.permute.xlu0 %3285  ;;  %3682 = vmatprep.subr.mxu0 %v3555_v30  ;;  %3768 = vmatpush1.msra.mxu1 %v13127_v6  ;;  %v3262_v6 = vpop.permute.xlu1 %3261  ;;  %v3615_v30 = vld [vmem:[#allocation4 + $0x288] sm:$0xff] }
 0x68e   :  { %v13213_v43 = vsel %vm3287_vm12, %v13152_v41, %v3286_v39  ;;  %3294 = vst.msk [vmem:[#allocation4 + $0x298] sm:$0xff] %vm2839_vm11, %v3286_v39  ;;  %3683 = vmatpush1.msra.mxu0 %v12788_v59  ;;  %v3551_v24 = vld [vmem:[#allocation4 + $0x88] sm:$0xff]  ;;  %3769 = vmatprep.subr.mxu1 %v3537_v35  ;;  %v3657_v41 = vld [vmem:[#allocation4 + $0x3d8] sm:$0xff]  ;;  %vm3212_vm12 = vcmask 908288  }
 0x68f   :  { %3684 = vmatprep.subr.mxu0 %v3551_v24  ;;  %3770 = vmatpush1.msra.mxu1 %v13133_v42  ;;  %v3533_v24 = vld [vmem:[#allocation10 + $0x18] sm:$0xff] }
 0x690   :  { %3685 = vmatpush1.msra.mxu0 %v12853_v48  ;;  %3771 = vmatprep.subr.mxu1 %v3661_v55  ;;  %v3653_v48 = vld [vmem:[#allocation4 + $0x3b8] sm:$0xff]  ;;  %v16255_v55 = vmov 0.0  }
 0x691   :  { %v3254_v19 = vpop.permute.xlu0 %3253  ;;  %3686 = vmatprep.subr.mxu0 %v3547_v62  ;;  %3772 = vmatpush2.msra.mxu1 %v13139_v40  ;;  %v3539_v40 = vld [vmem:[#allocation4 + $0x28] sm:$0xff]  ;;  %v3240_v23 = vpop.permute.xlu1 %3239  ;;  %v16257_v62 = vld [vmem:[#allocation29_spill] sm:$0xff] }
 0x692   :  { %v13222_v59 = vsel %vm3255_vm14, %v13030_v58, %v3254_v19  ;;  %3260 = vst.msk [vmem:[#allocation4 + $0x268] sm:$0xff] %vm2822_vm3, %v3254_v19  ;;  %3687 = vmatpush1.msra.mxu0 %v12810_v8  ;;  %v3543_v42 = vld [vmem:[#allocation4 + $0x48] sm:$0xff]  ;;  %3773 = vmatprep.subr.mxu1 %v3657_v41  ;;  %v3649_v58 = vld [vmem:[#allocation4 + $0x398] sm:$0xff] }
 0x693   :  { %3270 = vst.msk [vmem:[#allocation4 + $0x268] sm:$0xff] %vm2836_vm0, %v3262_v6  ;;  %3688 = vmatprep.subr.mxu0 %v3543_v42  ;;  %3774 = vmatpush2.msra.mxu1 %v13144_v57  ;;  %v3535_v8 = vld [vmem:[#allocation4 + $0x8] sm:$0xff]  ;;  %v3534_v57 = vld [vmem:[#allocation4] sm:$0xff] }
 0x694   :  { %3689 = vmatpush1.msra.mxu0 %v12876_v5  ;;  %3775 = vmatprep.subr.mxu1 %v3653_v48  ;;  %v3645_v5 = vld [vmem:[#allocation4 + $0x378] sm:$0xff]  ;;  %v16263_v19 = vld [vmem:[#allocation31_spill] sm:$0xff] }
 0x695   :  { %v3264_v38 = vpop.permute.xlu0 %3263  ;;  %3690 = vmatprep.subr.mxu0 %v3539_v40  ;;  %3776 = vmatpush2.msra.mxu1 %v13148_v29  ;;  %v3219_v31 = vpop.permute.xlu1 %3218  ;;  %v16269_v41 = vld [vmem:[#allocation33_spill] sm:$0xff]  ;;  %v16275_v42 = vld [vmem:[#allocation35_spill] sm:$0xff]  ;;  %v16278_v48 = vld [vmem:[#allocation36_spill] sm:$0xff] }
 0x696   :  { %v13230_v49 = vsel %vm3265_vm4, %v3262_v6, %v3264_v38  ;;  %3272 = vst.msk [vmem:[#allocation4 + $0x278] sm:$0xff] %vm2839_vm11, %v3264_v38  ;;  %3691 = vmatpush1.msra.mxu0 %v12832_v60  ;;  %3777 = vmatprep.subr.mxu1 %v3649_v58  ;;  %vm16252_vm4 = vcmask 654336   ;;  %v16260_v6 = vld [vmem:[#allocation30_spill] sm:$0xff] }
 0x697   :  { %3692 = vmatprep.subr.mxu0 %v3535_v8  ;;  %3778 = vmatpush2.msra.mxu1 %v13154_v34  ;;  %v3637_v34 = vld [vmem:[#allocation4 + $0x338] sm:$0xff] }
 0x698   :  { %3693 = vmatpush1.msra.mxu0 %v3534_v57  ;;  %3779 = vmatprep.subr.mxu1 %v3645_v5 }
 0x699   :  { %v3232_v29 = vpop.permute.xlu0 %3231  ;;  %3694 = vmatprep.subr.mxu0 %v3659_v37  ;;  %3780 = vmatpush2.msra.mxu1 %v13159_v53  ;;  %v3651_v53 = vld [vmem:[#allocation4 + $0x3a8] sm:$0xff] }
 0x69a   :  { %v13238_v60 = vsel %vm3233_vm10, %v13039_v54, %v3232_v29  ;;  %3238 = vst.msk [vmem:[#allocation4 + $0x248] sm:$0xff] %vm2822_vm3, %v3232_v29  ;;  %3695 = vmatpush2.msra.mxu0 %v12902_v32  ;;  %3781 = vmatprep.subr.mxu1 %v3641_v9 }
 0x69b   :  { %3248 = vst.msk [vmem:[#allocation4 + $0x248] sm:$0xff] %vm2836_vm0, %v3240_v23  ;;  %3696 = vmatprep.subr.mxu0 %v3655_v20  ;;  %3782 = vmatpush2.msra.mxu1 %v13163_v52  ;;  %v3643_v52 = vld [vmem:[#allocation4 + $0x368] sm:$0xff] }
 0x69c   :  { %3697 = vmatpush2.msra.mxu0 %v12916_v50  ;;  %3783 = vmatprep.subr.mxu1 %v3637_v34  ;;  %v3629_v50 = vld [vmem:[#allocation4 + $0x2f8] sm:$0xff] }
 0x69d   :  { %v3242_v54 = vpop.permute.xlu0 %3241  ;;  %3698 = vmatprep.subr.mxu0 %v3651_v53  ;;  %3784 = vmatpush2.msra.mxu1 %v13167_v28  ;;  %v3625_v28 = vld [vmem:[#allocation4 + $0x2d8] sm:$0xff] }
 0x69e   :  { %v3244_v32 = vsel %vm3243_vm9, %v3240_v23, %v3242_v54  ;;  %3250 = vst.msk [vmem:[#allocation4 + $0x258] sm:$0xff] %vm2839_vm11, %v3242_v54  ;;  %3699 = vmatpush2.msra.mxu0 %v12929_v0  ;;  %3785 = vmatprep.subr.mxu1 %v3633_v1  ;;  %v3639_v0 = vld [vmem:[#allocation4 + $0x348] sm:$0xff]  ;;  %vm16253_vm9 = vcmask 916480  }
 0x69f   :  { %3700 = vmatprep.subr.mxu0 %v3647_v61  ;;  %3786 = vmatpush2.msra.mxu1 %v13171_v27  ;;  %v3198_v27 = vpop.permute.xlu1 %3197 }
 0x6a0   :  { %3701 = vmatpush2.msra.mxu0 %v12946_v33  ;;  %3787 = vmatprep.subr.mxu1 %v3629_v50  ;;  %v3621_v33 = vld [vmem:[#allocation4 + $0x2b8] sm:$0xff] }
 0x6a1   :  { %v3211_v26 = vpop.permute.xlu0 %3210  ;;  %3702 = vmatprep.subr.mxu0 %v3643_v52  ;;  %3788 = vmatpush2.msra.mxu1 %v13174_v2  ;;  %v3635_v2 = vld [vmem:[#allocation4 + $0x328] sm:$0xff] }
 0x6a2   :  { %v13253_v15 = vsel %vm3212_vm12, %v13047_v46, %v3211_v26  ;;  %3217 = vst.msk [vmem:[#allocation4 + $0x228] sm:$0xff] %vm2822_vm3, %v3211_v26  ;;  %3703 = vmatpush2.msra.mxu0 %v12961_v3  ;;  %3789 = vmatprep.subr.mxu1 %v3625_v28  ;;  %v3617_v46 = vld [vmem:[#allocation4 + $0x298] sm:$0xff] }
 0x6a3   :  { %3226 = vst.msk [vmem:[#allocation4 + $0x228] sm:$0xff] %vm2836_vm0, %v3219_v31  ;;  %3704 = vmatprep.subr.mxu0 %v3639_v0  ;;  %3790 = vmatpush2.msra.mxu1 %v13177_v44  ;;  %v3613_v44 = vld [vmem:[#allocation4 + $0x278] sm:$0xff]  ;;  %v3189_v11 = vpop.permute.xlu1 %3188 }
 0x6a4   :  { %3705 = vmatpush2.msra.mxu0 %v12973_v10  ;;  %3791 = vmatprep.subr.mxu1 %v3621_v33  ;;  %v3627_v10 = vld [vmem:[#allocation4 + $0x2e8] sm:$0xff] }
 0x6a5   :  { %v3221_v4 = vpop.permute.xlu0 %3220  ;;  %3706 = vmatprep.subr.mxu0 %v3635_v2  ;;  %3792 = vmatpush2.msra.mxu1 %v13180_v7  ;;  %v3609_v7 = vld [vmem:[#allocation4 + $0x258] sm:$0xff] }
 0x6a6   :  { %v3222_v3 = vsel %vm16252_vm4, %v3219_v31, %v3221_v4  ;;  %3228 = vst.msk [vmem:[#allocation4 + $0x238] sm:$0xff] %vm2839_vm11, %v3221_v4  ;;  %3707 = vmatpush2.msra.mxu0 %v12987_v51  ;;  %3793 = vmatprep.subr.mxu1 %v3617_v46  ;;  %v3623_v51 = vld [vmem:[#allocation4 + $0x2c8] sm:$0xff]  ;;  %vm16254_vm4 = vcmask 662528  }
 0x6a7   :  { %3708 = vmatprep.subr.mxu0 %v3631_v56  ;;  %3794 = vmatpush2.msra.mxu1 %v13213_v43  ;;  %v3530_v43 = vld [vmem:[#allocation10] sm:$0xff] }
 0x6a8   :  { %3709 = vmatpush2.msra.mxu0 %v13001_v13  ;;  %3795 = vmatprep.subr.mxu1 %v3613_v44  ;;  %v3619_v13 = vld [vmem:[#allocation4 + $0x2a8] sm:$0xff] }
 0x6a9   :  { %v3191_v16 = vpop.permute.xlu0 %3190  ;;  %3710 = vmatprep.subr.mxu0 %v3627_v10  ;;  %3796 = vmatpush2.msra.mxu1 %v13230_v49 }
 0x6aa   :  { %v3192_v14 = vsel %vm16253_vm9, %v3189_v11, %v3191_v16  ;;  %3196 = vst.msk [vmem:[#allocation4 + $0x208] sm:$0xff] %vm2822_vm3, %v3191_v16  ;;  %3711 = vmatpush2.msra.mxu0 %v13014_v22  ;;  %3797 = vmatprep.subr.mxu1 %v3609_v7  ;;  %v3611_v22 = vld [vmem:[#allocation4 + $0x268] sm:$0xff]  ;;  %vm16256_vm3 = vcmp.eq.s32.totalorder %v10163_v17, %v10155_v12  ;;  %v16266_v17 = vld [vmem:[#allocation32_spill] sm:$0xff]  ;;  %v16289_v7 = vld [vmem:[#allocation49_spill] sm:$0xff] }
 0x6ab   :  { %3205 = vst.msk [vmem:[#allocation4 + $0x208] sm:$0xff] %vm2836_vm0, %v3198_v27  ;;  %3712 = vmatprep.subr.mxu0 %v3623_v51  ;;  %3798 = vmatpush2.msra.mxu1 %v3244_v32  ;;  %v3603_v39 = vld [vmem:[#allocation4 + $0x228] sm:$0xff]  ;;  %vm16259_vm0 = vmmov %vm16256_vm3  ;;  %vm16261_vm9 = vcmp.eq.s32.totalorder %v16260_v6, %v10155_v12 }
 0x6ac   :  { %3713 = vmatpush2.msra.mxu0 %v13025_v21  ;;  %v3607_v21 = vld [vmem:[#allocation4 + $0x248] sm:$0xff] }
 0x6ad   :  { %v3200_v63 = vpop.permute.xlu0 %3199  ;;  %3714 = vmatprep.subr.mxu0 %v3619_v13  ;;  %v3605_v45 = vld [vmem:[#allocation4 + $0x238] sm:$0xff]  ;;  %v16291_v51 = vld [vmem:[#allocation50_spill] sm:$0xff]  ;;  %v16294_v13 = vld [vmem:[#allocation51_spill] sm:$0xff] }
 0x6ae   :  { %v3201_v18 = vsel %vm16254_vm4, %v3198_v27, %v3200_v63  ;;  %3207 = vst.msk [vmem:[#allocation4 + $0x218] sm:$0xff] %vm2839_vm11, %v3200_v63  ;;  %3715 = vmatpush2.msra.mxu0 %v13034_v25  ;;  %3799 = vmatprep.subr.mxu1 %v3605_v45  ;;  %vm16258_vm11 = vcmp.eq.s32.totalorder %v16257_v62, %v10155_v12  ;;  %v16297_v63 = vld [vmem:[#allocation52_spill] sm:$0xff]  ;;  %v16300_v45 = vld [vmem:[#allocation53_spill] sm:$0xff] }
 0x6af   :  { %3716 = vmatprep.subr.mxu0 %v3615_v30  ;;  %3800 = vmatpush2.msra.mxu1 %v3222_v3  ;;  %vm16262_vm4 = vmmov %vm16258_vm11  ;;  %v16306_v30 = vld [vmem:[#allocation55_spill] sm:$0xff] }
 0x6b0   :  { %3717 = vmatpush2.msra.mxu0 %v13042_v36  ;;  %v3532_v36 = vld [vmem:[#allocation10 + $0x10] sm:$0xff] }
 0x6b1   :  { %3718 = vmatprep.subr.mxu0 %v3611_v22  ;;  %v16309_v22 = vld [vmem:[#allocation56_spill] sm:$0xff] }
 0x6b2   :  { %3719 = vmatpush2.msra.mxu0 %v13222_v59  ;;  %v3599_v25 = vld [vmem:[#allocation4 + $0x208] sm:$0xff] }
 0x6b3   :  { %3720 = vmatprep.subr.mxu0 %v3607_v21  ;;  %v16272_v59 = vld [vmem:[#allocation34_spill] sm:$0xff]  ;;  %v16312_v21 = vld [vmem:[#allocation57_spill] sm:$0xff] }
 0x6b4   :  { %3721 = vmatpush2.msra.mxu0 %v13238_v60  ;;  %v13432_v60 = vpop.permute.xlu1 %3840 }
 0x6b5   :  { %3722 = vmatprep.subr.mxu0 %v3603_v39  ;;  %v3601_v35 = vld [vmem:[#allocation4 + $0x218] sm:$0xff]  ;;  %v16315_v39 = vld [vmem:[#allocation58_spill] sm:$0xff] }
 0x6b6   :  { %3723 = vmatpush2.msra.mxu0 %v13253_v15  ;;  %3801 = vmatprep.subr.mxu1 %v3601_v35  ;;  %v16318_v35 = vld [vmem:[#allocation59_spill] sm:$0xff] }
 0x6b7   :  { %3724 = vmatprep.subr.mxu0 %v3599_v25  ;;  %3802 = vmatpush2.msra.mxu1 %v3201_v18  ;;  %v16303_v18 = vld [vmem:[#allocation54_spill] sm:$0xff] }
 0x6b8   :  { %3725 = vmatpush2.msra.mxu0 %v3192_v14  ;;  %3804 = vmatmul.mubr.f32.vlgmr.msra.gmra.mxu1 %v3530_v43  ;;  %v13458_v2 = vpop.permute.xlu1 %3845 }
 0x6b9   :  { %3727 = vmatmul.mubr.f32.vlgmr.msra.gmra.mxu0 %v3530_v43  ;;  %3809 = vmatprep.mubr.f32.mxu1 %v3533_v24 }
 0x6ba   :  { %3732 = vmatprep.mubr.f32.mxu0 %v3533_v24  ;;  %4070 = vmatprep.subr.mxu1 %v16255_v55  ;;  %v13427_v5 = vpop.permute.xlu0 %3820 }
 0x6bb   :  { %8407 = vmatpush1.msk.msra.mxu1 %vm16256_vm3, %v15911_v47  ;;  %3914 = vmatprep.subr.mxu0 %v16255_v55  ;;  %vm16264_vm3 = vcmp.eq.s32.totalorder %v16263_v19, %v10155_v12 }
 0x6bc   :  { %3810 = vmatmul.mubr.f32.gmra.mxu1 %v3532_v36  ;;  %4072 = vmatprep.subr.mxu1 %v16255_v55 }
 0x6bd   :  { %3733 = vmatmul.mubr.f32.gmra.mxu0 %v3532_v36  ;;  %8408 = vmatpush1.msk.msra.mxu1 %vm16258_vm11, %v15911_v47  ;;  %vm16265_vm11 = vmmov %vm16261_vm9 }
 0x6be   :  { %4074 = vmatprep.subr.mxu1 %v16255_v55  ;;  %8378 = vmatpush1.msk.msra.mxu0 %vm16259_vm0, %v15911_v47  ;;  %vm16267_vm0 = vcmp.eq.s32.totalorder %v16266_v17, %v10155_v12  ;;  %v13447_v26 = vpop.permute.xlu0 %3825 }
 0x6bf   :  { %8409 = vmatpush1.msk.msra.mxu1 %vm16261_vm9, %v15911_v47  ;;  %3916 = vmatprep.subr.mxu0 %v16255_v55  ;;  %vm16268_vm9 = vmmov %vm16264_vm3 }
 0x6c0   :  { %4076 = vmatprep.subr.mxu1 %v16255_v55  ;;  %8379 = vmatpush1.msk.msra.mxu0 %vm16262_vm4, %v15911_v47  ;;  %vm16270_vm4 = vcmp.eq.s32.totalorder %v16269_v41, %v10155_v12 }
 0x6c1   :  { %8410 = vmatpush1.msk.msra.mxu1 %vm16264_vm3, %v15911_v47  ;;  %3918 = vmatprep.subr.mxu0 %v16255_v55  ;;  %vm16271_vm3 = vmmov %vm16267_vm0 }
 0x6c2   :  { %4078 = vmatprep.subr.mxu1 %v16255_v55  ;;  %8380 = vmatpush1.msk.msra.mxu0 %vm16265_vm11, %v15911_v47  ;;  %vm16273_vm11 = vcmp.eq.s32.totalorder %v16272_v59, %v10155_v12 }
 0x6c3   :  { %8411 = vmatpush1.msk.msra.mxu1 %vm16267_vm0, %v15911_v47  ;;  %3920 = vmatprep.subr.mxu0 %v16255_v55  ;;  %vm16274_vm0 = vmmov %vm16270_vm4 }
 0x6c4   :  { %4080 = vmatprep.subr.mxu1 %v16255_v55  ;;  %8381 = vmatpush1.msk.msra.mxu0 %vm16268_vm9, %v15911_v47  ;;  %vm16276_vm9 = vcmp.eq.s32.totalorder %v16275_v42, %v10155_v12 }
 0x6c5   :  { %8412 = vmatpush1.msk.msra.mxu1 %vm16270_vm4, %v15911_v47  ;;  %3922 = vmatprep.subr.mxu0 %v16255_v55  ;;  %vm16277_vm4 = vmmov %vm16273_vm11 }
 0x6c6   :  { %4082 = vmatprep.subr.mxu1 %v16255_v55  ;;  %8382 = vmatpush1.msk.msra.mxu0 %vm16271_vm3, %v15911_v47  ;;  %vm16279_vm3 = vcmp.eq.s32.totalorder %v16278_v48, %v10155_v12 }
 0x6c7   :  { %8413 = vmatpush1.msk.msra.mxu1 %vm16273_vm11, %v15911_v47  ;;  %3924 = vmatprep.subr.mxu0 %v16255_v55  ;;  %vm16280_vm11 = vmmov %vm16276_vm9 }
 0x6c8   :  { %4084 = vmatprep.subr.mxu1 %v16255_v55  ;;  %8383 = vmatpush1.msk.msra.mxu0 %vm16274_vm0, %v15911_v47  ;;  %vm16282_vm0 = vmmov %vm16279_vm3 }
 0x6c9   :  { %8414 = vmatpush1.msk.msra.mxu1 %vm16276_vm9, %v15911_v47  ;;  %3926 = vmatprep.subr.mxu0 %v16255_v55  ;;  %vm16290_vm9 = vcmp.eq.s32.totalorder %v16289_v7, %v10155_v12 }
 0x6ca   :  { %4086 = vmatprep.subr.mxu1 %v16255_v55  ;;  %8384 = vmatpush1.msk.msra.mxu0 %vm16277_vm4, %v15911_v47  ;;  %v7876_v14 = vsel %vm16290_vm9, 1.0, %v16255_v55  ;;  %vm15765_vm4 = vcmask 1042432  }
 0x6cb   :  { %8415 = vmatpush1.msk.msra.mxu1 %vm16279_vm3, %v15911_v47  ;;  %3928 = vmatprep.subr.mxu0 %v16255_v55  ;;  %vm16292_vm3 = vcmp.eq.s32.totalorder %v16291_v51, %v10155_v12 }
 0x6cc   :  { %4088 = vmatprep.subr.mxu1 %v16255_v55  ;;  %8385 = vmatpush1.msk.msra.mxu0 %vm16280_vm11, %v15911_v47  ;;  %vm16293_vm11 = vmmov %vm16292_vm3 }
 0x6cd   :  { %8416 = vmatpush1.msk.msra.mxu1 %vm10311_vm2, %v15911_v47  ;;  %3930 = vmatprep.subr.mxu0 %v16255_v55 }
 0x6ce   :  { %4090 = vmatprep.subr.mxu1 %v16255_v55  ;;  %8386 = vmatpush1.msk.msra.mxu0 %vm16282_vm0, %v15911_v47  ;;  %vm16295_vm0 = vcmp.eq.s32.totalorder %v16294_v13, %v10155_v12 }
 0x6cf   :  { %8417 = vmatpush1.msk.msra.mxu1 %vm10330_vm15, %v15911_v47  ;;  %3932 = vmatprep.subr.mxu0 %v16255_v55  ;;  %vm16296_vm9 = vmmov %vm16295_vm0 }
 0x6d0   :  { %4092 = vmatprep.subr.mxu1 %v16255_v55  ;;  %8387 = vmatpush1.msk.msra.mxu0 %vm10311_vm2, %v15911_v47 }
 0x6d1   :  { %8418 = vmatpush1.msk.msra.mxu1 %vm10342_vm5, %v15911_v47  ;;  %3934 = vmatprep.subr.mxu0 %v16255_v55 }
 0x6d2   :  { %4094 = vmatprep.subr.mxu1 %v16255_v55  ;;  %8388 = vmatpush1.msk.msra.mxu0 %vm10330_vm15, %v15911_v47 }
 0x6d3   :  { %8419 = vmatpush1.msk.msra.mxu1 %vm10366_vm7, %v15911_v47  ;;  %3936 = vmatprep.subr.mxu0 %v16255_v55 }
 0x6d4   :  { %4096 = vmatprep.subr.mxu1 %v16255_v55  ;;  %8389 = vmatpush1.msk.msra.mxu0 %vm10342_vm5, %v15911_v47 }
 0x6d5   :  { %8420 = vmatpush1.msk.msra.mxu1 %vm10378_vm8, %v15911_v47  ;;  %3938 = vmatprep.subr.mxu0 %v16255_v55 }
 0x6d6   :  { %4098 = vmatprep.subr.mxu1 %v16255_v55  ;;  %8390 = vmatpush1.msk.msra.mxu0 %vm10366_vm7, %v15911_v47 }
 0x6d7   :  { %8421 = vmatpush1.msk.msra.mxu1 %vm10402_vm6, %v15911_v47  ;;  %3940 = vmatprep.subr.mxu0 %v16255_v55 }
 0x6d8   :  { %4100 = vmatprep.subr.mxu1 %v16255_v55  ;;  %8391 = vmatpush1.msk.msra.mxu0 %vm10378_vm8, %v15911_v47 }
 0x6d9   :  { %8422 = vmatpush1.msk.msra.mxu1 %vm10419_vm13, %v15911_v47  ;;  %3942 = vmatprep.subr.mxu0 %v16255_v55 }
 0x6da   :  { %4112 = vmatprep.subr.mxu1 %v16255_v55  ;;  %8392 = vmatpush1.msk.msra.mxu0 %vm10402_vm6, %v15911_v47 }
 0x6db   :  { %3944 = vmatprep.subr.mxu0 %v16255_v55  ;;  %8423 = vmatpush2.msk.msra.mxu1 %vm15765_vm4, %v7876_v14 }
 0x6dc   :  { %8393 = vmatpush1.msk.msra.mxu0 %vm10419_vm13, %v15911_v47  ;;  %4114 = vmatprep.subr.mxu1 %v16255_v55 }
 0x6dd   :  { %3956 = vmatprep.subr.mxu0 %v16255_v55  ;;  %8424 = vmatpush2.msk.msra.mxu1 %vm16292_vm3, %v15911_v47  ;;  %vm16298_vm3 = vcmp.eq.s32.totalorder %v16297_v63, %v10155_v12 }
 0x6de   :  { %8394 = vmatpush2.msk.msra.mxu0 %vm15765_vm4, %v7876_v14  ;;  %4116 = vmatprep.subr.mxu1 %v16255_v55  ;;  %vm16332_vm4 = vcmask 1031168  }
 0x6df   :  { %3958 = vmatprep.subr.mxu0 %v16255_v55  ;;  %8425 = vmatpush2.msk.msra.mxu1 %vm16295_vm0, %v15911_v47  ;;  %vm16301_vm0 = vcmp.eq.s32.totalorder %v16300_v45, %v10155_v12 }
 0x6e0   :  { %8395 = vmatpush2.msk.msra.mxu0 %vm16293_vm11, %v15911_v47  ;;  %4118 = vmatprep.subr.mxu1 %v16255_v55  ;;  %vm16299_vm11 = vmmov %vm16298_vm3 }
 0x6e1   :  { %3960 = vmatprep.subr.mxu0 %v16255_v55  ;;  %8426 = vmatpush2.msk.msra.mxu1 %vm16298_vm3, %v15911_v47  ;;  %vm16304_vm3 = vcmp.eq.s32.totalorder %v16303_v18, %v10155_v12 }
 0x6e2   :  { %8396 = vmatpush2.msk.msra.mxu0 %vm16296_vm9, %v15911_v47  ;;  %4120 = vmatprep.subr.mxu1 %v16255_v55  ;;  %vm16302_vm9 = vmmov %vm16301_vm0 }
 0x6e3   :  { %3962 = vmatprep.subr.mxu0 %v16255_v55  ;;  %8427 = vmatpush2.msk.msra.mxu1 %vm16301_vm0, %v15911_v47  ;;  %vm16307_vm0 = vcmp.eq.s32.totalorder %v16306_v30, %v10155_v12 }
 0x6e4   :  { %8397 = vmatpush2.msk.msra.mxu0 %vm16299_vm11, %v15911_v47  ;;  %4122 = vmatprep.subr.mxu1 %v16255_v55  ;;  %vm16305_vm11 = vmmov %vm16304_vm3 }
 0x6e5   :  { %3964 = vmatprep.subr.mxu0 %v16255_v55  ;;  %8428 = vmatpush2.msk.msra.mxu1 %vm16304_vm3, %v15911_v47  ;;  %vm16310_vm3 = vcmp.eq.s32.totalorder %v16309_v22, %v10155_v12 }
 0x6e6   :  { %8398 = vmatpush2.msk.msra.mxu0 %vm16302_vm9, %v15911_v47  ;;  %4124 = vmatprep.subr.mxu1 %v16255_v55  ;;  %vm16308_vm9 = vmmov %vm16307_vm0 }
 0x6e7   :  { %3966 = vmatprep.subr.mxu0 %v16255_v55  ;;  %8429 = vmatpush2.msk.msra.mxu1 %vm16307_vm0, %v15911_v47  ;;  %vm16313_vm0 = vcmp.eq.s32.totalorder %v16312_v21, %v10155_v12 }
 0x6e8   :  { %8399 = vmatpush2.msk.msra.mxu0 %vm16305_vm11, %v15911_v47  ;;  %4126 = vmatprep.subr.mxu1 %v16255_v55  ;;  %vm16311_vm11 = vmmov %vm16310_vm3 }
 0x6e9   :  { %3968 = vmatprep.subr.mxu0 %v16255_v55  ;;  %8430 = vmatpush2.msk.msra.mxu1 %vm16310_vm3, %v15911_v47  ;;  %vm16316_vm3 = vcmp.eq.s32.totalorder %v16315_v39, %v10155_v12 }
 0x6ea   :  { %8400 = vmatpush2.msk.msra.mxu0 %vm16308_vm9, %v15911_v47  ;;  %4128 = vmatprep.subr.mxu1 %v16255_v55  ;;  %vm16314_vm9 = vmmov %vm16313_vm0 }
 0x6eb   :  { %3970 = vmatprep.subr.mxu0 %v16255_v55  ;;  %8431 = vmatpush2.msk.msra.mxu1 %vm16313_vm0, %v15911_v47  ;;  %vm16319_vm0 = vcmp.eq.s32.totalorder %v16318_v35, %v10155_v12 }
 0x6ec   :  { %8401 = vmatpush2.msk.msra.mxu0 %vm16311_vm11, %v15911_v47  ;;  %4130 = vmatprep.subr.mxu1 %v16255_v55  ;;  %vm16317_vm11 = vmmov %vm16316_vm3 }
 0x6ed   :  { %3972 = vmatprep.subr.mxu0 %v16255_v55  ;;  %8432 = vmatpush2.msk.msra.mxu1 %vm16316_vm3, %v15911_v47  ;;  %vm16321_vm3 = vcmask 1039360  }
 0x6ee   :  { %8402 = vmatpush2.msk.msra.mxu0 %vm16314_vm9, %v15911_v47  ;;  %4132 = vmatprep.subr.mxu1 %v16255_v55  ;;  %vm16320_vm9 = vmmov %vm16319_vm0 }
 0x6ef   :  { %3974 = vmatprep.subr.mxu0 %v16255_v55  ;;  %8433 = vmatpush2.msk.msra.mxu1 %vm16319_vm0, %v15911_v47  ;;  %vm16323_vm0 = vcmask 1031168  }
 0x6f0   :  { %8403 = vmatpush2.msk.msra.mxu0 %vm16317_vm11, %v15911_v47  ;;  %vm16322_vm11 = vmmov %vm16321_vm3 }
 0x6f1   :  { %3976 = vmatprep.subr.mxu0 %v16255_v55 }
 0x6f2   :  { %8404 = vmatpush2.msk.msra.mxu0 %vm16320_vm9, %v15911_v47  ;;  %vm16324_vm9 = vmmov %vm16323_vm0 }
 0x778   :  { %v3805_v37 = vpop.f32.mrf.mxu1 }
 0x779   :  { %v3830_v29 = vmul.f32 %v13427_v5, %v3805_v37  ;;  %v13430_v9 = vpop.f32.mrf.mxu0 }
 0x77a   :  { %v3807_v20 = vpop.f32.mrf.mxu1 }
 0x77b   :  { %v3850_v34 = vadd.f32 %v13432_v60, %v3830_v29  ;;  %v3831_v53 = vmul.f32 %v13427_v5, %v3807_v20  ;;  %v3730_v31 = vpop.f32.mrf.mxu0 }
 0x77c   :  { %v3829_v54 = vmul.f32 %v13427_v5, %v3730_v31  ;;  %v3811_v50 = vpop.f32.mrf.mxu1 }
 0x77d   :  { %v13437_v1 = vmax.f32 %v3850_v34, 0.0  ;;  %v3851_v32 = vadd.f32 %v13432_v60, %v3831_v53  ;;  %v13441_v52 = vpop.f32.mrf.mxu0  ;;  %v3834_v0 = vmul.f32 %v13447_v26, %v3811_v50 }
 0x77e   :  { %v3849_v61 = vadd.f32 %v13432_v60, %v3829_v54  ;;  %v3813_v27 = vpop.f32.mrf.mxu1 }
 0x77f   :  { %4017 = vrot.lane.b32.xlu1 %v13437_v1, %s16195_s30  ;;  %3993 = vrot.lane.b32.xlu0 %v13437_v1, %s16193_s26  ;;  %v13451_v15 = vmax.f32 %v3851_v32, 0.0  ;;  %v3736_v33 = vpop.f32.mrf.mxu0  ;;  %v3854_v4 = vadd.f32 %v13458_v2, %v3834_v0  ;;  %v3835_v46 = vmul.f32 %v13447_v26, %v3813_v27 }
 0x780   :  { %v13449_v28 = vmax.f32 %v3849_v61, 0.0  ;;  %v3833_v3 = vmul.f32 %v13447_v26, %v3736_v33 }
 0x781   :  { %v13467_v56 = vmax.f32 %v3854_v4, 0.0  ;;  %v3855_v44 = vadd.f32 %v13458_v2, %v3835_v46  ;;  %v3832_v4 = vmul.f32 %v13447_v26, %v13441_v52 }
 0x782   :  { %v3853_v10 = vadd.f32 %v13458_v2, %v3833_v3 }
 0x783   :  { %3995 = vrot.lane.b32.xlu1 %v13451_v15, %s16193_s26  ;;  %3870 = vrot.lane.b32.xlu0 %v13449_v28, %s16193_s26  ;;  %v13475_v11 = vmax.f32 %v3855_v44, 0.0 }
 0x784   :  { %v13477_v16 = vmax.f32 %v3853_v10, 0.0 }
 0x787   :  { %3888 = vrot.lane.b32.xlu1 %v13449_v28, %s16195_s30  ;;  %4019 = vrot.lane.b32.xlu0 %v13451_v15, %s16195_s30 }
 0x78b   :  { %4021 = vrot.lane.b32.xlu1 %v13467_v56, %s16195_s30  ;;  %3997 = vrot.lane.b32.xlu0 %v13467_v56, %s16193_s26 }
 0x78f   :  { %3999 = vrot.lane.b32.xlu1 %v13475_v11, %s16193_s26  ;;  %3874 = vrot.lane.b32.xlu0 %v13477_v16, %s16193_s26 }
 0x793   :  { %3892 = vrot.lane.b32.xlu1 %v13477_v16, %s16195_s30  ;;  %4023 = vrot.lane.b32.xlu0 %v13475_v11, %s16195_s30 }
 0x7f1   :  { %v3994_v43 = vpop.permute.xlu0 %3993  ;;  %v4018_v25 = vpop.permute.xlu1 %4017 }
 0x7f5   :  { %v13593_v24 = vpop.permute.xlu0 %3870  ;;  %v3996_v36 = vpop.permute.xlu1 %3995 }
 0x7f6   :  { %v4002_v62 = vsel %vm16321_vm3, %v3994_v43, %v3996_v36  ;;  %v3883_v6 = vmax.f32 %v13449_v28, %v13593_v24  ;;  %v4013_v19 = vmax.f32 %v13451_v15, %v3996_v36  ;;  %v4001_v12 = vsel %vm16322_vm11, %v13593_v24, %v3994_v43 }
 0x7f7   :  { %v4012_v17 = vmax.f32 %v13437_v1, %v4002_v62  ;;  %vm16325_vm3 = vcmask 678912   ;;  %v4011_v34 = vmax.f32 %v13449_v28, %v4001_v12  ;;  %v3828_v1 = vmul.f32 %v13427_v5, %v13430_v9 }
 0x7f9   :  { %v4020_v41 = vpop.permute.xlu0 %4019  ;;  %v13600_v59 = vpop.permute.xlu1 %3888  ;;  %v3848_v0 = vadd.f32 %v13432_v60, %v3828_v1 }
 0x7fa   :  { %v4026_v42 = vsel %vm16323_vm0, %v4018_v25, %v4020_v41  ;;  %v4037_v48 = vmax.f32 %v4013_v19, %v4020_v41  ;;  %v3901_v37 = vmax.f32 %v3883_v6, %v13600_v59  ;;  %v4025_v20 = vsel %vm16324_vm9, %v13600_v59, %v4018_v25  ;;  %vm16326_vm0 = vmmov %vm16322_vm11 }
 0x7fb   :  { %v4036_v29 = vmax.f32 %v4012_v17, %v4026_v42  ;;  %v4035_v54 = vmax.f32 %v4011_v34, %v4025_v20  ;;  %v3856_v60 = vmax.f32 %v3848_v0, 0.0 }
 0x7fc   :  { %4051 = vrot.lane.b32.xlu1 %v4037_v48, %s9468_s27  ;;  %8405 = vmatprep.mubr.msk.f32.mxu0 %vm16325_vm3, %v3901_v37  ;;  %vm16327_vm3 = vmmov %vm16324_vm9 }
 0x7fd   :  { %v3998_v53 = vpop.permute.xlu0 %3997  ;;  %4049 = vrot.lane.b32.xlu0 %v4036_v29, %s9468_s27  ;;  %v4022_v31 = vpop.permute.xlu1 %4021 }
 0x801   :  { %v3875_v32 = vpop.permute.xlu0 %3874  ;;  %4047 = vrot.lane.b32.xlu0 %v4035_v54, %s9468_s27  ;;  %v4000_v61 = vpop.permute.xlu1 %3999 }
 0x802   :  { %v4004_v50 = vsel %vm16322_vm11, %v3998_v53, %v4000_v61  ;;  %v4016_v15 = vmax.f32 %v13475_v11, %v4000_v61  ;;  %v4003_v46 = vsel %vm16326_vm0, %v3875_v32, %v3998_v53  ;;  %vm4059_vm11 = vcmask 343040  }
 0x803   :  { %v4015_v28 = vmax.f32 %v13467_v56, %v4004_v50  ;;  %v4014_v10 = vmax.f32 %v13477_v16, %v4003_v46  ;;  %v3852_v56 = vadd.f32 %v13458_v2, %v3832_v4  ;;  %vm16328_vm0 = vcmask 678912  }
 0x804   :  { %v3885_v25 = vmax.f32 %v13477_v16, %v3875_v32 }
 0x805   :  { %v4024_v27 = vpop.permute.xlu0 %4023  ;;  %v3893_v33 = vpop.permute.xlu1 %3892  ;;  %v3860_v52 = vmax.f32 %v3852_v56, 0.0 }
 0x806   :  { %v4028_v5 = vsel %vm16324_vm9, %v4022_v31, %v4024_v27  ;;  %v4040_v9 = vmax.f32 %v4016_v15, %v4024_v27  ;;  %v4027_v44 = vsel %vm16327_vm3, %v3893_v33, %v4022_v31  ;;  %vm16329_vm9 = vmmov %vm16328_vm0  ;;  %vm16330_vm3 = vcmask 1039360  }
 0x807   :  { %v4039_v3 = vmax.f32 %v4015_v28, %v4028_v5  ;;  %v4038_v11 = vmax.f32 %v4014_v10, %v4027_v44  ;;  %v3903_v19 = vmax.f32 %v3885_v25, %v3893_v33 }
 0x808   :  { %4057 = vrot.lane.b32.xlu0 %v4040_v9, %s9468_s27 }
 0x809   :  { %4055 = vrot.lane.b32.xlu1 %v4039_v3, %s9468_s27 }
 0x80c   :  { %3868 = vrot.lane.b32.xlu0 %v3856_v60, %s16193_s26 }
 0x80d   :  { %4053 = vrot.lane.b32.xlu1 %v4038_v11, %s9468_s27  ;;  %s16340_s27 = smov 113  }
 0x810   :  { %3872 = vrot.lane.b32.xlu0 %v3860_v52, %s16193_s26 }
 0x811   :  { %3886 = vrot.lane.b32.xlu1 %v3856_v60, %s16195_s30 }
 0x815   :  { %3890 = vrot.lane.b32.xlu1 %v3860_v52, %s16195_s30 }
 0x86e   :  { %v4052_v26 = vpop.permute.xlu1 %4051 }
 0x86f   :  { %v4050_v7 = vpop.permute.xlu0 %4049 }
 0x870   :  { %v4061_v14 = vsel %vm4059_vm11, %v4050_v7, %v4052_v26 }
 0x871   :  { %8434 = vmatprep.mubr.msk.f32.mxu1 %vm16328_vm0, %v4061_v14  ;;  %vm16331_vm0 = vmmov %vm16330_vm3 }
 0x873   :  { %v4048_v51 = vpop.permute.xlu0 %4047 }
 0x874   :  { %v4060_v2 = vsel %vm4059_vm11, %v4048_v51, %v4050_v7 }
 0x875   :  { %4135 = vmatmul.mubr.f32.vlgmr.msra.gmra.mxu1 %v4060_v2 }
 0x87a   :  { %v4058_v13 = vpop.permute.xlu0 %4057 }
 0x87b   :  { %v4056_v63 = vpop.permute.xlu1 %4055 }
 0x87c   :  { %v4063_v45 = vsel %vm4059_vm11, %v4056_v63, %v4058_v13 }
 0x87d   :  { %8435 = vmatprep.mubr.msk.f32.mxu1 %vm16329_vm9, %v4063_v45  ;;  %vm16333_vm9 = vmmov %vm16332_vm4 }
 0x87e   :  { %v3869_v18 = vpop.permute.xlu0 %3868 }
 0x87f   :  { %v4054_v30 = vpop.permute.xlu1 %4053  ;;  %v3876_v22 = vsel %vm16330_vm3, %v3869_v18, %v13593_v24  ;;  %vm16334_vm3 = vcmask 678912  }
 0x880   :  { %v4062_v21 = vsel %vm4059_vm11, %v4054_v30, %v4056_v63  ;;  %v3882_v35 = vmax.f32 %v3856_v60, %v3876_v22  ;;  %vm16350_vm11 = vcmask 801792  }
 0x881   :  { %4140 = vmatmul.mubr.f32.gmra.mxu1 %v4062_v21 }
 0x882   :  { %v3873_v39 = vpop.permute.xlu0 %3872 }
 0x883   :  { %v3887_v43 = vpop.permute.xlu1 %3886  ;;  %v3877_v36 = vsel %vm16331_vm0, %v3873_v39, %v3875_v32  ;;  %vm16351_vm0 = vcmask 867328  }
 0x884   :  { %v3894_v62 = vsel %vm16332_vm4, %v3887_v43, %v13600_v59  ;;  %v3884_v17 = vmax.f32 %v3860_v52, %v3877_v36  ;;  %vm4155_vm4 = vcmask 457728   ;;  %v4488_v36 = vld [vmem:[#allocation12 + $0x8] sm:$0xff] }
 0x885   :  { %v3900_v6 = vmax.f32 %v3882_v35, %v3894_v62 }
 0x887   :  { %3979 = vmatmul.mubr.f32.vlgmr.msra.gmra.mxu0 %v3900_v6  ;;  %v3891_v41 = vpop.permute.xlu1 %3890 }
 0x888   :  { %v3895_v12 = vsel %vm16333_vm9, %v3891_v41, %v3893_v33  ;;  %8406 = vmatprep.mubr.msk.f32.mxu0 %vm16334_vm3, %v3903_v19  ;;  %vm16352_vm9 = vcmask 809984   ;;  %vm16353_vm3 = vcmask 875520  }
 0x889   :  { %v3902_v24 = vmax.f32 %v3884_v17, %v3895_v12 }
 0x88b   :  { %3984 = vmatmul.mubr.f32.gmra.mxu0 %v3902_v24 }
 0x88c   :  { %4591 = vmatprep.mubr.f32.mxu0 %v4488_v36 }
 0x935   :  { %v4136_v42 = vpop.f32.mrf.mxu1 }
 0x936   :  { %4147 = vrot.lane.b32.xlu1 %v4136_v42, %s16335_s4 }
 0x937   :  { %v4138_v16 = vpop.f32.mrf.mxu1 }
 0x938   :  { %v4641_v16 = vld [vmem:[%s15256_s9 + $0x8] sm:$0xff] }
 0x941   :  { %v4141_v48 = vpop.f32.mrf.mxu1 }
 0x942   :  { %4149 = vrot.lane.b32.xlu0 %v4141_v48, %s16335_s4  ;;  %s16341_s4 = smov 121   ;;  %v4640_v48 = vld [vmem:[%s15256_s9] sm:$0xff] }
 0x943   :  { %v4143_v37 = vpop.f32.mrf.mxu1 }
 0x947   :  { %v3980_v59 = vpop.f32.mrf.mxu0 }
 0x949   :  { %v3982_v29 = vpop.f32.mrf.mxu0 }
 0x94b   :  { %v3985_v20 = vpop.f32.mrf.mxu0 }
 0x94d   :  { %v3987_v34 = vpop.f32.mrf.mxu0 }
 0x9a8   :  { %v13645_v53 = vpop.permute.xlu1 %4147 }
 0x9a9   :  { %v13649_v31 = vsel %vm3416_vm1, %v3980_v59, %v13645_v53  ;;  %4305 = vrot.lane.b32.xlu1 %v13645_v53, %s16205_s8  ;;  %4475 = vrot.lane.b32.xlu0 %v13645_v53, %s16336_s13 }
 0x9aa   :  { %4156 = vst.msk [vmem:[#allocation5] sm:$0xff] %vm4155_vm4, %v13649_v31 }
 0x9ad   :  { %4283 = vrot.lane.b32.xlu1 %v13645_v53, %s16206_s7  ;;  %4459 = vrot.lane.b32.xlu0 %v13645_v53, %s16198_s5 }
 0x9b1   :  { %4261 = vrot.lane.b32.xlu1 %v13645_v53, %s16337_s29  ;;  %4437 = vrot.lane.b32.xlu0 %v13645_v53, %s16199_s17 }
 0x9b4   :  { %v4150_v54 = vpop.permute.xlu0 %4149 }
 0x9b5   :  { %v13666_v1 = vsel %vm3416_vm1, %v3985_v20, %v4150_v54  ;;  %4239 = vrot.lane.b32.xlu1 %v13645_v53, %s16234_s23  ;;  %4415 = vrot.lane.b32.xlu0 %v13645_v53, %s16200_s14  ;;  %vm4166_vm1 = vcmask 916928  }
 0x9b6   :  { %4157 = vst.msk [vmem:[#allocation5 + $0x8] sm:$0xff] %vm4155_vm4, %v13666_v1 }
 0x9b9   :  { %4217 = vrot.lane.b32.xlu1 %v13645_v53, %s16237_s25  ;;  %4393 = vrot.lane.b32.xlu0 %v13645_v53, %s16338_s22 }
 0x9bd   :  { %4195 = vrot.lane.b32.xlu1 %v13645_v53, %s16240_s20  ;;  %4371 = vrot.lane.b32.xlu0 %v13645_v53, %s16339_s21 }
 0x9c1   :  { %4349 = vrot.lane.b32.xlu1 %v13645_v53, %s16201_s28  ;;  %4160 = vrot.lane.b32.xlu0 %v13649_v31, %s16340_s27 }
 0x9c5   :  { %4473 = vrot.lane.b32.xlu1 %v13649_v31, %s16336_s13  ;;  %4303 = vrot.lane.b32.xlu0 %v13649_v31, %s16205_s8 }
 0x9c9   :  { %4295 = vrot.lane.b32.xlu1 %v13649_v31, %s16341_s4  ;;  %4449 = vrot.lane.b32.xlu0 %v13649_v31, %s16342_s16 }
 0x9cd   :  { %4457 = vrot.lane.b32.xlu1 %v13649_v31, %s16198_s5  ;;  %4281 = vrot.lane.b32.xlu0 %v13649_v31, %s16206_s7 }
 0x9d1   :  { %4273 = vrot.lane.b32.xlu1 %v13649_v31, %s16192_s0  ;;  %4427 = vrot.lane.b32.xlu0 %v13649_v31, %s16343_s19 }
 0x9d5   :  { %4435 = vrot.lane.b32.xlu1 %v13649_v31, %s16199_s17  ;;  %4259 = vrot.lane.b32.xlu0 %v13649_v31, %s16337_s29 }
 0x9d9   :  { %4251 = vrot.lane.b32.xlu1 %v13649_v31, %s16344_s15  ;;  %4405 = vrot.lane.b32.xlu0 %v13649_v31, %s16345_s18 }
 0x9dd   :  { %4413 = vrot.lane.b32.xlu1 %v13649_v31, %s16200_s14  ;;  %4237 = vrot.lane.b32.xlu0 %v13649_v31, %s16234_s23 }
 0x9e1   :  { %4229 = vrot.lane.b32.xlu1 %v13649_v31, %s16194_s2  ;;  %4383 = vrot.lane.b32.xlu0 %v13649_v31, %s16346_s12 }
 0x9e5   :  { %4391 = vrot.lane.b32.xlu1 %v13649_v31, %s16338_s22  ;;  %4215 = vrot.lane.b32.xlu0 %v13649_v31, %s16237_s25 }
 0x9e9   :  { %4207 = vrot.lane.b32.xlu1 %v13649_v31, %s16347_s11  ;;  %4361 = vrot.lane.b32.xlu0 %v13649_v31, %s16348_s10 }
 0x9ed   :  { %4369 = vrot.lane.b32.xlu1 %v13649_v31, %s16339_s21  ;;  %4193 = vrot.lane.b32.xlu0 %v13649_v31, %s16240_s20 }
 0x9f1   :  { %4185 = vrot.lane.b32.xlu1 %v13649_v31, %s16195_s30  ;;  %4347 = vrot.lane.b32.xlu0 %v13649_v31, %s16201_s28 }
 0x9f5   :  { %4339 = vrot.lane.b32.xlu1 %v13649_v31, %s16349_s1  ;;  %4169 = vrot.lane.b32.xlu0 %v13649_v31, %s16193_s26 }
 0x9f9   :  { %4177 = vrot.lane.b32.xlu1 %v13649_v31, %s16225_s24  ;;  %4479 = vrot.lane.b32.xlu0 %v4150_v54, %s16336_s13 }
 0x9fd   :  { %4317 = vrot.lane.b32.xlu1 %v13649_v31, %s16191_s6  ;;  %4463 = vrot.lane.b32.xlu0 %v4150_v54, %s16198_s5 }
 0xa01   :  { %4309 = vrot.lane.b32.xlu1 %v4150_v54, %s16205_s8  ;;  %4441 = vrot.lane.b32.xlu0 %v4150_v54, %s16199_s17 }
 0xa05   :  { %4287 = vrot.lane.b32.xlu1 %v4150_v54, %s16206_s7  ;;  %4419 = vrot.lane.b32.xlu0 %v4150_v54, %s16200_s14 }
 0xa09   :  { %4265 = vrot.lane.b32.xlu1 %v4150_v54, %s16337_s29  ;;  %4397 = vrot.lane.b32.xlu0 %v4150_v54, %s16338_s22 }
 0xa0d   :  { %4243 = vrot.lane.b32.xlu1 %v4150_v54, %s16234_s23  ;;  %4375 = vrot.lane.b32.xlu0 %v4150_v54, %s16339_s21 }
 0xa11   :  { %4221 = vrot.lane.b32.xlu1 %v4150_v54, %s16237_s25  ;;  %4353 = vrot.lane.b32.xlu0 %v4150_v54, %s16201_s28 }
 0xa15   :  { %4199 = vrot.lane.b32.xlu1 %v4150_v54, %s16240_s20  ;;  %4331 = vrot.lane.b32.xlu0 %v4150_v54, %s16203_s3 }
 0xa19   :  { %4477 = vrot.lane.b32.xlu1 %v13666_v1, %s16336_s13  ;;  %4162 = vrot.lane.b32.xlu0 %v13666_v1, %s16340_s27 }
 0xa1b   :  { %v4306_v32 = vpop.permute.xlu1 %4305  ;;  %v4476_v61 = vpop.permute.xlu0 %4475 }
 0xa1d   :  { %4297 = vrot.lane.b32.xlu1 %v13666_v1, %s16341_s4  ;;  %4307 = vrot.lane.b32.xlu0 %v13666_v1, %s16205_s8  ;;  %s16430_s8 = sld [smem:[#allocation127_spill]] }
 0xa1f   :  { %v4284_v50 = vpop.permute.xlu1 %4283  ;;  %v4460_v15 = vpop.permute.xlu0 %4459 }
 0xa21   :  { %4461 = vrot.lane.b32.xlu1 %v13666_v1, %s16198_s5  ;;  %4451 = vrot.lane.b32.xlu0 %v13666_v1, %s16342_s16  ;;  %s16357_s5 = sld [smem:[#allocation119_spill]] }
 0xa23   :  { %v4262_v0 = vpop.permute.xlu1 %4261  ;;  %v4438_v28 = vpop.permute.xlu0 %4437 }
 0xa25   :  { %4275 = vrot.lane.b32.xlu1 %v13666_v1, %s16192_s0  ;;  %4285 = vrot.lane.b32.xlu0 %v13666_v1, %s16206_s7 }
 0xa27   :  { %v13772_v27 = vpop.permute.xlu1 %4239  ;;  %v13774_v33 = vpop.permute.xlu0 %4415  ;;  %v4613_v17 = vld [vmem:[%s16357_s5 + $0x8] sm:$0xff]  ;;  %v4612_v41 = vld [vmem:[%s16357_s5] sm:$0xff]  ;;  %v4615_v20 = vld [vmem:[%s16357_s5 + $0x18] sm:$0xff] }
 0xa28   :  { %v4614_v34 = vld [vmem:[%s16357_s5 + $0x10] sm:$0xff]  ;;  %s16376_s5 = sld [smem:[#allocation122_spill]] }
 0xa29   :  { %4439 = vrot.lane.b32.xlu1 %v13666_v1, %s16199_s17  ;;  %4429 = vrot.lane.b32.xlu0 %v13666_v1, %s16343_s19  ;;  %s9469_s17 = smov 18  }
 0xa2b   :  { %v13780_v4 = vpop.permute.xlu1 %4217  ;;  %v13782_v46 = vpop.permute.xlu0 %4393 }
 0xa2d   :  { %4253 = vrot.lane.b32.xlu1 %v13666_v1, %s16344_s15  ;;  %4263 = vrot.lane.b32.xlu0 %v13666_v1, %s16337_s29  ;;  %s16422_s29 = sld [smem:[#allocation124_spill]] }
 0xa2f   :  { %v13788_v5 = vpop.permute.xlu1 %4195  ;;  %v13790_v9 = vpop.permute.xlu0 %4371 }
 0xa31   :  { %4417 = vrot.lane.b32.xlu1 %v13666_v1, %s16200_s14  ;;  %4407 = vrot.lane.b32.xlu0 %v13666_v1, %s16345_s18 }
 0xa33   :  { %v13796_v3 = vpop.permute.xlu1 %4349  ;;  %v4161_v44 = vpop.permute.xlu0 %4160 }
 0xa34   :  { %4167 = vst.msk [vmem:[#allocation5] sm:$0xff] %vm4166_vm1, %v4161_v44 }
 0xa35   :  { %4471 = vst.msk [vmem:[#allocation5 + $0xf0] sm:$0xff] %vm4155_vm4, %v4161_v44  ;;  %4231 = vrot.lane.b32.xlu1 %v13666_v1, %s16194_s2  ;;  %4241 = vrot.lane.b32.xlu0 %v13666_v1, %s16234_s23 }
 0xa37   :  { %v4474_v10 = vpop.permute.xlu1 %4473  ;;  %v4304_v60 = vpop.permute.xlu0 %4303 }
 0xa38   :  { %v4481_v56 = vsel %vm16350_vm11, %v4474_v10, %v4476_v61  ;;  %v4311_v26 = vsel %vm16351_vm0, %v4304_v60, %v4306_v32  ;;  %vm16354_vm11 = vcmask 818176   ;;  %vm16355_vm0 = vcmask 883712   ;;  %v4642_v32 = vld [vmem:[%s15256_s9 + $0x10] sm:$0xff] }
 0xa39   :  { %4485 = vst.msk [vmem:[#allocation5 + $0xf0] sm:$0xff] %vm4166_vm1, %v4481_v56  ;;  %4395 = vrot.lane.b32.xlu1 %v13666_v1, %s16338_s22  ;;  %4385 = vrot.lane.b32.xlu0 %v13666_v1, %s16346_s12 }
 0xa3b   :  { %v4296_v11 = vpop.permute.xlu1 %4295  ;;  %v4450_v52 = vpop.permute.xlu0 %4449 }
 0xa3c   :  { %4301 = vst.msk [vmem:[#allocation5 + $0x70] sm:$0xff] %vm4155_vm4, %v4296_v11  ;;  %4455 = vst.msk [vmem:[#allocation5 + $0xe0] sm:$0xff] %vm4155_vm4, %v4450_v52 }
 0xa3d   :  { %4315 = vst.msk [vmem:[#allocation5 + $0x70] sm:$0xff] %vm4166_vm1, %v4311_v26  ;;  %4209 = vrot.lane.b32.xlu1 %v13666_v1, %s16347_s11  ;;  %4219 = vrot.lane.b32.xlu0 %v13666_v1, %s16237_s25  ;;  %s16391_s25 = sld [smem:[#allocation126_spill]] }
 0xa3f   :  { %v4458_v7 = vpop.permute.xlu1 %4457  ;;  %v4282_v14 = vpop.permute.xlu0 %4281 }
 0xa40   :  { %v4465_v51 = vsel %vm16352_vm9, %v4458_v7, %v4460_v15  ;;  %v4289_v63 = vsel %vm16353_vm3, %v4282_v14, %v4284_v50  ;;  %vm16356_vm9 = vcmask 826368   ;;  %vm16358_vm3 = vcmask 834560  }
 0xa41   :  { %4469 = vst.msk [vmem:[#allocation5 + $0xe0] sm:$0xff] %vm4166_vm1, %v4465_v51  ;;  %4373 = vrot.lane.b32.xlu1 %v13666_v1, %s16339_s21  ;;  %4363 = vrot.lane.b32.xlu0 %v13666_v1, %s16348_s10 }
 0xa43   :  { %v4274_v2 = vpop.permute.xlu1 %4273  ;;  %v4428_v13 = vpop.permute.xlu0 %4427 }
 0xa44   :  { %4279 = vst.msk [vmem:[#allocation5 + $0x60] sm:$0xff] %vm4155_vm4, %v4274_v2  ;;  %4433 = vst.msk [vmem:[#allocation5 + $0xd0] sm:$0xff] %vm4155_vm4, %v4428_v13 }
 0xa45   :  { %4293 = vst.msk [vmem:[#allocation5 + $0x60] sm:$0xff] %vm4166_vm1, %v4289_v63  ;;  %4187 = vrot.lane.b32.xlu1 %v13666_v1, %s16195_s30  ;;  %4197 = vrot.lane.b32.xlu0 %v13666_v1, %s16240_s20 }
 0xa47   :  { %v4436_v45 = vpop.permute.xlu1 %4435  ;;  %v4260_v18 = vpop.permute.xlu0 %4259 }
 0xa48   :  { %v4443_v30 = vsel %vm16354_vm11, %v4436_v45, %v4438_v28  ;;  %v4267_v39 = vsel %vm16355_vm0, %v4260_v18, %v4262_v0  ;;  %vm16359_vm11 = vcmask 842752   ;;  %vm16360_vm0 = vcmask 850944  }
 0xa49   :  { %4447 = vst.msk [vmem:[#allocation5 + $0xd0] sm:$0xff] %vm4166_vm1, %v4443_v30  ;;  %4351 = vrot.lane.b32.xlu1 %v13666_v1, %s16201_s28  ;;  %4341 = vrot.lane.b32.xlu0 %v13666_v1, %s16349_s1 }
 0xa4b   :  { %v4252_v22 = vpop.permute.xlu1 %4251  ;;  %v4406_v21 = vpop.permute.xlu0 %4405 }
 0xa4c   :  { %4257 = vst.msk [vmem:[#allocation5 + $0x50] sm:$0xff] %vm4155_vm4, %v4252_v22  ;;  %4411 = vst.msk [vmem:[#allocation5 + $0xc0] sm:$0xff] %vm4155_vm4, %v4406_v21 }
 0xa4d   :  { %4271 = vst.msk [vmem:[#allocation5 + $0x50] sm:$0xff] %vm4166_vm1, %v4267_v39  ;;  %4171 = vrot.lane.b32.xlu1 %v13666_v1, %s16193_s26  ;;  %4179 = vrot.lane.b32.xlu0 %v13666_v1, %s16225_s24  ;;  %s16382_s24 = sld [smem:[#allocation123_spill]] }
 0xa4f   :  { %v4414_v35 = vpop.permute.xlu1 %4413  ;;  %v4238_v43 = vpop.permute.xlu0 %4237 }
 0xa50   :  { %v4421_v25 = vsel %vm16356_vm9, %v4414_v35, %v13774_v33  ;;  %v4245_v19 = vsel %vm3255_vm14, %v4238_v43, %v13772_v27  ;;  %vm16361_vm9 = vcmask 801792  }
 0xa51   :  { %4425 = vst.msk [vmem:[#allocation5 + $0xc0] sm:$0xff] %vm4166_vm1, %v4421_v25  ;;  %4329 = vrot.lane.b32.xlu1 %v13666_v1, %s16203_s3  ;;  %4319 = vrot.lane.b32.xlu0 %v13666_v1, %s16191_s6  ;;  %v4643_v1 = vld [vmem:[%s15256_s9 + $0x18] sm:$0xff]  ;;  %s16373_s9 = smov 72  }
 0xa53   :  { %v4230_v62 = vpop.permute.xlu1 %4229  ;;  %v4384_v6 = vpop.permute.xlu0 %4383 }
 0xa54   :  { %4235 = vst.msk [vmem:[#allocation5 + $0x40] sm:$0xff] %vm4155_vm4, %v4230_v62  ;;  %4389 = vst.msk [vmem:[#allocation5 + $0xb0] sm:$0xff] %vm4155_vm4, %v4384_v6  ;;  %v4525_v6 = vld [vmem:[#allocation5 + $0xf0] sm:$0xff] }
 0xa55   :  { %4249 = vst.msk [vmem:[#allocation5 + $0x40] sm:$0xff] %vm4166_vm1, %v4245_v19  ;;  %4327 = vrot.lane.b32.xlu1 %v13645_v53, %s16203_s3  ;;  %4325 = vrot.lane.b32.xlu0 %v13649_v31, %s16203_s3  ;;  %v4509_v19 = vld [vmem:[#allocation5 + $0x70] sm:$0xff] }
 0xa57   :  { %v4392_v12 = vpop.permute.xlu1 %4391  ;;  %v4216_v24 = vpop.permute.xlu0 %4215 }
 0xa58   :  { %v4399_v42 = vsel %vm16358_vm3, %v4392_v12, %v13782_v46  ;;  %v4223_v29 = vsel %vm3233_vm10, %v4216_v24, %v13780_v4  ;;  %vm16362_vm3 = vcmask 867328  }
 0xa59   :  { %4403 = vst.msk [vmem:[#allocation5 + $0xb0] sm:$0xff] %vm4166_vm1, %v4399_v42  ;;  %4623 = vperm.xlu1 %8957, %v4613_v17   ;;  %4618 = vperm.xlu0 %8956, %v4612_v41  }
 0xa5b   :  { %v4208_v37 = vpop.permute.xlu1 %4207  ;;  %v4362_v59 = vpop.permute.xlu0 %4361 }
 0xa5c   :  { %4213 = vst.msk [vmem:[#allocation5 + $0x30] sm:$0xff] %vm4155_vm4, %v4208_v37  ;;  %4367 = vst.msk [vmem:[#allocation5 + $0xa0] sm:$0xff] %vm4155_vm4, %v4362_v59  ;;  %v4523_v59 = vld [vmem:[#allocation5 + $0xe0] sm:$0xff] }
 0xa5d   :  { %4227 = vst.msk [vmem:[#allocation5 + $0x30] sm:$0xff] %vm4166_vm1, %v4223_v29  ;;  %4651 = vperm.xlu1 %8957, %v4641_v16   ;;  %4646 = vperm.xlu0 %8956, %v4640_v48   ;;  %v4507_v29 = vld [vmem:[#allocation5 + $0x60] sm:$0xff] }
 0xa5f   :  { %v4370_v53 = vpop.permute.xlu1 %4369  ;;  %v4194_v31 = vpop.permute.xlu0 %4193 }
 0xa60   :  { %v4377_v54 = vsel %vm16359_vm11, %v4370_v53, %v13790_v9  ;;  %v4201_v15 = vsel %vm3212_vm12, %v4194_v31, %v13788_v5  ;;  %vm16363_vm11 = vcmask 809984  }
 0xa61   :  { %4381 = vst.msk [vmem:[#allocation5 + $0xa0] sm:$0xff] %vm4166_vm1, %v4377_v54  ;;  %4633 = vperm.xlu1 %8957, %v4615_v20   ;;  %4628 = vperm.xlu0 %8956, %v4614_v34  }
 0xa63   :  { %v4186_v61 = vpop.permute.xlu1 %4185  ;;  %v4348_v50 = vpop.permute.xlu0 %4347 }
 0xa64   :  { %4191 = vst.msk [vmem:[#allocation5 + $0x20] sm:$0xff] %vm4155_vm4, %v4186_v61  ;;  %v4355_v27 = vsel %vm16360_vm0, %v4348_v50, %v13796_v3  ;;  %vm16364_vm0 = vcmask 875520   ;;  %v4521_v50 = vld [vmem:[#allocation5 + $0xd0] sm:$0xff] }
 0xa65   :  { %4205 = vst.msk [vmem:[#allocation5 + $0x20] sm:$0xff] %vm4166_vm1, %v4201_v15  ;;  %4661 = vperm.xlu1 %8957, %v4643_v1   ;;  %4656 = vperm.xlu0 %8956, %v4642_v32   ;;  %v4505_v15 = vld [vmem:[#allocation5 + $0x50] sm:$0xff] }
 0xa67   :  { %v4340_v0 = vpop.permute.xlu1 %4339  ;;  %v4170_v28 = vpop.permute.xlu0 %4169 }
 0xa68   :  { %4345 = vst.msk [vmem:[#allocation5 + $0x90] sm:$0xff] %vm4155_vm4, %v4340_v0  ;;  %4175 = vst.msk [vmem:[#allocation5 + $0x10] sm:$0xff] %vm4155_vm4, %v4170_v28 }
 0xa69   :  { %4359 = vst.msk [vmem:[#allocation5 + $0x90] sm:$0xff] %vm4166_vm1, %v4355_v27 }
 0xa6b   :  { %v4178_v33 = vpop.permute.xlu1 %4177  ;;  %v4480_v4 = vpop.permute.xlu0 %4479 }
 0xa6c   :  { %4183 = vst.msk [vmem:[#allocation5 + $0x10] sm:$0xff] %vm4166_vm1, %v4178_v33 }
 0xa6f   :  { %v4318_v46 = vpop.permute.xlu1 %4317  ;;  %v4464_v5 = vpop.permute.xlu0 %4463 }
 0xa70   :  { %4323 = vst.msk [vmem:[#allocation5 + $0x80] sm:$0xff] %vm4155_vm4, %v4318_v46 }
 0xa73   :  { %v4310_v9 = vpop.permute.xlu1 %4309  ;;  %v4442_v44 = vpop.permute.xlu0 %4441 }
 0xa77   :  { %v4288_v10 = vpop.permute.xlu1 %4287  ;;  %v4420_v60 = vpop.permute.xlu0 %4419 }
 0xa7b   :  { %v4266_v56 = vpop.permute.xlu1 %4265  ;;  %v13908_v3 = vpop.permute.xlu0 %4397 }
 0xa7f   :  { %v13910_v11 = vpop.permute.xlu1 %4243  ;;  %v13912_v52 = vpop.permute.xlu0 %4375 }
 0xa83   :  { %v13914_v26 = vpop.permute.xlu1 %4221  ;;  %v13916_v7 = vpop.permute.xlu0 %4353 }
 0xa87   :  { %v13918_v14 = vpop.permute.xlu1 %4199  ;;  %v13920_v51 = vpop.permute.xlu0 %4331 }
 0xa8b   :  { %v4478_v2 = vpop.permute.xlu1 %4477  ;;  %v4163_v13 = vpop.permute.xlu0 %4162 }
 0xa8c   :  { %v4482_v63 = vsel %vm16361_vm9, %v4478_v2, %v4480_v4  ;;  %4168 = vst.msk [vmem:[#allocation5 + $0x8] sm:$0xff] %vm4166_vm1, %v4163_v13  ;;  %vm16365_vm9 = vcmask 818176  }
 0xa8d   :  { %4472 = vst.msk [vmem:[#allocation5 + $0xf8] sm:$0xff] %vm4155_vm4, %v4163_v13 }
 0xa8e   :  { %4486 = vst.msk [vmem:[#allocation5 + $0xf8] sm:$0xff] %vm4166_vm1, %v4482_v63 }
 0xa8f   :  { %v4298_v45 = vpop.permute.xlu1 %4297  ;;  %v4308_v18 = vpop.permute.xlu0 %4307 }
 0xa90   :  { %4302 = vst.msk [vmem:[#allocation5 + $0x78] sm:$0xff] %vm4155_vm4, %v4298_v45  ;;  %v4312_v30 = vsel %vm16362_vm3, %v4308_v18, %v4310_v9  ;;  %vm16366_vm3 = vcmask 883712   ;;  %v4517_v45 = vld [vmem:[#allocation5 + $0xb0] sm:$0xff] }
 0xa91   :  { %4316 = vst.msk [vmem:[#allocation5 + $0x78] sm:$0xff] %vm4166_vm1, %v4312_v30 }
 0xa93   :  { %v4462_v22 = vpop.permute.xlu1 %4461  ;;  %v4452_v21 = vpop.permute.xlu0 %4451 }
 0xa94   :  { %v4466_v39 = vsel %vm16363_vm11, %v4462_v22, %v4464_v5  ;;  %4456 = vst.msk [vmem:[#allocation5 + $0xe8] sm:$0xff] %vm4155_vm4, %v4452_v21  ;;  %vm16367_vm11 = vcmask 826368  }
 0xa95   :  { %v4526_v35 = vld [vmem:[#allocation5 + $0xf8] sm:$0xff]  ;;  %4470 = vst.msk [vmem:[#allocation5 + $0xe8] sm:$0xff] %vm4166_vm1, %v4466_v39 }
 0xa96   :  { %8609 = vmatprep.subr.mxu0 %v4526_v35 }
 0xa97   :  { %v4276_v43 = vpop.permute.xlu1 %4275  ;;  %v4286_v25 = vpop.permute.xlu0 %4285 }
 0xa98   :  { %4280 = vst.msk [vmem:[#allocation5 + $0x68] sm:$0xff] %vm4155_vm4, %v4276_v43  ;;  %v4290_v36 = vsel %vm16364_vm0, %v4286_v25, %v4288_v10  ;;  %v4510_v62 = vld [vmem:[#allocation5 + $0x78] sm:$0xff]  ;;  %vm16368_vm0 = vcmask 834560   ;;  %v4503_v10 = vld [vmem:[#allocation5 + $0x40] sm:$0xff] }
 0xa99   :  { %4294 = vst.msk [vmem:[#allocation5 + $0x68] sm:$0xff] %vm4166_vm1, %v4290_v36  ;;  %8610 = vmatpush3.msra.mxu0 %v4510_v62  ;;  %v4515_v43 = vld [vmem:[#allocation5 + $0xa0] sm:$0xff] }
 0xa9a   :  { %8611 = vmatprep.subr.mxu0 %v4525_v6  ;;  %v4499_v25 = vld [vmem:[#allocation5 + $0x20] sm:$0xff] }
 0xa9b   :  { %v4440_v17 = vpop.permute.xlu1 %4439  ;;  %8612 = vmatpush3.msra.mxu0 %v4509_v19  ;;  %v4430_v41 = vpop.permute.xlu0 %4429 }
 0xa9c   :  { %v4444_v12 = vsel %vm16365_vm9, %v4440_v17, %v4442_v44  ;;  %4434 = vst.msk [vmem:[#allocation5 + $0xd8] sm:$0xff] %vm4155_vm4, %v4430_v41  ;;  %v4524_v24 = vld [vmem:[#allocation5 + $0xe8] sm:$0xff]  ;;  %v4519_v44 = vld [vmem:[#allocation5 + $0xc0] sm:$0xff] }
 0xa9d   :  { %4448 = vst.msk [vmem:[#allocation5 + $0xd8] sm:$0xff] %vm4166_vm1, %v4444_v12  ;;  %8613 = vmatprep.subr.mxu0 %v4524_v24  ;;  %v4513_v24 = vld [vmem:[#allocation5 + $0x90] sm:$0xff] }
 0xa9f   :  { %v4254_v42 = vpop.permute.xlu1 %4253  ;;  %v4264_v16 = vpop.permute.xlu0 %4263 }
 0xaa0   :  { %4258 = vst.msk [vmem:[#allocation5 + $0x58] sm:$0xff] %vm4155_vm4, %v4254_v42  ;;  %v4268_v48 = vsel %vm16366_vm3, %v4264_v16, %v4266_v56  ;;  %v4508_v37 = vld [vmem:[#allocation5 + $0x68] sm:$0xff]  ;;  %v4497_v42 = vld [vmem:[#allocation5 + $0x10] sm:$0xff] }
 0xaa1   :  { %4272 = vst.msk [vmem:[#allocation5 + $0x58] sm:$0xff] %vm4166_vm1, %v4268_v48  ;;  %8614 = vmatpush3.msra.mxu0 %v4508_v37  ;;  %v4487_v37 = vld [vmem:[#allocation12] sm:$0xff] }
 0xaa2   :  { %8615 = vmatprep.subr.mxu0 %v4523_v59  ;;  %v4495_v59 = vld [vmem:[#allocation5] sm:$0xff] }
 0xaa3   :  { %v4418_v20 = vpop.permute.xlu1 %4417  ;;  %8616 = vmatpush3.msra.mxu0 %v4507_v29  ;;  %v4408_v34 = vpop.permute.xlu0 %4407  ;;  %v4490_v29 = vld [vmem:[#allocation12 + $0x18] sm:$0xff] }
 0xaa4   :  { %v4422_v53 = vsel %vm16367_vm11, %v4418_v20, %v4420_v60  ;;  %4412 = vst.msk [vmem:[#allocation5 + $0xc8] sm:$0xff] %vm4155_vm4, %v4408_v34  ;;  %v4522_v31 = vld [vmem:[#allocation5 + $0xd8] sm:$0xff]  ;;  %v4492_v34 = vld [vmem:[#allocation12 + $0x28] sm:$0xff]  ;;  %vm6086_vm11 = vcmask 1040384  }
 0xaa5   :  { %4426 = vst.msk [vmem:[#allocation5 + $0xc8] sm:$0xff] %vm4166_vm1, %v4422_v53  ;;  %8617 = vmatprep.subr.mxu0 %v4522_v31  ;;  %v4489_v20 = vld [vmem:[#allocation12 + $0x10] sm:$0xff]  ;;  %v4491_v53 = vld [vmem:[#allocation12 + $0x20] sm:$0xff]  ;;  %v4494_v31 = vld [vmem:[#allocation12 + $0x38] sm:$0xff] }
 0xaa7   :  { %v4232_v54 = vpop.permute.xlu1 %4231  ;;  %v4242_v1 = vpop.permute.xlu0 %4241 }
 0xaa8   :  { %4236 = vst.msk [vmem:[#allocation5 + $0x48] sm:$0xff] %vm4155_vm4, %v4232_v54  ;;  %v4246_v32 = vsel %vm3255_vm14, %v4242_v1, %v13910_v11  ;;  %v4506_v61 = vld [vmem:[#allocation5 + $0x58] sm:$0xff]  ;;  %vm16369_vm14 = vcmask 842752   ;;  %v13979_v1 = vsel %vm10311_vm2, 1.0, %v16255_v55  ;;  %vm4708_vm2 = vcmask 424960  }
 0xaa9   :  { %4250 = vst.msk [vmem:[#allocation5 + $0x48] sm:$0xff] %vm4166_vm1, %v4246_v32  ;;  %8618 = vmatpush3.msra.mxu0 %v4506_v61  ;;  %v4493_v54 = vld [vmem:[#allocation12 + $0x30] sm:$0xff] }
 0xaaa   :  { %8619 = vmatprep.subr.mxu0 %v4521_v50 }
 0xaab   :  { %v4396_v0 = vpop.permute.xlu1 %4395  ;;  %8620 = vmatpush3.msra.mxu0 %v4505_v15  ;;  %v4386_v28 = vpop.permute.xlu0 %4385 }
 0xaac   :  { %v4400_v27 = vsel %vm16368_vm0, %v4396_v0, %v13908_v3  ;;  %4390 = vst.msk [vmem:[#allocation5 + $0xb8] sm:$0xff] %vm4155_vm4, %v4386_v28  ;;  %v4520_v33 = vld [vmem:[#allocation5 + $0xc8] sm:$0xff]  ;;  %vm6091_vm0 = vcmask 1041408  }
 0xaad   :  { %4404 = vst.msk [vmem:[#allocation5 + $0xb8] sm:$0xff] %vm4166_vm1, %v4400_v27  ;;  %8621 = vmatprep.subr.mxu0 %v4520_v33 }
 0xaaf   :  { %v4210_v4 = vpop.permute.xlu1 %4209  ;;  %v4220_v46 = vpop.permute.xlu0 %4219 }
 0xab0   :  { %4214 = vst.msk [vmem:[#allocation5 + $0x38] sm:$0xff] %vm4155_vm4, %v4210_v4  ;;  %v4224_v5 = vsel %vm3233_vm10, %v4220_v46, %v13914_v26  ;;  %v4504_v9 = vld [vmem:[#allocation5 + $0x48] sm:$0xff]  ;;  %vm16370_vm10 = vcmask 850944  }
 0xab1   :  { %4228 = vst.msk [vmem:[#allocation5 + $0x38] sm:$0xff] %vm4166_vm1, %v4224_v5  ;;  %8622 = vmatpush3.msra.mxu0 %v4504_v9 }
 0xab2   :  { %8623 = vmatprep.subr.mxu0 %v4519_v44 }
 0xab3   :  { %v4374_v60 = vpop.permute.xlu1 %4373  ;;  %8624 = vmatpush3.msra.mxu0 %v4503_v10  ;;  %v4364_v56 = vpop.permute.xlu0 %4363 }
 0xab4   :  { %v4378_v3 = vsel %vm16369_vm14, %v4374_v60, %v13912_v52  ;;  %4368 = vst.msk [vmem:[#allocation5 + $0xa8] sm:$0xff] %vm4155_vm4, %v4364_v56  ;;  %v4518_v11 = vld [vmem:[#allocation5 + $0xb8] sm:$0xff]  ;;  %v4501_v52 = vld [vmem:[#allocation5 + $0x30] sm:$0xff]  ;;  %vm16383_vm14 = vcmask 1042432  }
 0xab5   :  { %4382 = vst.msk [vmem:[#allocation5 + $0xa8] sm:$0xff] %vm4166_vm1, %v4378_v3  ;;  %8625 = vmatprep.subr.mxu0 %v4518_v11 }
 0xab7   :  { %v4188_v26 = vpop.permute.xlu1 %4187  ;;  %v4198_v2 = vpop.permute.xlu0 %4197 }
 0xab8   :  { %4192 = vst.msk [vmem:[#allocation5 + $0x28] sm:$0xff] %vm4155_vm4, %v4188_v26  ;;  %v4202_v13 = vsel %vm3212_vm12, %v4198_v2, %v13918_v14  ;;  %v4502_v63 = vld [vmem:[#allocation5 + $0x38] sm:$0xff]  ;;  %vm16371_vm12 = vcmask 859136  }
 0xab9   :  { %4206 = vst.msk [vmem:[#allocation5 + $0x28] sm:$0xff] %vm4166_vm1, %v4202_v13  ;;  %8626 = vmatpush3.msra.mxu0 %v4502_v63  ;;  %vm16372_vm9 = vmmov %vm16371_vm12 }
 0xaba   :  { %8627 = vmatprep.subr.mxu0 %v4517_v45 }
 0xabb   :  { %v4352_v18 = vpop.permute.xlu1 %4351  ;;  %8628 = vmatpush3.msra.mxu0 %v4501_v52  ;;  %v4342_v30 = vpop.permute.xlu0 %4341 }
 0xabc   :  { %v4356_v22 = vsel %vm16370_vm10, %v4352_v18, %v13916_v7  ;;  %4346 = vst.msk [vmem:[#allocation5 + $0x98] sm:$0xff] %vm4155_vm4, %v4342_v30  ;;  %v4516_v21 = vld [vmem:[#allocation5 + $0xa8] sm:$0xff]  ;;  %vm16384_vm10 = vmmov %vm16383_vm14 }
 0xabd   :  { %4360 = vst.msk [vmem:[#allocation5 + $0x98] sm:$0xff] %vm4166_vm1, %v4356_v22  ;;  %8629 = vmatprep.subr.mxu0 %v4516_v21 }
 0xabf   :  { %v4172_v14 = vpop.permute.xlu1 %4171  ;;  %v4180_v39 = vpop.permute.xlu0 %4179 }
 0xac0   :  { %4176 = vst.msk [vmem:[#allocation5 + $0x18] sm:$0xff] %vm4155_vm4, %v4172_v14  ;;  %v4500_v35 = vld [vmem:[#allocation5 + $0x28] sm:$0xff] }
 0xac1   :  { %4184 = vst.msk [vmem:[#allocation5 + $0x18] sm:$0xff] %vm4166_vm1, %v4180_v39  ;;  %8630 = vmatpush3.msra.mxu0 %v4500_v35 }
 0xac2   :  { %8631 = vmatprep.subr.mxu0 %v4515_v43 }
 0xac3   :  { %v4330_v36 = vpop.permute.xlu1 %4329  ;;  %8632 = vmatpush3.msra.mxu0 %v4499_v25  ;;  %v4320_v7 = vpop.permute.xlu0 %4319 }
 0xac4   :  { %v4334_v62 = vsel %vm16371_vm12, %v4330_v36, %v13920_v51  ;;  %4324 = vst.msk [vmem:[#allocation5 + $0x88] sm:$0xff] %vm4155_vm4, %v4320_v7  ;;  %v4514_v6 = vld [vmem:[#allocation5 + $0x98] sm:$0xff]  ;;  %v4496_v51 = vld [vmem:[#allocation5 + $0x8] sm:$0xff]  ;;  %vm4721_vm4 = vcmask 1043456   ;;  %vm16385_vm12 = vcmask 1044480  }
 0xac5   :  { %4338 = vst.msk [vmem:[#allocation5 + $0x88] sm:$0xff] %vm4166_vm1, %v4334_v62  ;;  %8633 = vmatprep.subr.mxu0 %v4514_v6  ;;  %8766 = vmatprep.subr.msk.mxu1 %vm4721_vm4, %v13979_v1 }
 0xac6   :  { %8767 = vmatpush3.msk.msra.mxu1 %vm4721_vm4, %v13979_v1 }
 0xac7   :  { %v4328_v19 = vpop.permute.xlu1 %4327  ;;  %v4326_v17 = vpop.permute.xlu0 %4325  ;;  %8768 = vmatprep.subr.msk.mxu1 %vm10330_vm15, %v15911_v47 }
 0xac8   :  { %v4333_v41 = vsel %vm16372_vm9, %v4326_v17, %v4328_v19  ;;  %v4498_v12 = vld [vmem:[#allocation5 + $0x18] sm:$0xff]  ;;  %8769 = vmatpush3.msk.msra.mxu1 %vm10330_vm15, %v15911_v47  ;;  %vm16386_vm9 = vmmov %vm16385_vm12 }
 0xac9   :  { %4337 = vst.msk [vmem:[#allocation5 + $0x80] sm:$0xff] %vm4166_vm1, %v4333_v41  ;;  %8634 = vmatpush3.msra.mxu0 %v4498_v12  ;;  %8770 = vmatprep.subr.msk.mxu1 %vm10342_vm5, %v15911_v47  ;;  %vm16378_vm1 = vcmask 523264  }
 0xaca   :  { %8635 = vmatprep.subr.mxu0 %v4513_v24  ;;  %8771 = vmatpush3.msk.msra.mxu1 %vm10342_vm5, %v15911_v47  ;;  %vm16379_vm3 = vmmov %vm16378_vm1 }
 0xacb   :  { %8636 = vmatpush3.msra.mxu0 %v4497_v42  ;;  %8772 = vmatprep.subr.msk.mxu1 %vm10366_vm7, %v15911_v47 }
 0xacc   :  { %v4512_v16 = vld [vmem:[#allocation5 + $0x88] sm:$0xff]  ;;  %8773 = vmatpush3.msk.msra.mxu1 %vm10366_vm7, %v15911_v47 }
 0xacd   :  { %8637 = vmatprep.subr.mxu0 %v4512_v16  ;;  %8774 = vmatprep.subr.msk.mxu1 %vm10378_vm8, %v15911_v47 }
 0xace   :  { %8638 = vmatpush3.msra.mxu0 %v4496_v51  ;;  %8775 = vmatpush3.msk.msra.mxu1 %vm10378_vm8, %v15911_v47 }
 0xacf   :  { %8776 = vmatprep.subr.msk.mxu1 %vm10402_vm6, %v15911_v47 }
 0xad0   :  { %v4511_v48 = vld [vmem:[#allocation5 + $0x80] sm:$0xff]  ;;  %8777 = vmatpush3.msk.msra.mxu1 %vm10402_vm6, %v15911_v47 }
 0xad1   :  { %8639 = vmatprep.subr.mxu0 %v4511_v48  ;;  %8778 = vmatprep.subr.msk.mxu1 %vm10419_vm13, %v15911_v47 }
 0xad2   :  { %8640 = vmatpush3.msra.mxu0 %v4495_v59  ;;  %8779 = vmatpush3.msk.msra.mxu1 %vm10419_vm13, %v15911_v47 }
 0xad3   :  { %4592 = vmatmul.mubr.f32.vlgmr.msra.gmra.mxu0 %v4487_v37  ;;  %8786 = vmatprep.subr.msk.mxu1 %vm4721_vm4, %v13979_v1 }
 0xad4   :  { %4596 = vmatprep.mubr.f32.mxu0 %v4490_v29  ;;  %v4619_v40 = vpop.permute.xlu0 %4618  ;;  %v4624_v32 = vpop.permute.xlu1 %4623 }
 0xad7   :  { %4597 = vmatmul.mubr.f32.gmra.mxu0 %v4489_v20 }
 0xad8   :  { %4601 = vmatprep.mubr.f32.mxu0 %v4492_v34  ;;  %v4647_v50 = vpop.permute.xlu0 %4646  ;;  %v4652_v33 = vpop.permute.xlu1 %4651 }
 0xadb   :  { %4602 = vmatmul.mubr.f32.gmra.mxu0 %v4491_v53 }
 0xadc   :  { %4606 = vmatprep.mubr.f32.mxu0 %v4494_v31  ;;  %v4629_v9 = vpop.permute.xlu0 %4628  ;;  %v4634_v26 = vpop.permute.xlu1 %4633 }
 0xadf   :  { %4607 = vmatmul.mubr.f32.gmra.mxu0 %v4493_v54 }
 0xae0   :  { %v4657_v45 = vpop.permute.xlu0 %4656  ;;  %v4662_v14 = vpop.permute.xlu1 %4661 }
 0xb93   :  { %v8641_v61 = vpop.f32.mrf.mxu0 }
 0xb95   :  { %v8642_v15 = vpop.f32.mrf.mxu0 }
 0xb96   :  { %v8643_v0 = vadd.f32 %v8642_v15, %v8641_v61 }
 0xb97   :  { %v8644_v28 = vpop.f32.mrf.mxu0 }
 0xb98   :  { %v4636_v27 = vmul.f32 %v8643_v0, %v4619_v40 }
 0xb99   :  { %v8645_v4 = vpop.f32.mrf.mxu0 }
 0xb9a   :  { %v4664_v46 = vadd.f32 %v4647_v50, %v4636_v27  ;;  %v8646_v5 = vadd.f32 %v8645_v4, %v8644_v28  ;;  %v5380_v4 = vld [vmem:[%s16376_s5 + $0x8] sm:$0xff] }
 0xb9b   :  { %v8647_v44 = vpop.f32.mrf.mxu0 }
 0xb9c   :  { %v4668_v10 = vmax.f32 %v4664_v46, 0.0  ;;  %v4637_v60 = vmul.f32 %v8646_v5, %v4624_v32  ;;  %v5379_v46 = vld [vmem:[%s16376_s5] sm:$0xff] }
 0xb9d   :  { %v8648_v56 = vpop.f32.mrf.mxu0 }
 0xb9e   :  { %v4665_v3 = vadd.f32 %v4652_v33, %v4637_v60  ;;  %v8649_v11 = vadd.f32 %v8648_v56, %v8647_v44  ;;  %4676 = vrot.lane.b32.xlu0 %v4668_v10, %s16193_s26 }
 0xb9f   :  { %v8650_v2 = vpop.f32.mrf.mxu0 }
 0xba0   :  { %v4669_v13 = vmax.f32 %v4665_v3, 0.0  ;;  %v4638_v63 = vmul.f32 %v8649_v11, %v4629_v9  ;;  %v5382_v3 = vld [vmem:[%s16376_s5 + $0x18] sm:$0xff]  ;;  %v5381_v11 = vld [vmem:[%s16376_s5 + $0x10] sm:$0xff] }
 0xba1   :  { %v8651_v52 = vpop.f32.mrf.mxu0 }
 0xba2   :  { %v4666_v18 = vadd.f32 %v4657_v45, %v4638_v63  ;;  %v8652_v30 = vadd.f32 %v8651_v52, %v8650_v2  ;;  %4678 = vrot.lane.b32.xlu1 %v4669_v13, %s16193_s26  ;;  %4692 = vrot.lane.b32.xlu0 %v4668_v10, %s16195_s30 }
 0xba4   :  { %v4670_v22 = vmax.f32 %v4666_v18, 0.0  ;;  %v4639_v21 = vmul.f32 %v8652_v30, %v4634_v26  ;;  %v5384_v18 = vld [vmem:[%s16376_s5 + $0x28] sm:$0xff]  ;;  %v5383_v30 = vld [vmem:[%s16376_s5 + $0x20] sm:$0xff] }
 0xba6   :  { %v4667_v39 = vadd.f32 %v4662_v14, %v4639_v21  ;;  %4694 = vrot.lane.b32.xlu1 %v4669_v13, %s16195_s30  ;;  %4680 = vrot.lane.b32.xlu0 %v4670_v22, %s16193_s26 }
 0xba8   :  { %v4671_v35 = vmax.f32 %v4667_v39, 0.0 }
 0xbaa   :  { %4682 = vrot.lane.b32.xlu1 %v4671_v35, %s16193_s26  ;;  %4696 = vrot.lane.b32.xlu0 %v4670_v22, %s16195_s30 }
 0xbae   :  { %4698 = vrot.lane.b32.xlu1 %v4671_v35, %s16195_s30 }
 0xc10   :  { %v4677_v43 = vpop.permute.xlu0 %4676 }
 0xc11   :  { %v4688_v25 = vmax.f32 %v4668_v10, %v4677_v43 }
 0xc14   :  { %v4679_v36 = vpop.permute.xlu1 %4678  ;;  %v4693_v7 = vpop.permute.xlu0 %4692 }
 0xc15   :  { %v4704_v62 = vmax.f32 %v4688_v25, %v4693_v7  ;;  %v4689_v6 = vmax.f32 %v4669_v13, %v4679_v36  ;;  %v5386_v25 = vld [vmem:[%s16376_s5 + $0x38] sm:$0xff]  ;;  %v5385_v36 = vld [vmem:[%s16376_s5 + $0x30] sm:$0xff] }
 0xc17   :  { %4810 = vrot.lane.b32.xlu0 %v4704_v62, %s16373_s9  ;;  %8780 = vmatprep.mubr.msk.f32.mxu1 %vm4708_vm2, %v4704_v62 }
 0xc18   :  { %v4695_v19 = vpop.permute.xlu1 %4694  ;;  %v4681_v17 = vpop.permute.xlu0 %4680 }
 0xc19   :  { %v4705_v41 = vmax.f32 %v4689_v6, %v4695_v19  ;;  %v4690_v12 = vmax.f32 %v4670_v22, %v4681_v17 }
 0xc1b   :  { %4812 = vrot.lane.b32.xlu1 %v4705_v41, %s16373_s9  ;;  %8781 = vmatmul.mubr.msk.f32.vlgmr.msra.gmra.mxu1 %vm4708_vm2, %v4705_v41 }
 0xc1c   :  { %v4683_v24 = vpop.permute.xlu1 %4682  ;;  %v4697_v42 = vpop.permute.xlu0 %4696  ;;  %8787 = vmatpush3.msk.msra.mxu1 %vm4721_vm4, %v13979_v1 }
 0xc1d   :  { %v4706_v16 = vmax.f32 %v4690_v12, %v4697_v42  ;;  %8788 = vmatprep.subr.msk.mxu1 %vm10330_vm15, %v15911_v47  ;;  %v4691_v51 = vmax.f32 %v4671_v35, %v4683_v24 }
 0xc1e   :  { %8789 = vmatpush3.msk.msra.mxu1 %vm10330_vm15, %v15911_v47  ;;  %vm5818_vm15 = vcmask 23552  }
 0xc1f   :  { %4814 = vrot.lane.b32.xlu0 %v4706_v16, %s16373_s9  ;;  %8783 = vmatprep.mubr.msk.f32.mxu1 %vm4708_vm2, %v4706_v16 }
 0xc20   :  { %v4699_v48 = vpop.permute.xlu1 %4698  ;;  %8790 = vmatprep.subr.msk.mxu1 %vm10342_vm5, %v15911_v47 }
 0xc21   :  { %v4707_v37 = vmax.f32 %v4691_v51, %v4699_v48  ;;  %8791 = vmatpush3.msk.msra.mxu1 %vm10342_vm5, %v15911_v47  ;;  %vm4927_vm5 = vcmask 146432  }
 0xc22   :  { %8792 = vmatprep.subr.msk.mxu1 %vm10366_vm7, %v15911_v47 }
 0xc23   :  { %4816 = vrot.lane.b32.xlu1 %v4707_v37, %s16373_s9  ;;  %8784 = vmatmul.mubr.msk.f32.gmra.mxu1 %vm4708_vm2, %v4707_v37 }
 0xc24   :  { %8793 = vmatpush3.msk.msra.mxu1 %vm10366_vm7, %v15911_v47  ;;  %vm4953_vm7 = vcmask 179288  }
 0xc25   :  { %8794 = vmatprep.subr.msk.mxu1 %vm10378_vm8, %v15911_v47 }
 0xc26   :  { %8795 = vmatpush3.msk.msra.mxu1 %vm10378_vm8, %v15911_v47  ;;  %vm5540_vm8 = vcmask 1046528  }
 0xc27   :  { %8796 = vmatprep.subr.msk.mxu1 %vm10402_vm6, %v15911_v47 }
 0xc28   :  { %8797 = vmatpush3.msk.msra.mxu1 %vm10402_vm6, %v15911_v47  ;;  %vm4932_vm6 = vcmask 89088  }
 0xc29   :  { %8798 = vmatprep.subr.msk.mxu1 %vm10419_vm13, %v15911_v47 }
 0xc2a   :  { %8799 = vmatpush3.msk.msra.mxu1 %vm10419_vm13, %v15911_v47 }
 0xc89   :  { %v4811_v38 = vpop.permute.xlu0 %4810 }
 0xc8a   :  { %8800 = vmatprep.mubr.msk.f32.mxu1 %vm4708_vm2, %v4811_v38 }
 0xc8d   :  { %v4813_v58 = vpop.permute.xlu1 %4812 }
 0xc8e   :  { %8801 = vmatmul.mubr.msk.f32.vlgmr.msra.gmra.mxu1 %vm4708_vm2, %v4813_v58 }
 0xc91   :  { %v4815_v49 = vpop.permute.xlu0 %4814 }
 0xc92   :  { %8803 = vmatprep.mubr.msk.f32.mxu1 %vm4708_vm2, %v4815_v49 }
 0xc95   :  { %v4817_v8 = vpop.permute.xlu1 %4816 }
 0xc96   :  { %8804 = vmatmul.mubr.msk.f32.gmra.mxu1 %vm4708_vm2, %v4817_v8  ;;  %vm16387_vm2 = vmmov %vm16384_vm10 }
 0xcdb   :  { %v8782_v23 = vpop.f32.mrf.mxu1 }
 0xcdd   :  { %v4791_v59 = vpop.f32.mrf.mxu1 }
 0xce3   :  { %v8785_v29 = vpop.f32.mrf.mxu1 }
 0xce5   :  { %v4801_v20 = vpop.f32.mrf.mxu1 }
 0xd4e   :  { %v8802_v34 = vpop.f32.mrf.mxu1 }
 0xd4f   :  { %4917 = vrot.lane.b32.xlu0 %v8802_v34, %s9469_s17 }
 0xd50   :  { %v4892_v47 = vpop.f32.mrf.mxu1 }
 0xd51   :  { %4915 = vrot.lane.b32.xlu1 %v4892_v47, %s9469_s17 }
 0xd56   :  { %v8805_v53 = vpop.f32.mrf.mxu1 }
 0xd57   :  { %4921 = vrot.lane.b32.xlu0 %v8805_v53, %s9469_s17 }
 0xd58   :  { %v4902_v31 = vpop.f32.mrf.mxu1 }
 0xd59   :  { %4919 = vrot.lane.b32.xlu1 %v4902_v31, %s9469_s17 }
 0xdc1   :  { %v4918_v54 = vpop.permute.xlu0 %4917 }
 0xdc2   :  { %v4929_v1 = vsel %vm4927_vm5, %v8782_v23, %v4918_v54 }
 0xdc3   :  { %v4916_v40 = vpop.permute.xlu1 %4915  ;;  %5156 = vrot.lane.b32.xlu0 %v4929_v1, %s16342_s16  ;;  %4943 = vrot.lane.b32.xlu1 %v4929_v1, %s16341_s4  ;;  %4934 = vst.msk [vmem:[#allocation6 + $0x8] sm:$0xff] %vm4932_vm6, %v4929_v1 }
 0xdc4   :  { %v4928_v32 = vsel %vm4927_vm5, %v4791_v59, %v4916_v40 }
 0xdc5   :  { %4933 = vst.msk [vmem:[#allocation6] sm:$0xff] %vm4932_vm6, %v4928_v32 }
 0xdc7   :  { %5040 = vrot.lane.b32.xlu0 %v4929_v1, %s16348_s10  ;;  %5024 = vrot.lane.b32.xlu1 %v4929_v1, %s16347_s11 }
 0xdc9   :  { %v4922_v61 = vpop.permute.xlu0 %4921 }
 0xdca   :  { %v4931_v50 = vsel %vm4927_vm5, %v8785_v29, %v4922_v61 }
 0xdcb   :  { %v4920_v15 = vpop.permute.xlu1 %4919  ;;  %5120 = vrot.lane.b32.xlu0 %v4929_v1, %s16192_s0  ;;  %4992 = vrot.lane.b32.xlu1 %v4929_v1, %s16195_s30  ;;  %4936 = vst.msk [vmem:[#allocation6 + $0x18] sm:$0xff] %vm4932_vm6, %v4931_v50 }
 0xdcc   :  { %v4930_v0 = vsel %vm4927_vm5, %v4801_v20, %v4920_v15  ;;  %vm16388_vm5 = vmmov %vm16387_vm2 }
 0xdcd   :  { %4935 = vst.msk [vmem:[#allocation6 + $0x10] sm:$0xff] %vm4932_vm6, %v4930_v0 }
 0xdcf   :  { %5136 = vrot.lane.b32.xlu0 %v4929_v1, %s16343_s19  ;;  %5008 = vrot.lane.b32.xlu1 %v4929_v1, %s16349_s1 }
 0xdd3   :  { %5088 = vrot.lane.b32.xlu0 %v4929_v1, %s16344_s15  ;;  %4960 = vrot.lane.b32.xlu1 %v4929_v1, %s16193_s26 }
 0xdd7   :  { %5104 = vrot.lane.b32.xlu0 %v4929_v1, %s16345_s18  ;;  %4976 = vrot.lane.b32.xlu1 %v4929_v1, %s16191_s6 }
 0xddb   :  { %5154 = vrot.lane.b32.xlu0 %v4928_v32, %s16342_s16  ;;  %4941 = vrot.lane.b32.xlu1 %v4928_v32, %s16341_s4 }
 0xddf   :  { %5118 = vrot.lane.b32.xlu0 %v4928_v32, %s16192_s0  ;;  %5022 = vrot.lane.b32.xlu1 %v4928_v32, %s16347_s11 }
 0xde3   :  { %5134 = vrot.lane.b32.xlu0 %v4928_v32, %s16343_s19  ;;  %5038 = vrot.lane.b32.xlu1 %v4928_v32, %s16348_s10 }
 0xde7   :  { %5086 = vrot.lane.b32.xlu0 %v4928_v32, %s16344_s15  ;;  %4990 = vrot.lane.b32.xlu1 %v4928_v32, %s16195_s30 }
 0xdeb   :  { %5102 = vrot.lane.b32.xlu0 %v4928_v32, %s16345_s18  ;;  %5006 = vrot.lane.b32.xlu1 %v4928_v32, %s16349_s1 }
 0xdef   :  { %4958 = vrot.lane.b32.xlu1 %v4928_v32, %s16193_s26  ;;  %4947 = vrot.lane.b32.xlu0 %v4931_v50, %s16341_s4 }
 0xdf3   :  { %4974 = vrot.lane.b32.xlu1 %v4928_v32, %s16191_s6  ;;  %5160 = vrot.lane.b32.xlu0 %v4931_v50, %s16342_s16 }
 0xdf7   :  { %5028 = vrot.lane.b32.xlu1 %v4931_v50, %s16347_s11  ;;  %5044 = vrot.lane.b32.xlu0 %v4931_v50, %s16348_s10 }
 0xdfb   :  { %4996 = vrot.lane.b32.xlu1 %v4931_v50, %s16195_s30  ;;  %5124 = vrot.lane.b32.xlu0 %v4931_v50, %s16192_s0 }
 0xdff   :  { %5012 = vrot.lane.b32.xlu1 %v4931_v50, %s16349_s1  ;;  %5140 = vrot.lane.b32.xlu0 %v4931_v50, %s16343_s19 }
 0xe03   :  { %4964 = vrot.lane.b32.xlu1 %v4931_v50, %s16193_s26  ;;  %5092 = vrot.lane.b32.xlu0 %v4931_v50, %s16344_s15 }
 0xe07   :  { %4980 = vrot.lane.b32.xlu1 %v4931_v50, %s16191_s6  ;;  %5108 = vrot.lane.b32.xlu0 %v4931_v50, %s16345_s18 }
 0xe0b   :  { %5076 = vrot.lane.b32.xlu1 %v4931_v50, %s16346_s12  ;;  %5060 = vrot.lane.b32.xlu0 %v4931_v50, %s16194_s2 }
 0xe0f   :  { %4945 = vrot.lane.b32.xlu1 %v4930_v0, %s16341_s4  ;;  %5158 = vrot.lane.b32.xlu0 %v4930_v0, %s16342_s16  ;;  %s16374_s16 = sld [smem:[#allocation120_spill]] }
 0xe13   :  { %5026 = vrot.lane.b32.xlu1 %v4930_v0, %s16347_s11  ;;  %5042 = vrot.lane.b32.xlu0 %v4930_v0, %s16348_s10 }
 0xe15   :  { %v5171_v28 = vld [vmem:[%s16374_s16 + $0x8] sm:$0xff] }
 0xe16   :  { %5282 = vmatprep.mubr.f32.mxu1 %v5171_v28 }
 0xe17   :  { %4994 = vrot.lane.b32.xlu1 %v4930_v0, %s16195_s30  ;;  %5122 = vrot.lane.b32.xlu0 %v4930_v0, %s16192_s0 }
 0xe1b   :  { %5010 = vrot.lane.b32.xlu1 %v4930_v0, %s16349_s1  ;;  %5138 = vrot.lane.b32.xlu0 %v4930_v0, %s16343_s19 }
 0xe1f   :  { %4962 = vrot.lane.b32.xlu1 %v4930_v0, %s16193_s26  ;;  %5090 = vrot.lane.b32.xlu0 %v4930_v0, %s16344_s15 }
 0xe23   :  { %4978 = vrot.lane.b32.xlu1 %v4930_v0, %s16191_s6  ;;  %5106 = vrot.lane.b32.xlu0 %v4930_v0, %s16345_s18  ;;  %s16375_s18 = sld [smem:[#allocation121_spill]] }
 0xe27   :  { %5072 = vrot.lane.b32.xlu1 %v4929_v1, %s16346_s12  ;;  %5056 = vrot.lane.b32.xlu0 %v4929_v1, %s16194_s2 }
 0xe29   :  { %v5324_v27 = vld [vmem:[%s16375_s18 + $0x8] sm:$0xff]  ;;  %v5323_v33 = vld [vmem:[%s16375_s18] sm:$0xff]  ;;  %v5326_v44 = vld [vmem:[%s16375_s18 + $0x18] sm:$0xff] }
 0xe2a   :  { %v5325_v10 = vld [vmem:[%s16375_s18 + $0x10] sm:$0xff]  ;;  %v5328_v13 = vld [vmem:[%s16375_s18 + $0x28] sm:$0xff]  ;;  %v5327_v63 = vld [vmem:[%s16375_s18 + $0x20] sm:$0xff] }
 0xe2b   :  { %5074 = vrot.lane.b32.xlu1 %v4930_v0, %s16346_s12  ;;  %5058 = vrot.lane.b32.xlu0 %v4930_v0, %s16194_s2  ;;  %v5330_v14 = vld [vmem:[%s16375_s18 + $0x38] sm:$0xff]  ;;  %v5329_v39 = vld [vmem:[%s16375_s18 + $0x30] sm:$0xff] }
 0xe2f   :  { %5070 = vrot.lane.b32.xlu1 %v4928_v32, %s16346_s12  ;;  %5054 = vrot.lane.b32.xlu0 %v4928_v32, %s16194_s2 }
 0xe33   :  { %5338 = vperm.xlu1 %8957, %v5324_v27   ;;  %5333 = vperm.xlu0 %8956, %v5323_v33  }
 0xe35   :  { %v4944_v5 = vpop.permute.xlu1 %4943  ;;  %v5157_v9 = vpop.permute.xlu0 %5156 }
 0xe36   :  { %4955 = vst.msk [vmem:[#allocation6 + $0x8] sm:$0xff] %vm4953_vm7, %v4944_v5 }
 0xe37   :  { %5151 = vst.msk [vmem:[#allocation6 + $0xe8] sm:$0xff] %vm4932_vm6, %v4944_v5  ;;  %5394 = vperm.xlu1 %8957, %v5380_v4   ;;  %5389 = vperm.xlu0 %8956, %v5379_v46  }
 0xe38   :  { %5167 = vst.msk [vmem:[#allocation6 + $0xe8] sm:$0xff] %vm4953_vm7, %v5157_v9 }
 0xe39   :  { %v5025_v60 = vpop.permute.xlu1 %5024  ;;  %v5041_v56 = vpop.permute.xlu0 %5040 }
 0xe3a   :  { %5035 = vst.msk [vmem:[#allocation6 + $0x68] sm:$0xff] %vm4932_vm6, %v5025_v60 }
 0xe3b   :  { %5051 = vst.msk [vmem:[#allocation6 + $0x68] sm:$0xff] %vm4953_vm7, %v5041_v56  ;;  %5348 = vperm.xlu1 %8957, %v5326_v44   ;;  %5343 = vperm.xlu0 %8956, %v5325_v10  }
 0xe3d   :  { %v4993_v26 = vpop.permute.xlu1 %4992  ;;  %v5121_v2 = vpop.permute.xlu0 %5120 }
 0xe3e   :  { %5003 = vst.msk [vmem:[#allocation6 + $0x48] sm:$0xff] %vm4932_vm6, %v4993_v26  ;;  %5131 = vst.msk [vmem:[#allocation6 + $0xc8] sm:$0xff] %vm4932_vm6, %v5121_v2 }
 0xe3f   :  { %5404 = vperm.xlu1 %8957, %v5382_v3   ;;  %5399 = vperm.xlu0 %8956, %v5381_v11   ;;  %v5215_v5 = vld [vmem:[#allocation6 + $0xe8] sm:$0xff] }
 0xe41   :  { %v5009_v45 = vpop.permute.xlu1 %5008  ;;  %v5137_v52 = vpop.permute.xlu0 %5136 }
 0xe42   :  { %5019 = vst.msk [vmem:[#allocation6 + $0x48] sm:$0xff] %vm4953_vm7, %v5009_v45  ;;  %5147 = vst.msk [vmem:[#allocation6 + $0xc8] sm:$0xff] %vm4953_vm7, %v5137_v52  ;;  %v5199_v9 = vld [vmem:[#allocation6 + $0x68] sm:$0xff] }
 0xe43   :  { %5358 = vperm.xlu1 %8957, %v5328_v13   ;;  %5353 = vperm.xlu0 %8956, %v5327_v63  }
 0xe45   :  { %v4961_v22 = vpop.permute.xlu1 %4960  ;;  %v5089_v21 = vpop.permute.xlu0 %5088 }
 0xe46   :  { %4971 = vst.msk [vmem:[#allocation6 + $0x28] sm:$0xff] %vm4932_vm6, %v4961_v22  ;;  %5099 = vst.msk [vmem:[#allocation6 + $0xa8] sm:$0xff] %vm4932_vm6, %v5089_v21 }
 0xe47   :  { %5414 = vperm.xlu1 %8957, %v5384_v18   ;;  %5409 = vperm.xlu0 %8956, %v5383_v30  }
 0xe49   :  { %v4977_v35 = vpop.permute.xlu1 %4976  ;;  %v5105_v43 = vpop.permute.xlu0 %5104  ;;  %v5211_v45 = vld [vmem:[#allocation6 + $0xc8] sm:$0xff] }
 0xe4a   :  { %4987 = vst.msk [vmem:[#allocation6 + $0x28] sm:$0xff] %vm4953_vm7, %v4977_v35  ;;  %5115 = vst.msk [vmem:[#allocation6 + $0xa8] sm:$0xff] %vm4953_vm7, %v5105_v43  ;;  %v5195_v52 = vld [vmem:[#allocation6 + $0x48] sm:$0xff] }
 0xe4b   :  { %5368 = vperm.xlu1 %8957, %v5330_v14   ;;  %5363 = vperm.xlu0 %8956, %v5329_v39  }
 0xe4d   :  { %v4942_v7 = vpop.permute.xlu1 %4941  ;;  %v5155_v62 = vpop.permute.xlu0 %5154 }
 0xe4e   :  { %4954 = vst.msk [vmem:[#allocation6] sm:$0xff] %vm4953_vm7, %v4942_v7 }
 0xe4f   :  { %5150 = vst.msk [vmem:[#allocation6 + $0xe0] sm:$0xff] %vm4932_vm6, %v4942_v7  ;;  %5424 = vperm.xlu1 %8957, %v5386_v25   ;;  %5419 = vperm.xlu0 %8956, %v5385_v36  }
 0xe50   :  { %5166 = vst.msk [vmem:[#allocation6 + $0xe0] sm:$0xff] %vm4953_vm7, %v5155_v62 }
 0xe51   :  { %v5023_v6 = vpop.permute.xlu1 %5022  ;;  %v5119_v19 = vpop.permute.xlu0 %5118  ;;  %v5207_v7 = vld [vmem:[#allocation6 + $0xa8] sm:$0xff] }
 0xe52   :  { %5034 = vst.msk [vmem:[#allocation6 + $0x60] sm:$0xff] %vm4932_vm6, %v5023_v6  ;;  %5130 = vst.msk [vmem:[#allocation6 + $0xc0] sm:$0xff] %vm4932_vm6, %v5119_v19  ;;  %v5191_v62 = vld [vmem:[#allocation6 + $0x28] sm:$0xff] }
 0xe55   :  { %v5039_v17 = vpop.permute.xlu1 %5038  ;;  %v5135_v41 = vpop.permute.xlu0 %5134 }
 0xe56   :  { %5050 = vst.msk [vmem:[#allocation6 + $0x60] sm:$0xff] %vm4953_vm7, %v5039_v17  ;;  %5146 = vst.msk [vmem:[#allocation6 + $0xc0] sm:$0xff] %vm4953_vm7, %v5135_v41 }
 0xe57   :  { %v5214_v60 = vld [vmem:[#allocation6 + $0xe0] sm:$0xff] }
 0xe59   :  { %v4991_v12 = vpop.permute.xlu1 %4990  ;;  %v5087_v24 = vpop.permute.xlu0 %5086 }
 0xe5a   :  { %5002 = vst.msk [vmem:[#allocation6 + $0x40] sm:$0xff] %vm4932_vm6, %v4991_v12  ;;  %5098 = vst.msk [vmem:[#allocation6 + $0xa0] sm:$0xff] %vm4932_vm6, %v5087_v24 }
 0xe5d   :  { %v5007_v42 = vpop.permute.xlu1 %5006  ;;  %v5103_v16 = vpop.permute.xlu0 %5102  ;;  %v5198_v56 = vld [vmem:[#allocation6 + $0x60] sm:$0xff] }
 0xe5e   :  { %5018 = vst.msk [vmem:[#allocation6 + $0x40] sm:$0xff] %vm4953_vm7, %v5007_v42  ;;  %5114 = vst.msk [vmem:[#allocation6 + $0xa0] sm:$0xff] %vm4953_vm7, %v5103_v16  ;;  %v5210_v22 = vld [vmem:[#allocation6 + $0xc0] sm:$0xff] }
 0xe61   :  { %v4959_v51 = vpop.permute.xlu1 %4958  ;;  %v4948_v48 = vpop.permute.xlu0 %4947 }
 0xe62   :  { %4970 = vst.msk [vmem:[#allocation6 + $0x20] sm:$0xff] %vm4932_vm6, %v4959_v51  ;;  %5153 = vst.msk [vmem:[#allocation6 + $0xf8] sm:$0xff] %vm4932_vm6, %v4948_v48 }
 0xe63   :  { %4957 = vst.msk [vmem:[#allocation6 + $0x18] sm:$0xff] %vm4953_vm7, %v4948_v48  ;;  %v5187_v48 = vld [vmem:[#allocation6 + $0x8] sm:$0xff] }
 0xe65   :  { %v4975_v37 = vpop.permute.xlu1 %4974  ;;  %v5161_v38 = vpop.permute.xlu0 %5160  ;;  %v5194_v21 = vld [vmem:[#allocation6 + $0x40] sm:$0xff] }
 0xe66   :  { %4986 = vst.msk [vmem:[#allocation6 + $0x20] sm:$0xff] %vm4953_vm7, %v4975_v37  ;;  %5169 = vst.msk [vmem:[#allocation6 + $0xf8] sm:$0xff] %vm4953_vm7, %v5161_v38  ;;  %v5206_v17 = vld [vmem:[#allocation6 + $0xa0] sm:$0xff]  ;;  %v5170_v38 = vld [vmem:[%s16374_s16] sm:$0xff] }
 0xe69   :  { %v5029_v58 = vpop.permute.xlu1 %5028  ;;  %v5045_v49 = vpop.permute.xlu0 %5044 }
 0xe6a   :  { %5037 = vst.msk [vmem:[#allocation6 + $0x78] sm:$0xff] %vm4932_vm6, %v5029_v58  ;;  %v5189_v24 = vld [vmem:[#allocation6 + $0x18] sm:$0xff]  ;;  %v5186_v58 = vld [vmem:[#allocation6] sm:$0xff] }
 0xe6b   :  { %5053 = vst.msk [vmem:[#allocation6 + $0x78] sm:$0xff] %vm4953_vm7, %v5045_v49  ;;  %v5173_v49 = vld [vmem:[%s16374_s16 + $0x18] sm:$0xff] }
 0xe6d   :  { %v4997_v8 = vpop.permute.xlu1 %4996  ;;  %v5125_v23 = vpop.permute.xlu0 %5124  ;;  %v5217_v59 = vld [vmem:[#allocation6 + $0xf8] sm:$0xff]  ;;  %v5190_v41 = vld [vmem:[#allocation6 + $0x20] sm:$0xff] }
 0xe6e   :  { %5005 = vst.msk [vmem:[#allocation6 + $0x58] sm:$0xff] %vm4932_vm6, %v4997_v8  ;;  %5133 = vst.msk [vmem:[#allocation6 + $0xd8] sm:$0xff] %vm4932_vm6, %v5125_v23  ;;  %8675 = vmatprep.subr.mxu1 %v5217_v59  ;;  %v5172_v8 = vld [vmem:[%s16374_s16 + $0x10] sm:$0xff]  ;;  %v5175_v23 = vld [vmem:[%s16374_s16 + $0x28] sm:$0xff] }
 0xe6f   :  { %v5174_v59 = vld [vmem:[%s16374_s16 + $0x20] sm:$0xff] }
 0xe71   :  { %v5013_v29 = vpop.permute.xlu1 %5012  ;;  %v5141_v20 = vpop.permute.xlu0 %5140 }
 0xe72   :  { %5021 = vst.msk [vmem:[#allocation6 + $0x58] sm:$0xff] %vm4953_vm7, %v5013_v29  ;;  %5149 = vst.msk [vmem:[#allocation6 + $0xd8] sm:$0xff] %vm4953_vm7, %v5141_v20  ;;  %v5201_v34 = vld [vmem:[#allocation6 + $0x78] sm:$0xff]  ;;  %v5177_v29 = vld [vmem:[%s16374_s16 + $0x38] sm:$0xff] }
 0xe73   :  { %8676 = vmatpush3.msra.mxu1 %v5201_v34  ;;  %v5176_v20 = vld [vmem:[%s16374_s16 + $0x30] sm:$0xff]  ;;  %v5179_v34 = vld [vmem:[%s16374_s16 + $0x48] sm:$0xff] }
 0xe75   :  { %v4965_v47 = vpop.permute.xlu1 %4964  ;;  %v5093_v53 = vpop.permute.xlu0 %5092 }
 0xe76   :  { %4973 = vst.msk [vmem:[#allocation6 + $0x38] sm:$0xff] %vm4932_vm6, %v4965_v47  ;;  %5101 = vst.msk [vmem:[#allocation6 + $0xb8] sm:$0xff] %vm4932_vm6, %v5093_v53  ;;  %v5178_v47 = vld [vmem:[%s16374_s16 + $0x40] sm:$0xff]  ;;  %v5181_v53 = vld [vmem:[%s16374_s16 + $0x58] sm:$0xff] }
 0xe79   :  { %v4981_v31 = vpop.permute.xlu1 %4980  ;;  %v5109_v54 = vpop.permute.xlu0 %5108  ;;  %v5213_v3 = vld [vmem:[#allocation6 + $0xd8] sm:$0xff] }
 0xe7a   :  { %4989 = vst.msk [vmem:[#allocation6 + $0x38] sm:$0xff] %vm4953_vm7, %v4981_v31  ;;  %5117 = vst.msk [vmem:[#allocation6 + $0xb8] sm:$0xff] %vm4953_vm7, %v5109_v54  ;;  %v5197_v11 = vld [vmem:[#allocation6 + $0x58] sm:$0xff]  ;;  %v5183_v54 = vld [vmem:[%s16374_s16 + $0x68] sm:$0xff] }
 0xe7b   :  { %v5180_v31 = vld [vmem:[%s16374_s16 + $0x50] sm:$0xff] }
 0xe7d   :  { %v5077_v1 = vpop.permute.xlu1 %5076  ;;  %v5061_v40 = vpop.permute.xlu0 %5060 }
 0xe7e   :  { %5069 = vst.msk [vmem:[#allocation6 + $0x98] sm:$0xff] %vm4932_vm6, %v5061_v40  ;;  %v5185_v40 = vld [vmem:[%s16374_s16 + $0x78] sm:$0xff] }
 0xe7f   :  { %5085 = vst.msk [vmem:[#allocation6 + $0x98] sm:$0xff] %vm4953_vm7, %v5077_v1  ;;  %v5182_v1 = vld [vmem:[%s16374_s16 + $0x60] sm:$0xff] }
 0xe81   :  { %v4946_v32 = vpop.permute.xlu1 %4945  ;;  %v5159_v61 = vpop.permute.xlu0 %5158  ;;  %v5209_v14 = vld [vmem:[#allocation6 + $0xb8] sm:$0xff] }
 0xe82   :  { %4956 = vst.msk [vmem:[#allocation6 + $0x10] sm:$0xff] %vm4953_vm7, %v4946_v32  ;;  %v5193_v39 = vld [vmem:[#allocation6 + $0x38] sm:$0xff] }
 0xe83   :  { %5152 = vst.msk [vmem:[#allocation6 + $0xf0] sm:$0xff] %vm4932_vm6, %v4946_v32  ;;  %v5184_v32 = vld [vmem:[%s16374_s16 + $0x70] sm:$0xff]  ;;  %s16380_s16 = sld [smem:[#allocation125_spill]] }
 0xe84   :  { %5168 = vst.msk [vmem:[#allocation6 + $0xf0] sm:$0xff] %vm4953_vm7, %v5159_v61  ;;  %v16377_v61 = vmov 0  }
 0xe85   :  { %v5027_v50 = vpop.permute.xlu1 %5026  ;;  %v5043_v15 = vpop.permute.xlu0 %5042 }
 0xe86   :  { %5036 = vst.msk [vmem:[#allocation6 + $0x70] sm:$0xff] %vm4932_vm6, %v5027_v50  ;;  %v5205_v12 = vld [vmem:[#allocation6 + $0x98] sm:$0xff] }
 0xe87   :  { %5052 = vst.msk [vmem:[#allocation6 + $0x70] sm:$0xff] %vm4953_vm7, %v5043_v15 }
 0xe89   :  { %v4995_v0 = vpop.permute.xlu1 %4994  ;;  %v5123_v28 = vpop.permute.xlu0 %5122  ;;  %v5188_v16 = vld [vmem:[#allocation6 + $0x10] sm:$0xff] }
 0xe8a   :  { %5004 = vst.msk [vmem:[#allocation6 + $0x50] sm:$0xff] %vm4932_vm6, %v4995_v0  ;;  %5132 = vst.msk [vmem:[#allocation6 + $0xd0] sm:$0xff] %vm4932_vm6, %v5123_v28 }
 0xe8b   :  { %v5216_v27 = vld [vmem:[#allocation6 + $0xf0] sm:$0xff] }
 0xe8c   :  { %8677 = vmatprep.subr.mxu1 %v5216_v27 }
 0xe8d   :  { %v5011_v33 = vpop.permute.xlu1 %5010  ;;  %v5139_v4 = vpop.permute.xlu0 %5138 }
 0xe8e   :  { %5020 = vst.msk [vmem:[#allocation6 + $0x50] sm:$0xff] %vm4953_vm7, %v5011_v33  ;;  %5148 = vst.msk [vmem:[#allocation6 + $0xd0] sm:$0xff] %vm4953_vm7, %v5139_v4  ;;  %v5200_v46 = vld [vmem:[#allocation6 + $0x70] sm:$0xff] }
 0xe8f   :  { %8678 = vmatpush3.msra.mxu1 %v5200_v46 }
 0xe90   :  { %8679 = vmatprep.subr.mxu1 %v5215_v5 }
 0xe91   :  { %v4963_v44 = vpop.permute.xlu1 %4962  ;;  %8680 = vmatpush3.msra.mxu1 %v5199_v9  ;;  %v5091_v10 = vpop.permute.xlu0 %5090 }
 0xe92   :  { %4972 = vst.msk [vmem:[#allocation6 + $0x30] sm:$0xff] %vm4932_vm6, %v4963_v44  ;;  %5100 = vst.msk [vmem:[#allocation6 + $0xb0] sm:$0xff] %vm4932_vm6, %v5091_v10  ;;  %8681 = vmatprep.subr.mxu1 %v5214_v60 }
 0xe93   :  { %8682 = vmatpush3.msra.mxu1 %v5198_v56  ;;  %v14305_v56 = vsel %vm10419_vm13, 1.0, %v16255_v55  ;;  %vm5515_vm13 = vcmask 56320   ;;  %v6141_v55 = vld [vmem:[#allocation15 + $0xf0] sm:$0xff] }
 0xe94   :  { %8683 = vmatprep.subr.mxu1 %v5213_v3  ;;  %8806 = vmatprep.subr.msk.mxu0 %vm5540_vm8, %v14305_v56 }
 0xe95   :  { %v4979_v26 = vpop.permute.xlu1 %4978  ;;  %8684 = vmatpush3.msra.mxu1 %v5197_v11  ;;  %v5107_v2 = vpop.permute.xlu0 %5106  ;;  %v5212_v13 = vld [vmem:[#allocation6 + $0xd0] sm:$0xff]  ;;  %8807 = vmatpush3.msk.msra.mxu0 %vm5540_vm8, %v14305_v56 }
 0xe96   :  { %v5196_v63 = vld [vmem:[#allocation6 + $0x50] sm:$0xff]  ;;  %4988 = vst.msk [vmem:[#allocation6 + $0x30] sm:$0xff] %vm4953_vm7, %v4979_v26  ;;  %5116 = vst.msk [vmem:[#allocation6 + $0xb0] sm:$0xff] %vm4953_vm7, %v5107_v2  ;;  %8685 = vmatprep.subr.mxu1 %v5212_v13  ;;  %8820 = vmatprep.subr.msk.mxu0 %vm5540_vm8, %v14305_v56 }
 0xe97   :  { %8686 = vmatpush3.msra.mxu1 %v5196_v63 }
 0xe98   :  { %8687 = vmatprep.subr.mxu1 %v5211_v45 }
 0xe99   :  { %v5073_v18 = vpop.permute.xlu1 %5072  ;;  %8688 = vmatpush3.msra.mxu1 %v5195_v52  ;;  %v5057_v30 = vpop.permute.xlu0 %5056 }
 0xe9a   :  { %5067 = vst.msk [vmem:[#allocation6 + $0x88] sm:$0xff] %vm4932_vm6, %v5057_v30  ;;  %8689 = vmatprep.subr.mxu1 %v5210_v22 }
 0xe9b   :  { %5083 = vst.msk [vmem:[#allocation6 + $0x88] sm:$0xff] %vm4953_vm7, %v5073_v18  ;;  %8690 = vmatpush3.msra.mxu1 %v5194_v21 }
 0xe9c   :  { %8691 = vmatprep.subr.mxu1 %v5209_v14 }
 0xe9d   :  { %v5075_v35 = vpop.permute.xlu1 %5074  ;;  %8692 = vmatpush3.msra.mxu1 %v5193_v39  ;;  %v5059_v43 = vpop.permute.xlu0 %5058  ;;  %v5208_v25 = vld [vmem:[#allocation6 + $0xb0] sm:$0xff] }
 0xe9e   :  { %v5192_v36 = vld [vmem:[#allocation6 + $0x30] sm:$0xff]  ;;  %5068 = vst.msk [vmem:[#allocation6 + $0x90] sm:$0xff] %vm4932_vm6, %v5059_v43  ;;  %8693 = vmatprep.subr.mxu1 %v5208_v25 }
 0xe9f   :  { %5084 = vst.msk [vmem:[#allocation6 + $0x90] sm:$0xff] %vm4953_vm7, %v5075_v35  ;;  %8694 = vmatpush3.msra.mxu1 %v5192_v36 }
 0xea0   :  { %8695 = vmatprep.subr.mxu1 %v5207_v7 }
 0xea1   :  { %v5071_v6 = vpop.permute.xlu1 %5070  ;;  %8696 = vmatpush3.msra.mxu1 %v5191_v62  ;;  %v5055_v19 = vpop.permute.xlu0 %5054 }
 0xea2   :  { %5066 = vst.msk [vmem:[#allocation6 + $0x80] sm:$0xff] %vm4932_vm6, %v5055_v19  ;;  %8697 = vmatprep.subr.mxu1 %v5206_v17  ;;  %v5203_v51 = vld [vmem:[#allocation6 + $0x88] sm:$0xff]  ;;  %vm16389_vm6 = vmmov %vm16386_vm9 }
 0xea3   :  { %5082 = vst.msk [vmem:[#allocation6 + $0x80] sm:$0xff] %vm4953_vm7, %v5071_v6  ;;  %8698 = vmatpush3.msra.mxu1 %v5190_v41  ;;  %vm16390_vm7 = vmmov %vm16389_vm6 }
 0xea4   :  { %8699 = vmatprep.subr.mxu1 %v5205_v12 }
 0xea5   :  { %8700 = vmatpush3.msra.mxu1 %v5189_v24 }
 0xea6   :  { %v5204_v42 = vld [vmem:[#allocation6 + $0x90] sm:$0xff] }
 0xea7   :  { %8701 = vmatprep.subr.mxu1 %v5204_v42 }
 0xea8   :  { %8702 = vmatpush3.msra.mxu1 %v5188_v16 }
 0xea9   :  { %8703 = vmatprep.subr.mxu1 %v5203_v51 }
 0xeaa   :  { %8704 = vmatpush3.msra.mxu1 %v5187_v48  ;;  %v5202_v37 = vld [vmem:[#allocation6 + $0x80] sm:$0xff] }
 0xeab   :  { %8705 = vmatprep.subr.mxu1 %v5202_v37 }
 0xeac   :  { %8706 = vmatpush3.msra.mxu1 %v5186_v58 }
 0xead   :  { %5283 = vmatmul.mubr.f32.vlgmr.msra.gmra.mxu1 %v5170_v38 }
 0xeae   :  { %5287 = vmatprep.mubr.f32.mxu1 %v5173_v49  ;;  %v5334_v50 = vpop.permute.xlu0 %5333  ;;  %v5339_v15 = vpop.permute.xlu1 %5338 }
 0xeb1   :  { %5288 = vmatmul.mubr.f32.gmra.mxu1 %v5172_v8 }
 0xeb2   :  { %5292 = vmatprep.mubr.f32.mxu1 %v5175_v23  ;;  %v5390_v0 = vpop.permute.xlu0 %5389  ;;  %v5395_v28 = vpop.permute.xlu1 %5394 }
 0xeb5   :  { %5293 = vmatmul.mubr.f32.gmra.mxu1 %v5174_v59 }
 0xeb6   :  { %5297 = vmatprep.mubr.f32.mxu1 %v5177_v29  ;;  %v5344_v27 = vpop.permute.xlu0 %5343  ;;  %v5349_v5 = vpop.permute.xlu1 %5348 }
 0xeb9   :  { %5298 = vmatmul.mubr.f32.gmra.mxu1 %v5176_v20 }
 0xeba   :  { %5302 = vmatprep.mubr.f32.mxu1 %v5179_v34  ;;  %v5400_v10 = vpop.permute.xlu0 %5399  ;;  %v5405_v63 = vpop.permute.xlu1 %5404 }
 0xebd   :  { %5303 = vmatmul.mubr.f32.gmra.mxu1 %v5178_v47 }
 0xebe   :  { %5307 = vmatprep.mubr.f32.mxu1 %v5181_v53  ;;  %v5354_v18 = vpop.permute.xlu0 %5353  ;;  %v5359_v43 = vpop.permute.xlu1 %5358 }
 0xec1   :  { %5308 = vmatmul.mubr.f32.gmra.mxu1 %v5180_v31 }
 0xec2   :  { %5312 = vmatprep.mubr.f32.mxu1 %v5183_v54  ;;  %v5410_v62 = vpop.permute.xlu0 %5409  ;;  %v5415_v42 = vpop.permute.xlu1 %5414 }
 0xec5   :  { %5313 = vmatmul.mubr.f32.gmra.mxu1 %v5182_v1 }
 0xec6   :  { %5317 = vmatprep.mubr.f32.mxu1 %v5185_v40  ;;  %v5364_v37 = vpop.permute.xlu0 %5363  ;;  %v5369_v29 = vpop.permute.xlu1 %5368 }
 0xec9   :  { %5318 = vmatmul.mubr.f32.gmra.mxu1 %v5184_v32 }
 0xeca   :  { %6041 = vmatprep.mubr.bf16.mxu1 %v16377_v61  ;;  %v5420_v53 = vpop.permute.xlu0 %5419 }
 0xf6d   :  { %v8707_v33 = vpop.f32.mrf.mxu1 }
 0xf6f   :  { %v8708_v4 = vpop.f32.mrf.mxu1 }
 0xf70   :  { %v8709_v46 = vadd.f32 %v8708_v4, %v8707_v33 }
 0xf71   :  { %v8710_v9 = vpop.f32.mrf.mxu1 }
 0xf72   :  { %v5371_v44 = vmul.f32 %v8709_v46, %v5334_v50  ;;  %v5425_v50 = vpop.permute.xlu1 %5424 }
 0xf73   :  { %v8711_v60 = vpop.f32.mrf.mxu1 }
 0xf74   :  { %v5427_v3 = vadd.f32 %v5390_v0, %v5371_v44  ;;  %v8712_v11 = vadd.f32 %v8711_v60, %v8710_v9 }
 0xf75   :  { %v8713_v26 = vpop.f32.mrf.mxu1 }
 0xf76   :  { %v14311_v2 = vmax.f32 %v5427_v3, 0.0  ;;  %v5372_v13 = vmul.f32 %v8712_v11, %v5339_v15 }
 0xf77   :  { %v8714_v57 = vpop.f32.mrf.mxu1 }
 0xf78   :  { %v5428_v45 = vadd.f32 %v5395_v28, %v5372_v13  ;;  %v8715_v52 = vadd.f32 %v8714_v57, %v8713_v26  ;;  %5451 = vrot.lane.b32.xlu0 %v14311_v2, %s16193_s26 }
 0xf79   :  { %v8716_v30 = vpop.f32.mrf.mxu1 }
 0xf7a   :  { %v14317_v22 = vmax.f32 %v5428_v45, 0.0  ;;  %v5373_v21 = vmul.f32 %v8715_v52, %v5344_v27 }
 0xf7b   :  { %v8717_v14 = vpop.f32.mrf.mxu1 }
 0xf7c   :  { %v5429_v39 = vadd.f32 %v5400_v10, %v5373_v21  ;;  %v8718_v35 = vadd.f32 %v8717_v14, %v8716_v30  ;;  %5453 = vrot.lane.b32.xlu1 %v14317_v22, %s16193_s26  ;;  %5483 = vrot.lane.b32.xlu0 %v14311_v2, %s16195_s30 }
 0xf7d   :  { %v8719_v25 = vpop.f32.mrf.mxu1 }
 0xf7e   :  { %v14323_v36 = vmax.f32 %v5429_v39, 0.0  ;;  %v5374_v7 = vmul.f32 %v8718_v35, %v5349_v5 }
 0xf7f   :  { %v8720_v6 = vpop.f32.mrf.mxu1 }
 0xf80   :  { %v5430_v19 = vadd.f32 %v5405_v63, %v5374_v7  ;;  %v8721_v17 = vadd.f32 %v8720_v6, %v8719_v25  ;;  %5485 = vrot.lane.b32.xlu1 %v14317_v22, %s16195_s30  ;;  %5455 = vrot.lane.b32.xlu0 %v14323_v36, %s16193_s26 }
 0xf81   :  { %v8722_v41 = vpop.f32.mrf.mxu1 }
 0xf82   :  { %v5438_v12 = vmax.f32 %v5430_v19, 0.0  ;;  %v5375_v24 = vmul.f32 %v8721_v17, %v5354_v18 }
 0xf83   :  { %v8723_v16 = vpop.f32.mrf.mxu1 }
 0xf84   :  { %v5431_v51 = vadd.f32 %v5410_v62, %v5375_v24  ;;  %v8724_v48 = vadd.f32 %v8723_v16, %v8722_v41  ;;  %5457 = vrot.lane.b32.xlu1 %v5438_v12, %s16193_s26  ;;  %5487 = vrot.lane.b32.xlu0 %v14323_v36, %s16195_s30 }
 0xf85   :  { %v8725_v38 = vpop.f32.mrf.mxu1 }
 0xf86   :  { %v5439_v58 = vmax.f32 %v5431_v51, 0.0  ;;  %v5376_v49 = vmul.f32 %v8724_v48, %v5359_v43 }
 0xf87   :  { %v8726_v8 = vpop.f32.mrf.mxu1 }
 0xf88   :  { %v5432_v23 = vadd.f32 %v5415_v42, %v5376_v49  ;;  %v8727_v59 = vadd.f32 %v8726_v8, %v8725_v38  ;;  %5489 = vrot.lane.b32.xlu1 %v5438_v12, %s16195_s30  ;;  %5459 = vrot.lane.b32.xlu0 %v5439_v58, %s16193_s26 }
 0xf89   :  { %v8728_v20 = vpop.f32.mrf.mxu1 }
 0xf8a   :  { %v5440_v34 = vmax.f32 %v5432_v23, 0.0  ;;  %v5377_v47 = vmul.f32 %v8727_v59, %v5364_v37 }
 0xf8b   :  { %v8729_v31 = vpop.f32.mrf.mxu1 }
 0xf8c   :  { %v5433_v54 = vadd.f32 %v5420_v53, %v5377_v47  ;;  %v8730_v1 = vadd.f32 %v8729_v31, %v8728_v20  ;;  %5461 = vrot.lane.b32.xlu1 %v5440_v34, %s16193_s26  ;;  %5491 = vrot.lane.b32.xlu0 %v5439_v58, %s16195_s30 }
 0xf8e   :  { %v5441_v40 = vmax.f32 %v5433_v54, 0.0  ;;  %v5378_v32 = vmul.f32 %v8730_v1, %v5369_v29 }
 0xf90   :  { %v5434_v15 = vadd.f32 %v5425_v50, %v5378_v32  ;;  %5493 = vrot.lane.b32.xlu1 %v5440_v34, %s16195_s30  ;;  %5463 = vrot.lane.b32.xlu0 %v5441_v40, %s16193_s26  ;;  %v9030_v32 = vld [vmem:[#allocation13 + $0x64] ss:$16 sps:$4 sm:$0xff]   ;;  %v9031_v50 = vld [vmem:[#allocation13 + $0x68] ss:$16 sps:$4 sm:$0xff]  }
 0xf92   :  { %v5442_v0 = vmax.f32 %v5434_v15, 0.0  ;;  %v9033_v15 = vld [vmem:[#allocation13 + $0x6c] ss:$16 sps:$4 sm:$0xff]  }
 0xf93   :  { %6017 = vmatprep.subr.bf16.mxu1 %v9033_v15 }
 0xf94   :  { %5465 = vrot.lane.b32.xlu1 %v5442_v0, %s16193_s26  ;;  %5495 = vrot.lane.b32.xlu0 %v5441_v40, %s16195_s30 }
 0xf95   :  { %6018 = vmatpush1.bf16.msra.mxu1 %v9031_v50 }
 0xf98   :  { %5497 = vrot.lane.b32.xlu1 %v5442_v0, %s16195_s30 }
 0xfea   :  { %v5452_v28 = vpop.permute.xlu0 %5451 }
 0xfeb   :  { %v5475_v27 = vmax.f32 %v14311_v2, %v5452_v28  ;;  %v9039_v28 = vld [vmem:[#allocation13 + $0x4c] ss:$16 sps:$4 sm:$0xff]  }
 0xfec   :  { %6019 = vmatprep.subr.bf16.mxu1 %v9039_v28  ;;  %v6147_v28 = vld [vmem:[#allocation15 + $0x120] sm:$0xff] }
 0xfee   :  { %v5454_v33 = vpop.permute.xlu1 %5453  ;;  %v5484_v4 = vpop.permute.xlu0 %5483 }
 0xfef   :  { %v5507_v46 = vmax.f32 %v5475_v27, %v5484_v4  ;;  %v5476_v5 = vmax.f32 %v14317_v22, %v5454_v33  ;;  %v9034_v33 = vld [vmem:[#allocation13 + $0x40] ss:$16 sps:$4 sm:$0xff]   ;;  %v9037_v4 = vld [vmem:[#allocation13 + $0x48] ss:$16 sps:$4 sm:$0xff]  }
 0xff0   :  { %6020 = vmatpush1.bf16.msra.mxu1 %v9037_v4 }
 0xff1   :  { %5649 = vrot.lane.b32.xlu0 %v5507_v46, %s16346_s12  ;;  %8808 = vmatprep.mubr.msk.f32.mxu0 %vm5515_vm13, %v5507_v46  ;;  %v9042_v46 = vld [vmem:[#allocation13 + $0x24] ss:$16 sps:$4 sm:$0xff]  }
 0xff2   :  { %v5486_v9 = vpop.permute.xlu1 %5485  ;;  %v5456_v44 = vpop.permute.xlu0 %5455 }
 0xff3   :  { %v5508_v10 = vmax.f32 %v5476_v5, %v5486_v9  ;;  %v5477_v60 = vmax.f32 %v14323_v36, %v5456_v44  ;;  %v9045_v9 = vld [vmem:[#allocation13 + $0x2c] ss:$16 sps:$4 sm:$0xff]   ;;  %v6167_v44 = vld [vmem:[#allocation15 + $0x1c0] sm:$0xff] }
 0xff4   :  { %6021 = vmatprep.subr.bf16.mxu1 %v9045_v9 }
 0xff5   :  { %5651 = vrot.lane.b32.xlu1 %v5508_v10, %s16346_s12  ;;  %8809 = vmatmul.mubr.msk.f32.vlgmr.msra.gmra.mxu0 %vm5515_vm13, %v5508_v10  ;;  %v6171_v10 = vld [vmem:[#allocation15 + $0x1e0] sm:$0xff] }
 0xff6   :  { %v5458_v3 = vpop.permute.xlu1 %5457  ;;  %v5488_v11 = vpop.permute.xlu0 %5487  ;;  %8821 = vmatpush3.msk.msra.mxu0 %vm5540_vm8, %v14305_v56 }
 0xff7   :  { %v5509_v26 = vmax.f32 %v5477_v60, %v5488_v11  ;;  %v5478_v2 = vmax.f32 %v5438_v12, %v5458_v3  ;;  %5976 = vmatprep.subr.bf16.mxu0 %v9030_v32  ;;  %v14390_v3 = vcombine.low %v6167_v44, %v6171_v10  ;;  %v6168_v11 = vld [vmem:[#allocation15 + $0x1c8] sm:$0xff] }
 0xff8   :  { %v6156_v32 = vld [vmem:[#allocation15 + $0x168] sm:$0xff] }
 0xff9   :  { %5653 = vrot.lane.b32.xlu0 %v5509_v26, %s16346_s12  ;;  %8811 = vmatprep.mubr.msk.f32.mxu0 %vm5515_vm13, %v5509_v26  ;;  %v6172_v26 = vld [vmem:[#allocation15 + $0x1e8] sm:$0xff] }
 0xffa   :  { %v5490_v13 = vpop.permute.xlu1 %5489  ;;  %v5460_v63 = vpop.permute.xlu0 %5459 }
 0xffb   :  { %v5510_v57 = vmax.f32 %v5478_v2, %v5490_v13  ;;  %v5479_v45 = vmax.f32 %v5439_v58, %v5460_v63  ;;  %v9040_v2 = vld [vmem:[#allocation13 + $0x20] ss:$16 sps:$4 sm:$0xff]   ;;  %v14392_v13 = vcombine.low %v6168_v11, %v6172_v26  ;;  %v9043_v63 = vld [vmem:[#allocation13 + $0x28] ss:$16 sps:$4 sm:$0xff]  }
 0xffc   :  { %6022 = vmatpush1.bf16.msra.mxu1 %v9043_v63 }
 0xffd   :  { %5655 = vrot.lane.b32.xlu1 %v5510_v57, %s16346_s12  ;;  %8812 = vmatmul.mubr.msk.f32.gmra.mxu0 %vm5515_vm13, %v5510_v57  ;;  %v9048_v57 = vld [vmem:[#allocation13 + $0x4] ss:$16 sps:$4 sm:$0xff]  }
 0xffe   :  { %v5462_v52 = vpop.permute.xlu1 %5461  ;;  %v5492_v18 = vpop.permute.xlu0 %5491 }
 0xfff   :  { %v5511_v30 = vmax.f32 %v5479_v45, %v5492_v18  ;;  %v5480_v22 = vmax.f32 %v5440_v34, %v5462_v52  ;;  %v9051_v45 = vld [vmem:[#allocation13 + $0xc] ss:$16 sps:$4 sm:$0xff]   ;;  %v9046_v52 = vld [vmem:[#allocation13] ss:$16 sps:$4 sm:$0xff]   ;;  %v9049_v18 = vld [vmem:[#allocation13 + $0x8] ss:$16 sps:$4 sm:$0xff]  }
0x1000   :  { %6023 = vmatprep.subr.bf16.mxu1 %v9051_v45  ;;  %v6127_v45 = vld [vmem:[#allocation15 + $0x80] sm:$0xff] }
0x1001   :  { %5657 = vrot.lane.b32.xlu0 %v5511_v30, %s16346_s12  ;;  %8814 = vmatprep.mubr.msk.f32.mxu0 %vm5515_vm13, %v5511_v30  ;;  %v14395_v30 = vcombine.high %v6167_v44, %v6171_v10  ;;  %v6135_v44 = vld [vmem:[#allocation15 + $0xc0] sm:$0xff] }
0x1002   :  { %v5494_v56 = vpop.permute.xlu1 %5493  ;;  %v5464_v21 = vpop.permute.xlu0 %5463  ;;  %6024 = vmatpush1.bf16.msra.mxu1 %v9049_v18  ;;  %v6139_v10 = vld [vmem:[#allocation15 + $0xe0] sm:$0xff]  ;;  %v6128_v18 = vld [vmem:[#allocation15 + $0x88] sm:$0xff] }
0x1003   :  { %v5512_v14 = vmax.f32 %v5480_v22, %v5494_v56  ;;  %v5481_v39 = vmax.f32 %v5441_v40, %v5464_v21  ;;  %v9028_v40 = vld [vmem:[#allocation13 + $0x60] ss:$16 sps:$4 sm:$0xff]   ;;  %v14397_v22 = vcombine.high %v6168_v11, %v6172_v26  ;;  %v6140_v11 = vld [vmem:[#allocation15 + $0xe8] sm:$0xff]  ;;  %v14457_v63 = vcombine.high %v6135_v44, %v6139_v10 }
0x1005   :  { %5659 = vrot.lane.b32.xlu1 %v5512_v14, %s16346_s12  ;;  %8815 = vmatmul.mubr.msk.f32.gmra.mxu0 %vm5515_vm13, %v5512_v14 }
0x1006   :  { %v5466_v35 = vpop.permute.xlu1 %5465  ;;  %v5496_v43 = vpop.permute.xlu0 %5495  ;;  %6376 = vmatprep.subr.bf16.mxu1 %v14397_v22 }
0x1007   :  { %v5513_v25 = vmax.f32 %v5481_v39, %v5496_v43  ;;  %v5482_v36 = vmax.f32 %v5442_v0, %v5466_v35  ;;  %v9036_v0 = vld [vmem:[#allocation13 + $0x44] ss:$16 sps:$4 sm:$0xff]  }
0x1009   :  { %5661 = vrot.lane.b32.xlu0 %v5513_v25, %s16346_s12  ;;  %8817 = vmatprep.mubr.msk.f32.mxu0 %vm5515_vm13, %v5513_v25 }
0x100a   :  { %v5498_v7 = vpop.permute.xlu1 %5497 }
0x100b   :  { %v5514_v62 = vmax.f32 %v5482_v36, %v5498_v7 }
0x100d   :  { %5663 = vrot.lane.b32.xlu1 %v5514_v62, %s16346_s12  ;;  %8818 = vmatmul.mubr.msk.f32.gmra.mxu0 %vm5515_vm13, %v5514_v62  ;;  %s9470_s12 = smov 3  }
0x1063   :  { %v5650_v6 = vpop.permute.xlu0 %5649 }
0x1064   :  { %8822 = vmatprep.mubr.msk.f32.mxu0 %vm5515_vm13, %v5650_v6 }
0x1067   :  { %v5652_v19 = vpop.permute.xlu1 %5651 }
0x1068   :  { %8823 = vmatmul.mubr.msk.f32.vlgmr.msra.gmra.mxu0 %vm5515_vm13, %v5652_v19 }
0x1069   :  { %5977 = vmatpush1.bf16.msra.mxu0 %v9028_v40  ;;  %v6152_v40 = vld [vmem:[#allocation15 + $0x148] sm:$0xff] }
0x106a   :  { %5978 = vmatprep.subr.bf16.mxu0 %v9036_v0  ;;  %v14433_v15 = vcombine.high %v6152_v40, %v6156_v32  ;;  %v6143_v0 = vld [vmem:[#allocation15 + $0x100] sm:$0xff] }
0x106b   :  { %v5654_v17 = vpop.permute.xlu0 %5653  ;;  %v14451_v26 = vcombine.low %v6143_v0, %v6147_v28 }
0x106c   :  { %8825 = vmatprep.mubr.msk.f32.mxu0 %vm5515_vm13, %v5654_v17 }
0x106d   :  { %5979 = vmatpush1.bf16.msra.mxu0 %v9034_v33  ;;  %v6148_v33 = vld [vmem:[#allocation15 + $0x128] sm:$0xff] }
0x106e   :  { %5980 = vmatprep.subr.bf16.mxu0 %v9042_v46  ;;  %v14441_v46 = vcombine.low %v6152_v40, %v6156_v32 }
0x106f   :  { %v5656_v41 = vpop.permute.xlu1 %5655 }
0x1070   :  { %8826 = vmatmul.mubr.msk.f32.gmra.mxu0 %vm5515_vm13, %v5656_v41 }
0x1071   :  { %5981 = vmatpush1.bf16.msra.mxu0 %v9040_v2 }
0x1072   :  { %5982 = vmatprep.subr.bf16.mxu0 %v9048_v57 }
0x1073   :  { %v5658_v12 = vpop.permute.xlu0 %5657 }
0x1074   :  { %8828 = vmatprep.mubr.msk.f32.mxu0 %vm5515_vm13, %v5658_v12 }
0x1075   :  { %5983 = vmatpush1.bf16.msra.mxu0 %v9046_v52  ;;  %v6131_v52 = vld [vmem:[#allocation15 + $0xa0] sm:$0xff] }
0x1076   :  { %6335 = vmatprep.subr.bf16.mxu0 %v14395_v30 }
0x1077   :  { %v5660_v24 = vpop.permute.xlu1 %5659 }
0x1078   :  { %8829 = vmatmul.mubr.msk.f32.gmra.mxu0 %vm5515_vm13, %v5660_v24 }
0x107b   :  { %v5662_v42 = vpop.permute.xlu0 %5661 }
0x107c   :  { %8831 = vmatprep.mubr.msk.f32.mxu0 %vm5515_vm13, %v5662_v42 }
0x107f   :  { %v5664_v16 = vpop.permute.xlu1 %5663 }
0x1080   :  { %8832 = vmatmul.mubr.msk.f32.gmra.mxu0 %vm5515_vm13, %v5664_v16 }
0x1081   :  { %6000 = vmatprep.mubr.bf16.mxu0 %v16377_v61 }
0x10b5   :  { %v14371_v51 = vpop.f32.mrf.mxu0 }
0x10b7   :  { %v14373_v48 = vpop.f32.mrf.mxu0 }
0x10bd   :  { %v14375_v37 = vpop.f32.mrf.mxu0 }
0x10bf   :  { %v14377_v38 = vpop.f32.mrf.mxu0 }
0x10c5   :  { %v14379_v58 = vpop.f32.mrf.mxu0 }
0x10c7   :  { %v14381_v49 = vpop.f32.mrf.mxu0 }
0x10cd   :  { %v14383_v8 = vpop.f32.mrf.mxu0 }
0x10cf   :  { %v14385_v23 = vpop.f32.mrf.mxu0 }
0x1128   :  { %v8824_v59 = vpop.f32.mrf.mxu0 }
0x112a   :  { %v5747_v29 = vpop.f32.mrf.mxu0 }
0x112b   :  { %v9008_v20 = vpack.i.bf16 %v8824_v59, %v5747_v29 }
0x112d   :  { %9009 = vrot.lane.b32.xlu0 %v9008_v20, %s9470_s12  ;;  %v6159_v20 = vld [vmem:[#allocation15 + $0x180] sm:$0xff] }
0x1130   :  { %v8827_v34 = vpop.f32.mrf.mxu0 }
0x1132   :  { %v5757_v47 = vpop.f32.mrf.mxu0 }
0x1133   :  { %v9013_v53 = vpack.i.bf16 %v8827_v34, %v5757_v47  ;;  %v6163_v34 = vld [vmem:[#allocation15 + $0x1a0] sm:$0xff]  ;;  %v6160_v47 = vld [vmem:[#allocation15 + $0x188] sm:$0xff] }
0x1135   :  { %9014 = vrot.lane.b32.xlu1 %v9013_v53, %s9470_s12  ;;  %v14417_v53 = vcombine.high %v6159_v20, %v6163_v34 }
0x1138   :  { %v8830_v31 = vpop.f32.mrf.mxu0 }
0x113a   :  { %v5767_v54 = vpop.f32.mrf.mxu0 }
0x113b   :  { %v9018_v1 = vpack.i.bf16 %v8830_v31, %v5767_v54  ;;  %v6151_v31 = vld [vmem:[#allocation15 + $0x140] sm:$0xff] }
0x113d   :  { %9019 = vrot.lane.b32.xlu0 %v9018_v1, %s9470_s12  ;;  %v6155_v1 = vld [vmem:[#allocation15 + $0x160] sm:$0xff] }
0x113e   :  { %v14431_v50 = vcombine.high %v6151_v31, %v6155_v1  ;;  %v14439_v4 = vcombine.low %v6151_v31, %v6155_v1  ;;  %v6174_v1 = vld [vmem:[#allocation15 + $0x1f8] sm:$0xff] }
0x1140   :  { %v8833_v27 = vpop.f32.mrf.mxu0 }
0x1142   :  { %v5777_v5 = vpop.f32.mrf.mxu0 }
0x1143   :  { %v9023_v60 = vpack.i.bf16 %v8833_v27, %v5777_v5  ;;  %v6144_v27 = vld [vmem:[#allocation15 + $0x108] sm:$0xff]  ;;  %v14445_v5 = vcombine.high %v6143_v0, %v6147_v28 }
0x1144   :  { %v14447_v9 = vcombine.high %v6144_v27, %v6148_v33  ;;  %v14453_v2 = vcombine.low %v6144_v27, %v6148_v33 }
0x1145   :  { %9024 = vrot.lane.b32.xlu1 %v9023_v60, %s9470_s12  ;;  %v6136_v60 = vld [vmem:[#allocation15 + $0xc8] sm:$0xff] }
0x1146   :  { %v14459_v57 = vcombine.high %v6136_v60, %v6140_v11 }
0x119f   :  { %v9010_v56 = vpop.permute.xlu0 %9009 }
0x11a0   :  { %v9012_v21 = vunpack.i.h.bf16 %v9010_v56  ;;  %v9011_v14 = vunpack.i.l.bf16 %v9010_v56  ;;  %v6132_v56 = vld [vmem:[#allocation15 + $0xa8] sm:$0xff] }
0x11a2   :  { %v5820_v39 = vsel %vm5818_vm15, %v14371_v51, %v9012_v21  ;;  %v5819_v35 = vsel %vm5818_vm15, %v14373_v48, %v9011_v14  ;;  %v14463_v21 = vcombine.low %v6135_v44, %v6139_v10  ;;  %v14465_v14 = vcombine.low %v6136_v60, %v6140_v11  ;;  %v16381_v44 = vld [vmem:[#allocation28_spill] sm:$0xff] }
0x11a3   :  { %v5827_v43 = vpack.c.bf16 %v5820_v39, %v5819_v35  ;;  %v14469_v39 = vcombine.high %v6127_v45, %v6131_v52  ;;  %v14471_v35 = vcombine.high %v6128_v18, %v6132_v56  ;;  %v15774_v10 = vsub.s32 0, %v16381_v44 }
0x11a5   :  { %5869 = vxpose.xlu0.c.b16.start [1/4] (short) (narrow) %v5827_v43, 16  ;;  %v6119_v43 = vld [vmem:[#allocation15 + $0x40] sm:$0xff] }
0x11a7   :  { %v9015_v25 = vpop.permute.xlu1 %9014 }
0x11a8   :  { %v9017_v36 = vunpack.i.h.bf16 %v9015_v25  ;;  %v9016_v7 = vunpack.i.l.bf16 %v9015_v25  ;;  %v6123_v25 = vld [vmem:[#allocation15 + $0x60] sm:$0xff] }
0x11aa   :  { %v5822_v62 = vsel %vm5818_vm15, %v14375_v37, %v9017_v36  ;;  %v5821_v6 = vsel %vm5818_vm15, %v14377_v38, %v9016_v7  ;;  %v6120_v36 = vld [vmem:[#allocation15 + $0x48] sm:$0xff] }
0x11ab   :  { %v5828_v19 = vpack.c.bf16 %v5822_v62, %v5821_v6  ;;  %v6124_v7 = vld [vmem:[#allocation15 + $0x68] sm:$0xff]  ;;  %v14475_v62 = vcombine.low %v6127_v45, %v6131_v52  ;;  %v14477_v6 = vcombine.low %v6128_v18, %v6132_v56  ;;  %v5847_v45 = vld [vmem:[%s16382_s24] sm:$0xf]  ;;  %v15772_v52 = vsub.s32 1, %v16381_v44 }
0x11ad   :  { %5870 = vxpose.xlu0.c.b16.cont [2/4] (short) (narrow) %v5828_v19, 16  ;;  %v14481_v19 = vcombine.high %v6119_v43, %v6123_v25 }
0x11af   :  { %v9020_v17 = vpop.permute.xlu0 %9019 }
0x11b0   :  { %v9022_v41 = vunpack.i.h.bf16 %v9020_v17  ;;  %v9021_v12 = vunpack.i.l.bf16 %v9020_v17  ;;  %v14483_v17 = vcombine.high %v6120_v36, %v6124_v7 }
0x11b2   :  { %v5824_v24 = vsel %vm5818_vm15, %v14379_v58, %v9022_v41  ;;  %v5823_v42 = vsel %vm5818_vm15, %v14381_v49, %v9021_v12  ;;  %v6164_v58 = vld [vmem:[#allocation15 + $0x1a8] sm:$0xff]  ;;  %v6111_v41 = vld [vmem:[#allocation15] sm:$0xff] }
0x11b3   :  { %v5829_v16 = vpack.c.bf16 %v5824_v24, %v5823_v42  ;;  %v14419_v49 = vcombine.high %v6160_v47, %v6164_v58  ;;  %v6115_v12 = vld [vmem:[#allocation15 + $0x20] sm:$0xff]  ;;  %v6112_v24 = vld [vmem:[#allocation15 + $0x8] sm:$0xff] }
0x11b4   :  { %v6116_v42 = vld [vmem:[#allocation15 + $0x28] sm:$0xff] }
0x11b5   :  { %5871 = vxpose.xlu0.c.b16.cont [3/4] (short) (narrow) %v5829_v16, 16  ;;  %v14487_v16 = vcombine.low %v6119_v43, %v6123_v25  ;;  %v5852_v43 = vrot.slane %v5847_v45, %v15774_v10  ;;  %v5856_v25 = vrot.slane %v5847_v45, %v15772_v52  ;;  %v6137_v10 = vld [vmem:[#allocation15 + $0xd0] sm:$0xff] }
0x11b7   :  { %v9025_v51 = vpop.permute.xlu1 %9024 }
0x11b8   :  { %v9027_v48 = vunpack.i.h.bf16 %v9025_v51  ;;  %v9026_v59 = vunpack.i.l.bf16 %v9025_v51  ;;  %v14489_v51 = vcombine.low %v6120_v36, %v6124_v7 }
0x11ba   :  { %v5826_v37 = vsel %vm5818_vm15, %v14383_v8, %v9027_v48  ;;  %v5825_v38 = vsel %vm5818_vm15, %v14385_v23, %v9026_v59  ;;  %v14425_v8 = vcombine.low %v6159_v20, %v6163_v34  ;;  %v14427_v23 = vcombine.low %v6160_v47, %v6164_v58  ;;  %v6169_v34 = vld [vmem:[#allocation15 + $0x1d0] sm:$0xff]  ;;  %v6170_v58 = vld [vmem:[#allocation15 + $0x1d8] sm:$0xff] }
0x11bb   :  { %v5830_v29 = vpack.c.bf16 %v5826_v37, %v5825_v38  ;;  %v14493_v48 = vcombine.high %v6111_v41, %v6115_v12  ;;  %v14495_v59 = vcombine.high %v6112_v24, %v6116_v42  ;;  %v14499_v37 = vcombine.low %v6111_v41, %v6115_v12  ;;  %v6173_v47 = vld [vmem:[#allocation15 + $0x1f0] sm:$0xff] }
0x11bc   :  { %v14501_v38 = vcombine.low %v6112_v24, %v6116_v42  ;;  %v14544_v31 = vcombine.low %v6169_v34, %v6173_v47  ;;  %v14548_v40 = vcombine.low %v6170_v58, %v6174_v1  ;;  %v14550_v32 = vcombine.high %v6170_v58, %v6174_v1 }
0x11bd   :  { %5872 = vxpose.xlu0.c.b16.end [4/4] (short) (narrow) %v5830_v29, 16  ;;  %v6108_v29 = vld [vmem:[%s16380_s16] sm:$0x3]  ;;  %v15771_v41 = vsub.s32 3, %v16381_v44 }
0x11be   :  { %v6110_v20 = vpack.c.bf16 %v6108_v29, %v6108_v29 }
0x11bf   :  { %v5864_v42 = vrot.slane %v5847_v45, %v15771_v41 }
0x1213   :  { %v5877_v54 = vpop.trf.xlu0 }
0x1214   :  { %8492 = vmatmul.mubr.msk.bf16.vlgmr.msra.gmra.mxu0 %vm16378_vm1, %v5877_v54  ;;  %8493 = vmatmul.mubr.msk.bf16.vlgmr.msra.gmra.mxu1 %vm16379_vm3, %v5877_v54  ;;  %v14546_v54 = vcombine.high %v6169_v34, %v6173_v47  ;;  %v15773_v34 = vsub.s32 2, %v16381_v44  ;;  %v6138_v44 = vld [vmem:[#allocation15 + $0xd8] sm:$0xff] }
0x1215   :  { %6336 = vmatpush1.bf16.msra.mxu0 %v14390_v3  ;;  %6377 = vmatpush1.bf16.msra.mxu1 %v14392_v13 }
0x1216   :  { %6337 = vmatprep.subr.bf16.mxu0 %v14417_v53  ;;  %6378 = vmatprep.subr.bf16.mxu1 %v14419_v49 }
0x1217   :  { %6367 = vmatprep.mubr.bf16.mxu0 %v16377_v61  ;;  %6408 = vmatprep.mubr.bf16.mxu1 %v16377_v61 }
0x1219   :  { %6338 = vmatpush1.bf16.msra.mxu0 %v14425_v8  ;;  %6379 = vmatpush1.bf16.msra.mxu1 %v14427_v23 }
0x121a   :  { %6339 = vmatprep.subr.bf16.mxu0 %v14431_v50  ;;  %6380 = vmatprep.subr.bf16.mxu1 %v14433_v15 }
0x121d   :  { %6340 = vmatpush1.bf16.msra.mxu0 %v14439_v4  ;;  %6381 = vmatpush1.bf16.msra.mxu1 %v14441_v46 }
0x121e   :  { %6341 = vmatprep.subr.bf16.mxu0 %v14445_v5  ;;  %6382 = vmatprep.subr.bf16.mxu1 %v14447_v9 }
0x1221   :  { %6342 = vmatpush1.bf16.msra.mxu0 %v14451_v26  ;;  %6383 = vmatpush1.bf16.msra.mxu1 %v14453_v2 }
0x1222   :  { %6343 = vmatprep.subr.bf16.mxu0 %v14457_v63  ;;  %6384 = vmatprep.subr.bf16.mxu1 %v14459_v57 }
0x1225   :  { %6344 = vmatpush1.bf16.msra.mxu0 %v14463_v21  ;;  %6385 = vmatpush1.bf16.msra.mxu1 %v14465_v14 }
0x1226   :  { %6345 = vmatprep.subr.bf16.mxu0 %v14469_v39  ;;  %6386 = vmatprep.subr.bf16.mxu1 %v14471_v35 }
0x1229   :  { %6346 = vmatpush1.bf16.msra.mxu0 %v14475_v62  ;;  %6387 = vmatpush1.bf16.msra.mxu1 %v14477_v6 }
0x122a   :  { %6347 = vmatprep.subr.bf16.mxu0 %v14481_v19  ;;  %6388 = vmatprep.subr.bf16.mxu1 %v14483_v17 }
0x122d   :  { %6348 = vmatpush1.bf16.msra.mxu0 %v14487_v16  ;;  %6389 = vmatpush1.bf16.msra.mxu1 %v14489_v51 }
0x122e   :  { %6349 = vmatprep.subr.bf16.mxu0 %v14493_v48  ;;  %6390 = vmatprep.subr.bf16.mxu1 %v14495_v59 }
0x1231   :  { %6350 = vmatpush1.bf16.msra.mxu0 %v14499_v37  ;;  %6391 = vmatpush1.bf16.msra.mxu1 %v14501_v38 }
0x1232   :  { %6606 = vmatprep.subr.bf16.mxu0 %v14395_v30  ;;  %6647 = vmatprep.subr.bf16.mxu1 %v14397_v22 }
0x1234   :  { %6368 = vmatmul.mubr.bf16.vlgmr.msra.gmra.mxu0 %v6110_v20  ;;  %6409 = vmatmul.mubr.bf16.vlgmr.msra.gmra.mxu1 %v6110_v20 }
0x1235   :  { %6607 = vmatpush1.bf16.msra.mxu0 %v14390_v3  ;;  %6648 = vmatpush1.bf16.msra.mxu1 %v14392_v13 }
0x1236   :  { %6608 = vmatprep.subr.bf16.mxu0 %v14417_v53  ;;  %6649 = vmatprep.subr.bf16.mxu1 %v14419_v49 }
0x1237   :  { %6638 = vmatprep.mubr.bf16.mxu0 %v16377_v61  ;;  %6679 = vmatprep.mubr.bf16.mxu1 %v16377_v61 }
0x1239   :  { %6609 = vmatpush1.bf16.msra.mxu0 %v14425_v8  ;;  %6650 = vmatpush1.bf16.msra.mxu1 %v14427_v23 }
0x123a   :  { %6610 = vmatprep.subr.bf16.mxu0 %v14431_v50  ;;  %6651 = vmatprep.subr.bf16.mxu1 %v14433_v15 }
0x123d   :  { %6611 = vmatpush1.bf16.msra.mxu0 %v14439_v4  ;;  %6652 = vmatpush1.bf16.msra.mxu1 %v14441_v46 }
0x123e   :  { %6612 = vmatprep.subr.bf16.mxu0 %v14445_v5  ;;  %6653 = vmatprep.subr.bf16.mxu1 %v14447_v9 }
0x1241   :  { %6613 = vmatpush1.bf16.msra.mxu0 %v14451_v26  ;;  %6654 = vmatpush1.bf16.msra.mxu1 %v14453_v2 }
0x1242   :  { %6614 = vmatprep.subr.bf16.mxu0 %v14457_v63  ;;  %6655 = vmatprep.subr.bf16.mxu1 %v14459_v57 }
0x1245   :  { %6615 = vmatpush1.bf16.msra.mxu0 %v14463_v21  ;;  %6656 = vmatpush1.bf16.msra.mxu1 %v14465_v14 }
0x1246   :  { %6616 = vmatprep.subr.bf16.mxu0 %v14469_v39  ;;  %6657 = vmatprep.subr.bf16.mxu1 %v14471_v35 }
0x1249   :  { %6617 = vmatpush1.bf16.msra.mxu0 %v14475_v62  ;;  %6658 = vmatpush1.bf16.msra.mxu1 %v14477_v6 }
0x124a   :  { %6618 = vmatprep.subr.bf16.mxu0 %v14481_v19  ;;  %6659 = vmatprep.subr.bf16.mxu1 %v14483_v17 }
0x124d   :  { %6619 = vmatpush1.bf16.msra.mxu0 %v14487_v16  ;;  %6660 = vmatpush1.bf16.msra.mxu1 %v14489_v51 }
0x124e   :  { %6620 = vmatprep.subr.bf16.mxu0 %v14493_v48  ;;  %6661 = vmatprep.subr.bf16.mxu1 %v14495_v59 }
0x1251   :  { %6621 = vmatpush1.bf16.msra.mxu0 %v14499_v37  ;;  %6662 = vmatpush1.bf16.msra.mxu1 %v14501_v38 }
0x1252   :  { %6688 = vmatprep.subr.bf16.mxu0 %v14546_v54  ;;  %6729 = vmatprep.subr.bf16.mxu1 %v14550_v32 }
0x12d4   :  { %v6002_v0 = vpop.f32.mrf.mxu0  ;;  %v6043_v28 = vpop.f32.mrf.mxu1 }
0x12d5   :  { %v6003_v36 = vadd.f32 %v6002_v0, %v5852_v43 }
0x12d6   :  { %v6004_v27 = vpop.f32.mrf.mxu0  ;;  %v6045_v33 = vpop.f32.mrf.mxu1 }
0x12d7   :  { %v6005_v7 = vadd.f32 %v6004_v27, %v5856_v25  ;;  %v6054_v12 = vrot.slane %v6003_v36, 2  ;;  %v6062_v29 = vrot.slane %v6003_v36, 7  ;;  %v6046_v1 = vadd.f32 %v6045_v33, %v5864_v42 }
0x12d8   :  { %v6006_v60 = vpop.f32.mrf.mxu0  ;;  %v6047_v11 = vpop.f32.mrf.mxu1  ;;  %v6070_v27 = vrot.slane %v6003_v36, 1  ;;  %v6078_v43 = vrot.slane %v6003_v36, 6 }
0x12d9   :  { %v6055_v24 = vrot.slane %v6005_v7, 2  ;;  %v6087_v20 = vsel %vm6086_vm11, %v6003_v36, %v6054_v12  ;;  %v6063_v47 = vrot.slane %v6005_v7, 7  ;;  %v5860_v60 = vrot.slane %v5847_v45, %v15773_v34 }
0x12da   :  { %v6007_v18 = vpop.f32.mrf.mxu0  ;;  %v6048_v56 = vpop.f32.mrf.mxu1  ;;  %v6092_v0 = vsel %vm6091_vm0, %v6087_v20, %v6062_v29  ;;  %v6057_v25 = vrot.slane %v6046_v1, 2  ;;  %v6065_v33 = vrot.slane %v6046_v1, 7  ;;  %v6081_v34 = vrot.slane %v6046_v1, 6 }
0x12db   :  { %v6088_v58 = vsel %vm6086_vm11, %v6005_v7, %v6055_v24  ;;  %v6096_v18 = vsel %vm16383_vm14, %v6092_v0, %v6070_v27  ;;  %v6071_v56 = vrot.slane %v6005_v7, 1  ;;  %v6044_v41 = vadd.f32 %v6043_v28, %v5860_v60 }
0x12dc   :  { %v6093_v11 = vsel %vm6091_vm0, %v6088_v58, %v6063_v47  ;;  %v6100_v52 = vsel %vm4721_vm4, %v6096_v18, %v6078_v43  ;;  %v6079_v24 = vrot.slane %v6005_v7, 6  ;;  %v6090_v29 = vsel %vm6086_vm11, %v6046_v1, %v6057_v25 }
0x12dd   :  { %v6097_v12 = vsel %vm16384_vm10, %v6093_v11, %v6071_v56  ;;  %v14579_v45 = vsel %vm16385_vm12, %v6100_v52, %v6003_v36  ;;  %v6056_v0 = vrot.slane %v6044_v41, 2  ;;  %v6095_v60 = vsel %vm6091_vm0, %v6090_v29, %v6065_v33 }
0x12de   :  { %v6101_v42 = vsel %vm4721_vm4, %v6097_v12, %v6079_v24  ;;  %v6073_v43 = vrot.slane %v6046_v1, 1  ;;  %v6064_v25 = vrot.slane %v6044_v41, 7 }
0x12df   :  { %v14583_v27 = vsel %vm16386_vm9, %v6101_v42, %v6005_v7  ;;  %v6089_v36 = vsel %vm6086_vm11, %v6044_v41, %v6056_v0 }
0x12e0   :  { %v6094_v33 = vsel %vm6091_vm0, %v6089_v36, %v6064_v25 }
0x12f4   :  { %v6369_v20 = vpop.f32.mrf.mxu0  ;;  %v6410_v47 = vpop.f32.mrf.mxu1 }
0x12f5   :  { %v6417_v58 = vadd.f32 %v6369_v20, %v14579_v45  ;;  %v6099_v20 = vsel %vm16387_vm2, %v6095_v60, %v6073_v43 }
0x12f6   :  { %v6371_v28 = vpop.f32.mrf.mxu0  ;;  %v6412_v11 = vpop.f32.mrf.mxu1  ;;  %v6103_v29 = vsel %vm4721_vm4, %v6099_v20, %v6081_v34 }
0x12f7   :  { %v8526_v18 = vmul.f32 -1.442695, %v6417_v58  ;;  %v6418_v56 = vadd.f32 %v6371_v28, %v14583_v27  ;;  %v6072_v58 = vrot.slane %v6044_v41, 1 }
0x12f8   :  { %v6373_v12 = vpop.f32.mrf.mxu0  ;;  %v6414_v52 = vpop.f32.mrf.mxu1 }
0x12f9   :  { %9100 = vpow2.f32 %v8526_v18  ;;  %v8527_v24 = vmul.f32 -1.442695, %v6418_v56  ;;  %v6098_v28 = vsel %vm16388_vm5, %v6094_v33, %v6072_v58  ;;  %v14593_v12 = vsel %vm16389_vm6, %v6103_v29, %v6046_v1 }
0x12fa   :  { %v6374_v7 = vpop.f32.mrf.mxu0  ;;  %v6415_v42 = vpop.f32.mrf.mxu1  ;;  %v6080_v18 = vrot.slane %v6044_v41, 6  ;;  %v6420_v0 = vadd.f32 %v6412_v11, %v14593_v12  ;;  %v6109_v11 = vld [vmem:[%s16391_s25] sm:$0x3] }
0x12fb   :  { %9102 = vpow2.f32 %v8527_v24 }
0x12fc   :  { %v6102_v56 = vsel %vm4721_vm4, %v6098_v28, %v6080_v18  ;;  %v8528_v60 = vmul.f32 -1.442695, %v6420_v0  ;;  %v6161_v28 = vld [vmem:[#allocation15 + $0x190] sm:$0xff]  ;;  %vm9471_vm4 = vmmov 0  }
0x12fd   :  { %v14598_v43 = vsel %vm16390_vm7, %v6102_v56, %v6044_v41  ;;  %v6165_v0 = vld [vmem:[#allocation15 + $0x1b0] sm:$0xff]  ;;  %v6162_v56 = vld [vmem:[#allocation15 + $0x198] sm:$0xff] }
0x12fe   :  { %v6419_v25 = vadd.f32 %v6410_v47, %v14598_v43  ;;  %9104 = vpow2.f32 %v8528_v60  ;;  %v6166_v60 = vld [vmem:[#allocation15 + $0x1b8] sm:$0xff] }
0x1306   :  { %v9101_v52 = vpop.eup %9100 }
0x1307   :  { %v6424_v36 = vadd.f32 1.0, %v9101_v52 }
0x1308   :  { %v9103_v34 = vpop.eup %9102 }
0x1309   :  { %9106 = vrcp.f32 %v6424_v36  ;;  %v6430_v24 = vadd.f32 1.0, %v9103_v34  ;;  %v14609_v36 = vcombine.high %v6161_v28, %v6165_v0  ;;  %v14611_v34 = vcombine.high %v6162_v56, %v6166_v60 }
0x130a   :  { %9108 = vtanh.f32 %v6419_v25 }
0x130b   :  { %9110 = vrcp.f32 %v6430_v24  ;;  %v9105_v1 = vpop.eup %9104  ;;  %16392 = vst [vmem:[#allocation61_spill] sm:$0xff] %v14611_v34  ;;  %v6153_v24 = vld [vmem:[#allocation15 + $0x150] sm:$0xff] }
0x130c   :  { %v6437_v41 = vadd.f32 1.0, %v9105_v1  ;;  %v6157_v1 = vld [vmem:[#allocation15 + $0x170] sm:$0xff] }
0x130e   :  { %9112 = vrcp.f32 %v6437_v41  ;;  %v14623_v41 = vcombine.high %v6153_v24, %v6157_v1 }
0x1310   :  { %16395 = vst [vmem:[#allocation63_spill] sm:$0xff] %v14623_v41 }
0x1316   :  { %v9107_v20 = vpop.eup %9106 }
0x1317   :  { %v9109_v7 = vpop.eup %9108 }
0x1318   :  { %v9111_v42 = vpop.eup %9110  ;;  %v6441_v33 = vmul.f32 %v9109_v7, %v9107_v20  ;;  %v6154_v20 = vld [vmem:[#allocation15 + $0x158] sm:$0xff]  ;;  %v14617_v7 = vcombine.low %v6161_v28, %v6165_v0  ;;  %v14631_v28 = vcombine.low %v6153_v24, %v6157_v1 }
0x1319   :  { %v6440_v29 = vmul.f32 %v9111_v42, %v6109_v11  ;;  %v6158_v11 = vld [vmem:[#allocation15 + $0x178] sm:$0xff]  ;;  %v14619_v42 = vcombine.low %v6162_v56, %v6166_v60 }
0x131a   :  { %16393 = vst [vmem:[#allocation62_spill] sm:$0xff] %v14617_v7  ;;  %16397 = vst [vmem:[#allocation80_spill] sm:$0xff] %v14631_v28  ;;  %v14633_v0 = vcombine.low %v6154_v20, %v6158_v11 }
0x131b   :  { %v14604_v58 = vadd.f32 %v6441_v33, %v6440_v29  ;;  %v9113_v47 = vpop.eup %9112  ;;  %16394 = vst [vmem:[#allocation42_spill] sm:$0xff] %v14619_v42  ;;  %v14625_v33 = vcombine.high %v6154_v20, %v6158_v11  ;;  %v6145_v29 = vld [vmem:[#allocation15 + $0x110] sm:$0xff]  ;;  %v14649_v20 = vcombine.high %v6137_v10, %v6141_v55 }
0x131c   :  { %16398 = vst [vmem:[#allocation81_spill] sm:$0xff] %v14633_v0 }
0x131d   :  { %9114 = vtanh.f32 %v14604_v58  ;;  %16396 = vst [vmem:[#allocation44_spill] sm:$0xff] %v14625_v33  ;;  %16403 = vst [vmem:[#allocation47_spill] sm:$0xff] %v14649_v20 }
0x132a   :  { %v9115_v18 = vpop.eup %9114 }
0x132b   :  { %v6444_v52 = vmul.f32 %v9115_v18, %v9113_v47  ;;  %v6149_v47 = vld [vmem:[#allocation15 + $0x130] sm:$0xff]  ;;  %v6146_v18 = vld [vmem:[#allocation15 + $0x118] sm:$0xff] }
0x132c   :  { %v14637_v56 = vcombine.high %v6145_v29, %v6149_v47  ;;  %v14643_v24 = vcombine.low %v6145_v29, %v6149_v47  ;;  %v14655_v29 = vcombine.low %v6137_v10, %v6141_v55 }
0x132d   :  { %v14607_v25 = vpack.c.bf16 %v6444_v52, %v6444_v52  ;;  %v6150_v52 = vld [vmem:[#allocation15 + $0x138] sm:$0xff] }
0x132e   :  { %16399 = vst [vmem:[#allocation64_spill] sm:$0xff] %v14637_v56  ;;  %v14639_v60 = vcombine.high %v6146_v18, %v6150_v52  ;;  %16401 = vst [vmem:[#allocation82_spill] sm:$0xff] %v14643_v24  ;;  %v14645_v1 = vcombine.low %v6146_v18, %v6150_v52 }
0x132f   :  { %6639 = vmatmul.mubr.bf16.vlgmr.msra.gmra.mxu0 %v14607_v25  ;;  %6680 = vmatmul.mubr.bf16.vlgmr.msra.gmra.mxu1 %v14607_v25 }
0x1330   :  { %6689 = vmatpush1.bf16.msra.mxu0 %v14544_v31  ;;  %6730 = vmatpush1.bf16.msra.mxu1 %v14548_v40  ;;  %16400 = vst [vmem:[#allocation46_spill] sm:$0xff] %v14639_v60  ;;  %16402 = vst [vmem:[#allocation65_spill] sm:$0xff] %v14645_v1 }
0x1331   :  { %6690 = vmatprep.subr.bf16.mxu0 %v14609_v36  ;;  %6731 = vmatprep.subr.bf16.mxu1 %v14611_v34  ;;  %v6142_v34 = vld [vmem:[#allocation15 + $0xf8] sm:$0xff] }
0x1332   :  { %6720 = vmatprep.mubr.bf16.mxu0 %v16377_v61  ;;  %6761 = vmatprep.mubr.bf16.mxu1 %v16377_v61  ;;  %v14651_v11 = vcombine.high %v6138_v44, %v6142_v34  ;;  %v14657_v47 = vcombine.low %v6138_v44, %v6142_v34 }
0x1334   :  { %6691 = vmatpush1.bf16.msra.mxu0 %v14617_v7  ;;  %6732 = vmatpush1.bf16.msra.mxu1 %v14619_v42  ;;  %16404 = vst [vmem:[#allocation66_spill] sm:$0xff] %v14651_v11  ;;  %v6130_v42 = vld [vmem:[#allocation15 + $0x98] sm:$0xff] }
0x1335   :  { %6692 = vmatprep.subr.bf16.mxu0 %v14623_v41  ;;  %6733 = vmatprep.subr.bf16.mxu1 %v14625_v33  ;;  %v6129_v33 = vld [vmem:[#allocation15 + $0x90] sm:$0xff]  ;;  %v6134_v7 = vld [vmem:[#allocation15 + $0xb8] sm:$0xff] }
0x1336   :  { %v6133_v41 = vld [vmem:[#allocation15 + $0xb0] sm:$0xff]  ;;  %v14663_v52 = vcombine.high %v6130_v42, %v6134_v7  ;;  %v14669_v44 = vcombine.low %v6130_v42, %v6134_v7 }
0x1337   :  { %v14661_v18 = vcombine.high %v6129_v33, %v6133_v41  ;;  %v14667_v55 = vcombine.low %v6129_v33, %v6133_v41 }
0x1338   :  { %6693 = vmatpush1.bf16.msra.mxu0 %v14631_v28  ;;  %6734 = vmatpush1.bf16.msra.mxu1 %v14633_v0  ;;  %16405 = vst [vmem:[#allocation48_spill] sm:$0xff] %v14663_v52  ;;  %v6122_v0 = vld [vmem:[#allocation15 + $0x58] sm:$0xff] }
0x1339   :  { %6694 = vmatprep.subr.bf16.mxu0 %v14637_v56  ;;  %6735 = vmatprep.subr.bf16.mxu1 %v14639_v60  ;;  %v6121_v60 = vld [vmem:[#allocation15 + $0x50] sm:$0xff]  ;;  %v6126_v28 = vld [vmem:[#allocation15 + $0x78] sm:$0xff]  ;;  %16406 = vst [vmem:[#allocation67_spill] sm:$0xff] %v14667_v55 }
0x133a   :  { %v6125_v56 = vld [vmem:[#allocation15 + $0x70] sm:$0xff]  ;;  %v14675_v34 = vcombine.high %v6122_v0, %v6126_v28  ;;  %v14681_v7 = vcombine.low %v6122_v0, %v6126_v28 }
0x133b   :  { %v14673_v10 = vcombine.high %v6121_v60, %v6125_v56  ;;  %v14679_v41 = vcombine.low %v6121_v60, %v6125_v56 }
0x133c   :  { %6695 = vmatpush1.bf16.msra.mxu0 %v14643_v24  ;;  %6736 = vmatpush1.bf16.msra.mxu1 %v14645_v1  ;;  %v6114_v1 = vld [vmem:[#allocation15 + $0x18] sm:$0xff] }
0x133d   :  { %6696 = vmatprep.subr.bf16.mxu0 %v14649_v20  ;;  %6737 = vmatprep.subr.bf16.mxu1 %v14651_v11  ;;  %v6113_v11 = vld [vmem:[#allocation15 + $0x10] sm:$0xff]  ;;  %v6118_v24 = vld [vmem:[#allocation15 + $0x38] sm:$0xff] }
0x133e   :  { %v6117_v20 = vld [vmem:[#allocation15 + $0x30] sm:$0xff]  ;;  %v14687_v33 = vcombine.high %v6114_v1, %v6118_v24 }
0x133f   :  { %v14685_v42 = vcombine.high %v6113_v11, %v6117_v20 }
0x1340   :  { %6697 = vmatpush1.bf16.msra.mxu0 %v14655_v29  ;;  %6738 = vmatpush1.bf16.msra.mxu1 %v14657_v47 }
0x1341   :  { %6698 = vmatprep.subr.bf16.mxu0 %v14661_v18  ;;  %6739 = vmatprep.subr.bf16.mxu1 %v14663_v52  ;;  %v14691_v52 = vcombine.low %v6113_v11, %v6117_v20 }
0x1344   :  { %6699 = vmatpush1.bf16.msra.mxu0 %v14667_v55  ;;  %6740 = vmatpush1.bf16.msra.mxu1 %v14669_v44  ;;  %v14693_v55 = vcombine.low %v6114_v1, %v6118_v24 }
0x1345   :  { %6700 = vmatprep.subr.bf16.mxu0 %v14673_v10  ;;  %6741 = vmatprep.subr.bf16.mxu1 %v14675_v34 }
0x1348   :  { %6701 = vmatpush1.bf16.msra.mxu0 %v14679_v41  ;;  %6742 = vmatpush1.bf16.msra.mxu1 %v14681_v7 }
0x1349   :  { %6702 = vmatprep.subr.bf16.mxu0 %v14685_v42  ;;  %6743 = vmatprep.subr.bf16.mxu1 %v14687_v33 }
0x134c   :  { %6703 = vmatpush1.bf16.msra.mxu0 %v14691_v52  ;;  %6744 = vmatpush1.bf16.msra.mxu1 %v14693_v55 }
0x134d   :  { %6843 = vmatprep.subr.bf16.mxu0 %v14395_v30  ;;  %6884 = vmatprep.subr.bf16.mxu1 %v14397_v22 }
0x134f   :  { %6721 = vmatmul.mubr.bf16.vlgmr.msra.gmra.mxu0 %v14607_v25  ;;  %6762 = vmatmul.mubr.bf16.vlgmr.msra.gmra.mxu1 %v14607_v25  ;;  %v6832_v25 = vrot.slane %v14604_v58, 6  ;;  %v16407_v58 = vld [vmem:[#allocation61_spill] sm:$0xff] }
0x1350   :  { %6844 = vmatpush1.bf16.msra.mxu0 %v14390_v3  ;;  %6885 = vmatpush1.bf16.msra.mxu1 %v14392_v13 }
0x1351   :  { %6845 = vmatprep.subr.bf16.mxu0 %v14417_v53  ;;  %6886 = vmatprep.subr.bf16.mxu1 %v14419_v49 }
0x1352   :  { %6875 = vmatprep.mubr.bf16.mxu0 %v16377_v61  ;;  %6916 = vmatprep.mubr.bf16.mxu1 %v16377_v61 }
0x1354   :  { %6846 = vmatpush1.bf16.msra.mxu0 %v14425_v8  ;;  %6887 = vmatpush1.bf16.msra.mxu1 %v14427_v23 }
0x1355   :  { %6847 = vmatprep.subr.bf16.mxu0 %v14431_v50  ;;  %6888 = vmatprep.subr.bf16.mxu1 %v14433_v15 }
0x1358   :  { %6848 = vmatpush1.bf16.msra.mxu0 %v14439_v4  ;;  %6889 = vmatpush1.bf16.msra.mxu1 %v14441_v46 }
0x1359   :  { %6849 = vmatprep.subr.bf16.mxu0 %v14445_v5  ;;  %6890 = vmatprep.subr.bf16.mxu1 %v14447_v9 }
0x135c   :  { %6850 = vmatpush1.bf16.msra.mxu0 %v14451_v26  ;;  %6891 = vmatpush1.bf16.msra.mxu1 %v14453_v2 }
0x135d   :  { %6851 = vmatprep.subr.bf16.mxu0 %v14457_v63  ;;  %6892 = vmatprep.subr.bf16.mxu1 %v14459_v57 }
0x1360   :  { %6852 = vmatpush1.bf16.msra.mxu0 %v14463_v21  ;;  %6893 = vmatpush1.bf16.msra.mxu1 %v14465_v14 }
0x1361   :  { %6853 = vmatprep.subr.bf16.mxu0 %v14469_v39  ;;  %6894 = vmatprep.subr.bf16.mxu1 %v14471_v35 }
0x1364   :  { %6854 = vmatpush1.bf16.msra.mxu0 %v14475_v62  ;;  %6895 = vmatpush1.bf16.msra.mxu1 %v14477_v6 }
0x1365   :  { %6855 = vmatprep.subr.bf16.mxu0 %v14481_v19  ;;  %6896 = vmatprep.subr.bf16.mxu1 %v14483_v17 }
0x1368   :  { %6856 = vmatpush1.bf16.msra.mxu0 %v14487_v16  ;;  %6897 = vmatpush1.bf16.msra.mxu1 %v14489_v51 }
0x1369   :  { %6857 = vmatprep.subr.bf16.mxu0 %v14493_v48  ;;  %6898 = vmatprep.subr.bf16.mxu1 %v14495_v59 }
0x136c   :  { %6858 = vmatpush1.bf16.msra.mxu0 %v14499_v37  ;;  %6899 = vmatpush1.bf16.msra.mxu1 %v14501_v38 }
0x136d   :  { %6925 = vmatprep.subr.bf16.mxu0 %v14546_v54  ;;  %6966 = vmatprep.subr.bf16.mxu1 %v14550_v32 }
0x13ef   :  { %v6640_v3 = vpop.f32.mrf.mxu0  ;;  %v6681_v13 = vpop.f32.mrf.mxu1 }
0x13f0   :  { %v6800_v30 = vrot.slane %v6640_v3, 6  ;;  %v6802_v63 = vrot.slane %v6681_v13, 6 }
0x13f1   :  { %v6642_v22 = vpop.f32.mrf.mxu0  ;;  %v6683_v53 = vpop.f32.mrf.mxu1 }
0x13f2   :  { %v6808_v49 = vadd.f32 %v6800_v30, %v14579_v45  ;;  %v6801_v8 = vrot.slane %v6642_v22, 6  ;;  %v6803_v26 = vrot.slane %v6683_v53, 6  ;;  %v6810_v14 = vadd.f32 %v6802_v63, %v14598_v43  ;;  %v16408_v53 = vld [vmem:[#allocation62_spill] sm:$0xff]  ;;  %v16420_v63 = vld [vmem:[#allocation48_spill] sm:$0xff] }
0x13f3   :  { %v6644_v23 = vpop.f32.mrf.mxu0  ;;  %v6685_v50 = vpop.f32.mrf.mxu1 }
0x13f4   :  { %v8561_v15 = vmul.f32 -1.442695, %v6808_v49  ;;  %v6809_v4 = vadd.f32 %v6801_v8, %v14583_v27  ;;  %v6811_v2 = vadd.f32 %v6803_v26, %v14593_v12  ;;  %v16409_v49 = vld [vmem:[#allocation42_spill] sm:$0xff]  ;;  %v16410_v8 = vld [vmem:[#allocation63_spill] sm:$0xff]  ;;  %v16411_v23 = vld [vmem:[#allocation44_spill] sm:$0xff] }
0x13f5   :  { %v6645_v46 = vpop.f32.mrf.mxu0  ;;  %v6686_v5 = vpop.f32.mrf.mxu1  ;;  %v16412_v50 = vld [vmem:[#allocation80_spill] sm:$0xff]  ;;  %v16418_v26 = vld [vmem:[#allocation47_spill] sm:$0xff] }
0x13f6   :  { %9116 = vpow2.f32 %v8561_v15  ;;  %v8562_v9 = vmul.f32 -1.442695, %v6809_v4  ;;  %v8563_v57 = vmul.f32 -1.442695, %v6811_v2  ;;  %v16413_v15 = vld [vmem:[#allocation81_spill] sm:$0xff]  ;;  %v16414_v4 = vld [vmem:[#allocation64_spill] sm:$0xff] }
0x13f7   :  { %v16415_v46 = vld [vmem:[#allocation46_spill] sm:$0xff] }
0x13f8   :  { %9118 = vpow2.f32 %v8562_v9  ;;  %v16416_v5 = vld [vmem:[#allocation82_spill] sm:$0xff]  ;;  %v16417_v9 = vld [vmem:[#allocation65_spill] sm:$0xff] }
0x13f9   :  { %9120 = vpow2.f32 %v8563_v57  ;;  %v16419_v2 = vld [vmem:[#allocation66_spill] sm:$0xff]  ;;  %v16421_v57 = vld [vmem:[#allocation67_spill] sm:$0xff] }
0x1403   :  { %v9117_v21 = vpop.eup %9116 }
0x1404   :  { %v6815_v39 = vadd.f32 1.0, %v9117_v21 }
0x1405   :  { %v9119_v35 = vpop.eup %9118 }
0x1406   :  { %9122 = vrcp.f32 %v6815_v39  ;;  %v6821_v62 = vadd.f32 1.0, %v9119_v35  ;;  %v9121_v51 = vpop.eup %9120 }
0x1407   :  { %9124 = vtanh.f32 %v6810_v14  ;;  %v6828_v0 = vadd.f32 1.0, %v9121_v51 }
0x1408   :  { %9126 = vrcp.f32 %v6821_v62 }
0x1409   :  { %9128 = vrcp.f32 %v6828_v0 }
0x140f   :  { %v14741_v6 = vpop.f32.mrf.mxu0  ;;  %v14743_v19 = vpop.f32.mrf.mxu1 }
0x1411   :  { %v14745_v17 = vpop.f32.mrf.mxu0  ;;  %v14747_v16 = vpop.f32.mrf.mxu1 }
0x1413   :  { %v9123_v48 = vpop.eup %9122  ;;  %v6726_v59 = vpop.f32.mrf.mxu0 }
0x1414   :  { %v6767_v37 = vpop.f32.mrf.mxu1  ;;  %v9125_v38 = vpop.eup %9124 }
0x1415   :  { %v9127_v28 = vpop.eup %9126  ;;  %v6727_v56 = vpop.f32.mrf.mxu0  ;;  %v6835_v24 = vmul.f32 %v9125_v38, %v9123_v48 }
0x1416   :  { %v6768_v60 = vpop.f32.mrf.mxu1  ;;  %v6834_v1 = vmul.f32 %v9127_v28, %v6832_v25  ;;  %v9129_v11 = vpop.eup %9128 }
0x1418   :  { %v14750_v20 = vadd.f32 %v6835_v24, %v6834_v1 }
0x141a   :  { %9130 = vtanh.f32 %v14750_v20  ;;  %v7047_v56 = vrot.slane %v14750_v20, 6  ;;  %v14855_v20 = vld [vmem:[%s16422_s29 + $0xe8] ss:$16 sps:$4 sm:$0xff]  }
0x1427   :  { %v9131_v3 = vpop.eup %9130 }
0x1428   :  { %v6838_v13 = vmul.f32 %v9131_v3, %v9129_v11 }
0x142a   :  { %v6839_v30 = vpack.c.bf16 %v6838_v13, %v6838_v13 }
0x142c   :  { %v6841_v22 = vrot.slane %v6839_v30, 1 }
0x142e   :  { %6876 = vmatmul.mubr.bf16.vlgmr.msra.gmra.mxu0 %v6841_v22  ;;  %6917 = vmatmul.mubr.bf16.vlgmr.msra.gmra.mxu1 %v6841_v22 }
0x142f   :  { %6926 = vmatpush1.bf16.msra.mxu0 %v14544_v31  ;;  %6967 = vmatpush1.bf16.msra.mxu1 %v14548_v40 }
0x1430   :  { %6927 = vmatprep.subr.bf16.mxu0 %v14609_v36  ;;  %6968 = vmatprep.subr.bf16.mxu1 %v16407_v58 }
0x1431   :  { %6957 = vmatprep.mubr.bf16.mxu0 %v16377_v61  ;;  %6998 = vmatprep.mubr.bf16.mxu1 %v16377_v61 }
0x1433   :  { %6928 = vmatpush1.bf16.msra.mxu0 %v16408_v53  ;;  %6969 = vmatpush1.bf16.msra.mxu1 %v16409_v49 }
0x1434   :  { %6929 = vmatprep.subr.bf16.mxu0 %v16410_v8  ;;  %6970 = vmatprep.subr.bf16.mxu1 %v16411_v23 }
0x1437   :  { %6930 = vmatpush1.bf16.msra.mxu0 %v16412_v50  ;;  %6971 = vmatpush1.bf16.msra.mxu1 %v16413_v15 }
0x1438   :  { %6931 = vmatprep.subr.bf16.mxu0 %v16414_v4  ;;  %6972 = vmatprep.subr.bf16.mxu1 %v16415_v46 }
0x143b   :  { %6932 = vmatpush1.bf16.msra.mxu0 %v16416_v5  ;;  %6973 = vmatpush1.bf16.msra.mxu1 %v16417_v9 }
0x143c   :  { %6933 = vmatprep.subr.bf16.mxu0 %v16418_v26  ;;  %6974 = vmatprep.subr.bf16.mxu1 %v16419_v2 }
0x143f   :  { %6934 = vmatpush1.bf16.msra.mxu0 %v14655_v29  ;;  %6975 = vmatpush1.bf16.msra.mxu1 %v14657_v47 }
0x1440   :  { %6935 = vmatprep.subr.bf16.mxu0 %v14661_v18  ;;  %6976 = vmatprep.subr.bf16.mxu1 %v16420_v63 }
0x1443   :  { %6936 = vmatpush1.bf16.msra.mxu0 %v16421_v57  ;;  %6977 = vmatpush1.bf16.msra.mxu1 %v14669_v44 }
0x1444   :  { %6937 = vmatprep.subr.bf16.mxu0 %v14673_v10  ;;  %6978 = vmatprep.subr.bf16.mxu1 %v14675_v34 }
0x1447   :  { %6938 = vmatpush1.bf16.msra.mxu0 %v14679_v41  ;;  %6979 = vmatpush1.bf16.msra.mxu1 %v14681_v7 }
0x1448   :  { %6939 = vmatprep.subr.bf16.mxu0 %v14685_v42  ;;  %6980 = vmatprep.subr.bf16.mxu1 %v14687_v33 }
0x144b   :  { %6940 = vmatpush1.bf16.msra.mxu0 %v14691_v52  ;;  %6981 = vmatpush1.bf16.msra.mxu1 %v14693_v55 }
0x144c   :  { %7058 = vmatprep.subr.bf16.mxu0 %v14546_v54  ;;  %7099 = vmatprep.subr.bf16.mxu1 %v14550_v32  ;;  %v14827_v54 = vld [vmem:[%s16422_s29 + $0xec] ss:$16 sps:$4 sm:$0xff]  }
0x144e   :  { %6958 = vmatmul.mubr.bf16.vlgmr.msra.gmra.mxu0 %v6841_v22  ;;  %6999 = vmatmul.mubr.bf16.vlgmr.msra.gmra.mxu1 %v6841_v22 }
0x144f   :  { %7059 = vmatpush1.bf16.msra.mxu0 %v14544_v31  ;;  %7100 = vmatpush1.bf16.msra.mxu1 %v14548_v40  ;;  %v14822_v31 = vld [vmem:[%s16422_s29 + $0xe4] ss:$16 sps:$4 sm:$0xff]  }
0x1450   :  { %7060 = vmatprep.subr.bf16.mxu0 %v14609_v36  ;;  %7101 = vmatprep.subr.bf16.mxu1 %v16407_v58 }
0x1451   :  { %7090 = vmatprep.mubr.bf16.mxu0 %v16377_v61  ;;  %7131 = vmatprep.mubr.bf16.mxu1 %v16377_v61 }
0x1453   :  { %7061 = vmatpush1.bf16.msra.mxu0 %v16408_v53  ;;  %7102 = vmatpush1.bf16.msra.mxu1 %v16409_v49 }
0x1454   :  { %7062 = vmatprep.subr.bf16.mxu0 %v16410_v8  ;;  %7103 = vmatprep.subr.bf16.mxu1 %v16411_v23  ;;  %v14850_v8 = vld [vmem:[%s16422_s29 + $0xe0] ss:$16 sps:$4 sm:$0xff]  }
0x1457   :  { %7063 = vmatpush1.bf16.msra.mxu0 %v16412_v50  ;;  %7104 = vmatpush1.bf16.msra.mxu1 %v16413_v15  ;;  %v14862_v50 = vld [vmem:[%s16422_s29 + $0xc4] ss:$16 sps:$4 sm:$0xff]   ;;  %v14867_v15 = vld [vmem:[%s16422_s29 + $0xcc] ss:$16 sps:$4 sm:$0xff]  }
0x1458   :  { %7064 = vmatprep.subr.bf16.mxu0 %v16414_v4  ;;  %7105 = vmatprep.subr.bf16.mxu1 %v16415_v46  ;;  %v14876_v4 = vld [vmem:[%s16422_s29 + $0xc0] ss:$16 sps:$4 sm:$0xff]   ;;  %v14881_v46 = vld [vmem:[%s16422_s29 + $0xc8] ss:$16 sps:$4 sm:$0xff]  }
0x145b   :  { %7065 = vmatpush1.bf16.msra.mxu0 %v16416_v5  ;;  %7106 = vmatpush1.bf16.msra.mxu1 %v16417_v9  ;;  %v14888_v5 = vld [vmem:[%s16422_s29 + $0xa4] ss:$16 sps:$4 sm:$0xff]   ;;  %v14893_v9 = vld [vmem:[%s16422_s29 + $0xac] ss:$16 sps:$4 sm:$0xff]  }
0x145c   :  { %7066 = vmatprep.subr.bf16.mxu0 %v16418_v26  ;;  %7107 = vmatprep.subr.bf16.mxu1 %v16419_v2  ;;  %v14902_v26 = vld [vmem:[%s16422_s29 + $0xa0] ss:$16 sps:$4 sm:$0xff]   ;;  %v14907_v2 = vld [vmem:[%s16422_s29 + $0xa8] ss:$16 sps:$4 sm:$0xff]  }
0x145f   :  { %7067 = vmatpush1.bf16.msra.mxu0 %v14655_v29  ;;  %7108 = vmatpush1.bf16.msra.mxu1 %v14657_v47 }
0x1460   :  { %7068 = vmatprep.subr.bf16.mxu0 %v14661_v18  ;;  %7109 = vmatprep.subr.bf16.mxu1 %v16420_v63  ;;  %v14914_v63 = vld [vmem:[%s16422_s29 + $0x84] ss:$16 sps:$4 sm:$0xff]  }
0x1463   :  { %7069 = vmatpush1.bf16.msra.mxu0 %v16421_v57  ;;  %7110 = vmatpush1.bf16.msra.mxu1 %v14669_v44  ;;  %v14919_v57 = vld [vmem:[%s16422_s29 + $0x8c] ss:$16 sps:$4 sm:$0xff]  }
0x1464   :  { %7070 = vmatprep.subr.bf16.mxu0 %v14673_v10  ;;  %7111 = vmatprep.subr.bf16.mxu1 %v14675_v34 }
0x1467   :  { %7071 = vmatpush1.bf16.msra.mxu0 %v14679_v41  ;;  %7112 = vmatpush1.bf16.msra.mxu1 %v14681_v7 }
0x1468   :  { %7072 = vmatprep.subr.bf16.mxu0 %v14685_v42  ;;  %7113 = vmatprep.subr.bf16.mxu1 %v14687_v33 }
0x146b   :  { %7073 = vmatpush1.bf16.msra.mxu0 %v14691_v52  ;;  %7114 = vmatpush1.bf16.msra.mxu1 %v14693_v55 }
0x146c   :  { %7336 = vmatprep.subr.bf16.mxu0 %v14822_v31  ;;  %7377 = vmatprep.subr.bf16.mxu1 %v14827_v54 }
0x14ee   :  { %v6877_v40 = vpop.f32.mrf.mxu0  ;;  %v6918_v32 = vpop.f32.mrf.mxu1 }
0x14ef   :  { %v7015_v36 = vrot.slane %v6877_v40, 4  ;;  %v7017_v14 = vrot.slane %v6918_v32, 4  ;;  %v14926_v40 = vld [vmem:[%s16422_s29 + $0x80] ss:$16 sps:$4 sm:$0xff]   ;;  %v14931_v32 = vld [vmem:[%s16422_s29 + $0x88] ss:$16 sps:$4 sm:$0xff]  }
0x14f0   :  { %v6879_v29 = vpop.f32.mrf.mxu0  ;;  %v6920_v47 = vpop.f32.mrf.mxu1 }
0x14f1   :  { %v7023_v18 = vadd.f32 %v7015_v36, %v14579_v45  ;;  %v7016_v52 = vrot.slane %v6879_v29, 4  ;;  %v7018_v33 = vrot.slane %v6920_v47, 4  ;;  %v7025_v62 = vadd.f32 %v7017_v14, %v14598_v43  ;;  %v14938_v36 = vld [vmem:[%s16422_s29 + $0x64] ss:$16 sps:$4 sm:$0xff]   ;;  %v14943_v29 = vld [vmem:[%s16422_s29 + $0x6c] ss:$16 sps:$4 sm:$0xff]  }
0x14f2   :  { %v6881_v55 = vpop.f32.mrf.mxu0  ;;  %v6922_v44 = vpop.f32.mrf.mxu1  ;;  %v14950_v47 = vld [vmem:[%s16422_s29 + $0x60] ss:$16 sps:$4 sm:$0xff]  }
0x14f3   :  { %v8564_v10 = vmul.f32 -1.442695, %v7023_v18  ;;  %v7024_v34 = vadd.f32 %v7016_v52, %v14583_v27  ;;  %v7026_v21 = vadd.f32 %v7018_v33, %v14593_v12  ;;  %v14955_v18 = vld [vmem:[%s16422_s29 + $0x68] ss:$16 sps:$4 sm:$0xff]   ;;  %v14962_v52 = vld [vmem:[%s16422_s29 + $0x44] ss:$16 sps:$4 sm:$0xff]  }
0x14f4   :  { %v6882_v41 = vpop.f32.mrf.mxu0  ;;  %v6923_v7 = vpop.f32.mrf.mxu1  ;;  %v14967_v55 = vld [vmem:[%s16422_s29 + $0x4c] ss:$16 sps:$4 sm:$0xff]   ;;  %v14974_v44 = vld [vmem:[%s16422_s29 + $0x40] ss:$16 sps:$4 sm:$0xff]   ;;  %v15010_v33 = vld [vmem:[%s16422_s29 + $0x4] ss:$16 sps:$4 sm:$0xff]  }
0x14f5   :  { %9132 = vpow2.f32 %v8564_v10  ;;  %v8565_v42 = vmul.f32 -1.442695, %v7024_v34  ;;  %v8566_v39 = vmul.f32 -1.442695, %v7026_v21  ;;  %v14979_v10 = vld [vmem:[%s16422_s29 + $0x48] ss:$16 sps:$4 sm:$0xff]  }
0x14f6   :  { %v14986_v34 = vld [vmem:[%s16422_s29 + $0x24] ss:$16 sps:$4 sm:$0xff]   ;;  %v14991_v41 = vld [vmem:[%s16422_s29 + $0x2c] ss:$16 sps:$4 sm:$0xff]   ;;  %v14998_v7 = vld [vmem:[%s16422_s29 + $0x20] ss:$16 sps:$4 sm:$0xff]  }
0x14f7   :  { %9134 = vpow2.f32 %v8565_v42  ;;  %v15003_v42 = vld [vmem:[%s16422_s29 + $0x28] ss:$16 sps:$4 sm:$0xff]   ;;  %v15015_v21 = vld [vmem:[%s16422_s29 + $0xc] ss:$16 sps:$4 sm:$0xff]   ;;  %v15022_v14 = vld [vmem:[%s16422_s29] ss:$16 sps:$4 sm:$0xff]  }
0x14f8   :  { %9136 = vpow2.f32 %v8566_v39  ;;  %v15027_v39 = vld [vmem:[%s16422_s29 + $0x8] ss:$16 sps:$4 sm:$0xff]  }
0x1502   :  { %v9133_v35 = vpop.eup %9132 }
0x1503   :  { %v7030_v45 = vadd.f32 1.0, %v9133_v35 }
0x1504   :  { %v9135_v51 = vpop.eup %9134 }
0x1505   :  { %9138 = vrcp.f32 %v7030_v45  ;;  %v7036_v48 = vadd.f32 1.0, %v9135_v51  ;;  %v9137_v12 = vpop.eup %9136 }
0x1506   :  { %9140 = vtanh.f32 %v7025_v62  ;;  %v7043_v24 = vadd.f32 1.0, %v9137_v12 }
0x1507   :  { %9142 = vrcp.f32 %v7036_v48 }
0x1508   :  { %9144 = vrcp.f32 %v7043_v24 }
0x150e   :  { %v14835_v27 = vpop.f32.mrf.mxu0  ;;  %v14837_v59 = vpop.f32.mrf.mxu1 }
0x1510   :  { %v14839_v37 = vpop.f32.mrf.mxu0  ;;  %v14841_v38 = vpop.f32.mrf.mxu1 }
0x1512   :  { %v9139_v25 = vpop.eup %9138  ;;  %v6963_v28 = vpop.f32.mrf.mxu0 }
0x1513   :  { %v7004_v0 = vpop.f32.mrf.mxu1  ;;  %v9141_v43 = vpop.eup %9140 }
0x1514   :  { %v9143_v60 = vpop.eup %9142  ;;  %v6964_v1 = vpop.f32.mrf.mxu0  ;;  %v7050_v3 = vmul.f32 %v9141_v43, %v9139_v25  ;;  %v6770_v0 = vld [vmem:[#allocation16] sm:$0xf]  ;;  %v16424_v43 = vld [vmem:[#allocation28_spill] sm:$0xff] }
0x1515   :  { %v7005_v11 = vpop.f32.mrf.mxu1  ;;  %v7049_v13 = vmul.f32 %v9143_v60, %v7047_v56  ;;  %v9145_v22 = vpop.eup %9144  ;;  %v16425_v56 = vsub.s32 0, %v16424_v43 }
0x1517   :  { %v14844_v30 = vadd.f32 %v7050_v3, %v7049_v13  ;;  %v15081_v60 = vrot.slane %v6770_v0, %v16425_v56 }
0x1519   :  { %9146 = vtanh.f32 %v14844_v30  ;;  %v6792_v24 = vadd.f32 %v15081_v60, %v14741_v6 }
0x1526   :  { %v9147_v58 = vpop.eup %9146 }
0x1527   :  { %v7053_v53 = vmul.f32 %v9147_v58, %v9145_v22 }
0x1529   :  { %v7054_v49 = vpack.c.bf16 %v7053_v53, %v7053_v53 }
0x152b   :  { %v14857_v23 = vrot.slane %v7054_v49, 2 }
0x152d   :  { %7091 = vmatmul.mubr.bf16.vlgmr.msra.gmra.mxu0 %v14857_v23  ;;  %7132 = vmatmul.mubr.bf16.vlgmr.msra.gmra.mxu1 %v14857_v23 }
0x152e   :  { %7337 = vmatpush1.bf16.msra.mxu0 %v14850_v8  ;;  %7378 = vmatpush1.bf16.msra.mxu1 %v14855_v20 }
0x152f   :  { %7338 = vmatprep.subr.bf16.mxu0 %v14862_v50  ;;  %7379 = vmatprep.subr.bf16.mxu1 %v14867_v15 }
0x1530   :  { %7368 = vmatprep.mubr.bf16.mxu0 %v16377_v61  ;;  %7409 = vmatprep.mubr.bf16.mxu1 %v16377_v61 }
0x1532   :  { %7339 = vmatpush1.bf16.msra.mxu0 %v14876_v4  ;;  %7380 = vmatpush1.bf16.msra.mxu1 %v14881_v46 }
0x1533   :  { %7340 = vmatprep.subr.bf16.mxu0 %v14888_v5  ;;  %7381 = vmatprep.subr.bf16.mxu1 %v14893_v9 }
0x1536   :  { %7341 = vmatpush1.bf16.msra.mxu0 %v14902_v26  ;;  %7382 = vmatpush1.bf16.msra.mxu1 %v14907_v2 }
0x1537   :  { %7342 = vmatprep.subr.bf16.mxu0 %v14914_v63  ;;  %7383 = vmatprep.subr.bf16.mxu1 %v14919_v57 }
0x153a   :  { %7343 = vmatpush1.bf16.msra.mxu0 %v14926_v40  ;;  %7384 = vmatpush1.bf16.msra.mxu1 %v14931_v32 }
0x153b   :  { %7344 = vmatprep.subr.bf16.mxu0 %v14938_v36  ;;  %7385 = vmatprep.subr.bf16.mxu1 %v14943_v29 }
0x153e   :  { %7345 = vmatpush1.bf16.msra.mxu0 %v14950_v47  ;;  %7386 = vmatpush1.bf16.msra.mxu1 %v14955_v18 }
0x153f   :  { %7346 = vmatprep.subr.bf16.mxu0 %v14962_v52  ;;  %7387 = vmatprep.subr.bf16.mxu1 %v14967_v55 }
0x1542   :  { %7347 = vmatpush1.bf16.msra.mxu0 %v14974_v44  ;;  %7388 = vmatpush1.bf16.msra.mxu1 %v14979_v10 }
0x1543   :  { %7348 = vmatprep.subr.bf16.mxu0 %v14986_v34  ;;  %7389 = vmatprep.subr.bf16.mxu1 %v14991_v41 }
0x1546   :  { %7349 = vmatpush1.bf16.msra.mxu0 %v14998_v7  ;;  %7390 = vmatpush1.bf16.msra.mxu1 %v15003_v42 }
0x1547   :  { %7350 = vmatprep.subr.bf16.mxu0 %v15010_v33  ;;  %7391 = vmatprep.subr.bf16.mxu1 %v15015_v21 }
0x154a   :  { %7351 = vmatpush1.bf16.msra.mxu0 %v15022_v14  ;;  %7392 = vmatpush1.bf16.msra.mxu1 %v15027_v39 }
0x154b   :  { %7451 = vmatprep.subr.bf16.mxu0 %v14822_v31  ;;  %7492 = vmatprep.subr.bf16.mxu1 %v14827_v54 }
0x154d   :  { %7369 = vmatmul.mubr.bf16.vlgmr.msra.gmra.mxu0 %v14857_v23  ;;  %7410 = vmatmul.mubr.bf16.vlgmr.msra.gmra.mxu1 %v14857_v23 }
0x154e   :  { %7452 = vmatpush1.bf16.msra.mxu0 %v14850_v8  ;;  %7493 = vmatpush1.bf16.msra.mxu1 %v14855_v20 }
0x154f   :  { %7453 = vmatprep.subr.bf16.mxu0 %v14862_v50  ;;  %7494 = vmatprep.subr.bf16.mxu1 %v14867_v15 }
0x1550   :  { %7483 = vmatprep.mubr.bf16.mxu0 %v16377_v61  ;;  %7524 = vmatprep.mubr.bf16.mxu1 %v16377_v61 }
0x1552   :  { %7454 = vmatpush1.bf16.msra.mxu0 %v14876_v4  ;;  %7495 = vmatpush1.bf16.msra.mxu1 %v14881_v46 }
0x1553   :  { %7455 = vmatprep.subr.bf16.mxu0 %v14888_v5  ;;  %7496 = vmatprep.subr.bf16.mxu1 %v14893_v9 }
0x1556   :  { %7456 = vmatpush1.bf16.msra.mxu0 %v14902_v26  ;;  %7497 = vmatpush1.bf16.msra.mxu1 %v14907_v2 }
0x1557   :  { %7457 = vmatprep.subr.bf16.mxu0 %v14914_v63  ;;  %7498 = vmatprep.subr.bf16.mxu1 %v14919_v57 }
0x155a   :  { %7458 = vmatpush1.bf16.msra.mxu0 %v14926_v40  ;;  %7499 = vmatpush1.bf16.msra.mxu1 %v14931_v32 }
0x155b   :  { %7459 = vmatprep.subr.bf16.mxu0 %v14938_v36  ;;  %7500 = vmatprep.subr.bf16.mxu1 %v14943_v29 }
0x155e   :  { %7460 = vmatpush1.bf16.msra.mxu0 %v14950_v47  ;;  %7501 = vmatpush1.bf16.msra.mxu1 %v14955_v18 }
0x155f   :  { %7461 = vmatprep.subr.bf16.mxu0 %v14962_v52  ;;  %7502 = vmatprep.subr.bf16.mxu1 %v14967_v55 }
0x1562   :  { %7462 = vmatpush1.bf16.msra.mxu0 %v14974_v44  ;;  %7503 = vmatpush1.bf16.msra.mxu1 %v14979_v10 }
0x1563   :  { %7463 = vmatprep.subr.bf16.mxu0 %v14986_v34  ;;  %7504 = vmatprep.subr.bf16.mxu1 %v14991_v41 }
0x1566   :  { %7464 = vmatpush1.bf16.msra.mxu0 %v14998_v7  ;;  %7505 = vmatpush1.bf16.msra.mxu1 %v15003_v42 }
0x1567   :  { %7465 = vmatprep.subr.bf16.mxu0 %v15010_v33  ;;  %7506 = vmatprep.subr.bf16.mxu1 %v15015_v21 }
0x156a   :  { %7466 = vmatpush1.bf16.msra.mxu0 %v15022_v14  ;;  %7507 = vmatpush1.bf16.msra.mxu1 %v15027_v39 }
0x156b   :  { %7563 = vmatprep.subr.bf16.mxu0 %v14822_v31  ;;  %7604 = vmatprep.subr.bf16.mxu1 %v14827_v54  ;;  %v16426_v31 = vsub.s32 1, %v16424_v43 }
0x156d   :  { %v15085_v54 = vrot.slane %v6770_v0, %v16426_v31  ;;  %v16428_v31 = vsub.s32 2, %v16424_v43 }
0x156f   :  { %v6793_v3 = vadd.f32 %v15085_v54, %v14745_v17 }
0x15ed   :  { %v15071_v35 = vpop.f32.mrf.mxu0  ;;  %v15073_v62 = vpop.f32.mrf.mxu1 }
0x15ee   :  { %16423 = vst [vmem:[#allocation68_spill] sm:$0xff] %v15073_v62  ;;  %v15097_v62 = vrot.slane %v6770_v0, %v16428_v31 }
0x15ef   :  { %v15075_v45 = vpop.f32.mrf.mxu0  ;;  %v15077_v51 = vpop.f32.mrf.mxu1 }
0x15f1   :  { %v7096_v48 = vpop.f32.mrf.mxu0  ;;  %v7137_v12 = vpop.f32.mrf.mxu1 }
0x15f3   :  { %v7097_v25 = vpop.f32.mrf.mxu0  ;;  %v7138_v28 = vpop.f32.mrf.mxu1 }
0x15f4   :  { %v16427_v25 = vsub.s32 3, %v16424_v43 }
0x15f6   :  { %v15093_v28 = vrot.slane %v6770_v0, %v16427_v25 }
0x15f8   :  { %v6795_v17 = vadd.f32 %v15093_v28, %v14747_v16  ;;  %v7442_v16 = vrot.slane %v14844_v30, 4  ;;  %v7007_v30 = vadd.f32 %v14835_v27, %v15081_v60  ;;  %v7010_v27 = vadd.f32 %v14841_v38, %v15093_v28 }
0x160d   :  { %v7370_v1 = vpop.f32.mrf.mxu0  ;;  %v7411_v11 = vpop.f32.mrf.mxu1 }
0x160e   :  { %v7418_v13 = vadd.f32 %v7370_v1, %v6792_v24  ;;  %v6794_v1 = vadd.f32 %v15097_v62, %v14743_v19 }
0x160f   :  { %v7372_v22 = vpop.f32.mrf.mxu0  ;;  %v7413_v58 = vpop.f32.mrf.mxu1 }
0x1610   :  { %v8599_v53 = vmul.f32 -1.442695, %v7418_v13  ;;  %v7419_v49 = vadd.f32 %v7372_v22, %v6793_v3  ;;  %v7421_v24 = vadd.f32 %v7413_v58, %v6795_v17  ;;  %v7420_v3 = vadd.f32 %v7411_v11, %v6794_v1  ;;  %v7689_v1 = vld [vmem:[%s16430_s8 + $0x70] sm:$0xff] }
0x1611   :  { %v7374_v23 = vpop.f32.mrf.mxu0  ;;  %v7415_v48 = vpop.f32.mrf.mxu1 }
0x1612   :  { %9148 = vpow2.f32 %v8599_v53  ;;  %v8600_v12 = vmul.f32 -1.442695, %v7419_v49  ;;  %v8601_v13 = vmul.f32 -1.442695, %v7421_v24  ;;  %v7690_v24 = vld [vmem:[%s16430_s8 + $0x78] sm:$0xff] }
0x1613   :  { %v7375_v56 = vpop.f32.mrf.mxu0  ;;  %v7416_v6 = vpop.f32.mrf.mxu1 }
0x1614   :  { %9150 = vpow2.f32 %v8600_v12 }
0x1615   :  { %9152 = vtanh.f32 %v7420_v3  ;;  %v7688_v3 = vld [vmem:[%s16430_s8 + $0x68] sm:$0xff] }
0x1616   :  { %9154 = vpow2.f32 %v8601_v13  ;;  %v7687_v13 = vld [vmem:[%s16430_s8 + $0x60] sm:$0xff] }
0x161f   :  { %v9149_v22 = vpop.eup %9148 }
0x1620   :  { %v7425_v53 = vadd.f32 1.0, %v9149_v22  ;;  %v7686_v22 = vld [vmem:[%s16430_s8 + $0x58] sm:$0xff] }
0x1621   :  { %v9151_v49 = vpop.eup %9150 }
0x1622   :  { %9156 = vrcp.f32 %v7425_v53  ;;  %v7431_v23 = vadd.f32 1.0, %v9151_v49  ;;  %v9153_v43 = vpop.eup %9152  ;;  %v7685_v53 = vld [vmem:[%s16430_s8 + $0x50] sm:$0xff]  ;;  %v7684_v49 = vld [vmem:[%s16430_s8 + $0x48] sm:$0xff] }
0x1623   :  { %v9155_v0 = vpop.eup %9154 }
0x1624   :  { %9158 = vrcp.f32 %v7431_v23  ;;  %v7438_v25 = vadd.f32 1.0, %v9155_v0  ;;  %v7683_v23 = vld [vmem:[%s16430_s8 + $0x40] sm:$0xff]  ;;  %v7681_v0 = vld [vmem:[%s16430_s8 + $0x30] sm:$0xff] }
0x1626   :  { %9160 = vrcp.f32 %v7438_v25  ;;  %v7676_v25 = vld [vmem:[%s16430_s8 + $0x8] sm:$0xff] }
0x162f   :  { %v9157_v48 = vpop.eup %9156 }
0x1630   :  { %v7445_v12 = vmul.f32 %v9157_v48, %v9153_v43  ;;  %v7682_v43 = vld [vmem:[%s16430_s8 + $0x38] sm:$0xff]  ;;  %v7680_v48 = vld [vmem:[%s16430_s8 + $0x28] sm:$0xff] }
0x1631   :  { %v9159_v58 = vpop.eup %9158 }
0x1632   :  { %v7444_v56 = vmul.f32 %v9159_v58, %v7442_v16  ;;  %v7678_v16 = vld [vmem:[%s16430_s8 + $0x18] sm:$0xff]  ;;  %v7677_v58 = vld [vmem:[%s16430_s8 + $0x10] sm:$0xff] }
0x1633   :  { %v9161_v11 = vpop.eup %9160 }
0x1634   :  { %v15104_v19 = vadd.f32 %v7445_v12, %v7444_v56  ;;  %v7679_v12 = vld [vmem:[%s16430_s8 + $0x20] sm:$0xff] }
0x1635   :  { %v7675_v56 = vld [vmem:[%s16430_s8] sm:$0xff]  ;;  %s9472_s8 = smov [#allocation19]  }
0x1636   :  { %9162 = vtanh.f32 %v15104_v19  ;;  %s7788_s9 = sshll.u32 %s9472_s8, 4  ;;  %s7789_s9 = int_to_ptr.vmem [resolvable:$true] %s7788_s9 }
0x1637   :  { %s9316_s17 = scalar_lea.vmem %s7789_s9, 32  ;;  %p9321_p3 = scmp.lt.s32.totalorder %s7789_s9, %s7789_s9 }
0x1638   :  { %p9317_p2 = scmp.ne.s32.totalorder %s7789_s9, %s9316_s17  ;;  %p9322_p4 = scmp.lt.s32.totalorder %s9316_s17, %s9316_s17 }
0x163a   :  { %p9323_p5 = por %p9322_p4, %p9321_p3 }
0x163c   :  { %p9324_p6 = pnand %p9323_p5, %p9317_p2 }
0x1643   :  { %v9163_v6 = vpop.eup %9162 }
0x1644   :  { %v15107_v31 = vmul.f32 %v9163_v6, %v9161_v11 }
0x1646   :  { %v7450_v17 = vpack.c.bf16 %v15107_v31, %v15107_v31 }
0x1648   :  { %7484 = vmatmul.mubr.bf16.vlgmr.msra.gmra.mxu0 %v7450_v17  ;;  %7525 = vmatmul.mubr.bf16.vlgmr.msra.gmra.mxu1 %v7450_v17  ;;  %v7141_v17 = vadd.f32 %v15075_v45, %v15085_v54 }
0x1649   :  { %7564 = vmatpush1.bf16.msra.mxu0 %v14850_v8  ;;  %7605 = vmatpush1.bf16.msra.mxu1 %v14855_v20 }
0x164a   :  { %7565 = vmatprep.subr.bf16.mxu0 %v14862_v50  ;;  %7606 = vmatprep.subr.bf16.mxu1 %v14867_v15  ;;  %v7008_v50 = vadd.f32 %v14839_v37, %v15085_v54 }
0x164b   :  { %7595 = vmatprep.mubr.bf16.mxu0 %v16377_v61  ;;  %7636 = vmatprep.mubr.bf16.mxu1 %v16377_v61  ;;  %v16429_v61 = vmov 0.0  }
0x164d   :  { %7566 = vmatpush1.bf16.msra.mxu0 %v14876_v4  ;;  %7607 = vmatpush1.bf16.msra.mxu1 %v14881_v46 }
0x164e   :  { %7567 = vmatprep.subr.bf16.mxu0 %v14888_v5  ;;  %7608 = vmatprep.subr.bf16.mxu1 %v14893_v9 }
0x1651   :  { %7568 = vmatpush1.bf16.msra.mxu0 %v14902_v26  ;;  %7609 = vmatpush1.bf16.msra.mxu1 %v14907_v2 }
0x1652   :  { %7569 = vmatprep.subr.bf16.mxu0 %v14914_v63  ;;  %7610 = vmatprep.subr.bf16.mxu1 %v14919_v57 }
0x1655   :  { %7570 = vmatpush1.bf16.msra.mxu0 %v14926_v40  ;;  %7611 = vmatpush1.bf16.msra.mxu1 %v14931_v32 }
0x1656   :  { %7571 = vmatprep.subr.bf16.mxu0 %v14938_v36  ;;  %7612 = vmatprep.subr.bf16.mxu1 %v14943_v29  ;;  %v7009_v36 = vadd.f32 %v14837_v59, %v15097_v62 }
0x1659   :  { %7572 = vmatpush1.bf16.msra.mxu0 %v14950_v47  ;;  %7613 = vmatpush1.bf16.msra.mxu1 %v14955_v18 }
0x165a   :  { %7573 = vmatprep.subr.bf16.mxu0 %v14962_v52  ;;  %7614 = vmatprep.subr.bf16.mxu1 %v14967_v55 }
0x165d   :  { %7574 = vmatpush1.bf16.msra.mxu0 %v14974_v44  ;;  %7615 = vmatpush1.bf16.msra.mxu1 %v14979_v10 }
0x165e   :  { %7575 = vmatprep.subr.bf16.mxu0 %v14986_v34  ;;  %7616 = vmatprep.subr.bf16.mxu1 %v14991_v41 }
0x1661   :  { %7576 = vmatpush1.bf16.msra.mxu0 %v14998_v7  ;;  %7617 = vmatpush1.bf16.msra.mxu1 %v15003_v42 }
0x1662   :  { %7577 = vmatprep.subr.bf16.mxu0 %v15010_v33  ;;  %7618 = vmatprep.subr.bf16.mxu1 %v15015_v21 }
0x1665   :  { %7578 = vmatpush1.bf16.msra.mxu0 %v15022_v14  ;;  %7619 = vmatpush1.bf16.msra.mxu1 %v15027_v39 }
0x1666   :  { %8834 = vmatprep.subr.mxu0 %v16429_v61 }
0x1708   :  { %v7485_v8 = vpop.f32.mrf.mxu0  ;;  %v7526_v20 = vpop.f32.mrf.mxu1 }
0x1709   :  { %v7533_v15 = vadd.f32 %v7485_v8, %v7007_v30  ;;  %v7535_v37 = vadd.f32 %v7526_v20, %v7009_v36 }
0x170a   :  { %v7487_v4 = vpop.f32.mrf.mxu0  ;;  %v7528_v46 = vpop.f32.mrf.mxu1 }
0x170b   :  { %v8602_v5 = vmul.f32 -1.442695, %v7533_v15  ;;  %v7534_v9 = vadd.f32 %v7487_v4, %v7008_v50  ;;  %v7536_v32 = vadd.f32 %v7528_v46, %v7010_v27 }
0x170c   :  { %v7489_v26 = vpop.f32.mrf.mxu0  ;;  %v7530_v2 = vpop.f32.mrf.mxu1 }
0x170d   :  { %9164 = vpow2.f32 %v8602_v5  ;;  %v8603_v63 = vmul.f32 -1.442695, %v7534_v9  ;;  %v8604_v29 = vmul.f32 -1.442695, %v7536_v32  ;;  %v16431_v26 = vld [vmem:[#allocation68_spill] sm:$0xff] }
0x170e   :  { %v7490_v57 = vpop.f32.mrf.mxu0  ;;  %v7531_v40 = vpop.f32.mrf.mxu1  ;;  %v7142_v2 = vadd.f32 %v16431_v26, %v15097_v62 }
0x170f   :  { %9166 = vpow2.f32 %v8603_v63 }
0x1710   :  { %9168 = vtanh.f32 %v7535_v37 }
0x1711   :  { %9170 = vpow2.f32 %v8604_v29 }
0x171a   :  { %v9165_v47 = vpop.eup %9164 }
0x171b   :  { %v7540_v18 = vadd.f32 1.0, %v9165_v47 }
0x171c   :  { %v9167_v52 = vpop.eup %9166 }
0x171d   :  { %9172 = vrcp.f32 %v7540_v18  ;;  %v7546_v55 = vadd.f32 1.0, %v9167_v52  ;;  %v9169_v44 = vpop.eup %9168 }
0x171e   :  { %v9171_v10 = vpop.eup %9170 }
0x171f   :  { %9174 = vrcp.f32 %v7546_v55  ;;  %v7553_v38 = vadd.f32 1.0, %v9171_v10 }
0x1721   :  { %9176 = vrcp.f32 %v7553_v38 }
0x172a   :  { %v9173_v34 = vpop.eup %9172 }
0x172b   :  { %v7557_v41 = vmul.f32 %v9173_v34, %v9169_v44 }
0x172c   :  { %v9175_v7 = vpop.eup %9174 }
0x172d   :  { %v7556_v42 = vmul.f32 %v9175_v7, %v15104_v19  ;;  %v7140_v19 = vadd.f32 %v15071_v35, %v15081_v60  ;;  %v7143_v35 = vadd.f32 %v15077_v51, %v15093_v28 }
0x172e   :  { %v9177_v59 = vpop.eup %9176 }
0x172f   :  { %v15153_v33 = vadd.f32 %v7557_v41, %v7556_v42 }
0x1731   :  { %9178 = vtanh.f32 %v15153_v33 }
0x173e   :  { %v9179_v21 = vpop.eup %9178 }
0x173f   :  { %v15156_v14 = vmul.f32 %v9179_v21, %v9177_v59 }
0x1741   :  { %v7562_v39 = vpack.c.bf16 %v15156_v14, %v15156_v14  ;;  %v7561_v55 = vadd.f32 %v15156_v14, %v15107_v31 }
0x1743   :  { %7596 = vmatmul.mubr.bf16.vlgmr.msra.gmra.mxu0 %v7562_v39  ;;  %7637 = vmatmul.mubr.bf16.vlgmr.msra.gmra.mxu1 %v7562_v39 }
0x1744   :  { %8835 = vmatpush3.msra.mxu0 %v7690_v24  ;;  %8866 = vmatprep.mubr.msk.f32.mxu0 %vm9471_vm4, %v16429_v61 }
0x1745   :  { %8836 = vmatprep.subr.mxu0 %v16429_v61 }
0x1746   :  { %8837 = vmatpush3.msra.mxu0 %v7689_v1 }
0x1747   :  { %8838 = vmatprep.subr.mxu0 %v16429_v61 }
0x1748   :  { %8839 = vmatpush3.msra.mxu0 %v7688_v3 }
0x1749   :  { %8840 = vmatprep.subr.mxu0 %v16429_v61 }
0x174a   :  { %8841 = vmatpush3.msra.mxu0 %v7687_v13 }
0x174b   :  { %8842 = vmatprep.subr.mxu0 %v16429_v61 }
0x174c   :  { %8843 = vmatpush3.msra.mxu0 %v7686_v22 }
0x174d   :  { %8844 = vmatprep.subr.mxu0 %v16429_v61 }
0x174e   :  { %8845 = vmatpush3.msra.mxu0 %v7685_v53 }
0x174f   :  { %8846 = vmatprep.subr.mxu0 %v16429_v61 }
0x1750   :  { %8847 = vmatpush3.msra.mxu0 %v7684_v49 }
0x1751   :  { %8848 = vmatprep.subr.mxu0 %v16429_v61 }
0x1752   :  { %8849 = vmatpush3.msra.mxu0 %v7683_v23 }
0x1753   :  { %8850 = vmatprep.subr.mxu0 %v16429_v61 }
0x1754   :  { %8851 = vmatpush3.msra.mxu0 %v7682_v43 }
0x1755   :  { %8852 = vmatprep.subr.mxu0 %v16429_v61 }
0x1756   :  { %8853 = vmatpush3.msra.mxu0 %v7681_v0 }
0x1757   :  { %8854 = vmatprep.subr.mxu0 %v16429_v61 }
0x1758   :  { %8855 = vmatpush3.msra.mxu0 %v7680_v48 }
0x1759   :  { %8856 = vmatprep.subr.mxu0 %v16429_v61 }
0x175a   :  { %8857 = vmatpush3.msra.mxu0 %v7679_v12 }
0x175b   :  { %8858 = vmatprep.subr.mxu0 %v16429_v61 }
0x175c   :  { %8859 = vmatpush3.msra.mxu0 %v7678_v16 }
0x175d   :  { %8860 = vmatprep.subr.mxu0 %v16429_v61 }
0x175e   :  { %8861 = vmatpush3.msra.mxu0 %v7677_v58 }
0x175f   :  { %8862 = vmatprep.subr.mxu0 %v16429_v61 }
0x1760   :  { %8863 = vmatpush3.msra.mxu0 %v7676_v25 }
0x1761   :  { %8864 = vmatprep.subr.mxu0 %v16429_v61 }
0x1762   :  { %8865 = vmatpush3.msra.mxu0 %v7675_v56 }
0x1803   :  { %v7597_v11 = vpop.f32.mrf.mxu0  ;;  %v7638_v6 = vpop.f32.mrf.mxu1 }
0x1804   :  { %v7645_v30 = vadd.f32 %v7597_v11, %v7140_v19  ;;  %v7647_v45 = vadd.f32 %v7638_v6, %v7142_v2 }
0x1805   :  { %v7599_v8 = vpop.f32.mrf.mxu0  ;;  %v7640_v20 = vpop.f32.mrf.mxu1 }
0x1806   :  { %v8605_v50 = vmul.f32 -1.442695, %v7645_v30  ;;  %v7646_v15 = vadd.f32 %v7599_v8, %v7141_v17  ;;  %v7648_v60 = vadd.f32 %v7640_v20, %v7143_v35 }
0x1807   :  { %v7601_v4 = vpop.f32.mrf.mxu0  ;;  %v7642_v46 = vpop.f32.mrf.mxu1 }
0x1808   :  { %9180 = vpow2.f32 %v8605_v50  ;;  %v8606_v5 = vmul.f32 -1.442695, %v7646_v15  ;;  %v8607_v54 = vmul.f32 -1.442695, %v7648_v60 }
0x1809   :  { %v7602_v9 = vpop.f32.mrf.mxu0  ;;  %v7643_v61 = vpop.f32.mrf.mxu1 }
0x180a   :  { %9182 = vpow2.f32 %v8606_v5 }
0x180b   :  { %9184 = vtanh.f32 %v7647_v45 }
0x180c   :  { %9186 = vpow2.f32 %v8607_v54 }
0x1815   :  { %v9181_v63 = vpop.eup %9180 }
0x1816   :  { %v7652_v57 = vadd.f32 1.0, %v9181_v63 }
0x1817   :  { %v9183_v40 = vpop.eup %9182 }
0x1818   :  { %9188 = vrcp.f32 %v7652_v57  ;;  %v7658_v27 = vadd.f32 1.0, %v9183_v40  ;;  %v9185_v32 = vpop.eup %9184 }
0x1819   :  { %v9187_v36 = vpop.eup %9186 }
0x181a   :  { %9190 = vrcp.f32 %v7658_v27  ;;  %v7665_v51 = vadd.f32 1.0, %v9187_v36 }
0x181c   :  { %9192 = vrcp.f32 %v7665_v51 }
0x1825   :  { %v9189_v37 = vpop.eup %9188 }
0x1826   :  { %v7669_v29 = vmul.f32 %v9189_v37, %v9185_v32 }
0x1827   :  { %v9191_v47 = vpop.eup %9190 }
0x1828   :  { %v7668_v28 = vmul.f32 %v9191_v47, %v15153_v33 }
0x1829   :  { %v9193_v62 = vpop.eup %9192 }
0x182a   :  { %v7670_v18 = vadd.f32 %v7669_v29, %v7668_v28 }
0x182c   :  { %9194 = vtanh.f32 %v7670_v18  ;;  %7771 = vst [vmem:[#allocation21] sm:$0x3] %v7670_v18 }
0x1839   :  { %v9195_v52 = vpop.eup %9194 }
0x183a   :  { %v7672_v44 = vmul.f32 %v9195_v52, %v9193_v62 }
0x183c   :  { %v7673_v10 = vadd.f32 %v7672_v44, %v7561_v55  ;;  %7770 = vst [vmem:[#allocation19] sm:$0x3] %v7672_v44 }
0x183e   :  { %v7674_v34 = vmul.f32 0.33333334, %v7673_v10 }
0x1840   :  { %8867 = vmatmul.mubr.f32.vlgmr.msra.gmra.mxu0 %v7674_v34 }
0x1841   :  { %9327 = shalt.err (!%p9324_p6)
}
0x1842   :  { %s16432_s15 = sld [smem:[#allocation130_spill]]  ;;  %s9473_s19 = smov [#allocation21]  }
0x1843   :  { %s7798_s0 = sshll.u32 %s9473_s19, 4  ;;  %s7799_s0 = int_to_ptr.vmem [resolvable:$true] %s7798_s0 }
0x1844   :  { %s9336_s6 = scalar_lea.vmem %s7799_s0, 32  ;;  %p9341_p8 = scmp.lt.s32.totalorder %s7799_s0, %s7799_s0 }
0x1845   :  { %p9337_p7 = scmp.ne.s32.totalorder %s7799_s0, %s9336_s6  ;;  %p9342_p9 = scmp.lt.s32.totalorder %s9336_s6, %s9336_s6 }
0x1847   :  { %p9343_p10 = por %p9342_p9, %p9341_p8 }
0x1848   :  { %7791 = dma.vmem_to_hbm [thread:$0]  %s7789_s9, 32, %s16432_s15, [#allocation20]  }
0x1849   :  { %p9344_p11 = pnand %p9343_p10, %p9337_p7 }
0x184b   :  { %9347 = shalt.err (!%p9344_p11)
}
0x184c   :  { %s16433_s7 = sld [smem:[#allocation131_spill]]  ;;  %s9474_s12 = smov [#allocation18]   ;;  %vm7768_vm8 = vcmask 33792  }
0x184d   :  { %s16434_s28 = sld [smem:[#allocation128_spill]]  ;;  %s7778_s30 = sshll.u32 %s9474_s12, 4  ;;  %s7779_s30 = int_to_ptr.vmem [resolvable:$true] %s7778_s30 }
0x184e   :  { %s9356_s26 = scalar_lea.vmem %s7779_s30, 32  ;;  %p9361_p13 = scmp.lt.s32.totalorder %s7779_s30, %s7779_s30 }
0x184f   :  { %p9357_p12 = scmp.ne.s32.totalorder %s7779_s30, %s9356_s26  ;;  %p9362_p0 = scmp.lt.s32.totalorder %s9356_s26, %s9356_s26 }
0x1851   :  { %p9363_p1 = por %p9362_p0, %p9361_p13 }
0x1852   :  { %7801 = dma.vmem_to_hbm [thread:$0]  %s7799_s0, 32, %s16433_s7, [#allocation20]  }
0x1853   :  { %v8608_v31 = vld [vmem:[%s16434_s28] ss:$0 sm:$0xff]  ;;  %p9364_p2 = pnand %p9363_p1, %p9357_p12 }
0x1900   :  { %v7764_v41 = vpop.f32.mrf.mxu0 }
0x1901   :  { %v7765_v7 = vadd.f32 %v8608_v31, %v7764_v41 }
0x1902   :  { %v8868_v38 = vpop.f32.mrf.mxu0 }
0x1903   :  { %7769 = vst.msk [vmem:[#allocation18] sm:$0x3] %vm7768_vm8, %v7765_v7 }
0x1904   :  { %9367 = shalt.err (!%p9364_p2)
}
0x1905   :  { %s16435_s14 = sld [smem:[#allocation129_spill]] }
0x190b   :  { %7781 = dma.vmem_to_hbm [thread:$0]  %s7779_s30, 32, %s16435_s14, [#allocation9]  }
0x190c   :  { %9384 = dma.done.wait [#allocation9], 32  }
0x190d   :  { %9385 = vsyncadd [#allocation9], 4294967264 }
0x190e   :  { %9386 = dma.done.wait [#allocation20], 64  }
0x190f   :  { %9387 = vsyncadd [#allocation20], 4294967232 }
0x1910   :  { %7811 = vsyncpa [#allocation8], 1 }
0x1911   :  { %7812 = vsyncpa [#allocation11], 1 }
0x1912   :  { %7813 = vsyncpa [#allocation14], 1 }
0x1913   :  { %7814 = vsyncpa [#allocation17], 1 }
0x1914   :  { %7815 = vsyncpa [#allocation9], 1 }
0x1915   :  { %7816 = vsyncpa [#allocation20], 1 }

</bundles_post_ra>
